<compile_context>
chip_gen: v5e
topology: v5e:2x2
jax: 0.10.0
libtpu: 0.0.40
codegen_flags: <defaults>
</compile_context>

<pallas_src>
import functools

import jax
import jax.numpy as jnp
import numpy as np
from jax.experimental import pallas as pl
from jax.experimental.pallas import tpu as pltpu


# ----------------------------------------------------------------------------
# helpers
# ----------------------------------------------------------------------------
def _round_up(x, m):
    return ((x + m - 1) // m) * m


def _pick_row_chunk(H, W, target_rows):
    """Largest divisor rh of H such that rh*W <= target_rows (at least 1)."""
    rh = 1
    for cand in range(1, H + 1):
        if H % cand == 0 and cand * W <= target_rows:
            rh = cand
    return rh


def _vmem_limit_bytes():
    """Scoped-VMEM budget: generous on 128 MiB parts, capped on v7x (64 MiB)."""
    try:
        cap = int(pltpu.get_tpu_info().vmem_capacity_bytes)
    except Exception:
        cap = 64 * 1024 * 1024
    return int(min(max(cap - 16 * 1024 * 1024, 32 * 1024 * 1024),
                   96 * 1024 * 1024))


def _sigmoid(x, approx):
    if approx:
        # divide goes to the (otherwise idle) EUP slot
        return pl.reciprocal(1.0 + jnp.exp(-x), approx=True)
    return 1.0 / (1.0 + jnp.exp(-x))


# ----------------------------------------------------------------------------
# Kernel 1: input projection  pre_x = conv(x, W_x) + b   (fully parallel)
# ----------------------------------------------------------------------------
def _xproj_kernel(xp_ref, wx_ref, b_ref, prex_ref, cols_ref, *,
                  kh, kw, cin, H, W, rh):
    """One (b, t) frame of the input projection.

    xp_ref  : (Hp, Wp, cin)      zero-padded input frame (compute dtype)
    wx_ref  : (kh, Kxp, 4*chid)  packed x-weights, Kxp = pad(kw*cin, 128)
    b_ref   : (1, 4*chid)        bias (f32)
    prex_ref: (H*W, 4*chid)      output (compute dtype)
    cols_ref: (Hp, W, Kxp)       scratch: im2col-along-W buffer
    """
    kxp = wx_ref.shape[1]
    c4 = wx_ref.shape[2]
    kwc = kw * cin
    hp = H + kh - 1
    chm = rh * W
    n_chunks = H // rh

    # Padded K lanes multiply zero weight rows, but must not hold NaN garbage
    # from uninitialised VMEM -> zero them once per frame.
    if kxp > kwc:
        cols_ref[:, :, kwc:] = jnp.zeros((hp, W, kxp - kwc), cols_ref.dtype)

    # Scatter the padded frame into the im2col buffer (all Hp rows written).
    x = xp_ref[...]                                # (Hp, Wp, cin)
    for dx in range(kw):
        cols_ref[:, :, dx * cin:(dx + 1) * cin] = x[:, dx:dx + W, :]

    bvec = b_ref[...].astype(jnp.float32)          # (1, 4*chid), hoisted

    def chunk(r):
        if isinstance(r, int):
            row0, m0 = r * rh, r * chm
        else:
            row0 = pl.multiple_of(r * rh, rh)
            m0 = pl.multiple_of(r * chm, chm)
        acc = jnp.zeros((chm, c4), jnp.float32) + bvec
        for dy in range(kh):                       # kh MXU matmuls, K = Kxp
            patch = cols_ref[pl.ds(row0 + dy, rh)].reshape(chm, kxp)
            acc = acc + jnp.dot(patch, wx_ref[dy],
                                preferred_element_type=jnp.float32)
        prex_ref[pl.ds(m0, chm), :] = acc.astype(prex_ref.dtype)

    if n_chunks <= 4:                              # unroll short trip counts
        for r in range(n_chunks):
            chunk(r)
    else:
        pl.loop(0, n_chunks)(chunk)


def _xproj_layer(xp, wx_packed, bias, *, H, W, cin, chid, kh, kw,
                 compute_dtype, matmul_rows):
    B, T = xp.shape[0], xp.shape[1]
    Hp, Wp = H + kh - 1, W + kw - 1
    M = H * W
    C4 = 4 * chid
    Kxp = wx_packed.shape[1]
    rh = _pick_row_chunk(H, W, matmul_rows)

    kernel = functools.partial(_xproj_kernel, kh=kh, kw=kw, cin=cin,
                               H=H, W=W, rh=rh)
    return pl.pallas_call(
        kernel,
        grid=(B, T),
        in_specs=[
            pl.BlockSpec((None, None, Hp, Wp, cin),
                         lambda b, t: (b, t, 0, 0, 0)),
            pl.BlockSpec((kh, Kxp, C4), lambda b, t: (0, 0, 0)),
            pl.BlockSpec((1, C4), lambda b, t: (0, 0)),
        ],
        out_specs=pl.BlockSpec((None, None, M, C4), lambda b, t: (b, t, 0, 0)),
        out_shape=jax.ShapeDtypeStruct((B, T, M, C4), compute_dtype),
        scratch_shapes=[pltpu.VMEM((Hp, W, Kxp), compute_dtype)],
        compiler_params=pltpu.CompilerParams(
            dimension_semantics=("parallel", "parallel"),
            vmem_limit_bytes=_vmem_limit_bytes(),
        ),
    )(xp, wx_packed, bias)


# ----------------------------------------------------------------------------
# Kernel 2: the serial recurrence (h-conv + gates + cell state)
# ----------------------------------------------------------------------------
def _recurrence_kernel(prex_ref, wh_ref, hseq_ref, clast_ref, cols_ref, c_ref,
                       *, kh, kw, chid, H, W, rh, approx_gates):
    """One (batch-block, timestep) grid step of the ConvLSTM recurrence.

    prex_ref : (H*W, 4*chid)     precomputed x-projection + bias for (b, t)
    wh_ref   : (kh, Khp, 4*chid) packed h-weights, Khp = pad(kw*chid, 128)
    hseq_ref : (H*W, chid)       hidden-state output for (b, t) (compute dtype)
    clast_ref: (H*W, chid)       final cell state for b (written at t==T-1, f32)
    cols_ref : (Hp, W, Khp)      scratch: im2col-along-W buffer of h taps
    c_ref    : (H*W, chid)       scratch: recurrent cell state (f32)
    """
    t = pl.program_id(1)
    n_t = pl.num_programs(1)
    ph, pw = kh // 2, kw // 2
    chm = rh * W
    n_chunks = H // rh
    khp = wh_ref.shape[1]

    # h_{-1} == 0: zero all h taps (halo rows / padded K lanes stay zero
    # forever since they are never written afterwards).
    @pl.when(t == 0)
    def _():
        cols_ref[...] = jnp.zeros(cols_ref.shape, cols_ref.dtype)
        c_ref[...] = jnp.zeros(c_ref.shape, c_ref.dtype)

    def chunk(r):
        if isinstance(r, int):
            row0, m0 = r * rh, r * chm
        else:
            row0 = pl.multiple_of(r * rh, rh)
            m0 = pl.multiple_of(r * chm, chm)
        # acc starts from the hoisted x-projection (+bias); only the h-conv
        # (kh matmuls, K = Khp) remains on the serial path.
        acc = prex_ref[pl.ds(m0, chm), :].astype(jnp.float32)
        for dy in range(kh):
            patch = cols_ref[pl.ds(row0 + dy, rh)].reshape(chm, khp)
            acc = acc + jnp.dot(patch, wh_ref[dy],
                                preferred_element_type=jnp.float32)
        # Gate / state math on <=128-row sub-slices bounds live vregs even
        # with chm = 256-512 (bigger MXU tiles on v6e/v7x).
        step = min(chm, 128)
        for s0 in range(0, chm, step):
            sz = min(step, chm - s0)
            a = acc[s0:s0 + sz]
            i = _sigmoid(a[:, 0 * chid:1 * chid], approx_gates)
            f = _sigmoid(a[:, 1 * chid:2 * chid], approx_gates)
            o = _sigmoid(a[:, 2 * chid:3 * chid], approx_gates)
            g = jnp.tanh(a[:, 3 * chid:4 * chid])
            c_new = f * c_ref[pl.ds(m0 + s0, sz), :] + i * g
            c_ref[pl.ds(m0 + s0, sz), :] = c_new
            hseq_ref[pl.ds(m0 + s0, sz), :] = (o * jnp.tanh(c_new)).astype(
                hseq_ref.dtype)

    if n_chunks <= 4:                              # unroll short trip counts
        for r in range(n_chunks):
            chunk(r)
    else:
        pl.loop(0, n_chunks)(chunk)

    # Carry h_t into the im2col buffer for t+1.  hseq is already in compute
    # dtype, so this is a plain re-read of the VMEM output block (no f32 read,
    # no cast).  Per-dx writes are contiguous chid-wide lane-aligned stores.
    @pl.when(t < n_t - 1)
    def _():
        h = hseq_ref[...].reshape(H, W, chid)
        for dx in range(kw):
            lo = max(0, pw - dx)
            hi = min(W, W + pw - dx)
            if hi <= lo:
                continue
            cols_ref[ph:ph + H, lo:hi, dx * chid:(dx + 1) * chid] = (
                h[:, lo + dx - pw:hi + dx - pw, :])

    @pl.when(t == n_t - 1)
    def _():
        clast_ref[...] = c_ref[...]


def _recurrence_layer(pre_x, wh_packed, *, H, W, chid, kh, kw, compute_dtype,
                      matmul_rows, approx_gates):
    B, T, M, C4 = pre_x.shape
    Hp = H + kh - 1
    Khp = wh_packed.shape[1]
    rh = _pick_row_chunk(H, W, matmul_rows)

    kernel = functools.partial(_recurrence_kernel, kh=kh, kw=kw, chid=chid,
                               H=H, W=W, rh=rh, approx_gates=approx_gates)
    return pl.pallas_call(
        kernel,
        grid=(B, T),
        in_specs=[
            # pre_x block for (b, t): pipelined / double-buffered.
            pl.BlockSpec((None, None, M, C4), lambda b, t: (b, t, 0, 0)),
            # packed h-weights: constant block index => fetched once.
            pl.BlockSpec((kh, Khp, C4), lambda b, t: (0, 0, 0)),
        ],
        out_specs=(
            pl.BlockSpec((None, None, M, chid), lambda b, t: (b, t, 0, 0)),
            pl.BlockSpec((None, M, chid), lambda b, t: (b, 0, 0)),
        ),
        out_shape=(
            jax.ShapeDtypeStruct((B, T, M, chid), compute_dtype),
            jax.ShapeDtypeStruct((B, M, chid), jnp.float32),
        ),
        scratch_shapes=[
            pltpu.VMEM((Hp, W, Khp), compute_dtype),   # h-tap im2col buffer
            pltpu.VMEM((M, chid), jnp.float32),        # recurrent cell state
        ],
        compiler_params=pltpu.CompilerParams(
            # batch axis "parallel" (megacore split needs B >= #cores),
            # t axis is the sequential recurrence -> "arbitrary".
            dimension_semantics=("parallel", "arbitrary"),
            vmem_limit_bytes=_vmem_limit_bytes(),
        ),
    )(pre_x, wh_packed)


# ----------------------------------------------------------------------------
# ConvLSTM module (multi-layer) -- plain-JAX orchestration around the kernels
# ----------------------------------------------------------------------------
class ConvLSTMPallas:
    """Multi-layer ConvLSTM forward pass backed by Pallas TPU kernels."""

    def __init__(self, input_dim, hidden_dim, kernel_size, num_layers,
                 batch_first=False, bias=True, return_all_layers=False,
                 compute_dtype=jnp.bfloat16, matmul_rows=256, key=None):
        if not isinstance(hidden_dim, list):
            hidden_dim = [hidden_dim] * num_layers
        if not isinstance(kernel_size, list):
            kernel_size = [kernel_size] * num_layers
        assert len(hidden_dim) == len(kernel_size) == num_layers

        self.input_dim = input_dim
        self.hidden_dim = hidden_dim
        self.kernel_size = kernel_size
        self.num_layers = num_layers
        self.batch_first = batch_first
        self.bias = bias
        self.return_all_layers = return_all_layers
        self.compute_dtype = compute_dtype
        self.matmul_rows = matmul_rows
        self.approx_gates = jnp.dtype(compute_dtype) != jnp.dtype(jnp.float32)

        if key is None:
            key = jax.random.PRNGKey(0)
        self.w_hwio = []     # (kh, kw, cin+chid, 4*chid) f32 -- JAX reference
        self.wx_packed = []  # (kh, Kxp, 4*chid) compute_dtype -- xproj kernel
        self.wh_packed = []  # (kh, Khp, 4*chid) compute_dtype -- recurrence
        self.b = []          # (1, 4*chid) f32
        for l in range(num_layers):
            cin = input_dim if l == 0 else hidden_dim[l - 1]
            kh, kw = kernel_size[l]
            assert kh % 2 == 1 and kw % 2 == 1, "odd kernel sizes only"
            chid = hidden_dim[l]
            ct = cin + chid
            cout = 4 * chid
            fan_in = ct * kh * kw
            bound = 1.0 / np.sqrt(fan_in)
            key, k_w, k_b = jax.random.split(key, 3)
            w = jax.random.uniform(k_w, (kh, kw, ct, cout), jnp.float32,
                                   -bound, bound)
            b_arr = (jax.random.uniform(k_b, (1, cout), jnp.float32,
                                        -bound, bound)
                     if bias else jnp.zeros((1, cout), jnp.float32))

            # split into x part / h part; pack K = (kw, c) row-major,
            # lane-padded to a multiple of 128.
            wx = w[:, :, :cin, :].reshape(kh, kw * cin, cout)
            kxp = _round_up(kw * cin, 128)
            if kxp != kw * cin:
                wx = jnp.pad(wx, ((0, 0), (0, kxp - kw * cin), (0, 0)))
            wh = w[:, :, cin:, :].reshape(kh, kw * chid, cout)
            khp = _round_up(kw * chid, 128)
            if khp != kw * chid:
                wh = jnp.pad(wh, ((0, 0), (0, khp - kw * chid), (0, 0)))

            self.w_hwio.append(w)
            self.wx_packed.append(wx.astype(compute_dtype))
            self.wh_packed.append(wh.astype(compute_dtype))
            self.b.append(b_arr)

    def __call__(self, input_tensor):
        """input: (T,B,C,H,W) (or (B,T,C,H,W) if batch_first).

        Returns (layer_output_list, last_state_list) in PyTorch NCHW layout:
          layer_output: (B, T, Chid, H, W); states: (B, Chid, H, W).
        """
        x = input_tensor
        if not self.batch_first:
            x = jnp.transpose(x, (1, 0, 2, 3, 4))     # -> (B, T, C, H, W)
        B, T, _, H, W = x.shape
        cur = jnp.transpose(x, (0, 1, 3, 4, 2))       # -> NHWC, once

        layer_output_list = []
        last_state_list = []
        for l in range(self.num_layers):
            chid = self.hidden_dim[l]
            kh, kw = self.kernel_size[l]
            cin = cur.shape[-1]
            ph, pw = kh // 2, kw // 2
            # one spatial zero-pad + dtype cast per layer for the whole seq
            xp = jnp.pad(cur.astype(self.compute_dtype),
                         ((0, 0), (0, 0), (ph, ph), (pw, pw), (0, 0)))
            # (1) hoisted, fully-parallel input projection (+bias)
            pre_x = _xproj_layer(
                xp, self.wx_packed[l], self.b[l], H=H, W=W, cin=cin,
                chid=chid, kh=kh, kw=kw, compute_dtype=self.compute_dtype,
                matmul_rows=self.matmul_rows)
            # (2) serial recurrence (h-conv + gates + cell state)
            h_seq, c_last = _recurrence_layer(
                pre_x, self.wh_packed[l], H=H, W=W, chid=chid, kh=kh, kw=kw,
                compute_dtype=self.compute_dtype,
                matmul_rows=self.matmul_rows, approx_gates=self.approx_gates)

            h_seq = h_seq.reshape(B, T, H, W, chid)   # compute_dtype, NHWC
            c_last = c_last.reshape(B, H, W, chid)    # f32, NHWC

            layer_output_list.append(
                jnp.transpose(h_seq, (0, 1, 4, 2, 3)).astype(jnp.float32))
            last_state_list.append(
                (jnp.transpose(h_seq[:, -1], (0, 3, 1, 2)).astype(jnp.float32),
                 jnp.transpose(c_last, (0, 3, 1, 2))))
            cur = h_seq                               # next layer input (NHWC)

        if not self.return_all_layers:
            layer_output_list = layer_output_list[-1:]
            last_state_list = last_state_list[-1:]
        return layer_output_list, last_state_list


# ----------------------------------------------------------------------------
# Pure-JAX reference (lax.conv) for correctness checks
# ----------------------------------------------------------------------------
def _ref_forward(model, input_tensor):
    x = input_tensor
    if not model.batch_first:
        x = jnp.transpose(x, (1, 0, 2, 3, 4))
    B, T, _, H, W = x.shape
    cur = jnp.transpose(x, (0, 1, 3, 4, 2))           # NHWC
    cdt = model.compute_dtype
    outs_all, states_all = [], []
    for l in range(model.num_layers):
        chid = model.hidden_dim[l]
        w = model.w_hwio[l].astype(cdt)
        h = jnp.zeros((B, H, W, chid), jnp.float32)
        c = jnp.zeros((B, H, W, chid), jnp.float32)
        outs = []
        for t in range(T):
            comb = jnp.concatenate(
                [cur[:, t].astype(cdt), h.astype(cdt)], axis=-1)
            cc = jax.lax.conv_general_dilated(
                comb, w, (1, 1), 'SAME',
                dimension_numbers=('NHWC', 'HWIO', 'NHWC'),
                preferred_element_type=jnp.float32) + model.b[l]
            i = jax.nn.sigmoid(cc[..., 0 * chid:1 * chid])
            f = jax.nn.sigmoid(cc[..., 1 * chid:2 * chid])
            o = jax.nn.sigmoid(cc[..., 2 * chid:3 * chid])
            g = jnp.tanh(cc[..., 3 * chid:4 * chid])
            c = f * c + i * g
            h = o * jnp.tanh(c)
            outs.append(h)
        seq = jnp.stack(outs, axis=1)                 # (B, T, H, W, chid)
        cur = seq
        outs_all.append(jnp.transpose(seq, (0, 1, 4, 2, 3)))
        states_all.append((jnp.transpose(h, (0, 3, 1, 2)),
                           jnp.transpose(c, (0, 3, 1, 2))))
    if not model.return_all_layers:
        outs_all, states_all = outs_all[-1:], states_all[-1:]
    return outs_all, states_all


if __name__ == "__main__":
    key = jax.random.PRNGKey(0)
    k_in, k_par = jax.random.split(key)

    # seq=8, batch=2, input channels=4, 16x16 spatial, hidden=32, 2 layers,
    # 3x3 kernels, batch_first=False -> input is (T, B, C, H, W).
    T, B, C, H, W = 8, 2, 4, 16, 16
    x = jax.random.normal(k_in, (T, B, C, H, W), jnp.float32)

    # --- exact-semantics (f32) configuration: tight correctness check -------
    model_f32 = ConvLSTMPallas(input_dim=C, hidden_dim=32, kernel_size=(3, 3),
                               num_layers=2, batch_first=False, bias=True,
                               return_all_layers=False,
                               compute_dtype=jnp.float32, key=k_par)
    outs, states = jax.jit(model_f32.__call__)(x)
    jax.block_until_ready(outs)
    jax.block_until_ready(states)
    ref_outs, ref_states = _ref_forward(model_f32, x)
    np.testing.assert_allclose(np.asarray(outs[0]), np.asarray(ref_outs[0]),
                               rtol=1e-4, atol=1e-4)
    np.testing.assert_allclose(np.asarray(states[0][0]),
                               np.asarray(ref_states[0][0]),
                               rtol=1e-4, atol=1e-4)
    np.testing.assert_allclose(np.asarray(states[0][1]),
                               np.asarray(ref_states[0][1]),
                               rtol=1e-4, atol=1e-4)

    # --- bf16-matmul configuration (performance setup): looser check --------
    model_bf16 = ConvLSTMPallas(input_dim=C, hidden_dim=32, kernel_size=(3, 3),
                                num_layers=2, batch_first=False, bias=True,
                                return_all_layers=False,
                                compute_dtype=jnp.bfloat16, key=k_par)
    outs_b, states_b = jax.jit(model_bf16.__call__)(x)
    jax.block_until_ready(outs_b)
    jax.block_until_ready(states_b)
    ref_outs_b, ref_states_b = _ref_forward(model_bf16, x)
    np.testing.assert_allclose(np.asarray(outs_b[0]),
                               np.asarray(ref_outs_b[0]),
                               rtol=3e-2, atol=3e-2)
    np.testing.assert_allclose(np.asarray(states_b[0][1]),
                               np.asarray(ref_states_b[0][1]),
                               rtol=3e-2, atol=3e-2)

    print("KERNEL_OK")
</pallas_src>

<mosaic_0001>
module attributes {stable_mosaic.version = 11 : i64} {
  func.func @_xproj_kernel(%arg0: i32, %arg1: i32, %arg2: memref<1x1x18x18x4xf32, #tpu.memory_space<vmem>>, %arg3: memref<3x128x128xf32, #tpu.memory_space<vmem>>, %arg4: memref<1x128xf32, #tpu.memory_space<vmem>>, %arg5: memref<1x1x256x128xf32, #tpu.memory_space<vmem>>, %arg6: memref<18x16x128xf32, #tpu.memory_space<vmem>>) attributes {dimension_semantics = [#tpu.dimension_semantics<parallel>, #tpu.dimension_semantics<parallel>], iteration_bounds = array<i64: 2, 8>, scalar_prefetch = 0 : i64, scratch_operands = 1 : i64, tpu.core_type = #tpu.core_type<tc>, window_params = [{transform_indices = @transform_0, window_bounds = array<i64: 1, 1, 18, 18, 4>}, {pipeline_mode = #tpu.pipeline_mode<synchronous>, transform_indices = @transform_1, window_bounds = array<i64: 3, 128, 128>}, {pipeline_mode = #tpu.pipeline_mode<synchronous>, transform_indices = @transform_2, window_bounds = array<i64: 1, 128>}, {transform_indices = @transform_3, window_bounds = array<i64: 1, 1, 256, 128>}]} {
    %cst = arith.constant 0.000000e+00 : f32
    %0 = vector.broadcast %cst : f32 to vector<18x16x116xf32>
    %c0 = arith.constant 0 : index
    %c0_0 = arith.constant 0 : index
    %c12 = arith.constant 12 : index
    %1 = vector.load %arg6[%c0, %c0_0, %c12] : memref<18x16x128xf32, #tpu.memory_space<vmem>>, vector<18x16x116xf32>
    tpu.vector_store %arg6[%c0, %c0_0, %c12], %0 {strides = array<i32>} : memref<18x16x128xf32, #tpu.memory_space<vmem>>, vector<18x16x116xf32>,
    %c0_1 = arith.constant 0 : index
    %c0_2 = arith.constant 0 : index
    %c0_3 = arith.constant 0 : index
    %c0_4 = arith.constant 0 : index
    %c0_5 = arith.constant 0 : index
    %2 = vector.load %arg2[%c0_1, %c0_2, %c0_3, %c0_4, %c0_5] : memref<1x1x18x18x4xf32, #tpu.memory_space<vmem>>, vector<1x1x18x18x4xf32>
    %3 = vector.shape_cast %2 : vector<1x1x18x18x4xf32> to vector<18x18x4xf32>
    %4 = vector.extract_strided_slice %3 {offsets = [0, 0, 0], sizes = [18, 16, 4], strides = [1, 1, 1]} : vector<18x18x4xf32> to vector<18x16x4xf32>
    %c0_6 = arith.constant 0 : index
    %c0_7 = arith.constant 0 : index
    %c0_8 = arith.constant 0 : index
    %5 = vector.load %arg6[%c0_6, %c0_7, %c0_8] : memref<18x16x128xf32, #tpu.memory_space<vmem>>, vector<18x16x4xf32>
    tpu.vector_store %arg6[%c0_6, %c0_7, %c0_8], %4 {strides = array<i32>} : memref<18x16x128xf32, #tpu.memory_space<vmem>>, vector<18x16x4xf32>,
    %6 = vector.extract_strided_slice %3 {offsets = [0, 1, 0], sizes = [18, 16, 4], strides = [1, 1, 1]} : vector<18x18x4xf32> to vector<18x16x4xf32>
    %c0_9 = arith.constant 0 : index
    %c0_10 = arith.constant 0 : index
    %c4 = arith.constant 4 : index
    %7 = vector.load %arg6[%c0_9, %c0_10, %c4] : memref<18x16x128xf32, #tpu.memory_space<vmem>>, vector<18x16x4xf32>
    tpu.vector_store %arg6[%c0_9, %c0_10, %c4], %6 {strides = array<i32>} : memref<18x16x128xf32, #tpu.memory_space<vmem>>, vector<18x16x4xf32>,
    %8 = vector.extract_strided_slice %3 {offsets = [0, 2, 0], sizes = [18, 16, 4], strides = [1, 1, 1]} : vector<18x18x4xf32> to vector<18x16x4xf32>
    %c0_11 = arith.constant 0 : index
    %c0_12 = arith.constant 0 : index
    %c8 = arith.constant 8 : index
    %9 = vector.load %arg6[%c0_11, %c0_12, %c8] : memref<18x16x128xf32, #tpu.memory_space<vmem>>, vector<18x16x4xf32>
    tpu.vector_store %arg6[%c0_11, %c0_12, %c8], %8 {strides = array<i32>} : memref<18x16x128xf32, #tpu.memory_space<vmem>>, vector<18x16x4xf32>,
    %c0_13 = arith.constant 0 : index
    %c0_14 = arith.constant 0 : index
    %10 = vector.load %arg4[%c0_13, %c0_14] : memref<1x128xf32, #tpu.memory_space<vmem>>, vector<1x128xf32>
    %cst_15 = arith.constant 0.000000e+00 : f32
    %11 = vector.broadcast %cst_15 : f32 to vector<256x128xf32>
    %12 = vector.broadcast %10 : vector<1x128xf32> to vector<256x128xf32>
    %13 = arith.addf %11, %12 : vector<256x128xf32>
    %c0_16 = arith.constant 0 : index
    %c0_17 = arith.constant 0 : index
    %c0_18 = arith.constant 0 : index
    %14 = vector.load %arg6[%c0_16, %c0_17, %c0_18] : memref<18x16x128xf32, #tpu.memory_space<vmem>>, vector<16x16x128xf32>
    %15 = vector.shape_cast %14 : vector<16x16x128xf32> to vector<256x128xf32>
    %c0_19 = arith.constant 0 : index
    %c0_20 = arith.constant 0 : index
    %c0_21 = arith.constant 0 : index
    %16 = vector.load %arg3[%c0_19, %c0_20, %c0_21] : memref<3x128x128xf32, #tpu.memory_space<vmem>>, vector<1x128x128xf32>
    %17 = vector.shape_cast %16 : vector<1x128x128xf32> to vector<128x128xf32>
    %cst_22 = arith.constant dense<0.000000e+00> : vector<256x128xf32>
    %18 = tpu.matmul %15, %17, %cst_22 {dimension_numbers = #tpu.dot_dimension_numbers<[1], [0], [0], [1], [0, 0, 1, 1], [], []>} : vector<256x128xf32>, vector<128x128xf32>, vector<256x128xf32> -> vector<256x128xf32>
    %19 = arith.addf %13, %18 : vector<256x128xf32>
    %c1 = arith.constant 1 : index
    %c0_23 = arith.constant 0 : index
    %c0_24 = arith.constant 0 : index
    %20 = vector.load %arg6[%c1, %c0_23, %c0_24] : memref<18x16x128xf32, #tpu.memory_space<vmem>>, vector<16x16x128xf32>
    %21 = vector.shape_cast %20 : vector<16x16x128xf32> to vector<256x128xf32>
    %c1_25 = arith.constant 1 : index
    %c0_26 = arith.constant 0 : index
    %c0_27 = arith.constant 0 : index
    %22 = vector.load %arg3[%c1_25, %c0_26, %c0_27] : memref<3x128x128xf32, #tpu.memory_space<vmem>>, vector<1x128x128xf32>
    %23 = vector.shape_cast %22 : vector<1x128x128xf32> to vector<128x128xf32>
    %cst_28 = arith.constant dense<0.000000e+00> : vector<256x128xf32>
    %24 = tpu.matmul %21, %23, %cst_28 {dimension_numbers = #tpu.dot_dimension_numbers<[1], [0], [0], [1], [0, 0, 1, 1], [], []>} : vector<256x128xf32>, vector<128x128xf32>, vector<256x128xf32> -> vector<256x128xf32>
    %25 = arith.addf %19, %24 : vector<256x128xf32>
    %c2 = arith.constant 2 : index
    %c0_29 = arith.constant 0 : index
    %c0_30 = arith.constant 0 : index
    %26 = vector.load %arg6[%c2, %c0_29, %c0_30] : memref<18x16x128xf32, #tpu.memory_space<vmem>>, vector<16x16x128xf32>
    %27 = vector.shape_cast %26 : vector<16x16x128xf32> to vector<256x128xf32>
    %c2_31 = arith.constant 2 : index
    %c0_32 = arith.constant 0 : index
    %c0_33 = arith.constant 0 : index
    %28 = vector.load %arg3[%c2_31, %c0_32, %c0_33] : memref<3x128x128xf32, #tpu.memory_space<vmem>>, vector<1x128x128xf32>
    %29 = vector.shape_cast %28 : vector<1x128x128xf32> to vector<128x128xf32>
    %cst_34 = arith.constant dense<0.000000e+00> : vector<256x128xf32>
    %30 = tpu.matmul %27, %29, %cst_34 {dimension_numbers = #tpu.dot_dimension_numbers<[1], [0], [0], [1], [0, 0, 1, 1], [], []>} : vector<256x128xf32>, vector<128x128xf32>, vector<256x128xf32> -> vector<256x128xf32>
    %31 = arith.addf %25, %30 : vector<256x128xf32>
    %c0_35 = arith.constant 0 : index
    %c0_36 = arith.constant 0 : index
    %c0_37 = arith.constant 0 : index
    %c0_38 = arith.constant 0 : index
    %32 = vector.load %arg5[%c0_35, %c0_36, %c0_37, %c0_38] : memref<1x1x256x128xf32, #tpu.memory_space<vmem>>, vector<1x1x256x128xf32>
    %33 = vector.shape_cast %32 : vector<1x1x256x128xf32> to vector<256x128xf32>
    %34 = vector.shape_cast %31 : vector<256x128xf32> to vector<1x1x256x128xf32>
    tpu.vector_store %arg5[%c0_35, %c0_36, %c0_37, %c0_38], %34 {strides = array<i32>} : memref<1x1x256x128xf32, #tpu.memory_space<vmem>>, vector<1x1x256x128xf32>,
    return
  }
  func.func @transform_0(%arg0: i32, %arg1: i32) -> (i32, i32, i32, i32, i32) {
    %c0_i32 = arith.constant 0 : i32
    %c0_i32_0 = arith.constant 0 : i32
    %c0_i32_1 = arith.constant 0 : i32
    %c0_i32_2 = arith.constant 0 : i32
    return %arg0, %arg1, %c0_i32, %c0_i32_0, %c0_i32_1 : i32, i32, i32, i32, i32
  }
  func.func @transform_1(%arg0: i32, %arg1: i32) -> (i32, i32, i32) {
    %c0_i32 = arith.constant 0 : i32
    %c0_i32_0 = arith.constant 0 : i32
    %c0_i32_1 = arith.constant 0 : i32
    %c0_i32_2 = arith.constant 0 : i32
    return %c0_i32, %c0_i32_0, %c0_i32_1 : i32, i32, i32
  }
  func.func @transform_2(%arg0: i32, %arg1: i32) -> (i32, i32) {
    %c0_i32 = arith.constant 0 : i32
    %c0_i32_0 = arith.constant 0 : i32
    %c0_i32_1 = arith.constant 0 : i32
    return %c0_i32, %c0_i32_0 : i32, i32
  }
  func.func @transform_3(%arg0: i32, %arg1: i32) -> (i32, i32, i32, i32) {
    %c0_i32 = arith.constant 0 : i32
    %c0_i32_0 = arith.constant 0 : i32
    %c0_i32_1 = arith.constant 0 : i32
    return %arg0, %arg1, %c0_i32, %c0_i32_0 : i32, i32, i32, i32
  }
}

module attributes {stable_mosaic.version = 11 : i64} {
  func.func @_recurrence_kernel(%arg0: i32, %arg1: i32, %arg2: memref<1x1x256x128xf32, #tpu.memory_space<vmem>>, %arg3: memref<3x128x128xf32, #tpu.memory_space<vmem>>, %arg4: memref<1x1x256x32xf32, #tpu.memory_space<vmem>>, %arg5: memref<1x256x32xf32, #tpu.memory_space<vmem>>, %arg6: memref<18x16x128xf32, #tpu.memory_space<vmem>>, %arg7: memref<256x32xf32, #tpu.memory_space<vmem>>) attributes {dimension_semantics = [#tpu.dimension_semantics<parallel>, #tpu.dimension_semantics<arbitrary>], iteration_bounds = array<i64: 2, 8>, scalar_prefetch = 0 : i64, scratch_operands = 2 : i64, tpu.core_type = #tpu.core_type<tc>, window_params = [{transform_indices = @transform_0, window_bounds = array<i64: 1, 1, 256, 128>}, {pipeline_mode = #tpu.pipeline_mode<synchronous>, transform_indices = @transform_1, window_bounds = array<i64: 3, 128, 128>}, {transform_indices = @transform_2, window_bounds = array<i64: 1, 1, 256, 32>}, {transform_indices = @transform_3, window_bounds = array<i64: 1, 256, 32>}]} {
    %c0_i32 = arith.constant 0 : i32
    %0 = arith.cmpi eq, %arg1, %c0_i32 : i32
    %1 = arith.extui %0 : i1 to i32
    %c0_i32_0 = arith.constant 0 : i32
    %2 = arith.cmpi ne, %1, %c0_i32_0 : i32
    scf.if %2 {
      %cst_58 = arith.constant 0.000000e+00 : f32
      %103 = vector.broadcast %cst_58 : f32 to vector<18x16x128xf32>
      %c0_59 = arith.constant 0 : index
      %c0_60 = arith.constant 0 : index
      %c0_61 = arith.constant 0 : index
      %104 = vector.load %arg6[%c0_59, %c0_60, %c0_61] : memref<18x16x128xf32, #tpu.memory_space<vmem>>, vector<18x16x128xf32>
      tpu.vector_store %arg6[%c0_59, %c0_60, %c0_61], %103 {strides = array<i32>} : memref<18x16x128xf32, #tpu.memory_space<vmem>>, vector<18x16x128xf32>,
      %cst_62 = arith.constant 0.000000e+00 : f32
      %105 = vector.broadcast %cst_62 : f32 to vector<256x32xf32>
      %c0_63 = arith.constant 0 : index
      %c0_64 = arith.constant 0 : index
      %106 = vector.load %arg7[%c0_63, %c0_64] : memref<256x32xf32, #tpu.memory_space<vmem>>, vector<256x32xf32>
      tpu.vector_store %arg7[%c0_63, %c0_64], %105 {strides = array<i32>} : memref<256x32xf32, #tpu.memory_space<vmem>>, vector<256x32xf32>,
    } else {
    }
    %c0 = arith.constant 0 : index
    %c0_1 = arith.constant 0 : index
    %c0_2 = arith.constant 0 : index
    %c0_3 = arith.constant 0 : index
    %3 = vector.load %arg2[%c0, %c0_1, %c0_2, %c0_3] : memref<1x1x256x128xf32, #tpu.memory_space<vmem>>, vector<1x1x256x128xf32>
    %4 = vector.shape_cast %3 : vector<1x1x256x128xf32> to vector<256x128xf32>
    %c0_4 = arith.constant 0 : index
    %c0_5 = arith.constant 0 : index
    %c0_6 = arith.constant 0 : index
    %5 = vector.load %arg6[%c0_4, %c0_5, %c0_6] : memref<18x16x128xf32, #tpu.memory_space<vmem>>, vector<16x16x128xf32>
    %6 = vector.shape_cast %5 : vector<16x16x128xf32> to vector<256x128xf32>
    %c0_7 = arith.constant 0 : index
    %c0_8 = arith.constant 0 : index
    %c0_9 = arith.constant 0 : index
    %7 = vector.load %arg3[%c0_7, %c0_8, %c0_9] : memref<3x128x128xf32, #tpu.memory_space<vmem>>, vector<1x128x128xf32>
    %8 = vector.shape_cast %7 : vector<1x128x128xf32> to vector<128x128xf32>
    %cst = arith.constant dense<0.000000e+00> : vector<256x128xf32>
    %9 = tpu.matmul %6, %8, %cst {dimension_numbers = #tpu.dot_dimension_numbers<[1], [0], [0], [1], [0, 0, 1, 1], [], []>} : vector<256x128xf32>, vector<128x128xf32>, vector<256x128xf32> -> vector<256x128xf32>
    %10 = arith.addf %4, %9 : vector<256x128xf32>
    %c1 = arith.constant 1 : index
    %c0_10 = arith.constant 0 : index
    %c0_11 = arith.constant 0 : index
    %11 = vector.load %arg6[%c1, %c0_10, %c0_11] : memref<18x16x128xf32, #tpu.memory_space<vmem>>, vector<16x16x128xf32>
    %12 = vector.shape_cast %11 : vector<16x16x128xf32> to vector<256x128xf32>
    %c1_12 = arith.constant 1 : index
    %c0_13 = arith.constant 0 : index
    %c0_14 = arith.constant 0 : index
    %13 = vector.load %arg3[%c1_12, %c0_13, %c0_14] : memref<3x128x128xf32, #tpu.memory_space<vmem>>, vector<1x128x128xf32>
    %14 = vector.shape_cast %13 : vector<1x128x128xf32> to vector<128x128xf32>
    %cst_15 = arith.constant dense<0.000000e+00> : vector<256x128xf32>
    %15 = tpu.matmul %12, %14, %cst_15 {dimension_numbers = #tpu.dot_dimension_numbers<[1], [0], [0], [1], [0, 0, 1, 1], [], []>} : vector<256x128xf32>, vector<128x128xf32>, vector<256x128xf32> -> vector<256x128xf32>
    %16 = arith.addf %10, %15 : vector<256x128xf32>
    %c2 = arith.constant 2 : index
    %c0_16 = arith.constant 0 : index
    %c0_17 = arith.constant 0 : index
    %17 = vector.load %arg6[%c2, %c0_16, %c0_17] : memref<18x16x128xf32, #tpu.memory_space<vmem>>, vector<16x16x128xf32>
    %18 = vector.shape_cast %17 : vector<16x16x128xf32> to vector<256x128xf32>
    %c2_18 = arith.constant 2 : index
    %c0_19 = arith.constant 0 : index
    %c0_20 = arith.constant 0 : index
    %19 = vector.load %arg3[%c2_18, %c0_19, %c0_20] : memref<3x128x128xf32, #tpu.memory_space<vmem>>, vector<1x128x128xf32>
    %20 = vector.shape_cast %19 : vector<1x128x128xf32> to vector<128x128xf32>
    %cst_21 = arith.constant dense<0.000000e+00> : vector<256x128xf32>
    %21 = tpu.matmul %18, %20, %cst_21 {dimension_numbers = #tpu.dot_dimension_numbers<[1], [0], [0], [1], [0, 0, 1, 1], [], []>} : vector<256x128xf32>, vector<128x128xf32>, vector<256x128xf32> -> vector<256x128xf32>
    %22 = arith.addf %16, %21 : vector<256x128xf32>
    %23 = vector.extract_strided_slice %22 {offsets = [0, 0], sizes = [128, 128], strides = [1, 1]} : vector<256x128xf32> to vector<128x128xf32>
    %24 = vector.extract_strided_slice %23 {offsets = [0, 0], sizes = [128, 32], strides = [1, 1]} : vector<128x128xf32> to vector<128x32xf32>
    %cst_22 = arith.constant 0.000000e+00 : f32
    %25 = vector.broadcast %cst_22 : f32 to vector<128x32xf32>
    %26 = arith.subf %25, %24 : vector<128x32xf32>
    %27 = math.exp %26 : vector<128x32xf32>
    %cst_23 = arith.constant 1.000000e+00 : f32
    %28 = vector.broadcast %cst_23 : f32 to vector<128x32xf32>
    %29 = arith.addf %28, %27 : vector<128x32xf32>
    %cst_24 = arith.constant 1.000000e+00 : f32
    %30 = vector.broadcast %cst_24 : f32 to vector<128x32xf32>
    %31 = arith.divf %30, %29 : vector<128x32xf32>
    %32 = vector.extract_strided_slice %23 {offsets = [0, 32], sizes = [128, 32], strides = [1, 1]} : vector<128x128xf32> to vector<128x32xf32>
    %cst_25 = arith.constant 0.000000e+00 : f32
    %33 = vector.broadcast %cst_25 : f32 to vector<128x32xf32>
    %34 = arith.subf %33, %32 : vector<128x32xf32>
    %35 = math.exp %34 : vector<128x32xf32>
    %cst_26 = arith.constant 1.000000e+00 : f32
    %36 = vector.broadcast %cst_26 : f32 to vector<128x32xf32>
    %37 = arith.addf %36, %35 : vector<128x32xf32>
    %cst_27 = arith.constant 1.000000e+00 : f32
    %38 = vector.broadcast %cst_27 : f32 to vector<128x32xf32>
    %39 = arith.divf %38, %37 : vector<128x32xf32>
    %40 = vector.extract_strided_slice %23 {offsets = [0, 64], sizes = [128, 32], strides = [1, 1]} : vector<128x128xf32> to vector<128x32xf32>
    %cst_28 = arith.constant 0.000000e+00 : f32
    %41 = vector.broadcast %cst_28 : f32 to vector<128x32xf32>
    %42 = arith.subf %41, %40 : vector<128x32xf32>
    %43 = math.exp %42 : vector<128x32xf32>
    %cst_29 = arith.constant 1.000000e+00 : f32
    %44 = vector.broadcast %cst_29 : f32 to vector<128x32xf32>
    %45 = arith.addf %44, %43 : vector<128x32xf32>
    %cst_30 = arith.constant 1.000000e+00 : f32
    %46 = vector.broadcast %cst_30 : f32 to vector<128x32xf32>
    %47 = arith.divf %46, %45 : vector<128x32xf32>
    %48 = vector.extract_strided_slice %23 {offsets = [0, 96], sizes = [128, 32], strides = [1, 1]} : vector<128x128xf32> to vector<128x32xf32>
    %49 = math.tanh %48 : vector<128x32xf32>
    %c0_31 = arith.constant 0 : index
    %c0_32 = arith.constant 0 : index
    %50 = vector.load %arg7[%c0_31, %c0_32] : memref<256x32xf32, #tpu.memory_space<vmem>>, vector<128x32xf32>
    %51 = arith.mulf %39, %50 : vector<128x32xf32>
    %52 = arith.mulf %31, %49 : vector<128x32xf32>
    %53 = arith.addf %51, %52 : vector<128x32xf32>
    %c0_33 = arith.constant 0 : index
    %c0_34 = arith.constant 0 : index
    %54 = vector.load %arg7[%c0_33, %c0_34] : memref<256x32xf32, #tpu.memory_space<vmem>>, vector<128x32xf32>
    tpu.vector_store %arg7[%c0_33, %c0_34], %53 {strides = array<i32>} : memref<256x32xf32, #tpu.memory_space<vmem>>, vector<128x32xf32>,
    %55 = math.tanh %53 : vector<128x32xf32>
    %56 = arith.mulf %47, %55 : vector<128x32xf32>
    %c0_35 = arith.constant 0 : index
    %c0_36 = arith.constant 0 : index
    %c0_37 = arith.constant 0 : index
    %c0_38 = arith.constant 0 : index
    %57 = vector.load %arg4[%c0_35, %c0_36, %c0_37, %c0_38] : memref<1x1x256x32xf32, #tpu.memory_space<vmem>>, vector<1x1x128x32xf32>
    %58 = vector.shape_cast %57 : vector<1x1x128x32xf32> to vector<128x32xf32>
    %59 = vector.shape_cast %56 : vector<128x32xf32> to vector<1x1x128x32xf32>
    tpu.vector_store %arg4[%c0_35, %c0_36, %c0_37, %c0_38], %59 {strides = array<i32>} : memref<1x1x256x32xf32, #tpu.memory_space<vmem>>, vector<1x1x128x32xf32>,
    %60 = vector.extract_strided_slice %22 {offsets = [128, 0], sizes = [128, 128], strides = [1, 1]} : vector<256x128xf32> to vector<128x128xf32>
    %61 = vector.extract_strided_slice %60 {offsets = [0, 0], sizes = [128, 32], strides = [1, 1]} : vector<128x128xf32> to vector<128x32xf32>
    %cst_39 = arith.constant 0.000000e+00 : f32
    %62 = vector.broadcast %cst_39 : f32 to vector<128x32xf32>
    %63 = arith.subf %62, %61 : vector<128x32xf32>
    %64 = math.exp %63 : vector<128x32xf32>
    %cst_40 = arith.constant 1.000000e+00 : f32
    %65 = vector.broadcast %cst_40 : f32 to vector<128x32xf32>
    %66 = arith.addf %65, %64 : vector<128x32xf32>
    %cst_41 = arith.constant 1.000000e+00 : f32
    %67 = vector.broadcast %cst_41 : f32 to vector<128x32xf32>
    %68 = arith.divf %67, %66 : vector<128x32xf32>
    %69 = vector.extract_strided_slice %60 {offsets = [0, 32], sizes = [128, 32], strides = [1, 1]} : vector<128x128xf32> to vector<128x32xf32>
    %cst_42 = arith.constant 0.000000e+00 : f32
    %70 = vector.broadcast %cst_42 : f32 to vector<128x32xf32>
    %71 = arith.subf %70, %69 : vector<128x32xf32>
    %72 = math.exp %71 : vector<128x32xf32>
    %cst_43 = arith.constant 1.000000e+00 : f32
    %73 = vector.broadcast %cst_43 : f32 to vector<128x32xf32>
    %74 = arith.addf %73, %72 : vector<128x32xf32>
    %cst_44 = arith.constant 1.000000e+00 : f32
    %75 = vector.broadcast %cst_44 : f32 to vector<128x32xf32>
    %76 = arith.divf %75, %74 : vector<128x32xf32>
    %77 = vector.extract_strided_slice %60 {offsets = [0, 64], sizes = [128, 32], strides = [1, 1]} : vector<128x128xf32> to vector<128x32xf32>
    %cst_45 = arith.constant 0.000000e+00 : f32
    %78 = vector.broadcast %cst_45 : f32 to vector<128x32xf32>
    %79 = arith.subf %78, %77 : vector<128x32xf32>
    %80 = math.exp %79 : vector<128x32xf32>
    %cst_46 = arith.constant 1.000000e+00 : f32
    %81 = vector.broadcast %cst_46 : f32 to vector<128x32xf32>
    %82 = arith.addf %81, %80 : vector<128x32xf32>
    %cst_47 = arith.constant 1.000000e+00 : f32
    %83 = vector.broadcast %cst_47 : f32 to vector<128x32xf32>
    %84 = arith.divf %83, %82 : vector<128x32xf32>
    %85 = vector.extract_strided_slice %60 {offsets = [0, 96], sizes = [128, 32], strides = [1, 1]} : vector<128x128xf32> to vector<128x32xf32>
    %86 = math.tanh %85 : vector<128x32xf32>
    %c128 = arith.constant 128 : index
    %c0_48 = arith.constant 0 : index
    %87 = vector.load %arg7[%c128, %c0_48] : memref<256x32xf32, #tpu.memory_space<vmem>>, vector<128x32xf32>
    %88 = arith.mulf %76, %87 : vector<128x32xf32>
    %89 = arith.mulf %68, %86 : vector<128x32xf32>
    %90 = arith.addf %88, %89 : vector<128x32xf32>
    %c128_49 = arith.constant 128 : index
    %c0_50 = arith.constant 0 : index
    %91 = vector.load %arg7[%c128_49, %c0_50] : memref<256x32xf32, #tpu.memory_space<vmem>>, vector<128x32xf32>
    tpu.vector_store %arg7[%c128_49, %c0_50], %90 {strides = array<i32>} : memref<256x32xf32, #tpu.memory_space<vmem>>, vector<128x32xf32>,
    %92 = math.tanh %90 : vector<128x32xf32>
    %93 = arith.mulf %84, %92 : vector<128x32xf32>
    %c0_51 = arith.constant 0 : index
    %c0_52 = arith.constant 0 : index
    %c128_53 = arith.constant 128 : index
    %c0_54 = arith.constant 0 : index
    %94 = vector.load %arg4[%c0_51, %c0_52, %c128_53, %c0_54] : memref<1x1x256x32xf32, #tpu.memory_space<vmem>>, vector<1x1x128x32xf32>
    %95 = vector.shape_cast %94 : vector<1x1x128x32xf32> to vector<128x32xf32>
    %96 = vector.shape_cast %93 : vector<128x32xf32> to vector<1x1x128x32xf32>
    tpu.vector_store %arg4[%c0_51, %c0_52, %c128_53, %c0_54], %96 {strides = array<i32>} : memref<1x1x256x32xf32, #tpu.memory_space<vmem>>, vector<1x1x128x32xf32>,
    %c7_i32 = arith.constant 7 : i32
    %97 = arith.cmpi slt, %arg1, %c7_i32 : i32
    %98 = arith.extui %97 : i1 to i32
    %c0_i32_55 = arith.constant 0 : i32
    %99 = arith.cmpi ne, %98, %c0_i32_55 : i32
    scf.if %99 {
      %c0_58 = arith.constant 0 : index
      %c0_59 = arith.constant 0 : index
      %c0_60 = arith.constant 0 : index
      %c0_61 = arith.constant 0 : index
      %103 = vector.load %arg4[%c0_58, %c0_59, %c0_60, %c0_61] : memref<1x1x256x32xf32, #tpu.memory_space<vmem>>, vector<1x1x256x32xf32>
      %104 = vector.shape_cast %103 : vector<1x1x256x32xf32> to vector<256x32xf32>
      %105 = vector.shape_cast %104 : vector<256x32xf32> to vector<16x16x32xf32>
      %106 = vector.extract_strided_slice %105 {offsets = [0, 0, 0], sizes = [16, 15, 32], strides = [1, 1, 1]} : vector<16x16x32xf32> to vector<16x15x32xf32>
      %c1_62 = arith.constant 1 : index
      %c1_63 = arith.constant 1 : index
      %c0_64 = arith.constant 0 : index
      %107 = vector.load %arg6[%c1_62, %c1_63, %c0_64] : memref<18x16x128xf32, #tpu.memory_space<vmem>>, vector<16x15x32xf32>
      tpu.vector_store %arg6[%c1_62, %c1_63, %c0_64], %106 {strides = array<i32>} : memref<18x16x128xf32, #tpu.memory_space<vmem>>, vector<16x15x32xf32>,
      %c1_65 = arith.constant 1 : index
      %c0_66 = arith.constant 0 : index
      %c32 = arith.constant 32 : index
      %108 = vector.load %arg6[%c1_65, %c0_66, %c32] : memref<18x16x128xf32, #tpu.memory_space<vmem>>, vector<16x16x32xf32>
      tpu.vector_store %arg6[%c1_65, %c0_66, %c32], %105 {strides = array<i32>} : memref<18x16x128xf32, #tpu.memory_space<vmem>>, vector<16x16x32xf32>,
      %109 = vector.extract_strided_slice %105 {offsets = [0, 1, 0], sizes = [16, 15, 32], strides = [1, 1, 1]} : vector<16x16x32xf32> to vector<16x15x32xf32>
      %c1_67 = arith.constant 1 : index
      %c0_68 = arith.constant 0 : index
      %c64 = arith.constant 64 : index
      %110 = vector.load %arg6[%c1_67, %c0_68, %c64] : memref<18x16x128xf32, #tpu.memory_space<vmem>>, vector<16x15x32xf32>
      tpu.vector_store %arg6[%c1_67, %c0_68, %c64], %109 {strides = array<i32>} : memref<18x16x128xf32, #tpu.memory_space<vmem>>, vector<16x15x32xf32>,
    } else {
    }
    %c7_i32_56 = arith.constant 7 : i32
    %100 = arith.cmpi eq, %arg1, %c7_i32_56 : i32
    %101 = arith.extui %100 : i1 to i32
    %c0_i32_57 = arith.constant 0 : i32
    %102 = arith.cmpi ne, %101, %c0_i32_57 : i32
    scf.if %102 {
      %c0_58 = arith.constant 0 : index
      %c0_59 = arith.constant 0 : index
      %103 = vector.load %arg7[%c0_58, %c0_59] : memref<256x32xf32, #tpu.memory_space<vmem>>, vector<256x32xf32>
      %c0_60 = arith.constant 0 : index
      %c0_61 = arith.constant 0 : index
      %c0_62 = arith.constant 0 : index
      %104 = vector.load %arg5[%c0_60, %c0_61, %c0_62] : memref<1x256x32xf32, #tpu.memory_space<vmem>>, vector<1x256x32xf32>
      %105 = vector.shape_cast %104 : vector<1x256x32xf32> to vector<256x32xf32>
      %106 = vector.shape_cast %103 : vector<256x32xf32> to vector<1x256x32xf32>
      tpu.vector_store %arg5[%c0_60, %c0_61, %c0_62], %106 {strides = array<i32>} : memref<1x256x32xf32, #tpu.memory_space<vmem>>, vector<1x256x32xf32>,
    } else {
    }
    return
  }
  func.func @transform_0(%arg0: i32, %arg1: i32) -> (i32, i32, i32, i32) {
    %c0_i32 = arith.constant 0 : i32
    %c0_i32_0 = arith.constant 0 : i32
    %c0_i32_1 = arith.constant 0 : i32
    return %arg0, %arg1, %c0_i32, %c0_i32_0 : i32, i32, i32, i32
  }
  func.func @transform_1(%arg0: i32, %arg1: i32) -> (i32, i32, i32) {
    %c0_i32 = arith.constant 0 : i32
    %c0_i32_0 = arith.constant 0 : i32
    %c0_i32_1 = arith.constant 0 : i32
    %c0_i32_2 = arith.constant 0 : i32
    return %c0_i32, %c0_i32_0, %c0_i32_1 : i32, i32, i32
  }
  func.func @transform_2(%arg0: i32, %arg1: i32) -> (i32, i32, i32, i32) {
    %c0_i32 = arith.constant 0 : i32
    %c0_i32_0 = arith.constant 0 : i32
    %c0_i32_1 = arith.constant 0 : i32
    return %arg0, %arg1, %c0_i32, %c0_i32_0 : i32, i32, i32, i32
  }
  func.func @transform_3(%arg0: i32, %arg1: i32) -> (i32, i32, i32) {
    %c0_i32 = arith.constant 0 : i32
    %c0_i32_0 = arith.constant 0 : i32
    %c0_i32_1 = arith.constant 0 : i32
    return %arg0, %c0_i32, %c0_i32_0 : i32, i32, i32
  }
}

module attributes {stable_mosaic.version = 11 : i64} {
  func.func @_xproj_kernel(%arg0: i32, %arg1: i32, %arg2: memref<1x1x18x18x32xf32, #tpu.memory_space<vmem>>, %arg3: memref<3x128x128xf32, #tpu.memory_space<vmem>>, %arg4: memref<1x128xf32, #tpu.memory_space<vmem>>, %arg5: memref<1x1x256x128xf32, #tpu.memory_space<vmem>>, %arg6: memref<18x16x128xf32, #tpu.memory_space<vmem>>) attributes {dimension_semantics = [#tpu.dimension_semantics<parallel>, #tpu.dimension_semantics<parallel>], iteration_bounds = array<i64: 2, 8>, scalar_prefetch = 0 : i64, scratch_operands = 1 : i64, tpu.core_type = #tpu.core_type<tc>, window_params = [{transform_indices = @transform_0, window_bounds = array<i64: 1, 1, 18, 18, 32>}, {pipeline_mode = #tpu.pipeline_mode<synchronous>, transform_indices = @transform_1, window_bounds = array<i64: 3, 128, 128>}, {pipeline_mode = #tpu.pipeline_mode<synchronous>, transform_indices = @transform_2, window_bounds = array<i64: 1, 128>}, {transform_indices = @transform_3, window_bounds = array<i64: 1, 1, 256, 128>}]} {
    %cst = arith.constant 0.000000e+00 : f32
    %0 = vector.broadcast %cst : f32 to vector<18x16x32xf32>
    %c0 = arith.constant 0 : index
    %c0_0 = arith.constant 0 : index
    %c96 = arith.constant 96 : index
    %1 = vector.load %arg6[%c0, %c0_0, %c96] : memref<18x16x128xf32, #tpu.memory_space<vmem>>, vector<18x16x32xf32>
    tpu.vector_store %arg6[%c0, %c0_0, %c96], %0 {strides = array<i32>} : memref<18x16x128xf32, #tpu.memory_space<vmem>>, vector<18x16x32xf32>,
    %c0_1 = arith.constant 0 : index
    %c0_2 = arith.constant 0 : index
    %c0_3 = arith.constant 0 : index
    %c0_4 = arith.constant 0 : index
    %c0_5 = arith.constant 0 : index
    %2 = vector.load %arg2[%c0_1, %c0_2, %c0_3, %c0_4, %c0_5] : memref<1x1x18x18x32xf32, #tpu.memory_space<vmem>>, vector<1x1x18x18x32xf32>
    %3 = vector.shape_cast %2 : vector<1x1x18x18x32xf32> to vector<18x18x32xf32>
    %4 = vector.extract_strided_slice %3 {offsets = [0, 0, 0], sizes = [18, 16, 32], strides = [1, 1, 1]} : vector<18x18x32xf32> to vector<18x16x32xf32>
    %c0_6 = arith.constant 0 : index
    %c0_7 = arith.constant 0 : index
    %c0_8 = arith.constant 0 : index
    %5 = vector.load %arg6[%c0_6, %c0_7, %c0_8] : memref<18x16x128xf32, #tpu.memory_space<vmem>>, vector<18x16x32xf32>
    tpu.vector_store %arg6[%c0_6, %c0_7, %c0_8], %4 {strides = array<i32>} : memref<18x16x128xf32, #tpu.memory_space<vmem>>, vector<18x16x32xf32>,
    %6 = vector.extract_strided_slice %3 {offsets = [0, 1, 0], sizes = [18, 16, 32], strides = [1, 1, 1]} : vector<18x18x32xf32> to vector<18x16x32xf32>
    %c0_9 = arith.constant 0 : index
    %c0_10 = arith.constant 0 : index
    %c32 = arith.constant 32 : index
    %7 = vector.load %arg6[%c0_9, %c0_10, %c32] : memref<18x16x128xf32, #tpu.memory_space<vmem>>, vector<18x16x32xf32>
    tpu.vector_store %arg6[%c0_9, %c0_10, %c32], %6 {strides = array<i32>} : memref<18x16x128xf32, #tpu.memory_space<vmem>>, vector<18x16x32xf32>,
    %8 = vector.extract_strided_slice %3 {offsets = [0, 2, 0], sizes = [18, 16, 32], strides = [1, 1, 1]} : vector<18x18x32xf32> to vector<18x16x32xf32>
    %c0_11 = arith.constant 0 : index
    %c0_12 = arith.constant 0 : index
    %c64 = arith.constant 64 : index
    %9 = vector.load %arg6[%c0_11, %c0_12, %c64] : memref<18x16x128xf32, #tpu.memory_space<vmem>>, vector<18x16x32xf32>
    tpu.vector_store %arg6[%c0_11, %c0_12, %c64], %8 {strides = array<i32>} : memref<18x16x128xf32, #tpu.memory_space<vmem>>, vector<18x16x32xf32>,
    %c0_13 = arith.constant 0 : index
    %c0_14 = arith.constant 0 : index
    %10 = vector.load %arg4[%c0_13, %c0_14] : memref<1x128xf32, #tpu.memory_space<vmem>>, vector<1x128xf32>
    %cst_15 = arith.constant 0.000000e+00 : f32
    %11 = vector.broadcast %cst_15 : f32 to vector<256x128xf32>
    %12 = vector.broadcast %10 : vector<1x128xf32> to vector<256x128xf32>
    %13 = arith.addf %11, %12 : vector<256x128xf32>
    %c0_16 = arith.constant 0 : index
    %c0_17 = arith.constant 0 : index
    %c0_18 = arith.constant 0 : index
    %14 = vector.load %arg6[%c0_16, %c0_17, %c0_18] : memref<18x16x128xf32, #tpu.memory_space<vmem>>, vector<16x16x128xf32>
    %15 = vector.shape_cast %14 : vector<16x16x128xf32> to vector<256x128xf32>
    %c0_19 = arith.constant 0 : index
    %c0_20 = arith.constant 0 : index
    %c0_21 = arith.constant 0 : index
    %16 = vector.load %arg3[%c0_19, %c0_20, %c0_21] : memref<3x128x128xf32, #tpu.memory_space<vmem>>, vector<1x128x128xf32>
    %17 = vector.shape_cast %16 : vector<1x128x128xf32> to vector<128x128xf32>
    %cst_22 = arith.constant dense<0.000000e+00> : vector<256x128xf32>
    %18 = tpu.matmul %15, %17, %cst_22 {dimension_numbers = #tpu.dot_dimension_numbers<[1], [0], [0], [1], [0, 0, 1, 1], [], []>} : vector<256x128xf32>, vector<128x128xf32>, vector<256x128xf32> -> vector<256x128xf32>
    %19 = arith.addf %13, %18 : vector<256x128xf32>
    %c1 = arith.constant 1 : index
    %c0_23 = arith.constant 0 : index
    %c0_24 = arith.constant 0 : index
    %20 = vector.load %arg6[%c1, %c0_23, %c0_24] : memref<18x16x128xf32, #tpu.memory_space<vmem>>, vector<16x16x128xf32>
    %21 = vector.shape_cast %20 : vector<16x16x128xf32> to vector<256x128xf32>
    %c1_25 = arith.constant 1 : index
    %c0_26 = arith.constant 0 : index
    %c0_27 = arith.constant 0 : index
    %22 = vector.load %arg3[%c1_25, %c0_26, %c0_27] : memref<3x128x128xf32, #tpu.memory_space<vmem>>, vector<1x128x128xf32>
    %23 = vector.shape_cast %22 : vector<1x128x128xf32> to vector<128x128xf32>
    %cst_28 = arith.constant dense<0.000000e+00> : vector<256x128xf32>
    %24 = tpu.matmul %21, %23, %cst_28 {dimension_numbers = #tpu.dot_dimension_numbers<[1], [0], [0], [1], [0, 0, 1, 1], [], []>} : vector<256x128xf32>, vector<128x128xf32>, vector<256x128xf32> -> vector<256x128xf32>
    %25 = arith.addf %19, %24 : vector<256x128xf32>
    %c2 = arith.constant 2 : index
    %c0_29 = arith.constant 0 : index
    %c0_30 = arith.constant 0 : index
    %26 = vector.load %arg6[%c2, %c0_29, %c0_30] : memref<18x16x128xf32, #tpu.memory_space<vmem>>, vector<16x16x128xf32>
    %27 = vector.shape_cast %26 : vector<16x16x128xf32> to vector<256x128xf32>
    %c2_31 = arith.constant 2 : index
    %c0_32 = arith.constant 0 : index
    %c0_33 = arith.constant 0 : index
    %28 = vector.load %arg3[%c2_31, %c0_32, %c0_33] : memref<3x128x128xf32, #tpu.memory_space<vmem>>, vector<1x128x128xf32>
    %29 = vector.shape_cast %28 : vector<1x128x128xf32> to vector<128x128xf32>
    %cst_34 = arith.constant dense<0.000000e+00> : vector<256x128xf32>
    %30 = tpu.matmul %27, %29, %cst_34 {dimension_numbers = #tpu.dot_dimension_numbers<[1], [0], [0], [1], [0, 0, 1, 1], [], []>} : vector<256x128xf32>, vector<128x128xf32>, vector<256x128xf32> -> vector<256x128xf32>
    %31 = arith.addf %25, %30 : vector<256x128xf32>
    %c0_35 = arith.constant 0 : index
    %c0_36 = arith.constant 0 : index
    %c0_37 = arith.constant 0 : index
    %c0_38 = arith.constant 0 : index
    %32 = vector.load %arg5[%c0_35, %c0_36, %c0_37, %c0_38] : memref<1x1x256x128xf32, #tpu.memory_space<vmem>>, vector<1x1x256x128xf32>
    %33 = vector.shape_cast %32 : vector<1x1x256x128xf32> to vector<256x128xf32>
    %34 = vector.shape_cast %31 : vector<256x128xf32> to vector<1x1x256x128xf32>
    tpu.vector_store %arg5[%c0_35, %c0_36, %c0_37, %c0_38], %34 {strides = array<i32>} : memref<1x1x256x128xf32, #tpu.memory_space<vmem>>, vector<1x1x256x128xf32>,
    return
  }
  func.func @transform_0(%arg0: i32, %arg1: i32) -> (i32, i32, i32, i32, i32) {
    %c0_i32 = arith.constant 0 : i32
    %c0_i32_0 = arith.constant 0 : i32
    %c0_i32_1 = arith.constant 0 : i32
    %c0_i32_2 = arith.constant 0 : i32
    return %arg0, %arg1, %c0_i32, %c0_i32_0, %c0_i32_1 : i32, i32, i32, i32, i32
  }
  func.func @transform_1(%arg0: i32, %arg1: i32) -> (i32, i32, i32) {
    %c0_i32 = arith.constant 0 : i32
    %c0_i32_0 = arith.constant 0 : i32
    %c0_i32_1 = arith.constant 0 : i32
    %c0_i32_2 = arith.constant 0 : i32
    return %c0_i32, %c0_i32_0, %c0_i32_1 : i32, i32, i32
  }
  func.func @transform_2(%arg0: i32, %arg1: i32) -> (i32, i32) {
    %c0_i32 = arith.constant 0 : i32
    %c0_i32_0 = arith.constant 0 : i32
    %c0_i32_1 = arith.constant 0 : i32
    return %c0_i32, %c0_i32_0 : i32, i32
  }
  func.func @transform_3(%arg0: i32, %arg1: i32) -> (i32, i32, i32, i32) {
    %c0_i32 = arith.constant 0 : i32
    %c0_i32_0 = arith.constant 0 : i32
    %c0_i32_1 = arith.constant 0 : i32
    return %arg0, %arg1, %c0_i32, %c0_i32_0 : i32, i32, i32, i32
  }
}

</mosaic_0001>

<bundles_post_ra>
// kernel: a_call__.4
= control target key start
LH: loop header
LB: loop body
LE: loop exit
PB: predicated region body
PF: predicated region fallthrough
CT: control target
= control target key end

     0   :  { %s1742_s12 = smov 0   ;;  %s1744_s13 = smov 0   ;;  %s2663_s0 = inlined_call_operand.vmem [shape: f32[2,8,18,18,4], index: 0, kind: input, shape index: {}]   ;;  %s2664_s1 = inlined_call_operand.vmem [shape: f32[3,128,128], index: 1, kind: input, shape index: {}]   ;;  %s2665_s2 = inlined_call_operand.vmem [shape: f32[1,128], index: 2, kind: input, shape index: {}]   ;;  %s2666_s3 = inlined_call_operand.vmem [shape: f32[2,8,256,128], index: 3, kind: output, shape index: {}]  }
   0x1   :  { %s1746_s14 = smov 0   ;;  %s1748_s15 = smov 0  }
   0x2   :  { %s1750_s16 = smov 0  }
   0x3 LB: > { %s22_s17 = sadd.s32 1, %s1709_s14  ;;  %s25_s18 = sadd.s32 1, %s1713_s15  ;;  %s1717_s16 = sphi %s1750_s16, %s13_s16   ;;  %s1713_s15 = sphi %s1748_s15, %s2670_s15   ;;  %s1709_s14 = sphi %s1746_s14, %s2669_s14   ;;  %s1705_s13 = sphi %s1744_s13, %s2668_s13   ;;  %s1701_s12 = sphi %s1742_s12, %s2667_s12  }
   0x4   : > { %p23_p0 = scmp.ge.s32.totalorder %s22_s17, 8  ;;  %p1546_p1 = scmp.ge.s32.totalorder %s1717_s16, 1 }
   0x5   : > { %p157_p2 = scmp.lt.s32.totalorder %s1717_s16, 17 }
   0x6   : > { %s2672_s17 = smov (%p23_p0, %s22_s17), 0  ;;  %s2674_s18 = smov (!%p23_p0, %s25_s18), %s1713_s15 }
   0x7   : > { %p158_p3 = pnand %p1546_p1, %p157_p2  ;;  %p27_p4 = scmp.ge.s32.totalorder %s2674_s18, 2 }
   0x8   : > { %p189_p5 = scmp.lt.s32.totalorder (!%p158_p3), %s1705_s13, 1  ;;  %p191_p6 = scmp.lt.s32.totalorder (!%p158_p3), %s1701_s12, 7 }
   0x9   : > { %s2676_s18 = smov (%p27_p4, %s2674_s18), 0  ;;  %161 = sbr.rel (%p158_p3) target bundleno = 586 (0x24a), region = 32 }
   0xa   : > { %s1720_s26 = smov (!%p158_p3), 4   ;;  %s1721_s27 = smov (!%p158_p3), 8  }
   0xe   : > { %vm207_vm0 = vcmask 1047648   ;;  %v1719_v0 = vmov 0.0   ;;  %s2678_s13 = smov (!%p189_p5, %s1705_s13), 1  ;;  %s2680_s12 = smov (!%p191_p6, %s1701_s12), 7  ;;  %vm298_vm1 = vcmask 31744   ;;  %v1922_v19 = vld [vmem:[%s2664_s1 + $0x178] sm:$0xff] }
   0xf   : > { %233 = vst.msk [vmem:[#allocation2 + $0xc8] sm:$0xff] %vm207_vm0, %v1719_v0  ;;  %s1634_s19 = smul.u32 432, %s2678_s13  ;;  %v1927_v20 = vld [vmem:[%s2664_s1 + $0x170] sm:$0xff]  ;;  %1270 = vmatpush.msra.mxu2 %v1922_v19  ;;  %v1942_v22 = vld [vmem:[%s2664_s1 + $0x168] sm:$0xff]  ;;  %v1947_v23 = vld [vmem:[%s2664_s1 + $0x160] sm:$0xff]  ;;  %vm551_vm2 = vcmask 64545  }
  0x10   : > { %208 = vst.msk [vmem:[#allocation2] sm:$0xff] %vm207_vm0, %v1719_v0  ;;  %s1633_s20 = smul.u32 54, %s2680_s12  ;;  %v879_v24 = vld [vmem:[%s2664_s1 + $0x78] sm:$0xff]  ;;  %v878_v25 = vld [vmem:[%s2664_s1 + $0x70] sm:$0xff]  ;;  %v877_v28 = vld [vmem:[%s2664_s1 + $0x68] sm:$0xff]  ;;  %vm770_vm3 = vcmask 97346  }
  0x11   : > { %209 = vst.msk [vmem:[#allocation2 + $0x8] sm:$0xff] %vm207_vm0, %v1719_v0  ;;  %1271 = vmatpush.msra.mxu2 %v1927_v20  ;;  %1585 = vmatpush.msra.mxu3 %v879_v24  ;;  %v1960_v26 = vld [vmem:[%s2664_s1 + $0x158] sm:$0xff]  ;;  %v1974_v29 = vld [vmem:[%s2664_s1 + $0x150] sm:$0xff]  ;;  %v1984_v31 = vld [vmem:[%s2664_s1 + $0x148] sm:$0xff]  ;;  %vm553_vm4 = vcmask 64544   ;;  %vm772_vm5 = vcmask 97344  }
  0x12   : > { %210 = vst.msk [vmem:[#allocation2 + $0x10] sm:$0xff] %vm207_vm0, %v1719_v0  ;;  %s195_s21 = sadd.s32 %s1634_s19, %s1633_s20  ;;  %880 = vmatpush.msra.mxu0 %v879_v24  ;;  %v876_v32 = vld [vmem:[%s2664_s1 + $0x60] sm:$0xff]  ;;  %v875_v34 = vld [vmem:[%s2664_s1 + $0x58] sm:$0xff]  ;;  %v874_v37 = vld [vmem:[%s2664_s1 + $0x50] sm:$0xff]  ;;  %vm555_vm6 = vcmask 57376   ;;  %vm774_vm7 = vcmask 91200  }
  0x13   : > { %211 = vst.msk [vmem:[#allocation2 + $0x18] sm:$0xff] %vm207_vm0, %v1719_v0  ;;  %s1547_s22 = sshll.u32 %s195_s21, 3  ;;  %1272 = vmatpush.msra.mxu2 %v1942_v22  ;;  %1586 = vmatpush.msra.mxu3 %v878_v25  ;;  %v1994_v33 = vld [vmem:[%s2664_s1 + $0x140] sm:$0xff]  ;;  %v2004_v36 = vld [vmem:[%s2664_s1 + $0x138] sm:$0xff]  ;;  %v2013_v38 = vld [vmem:[%s2664_s1 + $0x130] sm:$0xff]  ;;  %s1548_s19 = sshll.u32 %s2680_s12, 5 }
  0x14   : > { %212 = vst.msk [vmem:[#allocation2 + $0x20] sm:$0xff] %vm207_vm0, %v1719_v0  ;;  %s1797_s25 = scalar_lea.vmem %s2663_s0, %s1547_s22  ;;  %881 = vmatpush.msra.mxu0 %v878_v25  ;;  %v873_v39 = vld [vmem:[%s2664_s1 + $0x48] sm:$0xff]  ;;  %v872_v41 = vld [vmem:[%s2664_s1 + $0x40] sm:$0xff]  ;;  %v871_v44 = vld [vmem:[%s2664_s1 + $0x38] sm:$0xff]  ;;  %s1549_s20 = sshll.u32 %s2678_s13, 8 }
  0x15   : > { %213 = vst.msk [vmem:[#allocation2 + $0x28] sm:$0xff] %vm207_vm0, %v1719_v0  ;;  %v280_v1 = vld [vmem:[%s1797_s25 + $0x120] sm:$0xff]  ;;  %v250_v2 = vld [vmem:[%s1797_s25 + $0x30] sm:$0xff]  ;;  %v281_v3 = vld [vmem:[%s1797_s25 + $0x128] sm:$0xff]  ;;  %1273 = vmatpush.msra.mxu2 %v1947_v23  ;;  %1587 = vmatpush.msra.mxu3 %v877_v28  ;;  %s204_s21 = sadd.s32 %s1549_s20, %s1548_s19 }
  0x16   : > { %214 = vst.msk [vmem:[#allocation2 + $0x30] sm:$0xff] %vm207_vm0, %v1719_v0  ;;  %461 = vrot.lane.b32.xlu1 %v280_v1, %s1720_s26  ;;  %401 = vrot.lane.b32.xlu0 %v250_v2, %s1720_s26  ;;  %v251_v4 = vld [vmem:[%s1797_s25 + $0x38] sm:$0xff]  ;;  %v244_v5 = vld [vmem:[%s1797_s25] sm:$0xff]  ;;  %s1550_s12 = sshll.u32 %s204_s21, 3 }
  0x17   : > { %215 = vst.msk [vmem:[#allocation2 + $0x38] sm:$0xff] %vm207_vm0, %v1719_v0  ;;  %620 = vrot.lane.b32.xlu2 %v250_v2, %s1721_s27  ;;  %v245_v6 = vld [vmem:[%s1797_s25 + $0x8] sm:$0xff]  ;;  %v247_v7 = vld [vmem:[%s1797_s25 + $0x18] sm:$0xff]  ;;  %v248_v8 = vld [vmem:[%s1797_s25 + $0x20] sm:$0xff]  ;;  %1274 = vmatpush.msra.mxu2 %v1960_v26 }
  0x18   : > { %216 = vst.msk [vmem:[#allocation2 + $0x40] sm:$0xff] %vm207_vm0, %v1719_v0  ;;  %v253_v9 = vld [vmem:[%s1797_s25 + $0x48] sm:$0xff]  ;;  %v254_v10 = vld [vmem:[%s1797_s25 + $0x50] sm:$0xff]  ;;  %v284_v11 = vld [vmem:[%s1797_s25 + $0x140] sm:$0xff]  ;;  %882 = vmatpush.msra.mxu0 %v877_v28  ;;  %1588 = vmatpush.msra.mxu3 %v876_v32 }
  0x19   : > { %324 = vst.msk [vmem:[#allocation2 + $0xc8] sm:$0xff] %vm298_vm1, %v281_v3  ;;  %v252_v12 = vld [vmem:[%s1797_s25 + $0x40] sm:$0x3]  ;;  %v282_v13 = vld [vmem:[%s1797_s25 + $0x130] sm:$0x3]  ;;  %v283_v14 = vld [vmem:[%s1797_s25 + $0x138] sm:$0xff]  ;;  %1275 = vmatpush.msra.mxu2 %v1974_v29 }
  0x1a   : > { %217 = vst.msk [vmem:[#allocation2 + $0x48] sm:$0xff] %vm207_vm0, %v1719_v0  ;;  %v246_v15 = vld [vmem:[%s1797_s25 + $0x10] sm:$0x3]  ;;  %v249_v16 = vld [vmem:[%s1797_s25 + $0x28] sm:$0x3]  ;;  %v1907_v17 = vld [vmem:[%s1797_s25 + $0x60] sm:$0xff]  ;;  %883 = vmatpush.msra.mxu0 %v876_v32  ;;  %1589 = vmatpush.msra.mxu3 %v875_v34 }
  0x1b   : > { %218 = vst.msk [vmem:[#allocation2 + $0x50] sm:$0xff] %vm207_vm0, %v1719_v0  ;;  %v1913_v18 = vld [vmem:[%s1797_s25 + $0x68] sm:$0xff]  ;;  %v1932_v21 = vld [vmem:[%s1797_s25 + $0x158] sm:$0xff]  ;;  %v1963_v27 = vld [vmem:[%s1797_s25 + $0x150] sm:$0xff]  ;;  %1276 = vmatpush.msra.mxu2 %v1984_v31 }
  0x1c   : > { %219 = vst.msk [vmem:[#allocation2 + $0x58] sm:$0xff] %vm207_vm0, %v1719_v0  ;;  %v255_v30 = vld [vmem:[%s1797_s25 + $0x58] sm:$0x3]  ;;  %v285_v35 = vld [vmem:[%s1797_s25 + $0x148] sm:$0x3]  ;;  %884 = vmatpush.msra.mxu0 %v875_v34  ;;  %1590 = vmatpush.msra.mxu3 %v874_v37  ;;  %v2036_v43 = vld [vmem:[%s2664_s1 + $0x120] sm:$0xff] }
  0x1d   : > { %220 = vst.msk [vmem:[#allocation2 + $0x60] sm:$0xff] %vm207_vm0, %v1719_v0  ;;  %1277 = vmatpush.msra.mxu2 %v1994_v33  ;;  %v2023_v40 = vld [vmem:[%s2664_s1 + $0x128] sm:$0xff]  ;;  %v2045_v45 = vld [vmem:[%s2664_s1 + $0x118] sm:$0xff]  ;;  %v870_v46 = vld [vmem:[%s2664_s1 + $0x30] sm:$0xff] }
  0x1e   : > { %221 = vst.msk [vmem:[#allocation2 + $0x68] sm:$0xff] %vm207_vm0, %v1719_v0  ;;  %463 = vrot.lane.b32.xlu1 %v281_v3, %s1720_s26  ;;  %403 = vrot.lane.b32.xlu0 %v251_v4, %s1720_s26  ;;  %v2051_v47 = vld [vmem:[%s1797_s25 + $0x78] sm:$0xff]  ;;  %v2057_v48 = vld [vmem:[%s2664_s1 + $0x110] sm:$0xff] }
  0x1f   : > { %222 = vst.msk [vmem:[#allocation2 + $0x70] sm:$0xff] %vm207_vm0, %v1719_v0  ;;  %622 = vrot.lane.b32.xlu2 %v251_v4, %s1721_s27  ;;  %1278 = vmatpush.msra.mxu2 %v2004_v36  ;;  %v869_v49 = vld [vmem:[%s2664_s1 + $0x28] sm:$0xff]  ;;  %v2069_v50 = vld [vmem:[%s1797_s25 + $0x80] sm:$0xff]  ;;  %v867_v55 = vld [vmem:[%s2664_s1 + $0x18] sm:$0xff] }
  0x20   : > { %223 = vst.msk [vmem:[#allocation2 + $0x78] sm:$0xff] %vm207_vm0, %v1719_v0  ;;  %885 = vmatpush.msra.mxu0 %v874_v37  ;;  %1591 = vmatpush.msra.mxu3 %v873_v39  ;;  %v2078_v51 = vld [vmem:[%s2664_s1 + $0x108] sm:$0xff]  ;;  %v868_v52 = vld [vmem:[%s2664_s1 + $0x20] sm:$0xff]  ;;  %v1566_v56 = vld [vmem:[%s2664_s1 + $0xf8] sm:$0xff] }
  0x21   : > { %224 = vst.msk [vmem:[#allocation2 + $0x80] sm:$0xff] %vm207_vm0, %v1719_v0  ;;  %1279 = vmatpush.msra.mxu2 %v2013_v38  ;;  %v2089_v54 = vld [vmem:[%s2664_s1 + $0x100] sm:$0xff]  ;;  %1075 = vmatpush.msra.mxu1 %v1566_v56  ;;  %v1565_v57 = vld [vmem:[%s2664_s1 + $0xf0] sm:$0xff]  ;;  %v1564_v60 = vld [vmem:[%s2664_s1 + $0xe8] sm:$0xff] }
  0x22   : > { %225 = vst.msk [vmem:[#allocation2 + $0x88] sm:$0xff] %vm207_vm0, %v1719_v0  ;;  %886 = vmatpush.msra.mxu0 %v873_v39  ;;  %1592 = vmatpush.msra.mxu3 %v872_v41  ;;  %v866_v58 = vld [vmem:[%s2664_s1 + $0x10] sm:$0xff]  ;;  %v865_v61 = vld [vmem:[%s2664_s1 + $0x8] sm:$0xff]  ;;  %v1563_v62 = vld [vmem:[%s2664_s1 + $0xe0] sm:$0xff] }
  0x23   : > { %226 = vst.msk [vmem:[#allocation2 + $0x90] sm:$0xff] %vm207_vm0, %v1719_v0  ;;  %1280 = vmatpush.msra.mxu2 %v2023_v40  ;;  %v2106_v59 = vld [vmem:[%s1797_s25 + $0x170] sm:$0xff]  ;;  %1076 = vmatpush.msra.mxu1 %v1565_v57  ;;  %v864_v63 = vld [vmem:[%s2664_s1] sm:$0xff]  ;;  %v1552_v25 = vld [vmem:[%s2664_s1 + $0x88] sm:$0xff] }
  0x24   : > { %227 = vst.msk [vmem:[#allocation2 + $0x98] sm:$0xff] %vm207_vm0, %v1719_v0  ;;  %887 = vmatpush.msra.mxu0 %v872_v41  ;;  %1593 = vmatpush.msra.mxu3 %v871_v44  ;;  %v1553_v24 = vld [vmem:[%s2664_s1 + $0x90] sm:$0xff]  ;;  %v1551_v32 = vld [vmem:[%s2664_s1 + $0x80] sm:$0xff] }
  0x25   : > { %228 = vst.msk [vmem:[#allocation2 + $0xa0] sm:$0xff] %vm207_vm0, %v1719_v0  ;;  %1281 = vmatpush.msra.mxu2 %v2036_v43  ;;  %1077 = vmatpush.msra.mxu1 %v1564_v60 }
  0x26   : > { %229 = vst.msk [vmem:[#allocation2 + $0xa8] sm:$0xff] %vm207_vm0, %v1719_v0  ;;  %682 = vrot.lane.b32.xlu1 %v281_v3, %s1721_s27  ;;  %680 = vrot.lane.b32.xlu0 %v280_v1, %s1721_s27  ;;  %v1561_v3 = vld [vmem:[%s2664_s1 + $0xd0] sm:$0xff] }
  0x27   : > { %230 = vst.msk [vmem:[#allocation2 + $0xb0] sm:$0xff] %vm207_vm0, %v1719_v0  ;;  %389 = vrot.lane.b32.xlu2 %v244_v5, %s1720_s26  ;;  %888 = vmatpush.msra.mxu0 %v871_v44  ;;  %v2226_v44 = vld [vmem:[%s1797_s25 + $0xa8] sm:$0xff] }
  0x28   : > { %231 = vst.msk [vmem:[#allocation2 + $0xb8] sm:$0xff] %vm207_vm0, %v1719_v0  ;;  %1282 = vmatpush.msra.mxu2 %v2045_v45  ;;  %1594 = vmatpush.msra.mxu3 %v870_v46 }
  0x29   : > { %232 = vst.msk [vmem:[#allocation2 + $0xc0] sm:$0xff] %vm207_vm0, %v1719_v0  ;;  %889 = vmatpush.msra.mxu0 %v870_v46  ;;  %1078 = vmatpush.msra.mxu1 %v1563_v62  ;;  %v261_v46 = vld [vmem:[%s1797_s25 + $0x88] sm:$0x3] }
  0x2a   : > { %234 = vst.msk [vmem:[#allocation2 + $0xd0] sm:$0xff] %vm207_vm0, %v1719_v0  ;;  %1283 = vmatpush.msra.mxu2 %v2057_v48  ;;  %1595 = vmatpush.msra.mxu3 %v869_v49 }
  0x2b   : > { %235 = vst.msk [vmem:[#allocation2 + $0xd8] sm:$0xff] %vm207_vm0, %v1719_v0  ;;  %890 = vmatpush.msra.mxu0 %v869_v49 }
  0x2c   : > { %236 = vst.msk [vmem:[#allocation2 + $0xe0] sm:$0xff] %vm207_vm0, %v1719_v0  ;;  %1284 = vmatpush.msra.mxu2 %v2078_v51  ;;  %1596 = vmatpush.msra.mxu3 %v868_v52 }
  0x2d   : > { %237 = vst.msk [vmem:[#allocation2 + $0xe8] sm:$0xff] %vm207_vm0, %v1719_v0  ;;  %891 = vmatpush.msra.mxu0 %v868_v52 }
  0x2e   : > { %238 = vst.msk [vmem:[#allocation2 + $0xf0] sm:$0xff] %vm207_vm0, %v1719_v0  ;;  %391 = vrot.lane.b32.xlu0 %v245_v6, %s1720_s26  ;;  %608 = vrot.lane.b32.xlu1 %v244_v5, %s1721_s27 }
  0x2f   : > { %239 = vst.msk [vmem:[#allocation2 + $0xf8] sm:$0xff] %vm207_vm0, %v1719_v0  ;;  %610 = vrot.lane.b32.xlu2 %v245_v6, %s1721_s27  ;;  %1285 = vmatpush.msra.mxu2 %v2089_v54 }
  0x30   : > { %240 = vst.msk [vmem:[#allocation2 + $0x100] sm:$0xff] %vm207_vm0, %v1719_v0  ;;  %1597 = vmatpush.msra.mxu3 %v867_v55  ;;  %892 = vmatpush.msra.mxu0 %v867_v55  ;;  %v291_v55 = vld [vmem:[%s1797_s25 + $0x178] sm:$0x3] }
  0x31   : > { %241 = vst.msk [vmem:[#allocation2 + $0x108] sm:$0xff] %vm207_vm0, %v1719_v0 }
  0x32   : > { %242 = vst.msk [vmem:[#allocation2 + $0x110] sm:$0xff] %vm207_vm0, %v1719_v0  ;;  %1598 = vmatpush.msra.mxu3 %v866_v58  ;;  %893 = vmatpush.msra.mxu0 %v866_v58 }
  0x33   : > { %243 = vst.msk [vmem:[#allocation2 + $0x118] sm:$0xff] %vm207_vm0, %v1719_v0 }
  0x34   : > { %304 = vst.msk [vmem:[#allocation2 + $0x28] sm:$0xff] %vm298_vm1, %v251_v4  ;;  %1599 = vmatpush.msra.mxu3 %v865_v61  ;;  %894 = vmatpush.msra.mxu0 %v865_v61  ;;  %v258_v4 = vld [vmem:[%s1797_s25 + $0x70] sm:$0x3] }
  0x35   : > { %303 = vst.msk [vmem:[#allocation2 + $0x20] sm:$0xff] %vm298_vm1, %v250_v2  ;;  %v2133_v2 = vld [vmem:[%s1797_s25 + $0x168] sm:$0xff] }
  0x36   : > { %323 = vst.msk [vmem:[#allocation2 + $0xc0] sm:$0xff] %vm298_vm1, %v280_v1  ;;  %395 = vrot.lane.b32.xlu0 %v247_v7, %s1720_s26  ;;  %397 = vrot.lane.b32.xlu1 %v248_v8, %s1720_s26  ;;  %v1562_v1 = vld [vmem:[%s2664_s1 + $0xd8] sm:$0xff] }
  0x37   : > { %300 = vst.msk [vmem:[#allocation2 + $0x8] sm:$0xff] %vm298_vm1, %v245_v6  ;;  %614 = vrot.lane.b32.xlu2 %v247_v7, %s1721_s27  ;;  %1600 = vmatpush.msra.mxu3 %v864_v63 }
  0x38   : > { %299 = vst.msk [vmem:[#allocation2] sm:$0xff] %vm298_vm1, %v244_v5  ;;  %1079 = vmatpush.msra.mxu1 %v1562_v1  ;;  %v1560_v5 = vld [vmem:[%s2664_s1 + $0xc8] sm:$0xff]  ;;  %895 = vmatpush.msra.mxu0 %v864_v63 }
  0x39   : > { %301 = vst.msk [vmem:[#allocation2 + $0x10] sm:$0xff] %vm298_vm1, %v247_v7  ;;  %1601 = vmatpush.msrb.mxu3 %v1566_v56 }
  0x3a   : > { %302 = vst.msk [vmem:[#allocation2 + $0x18] sm:$0xff] %vm298_vm1, %v248_v8  ;;  %1080 = vmatpush.msra.mxu1 %v1561_v3 }
  0x3b   : > { %305 = vst.msk [vmem:[#allocation2 + $0x30] sm:$0xff] %vm298_vm1, %v253_v9  ;;  %1602 = vmatpush.msrb.mxu3 %v1565_v57 }
  0x3c   : > { %306 = vst.msk [vmem:[#allocation2 + $0x38] sm:$0xff] %vm298_vm1, %v254_v10  ;;  %1081 = vmatpush.msra.mxu1 %v1560_v5 }
  0x3d   : > { %326 = vst.msk [vmem:[#allocation2 + $0xd8] sm:$0xff] %vm298_vm1, %v284_v11  ;;  %1603 = vmatpush.msrb.mxu3 %v1564_v60 }
  0x3e   : > { %616 = vrot.lane.b32.xlu0 %v248_v8, %s1721_s27  ;;  %405 = vrot.lane.b32.xlu1 %v252_v12, %s1720_s26  ;;  %325 = vst.msk [vmem:[#allocation2 + $0xd0] sm:$0xff] %vm298_vm1, %v283_v14  ;;  %v1559_v8 = vld [vmem:[%s2664_s1 + $0xc0] sm:$0xff] }
  0x3f   : > { %465 = vrot.lane.b32.xlu2 %v282_v13, %s1720_s26  ;;  %307 = vst.msk [vmem:[#allocation2 + $0x40] sm:$0xff] %vm298_vm1, %v1907_v17  ;;  %1082 = vmatpush.msra.mxu1 %v1559_v8 }
  0x40   : > { %308 = vst.msk [vmem:[#allocation2 + $0x48] sm:$0xff] %vm298_vm1, %v1913_v18  ;;  %1604 = vmatpush.msrb.mxu3 %v1563_v62 }
  0x41   : > { %328 = vst.msk [vmem:[#allocation2 + $0xe8] sm:$0xff] %vm298_vm1, %v1932_v21 }
  0x42   : > { %327 = vst.msk [vmem:[#allocation2 + $0xe0] sm:$0xff] %vm298_vm1, %v1963_v27  ;;  %1605 = vmatpush.msrb.mxu3 %v1562_v1  ;;  %v2319_v1 = vld [vmem:[%s1797_s25 + $0x188] sm:$0xff] }
  0x43   : > { %309 = vst.msk [vmem:[#allocation2 + $0x50] sm:$0xff] %vm298_vm1, %v2051_v47 }
  0x44   : > { %310 = vst.msk [vmem:[#allocation2 + $0x58] sm:$0xff] %vm298_vm1, %v2069_v50  ;;  %1606 = vmatpush.msrb.mxu3 %v1561_v3  ;;  %v292_v3 = vld [vmem:[%s1797_s25 + $0x180] sm:$0xff] }
  0x45   : > { %330 = vst.msk [vmem:[#allocation2 + $0xf8] sm:$0xff] %vm298_vm1, %v2106_v59 }
  0x46   : > { %624 = vrot.lane.b32.xlu0 %v252_v12, %s1721_s27  ;;  %684 = vrot.lane.b32.xlu1 %v282_v13, %s1721_s27  ;;  %329 = vst.msk [vmem:[#allocation2 + $0xf0] sm:$0xff] %vm298_vm1, %v2133_v2  ;;  %v1557_v12 = vld [vmem:[%s2664_s1 + $0xb0] sm:$0xff]  ;;  %v1556_v13 = vld [vmem:[%s2664_s1 + $0xa8] sm:$0xff] }
  0x47   : > { %393 = vrot.lane.b32.xlu2 %v246_v15, %s1720_s26  ;;  %1607 = vmatpush.msrb.mxu3 %v1560_v5  ;;  %313 = vst.msk [vmem:[#allocation2 + $0x70] sm:$0xff] %vm298_vm1, %v2226_v44 }
  0x48   : > { %332 = vst.msk [vmem:[#allocation2 + $0x108] sm:$0xff] %vm298_vm1, %v2319_v1 }
  0x49   : > { %1608 = vmatpush.msrb.mxu3 %v1559_v8  ;;  %331 = vst.msk [vmem:[#allocation2 + $0x100] sm:$0xff] %vm298_vm1, %v292_v3  ;;  %v270_v8 = vld [vmem:[%s1797_s25 + $0xd0] sm:$0x3] }
  0x4e   : > { %612 = vrot.lane.b32.xlu0 %v246_v15, %s1721_s27  ;;  %399 = vrot.lane.b32.xlu1 %v249_v16, %s1720_s26 }
  0x4f   : > { %618 = vrot.lane.b32.xlu2 %v249_v16, %s1721_s27  ;;  %v1555_v16 = vld [vmem:[%s2664_s1 + $0xa0] sm:$0xff] }
  0x56   : > { %407 = vrot.lane.b32.xlu0 %v253_v9, %s1720_s26  ;;  %409 = vrot.lane.b32.xlu1 %v254_v10, %s1720_s26 }
  0x57   : > { %467 = vrot.lane.b32.xlu2 %v283_v14, %s1720_s26 }
  0x5e   : > { %469 = vrot.lane.b32.xlu0 %v284_v11, %s1720_s26  ;;  %626 = vrot.lane.b32.xlu1 %v253_v9, %s1721_s27 }
  0x5f   : > { %628 = vrot.lane.b32.xlu2 %v254_v10, %s1721_s27  ;;  %v1558_v10 = vld [vmem:[%s2664_s1 + $0xb8] sm:$0xff] }
  0x60   : > { %1083 = vmatpush.msra.mxu1 %v1558_v10  ;;  %1609 = vmatpush.msrb.mxu3 %v1558_v10 }
  0x62   : > { %1084 = vmatpush.msra.mxu1 %v1557_v12  ;;  %1610 = vmatpush.msrb.mxu3 %v1557_v12 }
  0x64   : > { %1085 = vmatpush.msra.mxu1 %v1556_v13  ;;  %1611 = vmatpush.msrb.mxu3 %v1556_v13  ;;  %v274_v13 = vld [vmem:[%s1797_s25 + $0xf0] sm:$0xff] }
  0x65   : > { %319 = vst.msk [vmem:[#allocation2 + $0xa0] sm:$0xff] %vm298_vm1, %v274_v13 }
  0x66   : > { %686 = vrot.lane.b32.xlu0 %v283_v14, %s1721_s27  ;;  %688 = vrot.lane.b32.xlu1 %v284_v11, %s1721_s27  ;;  %v288_v11 = vld [vmem:[%s1797_s25 + $0x160] sm:$0x3] }
  0x67   : > { %411 = vrot.lane.b32.xlu2 %v255_v30, %s1720_s26  ;;  %1086 = vmatpush.msra.mxu1 %v1555_v16 }
  0x68   : > { %1612 = vmatpush.msrb.mxu3 %v1555_v16 }
  0x6e   : > { %471 = vrot.lane.b32.xlu0 %v285_v35, %s1720_s26  ;;  %630 = vrot.lane.b32.xlu1 %v255_v30, %s1721_s27 }
  0x6f   : > { %690 = vrot.lane.b32.xlu2 %v285_v35, %s1721_s27 }
  0x71   : > { %v2030_v42 = vpop.permute.xlu2 %620 }
  0x76   : > { %413 = vrot.lane.b32.xlu0 %v1907_v17, %s1720_s26  ;;  %415 = vrot.lane.b32.xlu1 %v1913_v18, %s1720_s26 }
  0x77   : > { %473 = vrot.lane.b32.xlu2 %v1963_v27, %s1720_s26 }
  0x79   : > { %v2084_v53 = vpop.permute.xlu2 %622 }
  0x7e   : > { %475 = vrot.lane.b32.xlu0 %v1932_v21, %s1720_s26  ;;  %632 = vrot.lane.b32.xlu1 %v1907_v17, %s1721_s27 }
  0x7f   : > { %634 = vrot.lane.b32.xlu2 %v1913_v18, %s1721_s27  ;;  %v1554_v18 = vld [vmem:[%s2664_s1 + $0x98] sm:$0xff] }
  0x80   : > { %1087 = vmatpush.msra.mxu1 %v1554_v18  ;;  %1613 = vmatpush.msrb.mxu3 %v1554_v18 }
  0x81   : > { %v390_v0 = vpop.permute.xlu2 %389 }
  0x82   : > { %552 = vst.msk [vmem:[#allocation2 - $0x1] sm:$0xfe] %vm551_vm2, %v390_v0  ;;  %1088 = vmatpush.msra.mxu1 %v1553_v24  ;;  %1614 = vmatpush.msrb.mxu3 %v1553_v24  ;;  %v267_v0 = vld [vmem:[%s1797_s25 + $0xb8] sm:$0x3] }
  0x84   : > { %1089 = vmatpush.msra.mxu1 %v1552_v25  ;;  %1615 = vmatpush.msrb.mxu3 %v1552_v25 }
  0x86   : > { %692 = vrot.lane.b32.xlu0 %v1963_v27, %s1721_s27  ;;  %694 = vrot.lane.b32.xlu1 %v1932_v21, %s1721_s27  ;;  %v2184_v21 = vld [vmem:[%s1797_s25 + $0x90] sm:$0xff]  ;;  %v2199_v27 = vld [vmem:[%s1797_s25 + $0x98] sm:$0xff] }
  0x87   : > { %417 = vrot.lane.b32.xlu2 %v258_v4, %s1720_s26  ;;  %311 = vst.msk [vmem:[#allocation2 + $0x60] sm:$0xff] %vm298_vm1, %v2184_v21  ;;  %1090 = vmatpush.msra.mxu1 %v1551_v32 }
  0x88   : > { %v462_v6 = vpop.permute.xlu1 %461  ;;  %v402_v7 = vpop.permute.xlu0 %401  ;;  %312 = vst.msk [vmem:[#allocation2 + $0x68] sm:$0xff] %vm298_vm1, %v2199_v27  ;;  %1616 = vmatpush.msrb.mxu3 %v1551_v32  ;;  %v2390_v32 = vld [vmem:[%s1797_s25 + $0x110] sm:$0xff] }
  0x89   : > { %590 = vst.msk [vmem:[#allocation2 + $0xbf] sm:$0xfe] %vm551_vm2, %v462_v6  ;;  %v2153_v9 = vpop.permute.xlu2 %610 }
  0x8a   : > { %560 = vst.msk [vmem:[#allocation2 + $0x1f] sm:$0xfe] %vm551_vm2, %v402_v7 }
  0x8b   : > { %779 = vst.msk [vmem:[#allocation2 + $0x1e] sm:$0xfc] %vm770_vm3, %v2030_v42 }
  0x8c   : > { %322 = vst.msk [vmem:[#allocation2 + $0xb8] sm:$0xff] %vm298_vm1, %v2390_v32 }
  0x8e   : > { %477 = vrot.lane.b32.xlu0 %v288_v11, %s1720_s26  ;;  %636 = vrot.lane.b32.xlu1 %v258_v4, %s1721_s27 }
  0x8f   : > { %696 = vrot.lane.b32.xlu2 %v288_v11, %s1721_s27 }
  0x90   : > { %v464_v14 = vpop.permute.xlu1 %463  ;;  %v404_v15 = vpop.permute.xlu0 %403 }
  0x91   : > { %591 = vst.msk [vmem:[#allocation2 + $0xc7] sm:$0xff] %vm553_vm4, %v464_v14  ;;  %v2175_v17 = vpop.permute.xlu2 %614  ;;  %v2362_v14 = vld [vmem:[%s1797_s25 + $0xf8] sm:$0xff] }
  0x92   : > { %561 = vst.msk [vmem:[#allocation2 + $0x27] sm:$0xff] %vm553_vm4, %v404_v15 }
  0x93   : > { %780 = vst.msk [vmem:[#allocation2 + $0x26] sm:$0xff] %vm772_vm5, %v2084_v53 }
  0x94   : > { %320 = vst.msk [vmem:[#allocation2 + $0xa8] sm:$0xff] %vm298_vm1, %v2362_v14 }
  0x96   : > { %419 = vrot.lane.b32.xlu0 %v2051_v47, %s1720_s26  ;;  %421 = vrot.lane.b32.xlu1 %v2069_v50, %s1720_s26 }
  0x97   : > { %479 = vrot.lane.b32.xlu2 %v2133_v2, %s1720_s26 }
  0x98   : > { %v683_v28 = vpop.permute.xlu1 %682  ;;  %v681_v30 = vpop.permute.xlu0 %680 }
  0x99   : > { %810 = vst.msk [vmem:[#allocation2 + $0xc6] sm:$0xff] %vm772_vm5, %v683_v28  ;;  %v466_v34 = vpop.permute.xlu2 %465  ;;  %v277_v28 = vld [vmem:[%s1797_s25 + $0x108] sm:$0xff] }
  0x9a   : > { %809 = vst.msk [vmem:[#allocation2 + $0xbe] sm:$0xfc] %vm770_vm3, %v681_v30  ;;  %v2210_v35 = vld [vmem:[#allocation2 + $0x20] sm:$0xff]  ;;  %v273_v30 = vld [vmem:[%s1797_s25 + $0xe8] sm:$0x3] }
  0x9b   : > { %1286 = vmatmul.f32.vlgmr.msra.gmra.mxu2 %v2210_v35  ;;  %592 = vst.msk [vmem:[#allocation2 + $0xcf] sm:$0x1] %vm555_vm6, %v466_v34 }
  0x9c   : > { %321 = vst.msk [vmem:[#allocation2 + $0xb0] sm:$0xff] %vm298_vm1, %v277_v28 }
  0x9e   : > { %481 = vrot.lane.b32.xlu0 %v2106_v59, %s1720_s26  ;;  %638 = vrot.lane.b32.xlu1 %v2051_v47, %s1721_s27  ;;  %v2236_v47 = vld [vmem:[%s1797_s25 + $0xb0] sm:$0xff] }
  0x9f   : > { %640 = vrot.lane.b32.xlu2 %v2069_v50, %s1721_s27  ;;  %314 = vst.msk [vmem:[#allocation2 + $0x78] sm:$0xff] %vm298_vm1, %v2236_v47 }
  0xa0   : > { %v392_v37 = vpop.permute.xlu0 %391  ;;  %v609_v39 = vpop.permute.xlu1 %608 }
  0xa1   : > { %554 = vst.msk [vmem:[#allocation2 + $0x7] sm:$0xff] %vm553_vm4, %v392_v37  ;;  %v856_v41 = vld [vmem:[#allocation2 + $0xc0] sm:$0xff]  ;;  %v394_v42 = vpop.permute.xlu2 %393 }
  0xa2   : > { %771 = vst.msk [vmem:[#allocation2 - $0x2] sm:$0xfc] %vm770_vm3, %v609_v39  ;;  %968 = vmatmul.f32.vlgmr.msra.gmra.mxu3 %v856_v41  ;;  %v294_v41 = vld [vmem:[%s1797_s25 + $0x190] sm:$0x3] }
  0xa3   : > { %773 = vst.msk [vmem:[#allocation2 + $0x6] sm:$0xff] %vm772_vm5, %v2153_v9  ;;  %1617 = vmatpush.msra.mxu3 %v1922_v19 }
  0xa4   : > { %556 = vst.msk [vmem:[#allocation2 + $0xf] sm:$0x1] %vm555_vm6, %v394_v42 }
  0xa5   : > { %1618 = vmatpush.msra.mxu3 %v1927_v20  ;;  %v2257_v20 = vld [vmem:[%s1797_s25 + $0xc0] sm:$0xff] }
  0xa6   : > { %698 = vrot.lane.b32.xlu0 %v2133_v2, %s1721_s27  ;;  %700 = vrot.lane.b32.xlu1 %v2106_v59, %s1721_s27  ;;  %315 = vst.msk [vmem:[#allocation2 + $0x80] sm:$0xff] %vm298_vm1, %v2257_v20  ;;  %v264_v59 = vld [vmem:[%s1797_s25 + $0xa0] sm:$0x3] }
  0xa7   : > { %423 = vrot.lane.b32.xlu2 %v261_v46, %s1720_s26  ;;  %1619 = vmatpush.msra.mxu3 %v1942_v22  ;;  %v2268_v22 = vld [vmem:[%s1797_s25 + $0xc8] sm:$0xff] }
  0xa8   : > { %v396_v49 = vpop.permute.xlu0 %395  ;;  %v398_v50 = vpop.permute.xlu1 %397  ;;  %316 = vst.msk [vmem:[#allocation2 + $0x88] sm:$0xff] %vm298_vm1, %v2268_v22 }
  0xa9   : > { %557 = vst.msk [vmem:[#allocation2 + $0xf] sm:$0xfe] %vm551_vm2, %v396_v49  ;;  %v619_v52 = vpop.permute.xlu2 %618  ;;  %1620 = vmatpush.msra.mxu3 %v1947_v23 }
  0xaa   : > { %558 = vst.msk [vmem:[#allocation2 + $0x17] sm:$0xff] %vm553_vm4, %v398_v50  ;;  %v832_v53 = vld [vmem:[#allocation2] sm:$0xff] }
  0xab   : > { %776 = vst.msk [vmem:[#allocation2 + $0xe] sm:$0xfc] %vm770_vm3, %v2175_v17  ;;  %896 = vmatmul.f32.vlgmr.msra.gmra.mxu0 %v832_v53  ;;  %1621 = vmatpush.msra.mxu3 %v1960_v26 }
  0xad   : > { %1622 = vmatpush.msra.mxu3 %v1974_v29 }
  0xae   : > { %483 = vrot.lane.b32.xlu0 %v291_v55, %s1720_s26  ;;  %642 = vrot.lane.b32.xlu1 %v261_v46, %s1721_s27 }
  0xaf   : > { %702 = vrot.lane.b32.xlu2 %v291_v55, %s1721_s27  ;;  %1623 = vmatpush.msra.mxu3 %v1984_v31 }
  0xb0   : > { %v617_v56 = vpop.permute.xlu0 %616  ;;  %v406_v57 = vpop.permute.xlu1 %405 }
  0xb1   : > { %777 = vst.msk [vmem:[#allocation2 + $0x16] sm:$0xff] %vm772_vm5, %v617_v56  ;;  %v468_v19 = vpop.permute.xlu2 %467  ;;  %1624 = vmatpush.msra.mxu3 %v1994_v33  ;;  %v276_v56 = vld [vmem:[%s1797_s25 + $0x100] sm:$0x3] }
  0xb2   : > { %562 = vst.msk [vmem:[#allocation2 + $0x2f] sm:$0x1] %vm555_vm6, %v406_v57  ;;  %v295_v57 = vld [vmem:[%s1797_s25 + $0x198] sm:$0xff] }
  0xb3   : > { %593 = vst.msk [vmem:[#allocation2 + $0xcf] sm:$0xfe] %vm551_vm2, %v468_v19  ;;  %1625 = vmatpush.msra.mxu3 %v2004_v36 }
  0xb4   : > { %333 = vst.msk [vmem:[#allocation2 + $0x110] sm:$0xff] %vm298_vm1, %v295_v57 }
  0xb5   : > { %1626 = vmatpush.msra.mxu3 %v2013_v38 }
  0xb6   : > { %425 = vrot.lane.b32.xlu0 %v2184_v21, %s1720_s26  ;;  %427 = vrot.lane.b32.xlu1 %v2199_v27, %s1720_s26 }
  0xb7   : > { %644 = vrot.lane.b32.xlu2 %v2184_v21, %s1721_s27  ;;  %1627 = vmatpush.msra.mxu3 %v2023_v40  ;;  %v2296_v40 = vld [vmem:[%s1797_s25 + $0xd8] sm:$0xff] }
  0xb8   : > { %v625_v23 = vpop.permute.xlu0 %624  ;;  %v685_v26 = vpop.permute.xlu1 %684  ;;  %v1026_v29 = vld [vmem:[#allocation2 + $0x10] sm:$0xff]  ;;  %317 = vst.msk [vmem:[#allocation2 + $0x90] sm:$0xff] %vm298_vm1, %v2296_v40 }
  0xb9   : > { %781 = vst.msk [vmem:[#allocation2 + $0x2e] sm:$0x3] %vm774_vm7, %v625_v23  ;;  %1091 = vmatmul.f32.vlgmr.msra.gmra.mxu1 %v1026_v29  ;;  %v629_v58 = vpop.permute.xlu2 %628  ;;  %1628 = vmatpush.msra.mxu3 %v2036_v43  ;;  %v2306_v43 = vld [vmem:[%s1797_s25 + $0xe0] sm:$0xff] }
  0xba   : > { %811 = vst.msk [vmem:[#allocation2 + $0xce] sm:$0x3] %vm774_vm7, %v685_v26  ;;  %v296_v23 = vld [vmem:[%s1797_s25 + $0x1a0] sm:$0xff] }
  0xbb   : > { %1629 = vmatpush.msra.mxu3 %v2045_v45  ;;  %318 = vst.msk [vmem:[#allocation2 + $0x98] sm:$0xff] %vm298_vm1, %v2306_v43 }
  0xbc   : > { %334 = vst.msk [vmem:[#allocation2 + $0x118] sm:$0xff] %vm298_vm1, %v296_v23 }
  0xbd   : > { %1630 = vmatpush.msra.mxu3 %v2057_v48 }
  0xbe   : > { %646 = vrot.lane.b32.xlu0 %v2199_v27, %s1721_s27  ;;  %429 = vrot.lane.b32.xlu1 %v264_v59, %s1720_s26 }
  0xbf   : > { %648 = vrot.lane.b32.xlu2 %v264_v59, %s1721_s27  ;;  %1631 = vmatpush.msra.mxu3 %v2078_v51 }
  0xc0   : > { %v613_v31 = vpop.permute.xlu0 %612  ;;  %v400_v60 = vpop.permute.xlu1 %399  ;;  %v2286_v33 = vld [vmem:[#allocation2 + $0x28] sm:$0xff] }
  0xc1   : > { %775 = vst.msk [vmem:[#allocation2 + $0xe] sm:$0x3] %vm774_vm7, %v613_v31  ;;  %v857_v36 = vld [vmem:[#allocation2 + $0xc8] sm:$0xff]  ;;  %1289 = vmatmul.f32.gmra.mxu2 %v2286_v33  ;;  %v412_v38 = vpop.permute.xlu2 %411  ;;  %1632 = vmatpush.msra.mxu3 %v2089_v54  ;;  %v279_v31 = vld [vmem:[%s1797_s25 + $0x118] sm:$0x3] }
  0xc2   : > { %559 = vst.msk [vmem:[#allocation2 + $0x1f] sm:$0x1] %vm555_vm6, %v400_v60  ;;  %971 = vmatmul.f32.gmra.mxu3 %v857_v36 }
  0xc3   : > { %778 = vst.msk [vmem:[#allocation2 + $0x1e] sm:$0x3] %vm774_vm7, %v619_v52 }
  0xc4   : > { %565 = vst.msk [vmem:[#allocation2 + $0x3f] sm:$0x1] %vm555_vm6, %v412_v38 }
  0xc6   : > { %431 = vrot.lane.b32.xlu0 %v2226_v44, %s1720_s26  ;;  %433 = vrot.lane.b32.xlu1 %v2236_v47, %s1720_s26 }
  0xc7   : > { %650 = vrot.lane.b32.xlu2 %v2226_v44, %s1721_s27 }
  0xc8   : > { %v408_v45 = vpop.permute.xlu0 %407  ;;  %v410_v48 = vpop.permute.xlu1 %409  ;;  %v833_v61 = vld [vmem:[#allocation2 + $0x8] sm:$0xff] }
  0xc9   : > { %563 = vst.msk [vmem:[#allocation2 + $0x2f] sm:$0xfe] %vm551_vm2, %v408_v45  ;;  %899 = vmatmul.f32.gmra.mxu0 %v833_v61  ;;  %v691_v62 = vpop.permute.xlu2 %690 }
  0xca   : > { %564 = vst.msk [vmem:[#allocation2 + $0x37] sm:$0xff] %vm553_vm4, %v410_v48  ;;  %v1027_v63 = vld [vmem:[#allocation2 + $0x18] sm:$0xff] }
  0xcb   : > { %1094 = vmatmul.f32.gmra.mxu1 %v1027_v63  ;;  %783 = vst.msk [vmem:[#allocation2 + $0x36] sm:$0xff] %vm772_vm5, %v629_v58 }
  0xce   : > { %652 = vrot.lane.b32.xlu0 %v2236_v47, %s1721_s27  ;;  %435 = vrot.lane.b32.xlu1 %v267_v0, %s1720_s26 }
  0xcf   : > { %654 = vrot.lane.b32.xlu2 %v267_v0, %s1721_s27 }
  0xd0   : > { %v470_v51 = vpop.permute.xlu0 %469  ;;  %v627_v54 = vpop.permute.xlu1 %626 }
  0xd1   : > { %594 = vst.msk [vmem:[#allocation2 + $0xd7] sm:$0xff] %vm553_vm4, %v470_v51  ;;  %902 = vmatmul.f32.gmra.mxu0 %v1026_v29  ;;  %v474_v2 = vpop.permute.xlu2 %473 }
  0xd2   : > { %782 = vst.msk [vmem:[#allocation2 + $0x2e] sm:$0xfc] %vm770_vm3, %v627_v54  ;;  %v2466_v54 = vld [vmem:[%s2665_s2] ss:$0 sm:$0xff] }
  0xd3   : > { %1097 = vmatmul.f32.gmra.mxu1 %v2210_v35  ;;  %596 = vst.msk [vmem:[#allocation2 + $0xdf] sm:$0xfe] %vm551_vm2, %v474_v2 }
  0xd6   : > { %437 = vrot.lane.b32.xlu0 %v2257_v20, %s1720_s26  ;;  %439 = vrot.lane.b32.xlu1 %v2268_v22, %s1720_s26 }
  0xd7   : > { %656 = vrot.lane.b32.xlu2 %v2257_v20, %s1721_s27 }
  0xd8   : > { %v687_v4 = vpop.permute.xlu0 %686  ;;  %v689_v5 = vpop.permute.xlu1 %688 }
  0xd9   : > { %812 = vst.msk [vmem:[#allocation2 + $0xce] sm:$0xfc] %vm770_vm3, %v687_v4  ;;  %905 = vmatmul.f32.gmra.mxu0 %v1027_v63  ;;  %v1223_v6 = vld [vmem:[#allocation2 + $0x30] sm:$0xff]  ;;  %v635_v7 = vpop.permute.xlu2 %634 }
  0xda   : > { %813 = vst.msk [vmem:[#allocation2 + $0xd6] sm:$0xff] %vm772_vm5, %v689_v5  ;;  %1292 = vmatmul.f32.gmra.mxu2 %v1223_v6 }
  0xdb   : > { %1100 = vmatmul.f32.gmra.mxu1 %v2286_v33 }
  0xde   : > { %658 = vrot.lane.b32.xlu0 %v2268_v22, %s1721_s27  ;;  %441 = vrot.lane.b32.xlu1 %v270_v8, %s1720_s26 }
  0xdf   : > { %660 = vrot.lane.b32.xlu2 %v270_v8, %s1721_s27 }
  0xe0   : > { %v472_v9 = vpop.permute.xlu0 %471  ;;  %v631_v10 = vpop.permute.xlu1 %630 }
  0xe1   : > { %595 = vst.msk [vmem:[#allocation2 + $0xdf] sm:$0x1] %vm555_vm6, %v472_v9  ;;  %908 = vmatmul.f32.gmra.mxu0 %v2210_v35  ;;  %v2349_v11 = vld [vmem:[#allocation2 + $0xd0] sm:$0xff]  ;;  %v418_v12 = vpop.permute.xlu2 %417 }
  0xe2   : > { %784 = vst.msk [vmem:[#allocation2 + $0x3e] sm:$0x3] %vm774_vm7, %v631_v10  ;;  %974 = vmatmul.f32.gmra.mxu3 %v2349_v11 }
  0xe3   : > { %814 = vst.msk [vmem:[#allocation2 + $0xde] sm:$0x3] %vm774_vm7, %v691_v62  ;;  %1103 = vmatmul.f32.gmra.mxu1 %v1223_v6  ;;  %v297_v62 = vld [vmem:[%s1797_s25 + $0x1a8] sm:$0x3] }
  0xe4   : > { %568 = vst.msk [vmem:[#allocation2 + $0x4f] sm:$0x1] %vm555_vm6, %v418_v12 }
  0xe6   : > { %443 = vrot.lane.b32.xlu0 %v2296_v40, %s1720_s26  ;;  %445 = vrot.lane.b32.xlu1 %v2306_v43, %s1720_s26 }
  0xe7   : > { %485 = vrot.lane.b32.xlu2 %v292_v3, %s1720_s26 }
  0xe8   : > { %v414_v15 = vpop.permute.xlu0 %413  ;;  %v416_v16 = vpop.permute.xlu1 %415 }
  0xe9   : > { %566 = vst.msk [vmem:[#allocation2 + $0x3f] sm:$0xfe] %vm551_vm2, %v414_v15  ;;  %911 = vmatmul.f32.gmra.mxu0 %v2286_v33  ;;  %v1224_v17 = vld [vmem:[#allocation2 + $0x38] sm:$0xff]  ;;  %v697_v18 = vpop.permute.xlu2 %696 }
  0xea   : > { %567 = vst.msk [vmem:[#allocation2 + $0x47] sm:$0xff] %vm553_vm4, %v416_v16  ;;  %1295 = vmatmul.f32.gmra.mxu2 %v1224_v17  ;;  %v2370_v21 = vld [vmem:[#allocation2 + $0xd8] sm:$0xff] }
  0xeb   : > { %977 = vmatmul.f32.gmra.mxu3 %v2370_v21  ;;  %1106 = vmatmul.f32.gmra.mxu1 %v1224_v17  ;;  %786 = vst.msk [vmem:[#allocation2 + $0x46] sm:$0xff] %vm772_vm5, %v635_v7 }
  0xee   : > { %487 = vrot.lane.b32.xlu0 %v2319_v1, %s1720_s26  ;;  %662 = vrot.lane.b32.xlu1 %v2296_v40, %s1721_s27 }
  0xef   : > { %664 = vrot.lane.b32.xlu2 %v2306_v43, %s1721_s27 }
  0xf0   : > { %v476_v24 = vpop.permute.xlu0 %475  ;;  %v633_v25 = vpop.permute.xlu1 %632 }
  0xf1   : > { %597 = vst.msk [vmem:[#allocation2 + $0xe7] sm:$0xff] %vm553_vm4, %v476_v24  ;;  %914 = vmatmul.f32.gmra.mxu0 %v1223_v6  ;;  %v480_v27 = vpop.permute.xlu2 %479 }
  0xf2   : > { %785 = vst.msk [vmem:[#allocation2 + $0x3e] sm:$0xfc] %vm770_vm3, %v633_v25 }
  0xf3   : > { %599 = vst.msk [vmem:[#allocation2 + $0xef] sm:$0xfe] %vm551_vm2, %v480_v27 }
  0xf6   : > { %704 = vrot.lane.b32.xlu0 %v292_v3, %s1721_s27  ;;  %706 = vrot.lane.b32.xlu1 %v2319_v1, %s1721_s27 }
  0xf7   : > { %447 = vrot.lane.b32.xlu2 %v273_v30, %s1720_s26 }
  0xf8   : > { %v693_v34 = vpop.permute.xlu0 %692  ;;  %v695_v35 = vpop.permute.xlu1 %694 }
  0xf9   : > { %815 = vst.msk [vmem:[#allocation2 + $0xde] sm:$0xfc] %vm770_vm3, %v693_v34  ;;  %917 = vmatmul.f32.gmra.mxu0 %v1224_v17  ;;  %v1032_v37 = vld [vmem:[#allocation2 + $0x40] sm:$0xff]  ;;  %v641_v39 = vpop.permute.xlu2 %640 }
  0xfa   : > { %816 = vst.msk [vmem:[#allocation2 + $0xe6] sm:$0xff] %vm772_vm5, %v695_v35  ;;  %1109 = vmatmul.f32.gmra.mxu1 %v1032_v37  ;;  %1298 = vmatmul.f32.gmra.mxu2 %v1032_v37 }
  0xfe   : > { %489 = vrot.lane.b32.xlu0 %v294_v41, %s1720_s26  ;;  %666 = vrot.lane.b32.xlu1 %v273_v30, %s1721_s27 }
  0xff   : > { %708 = vrot.lane.b32.xlu2 %v294_v41, %s1721_s27 }
 0x100   : > { %v478_v42 = vpop.permute.xlu0 %477  ;;  %v637_v44 = vpop.permute.xlu1 %636 }
 0x101   : > { %598 = vst.msk [vmem:[#allocation2 + $0xef] sm:$0x1] %vm555_vm6, %v478_v42  ;;  %920 = vmatmul.f32.gmra.mxu0 %v1032_v37  ;;  %v2402_v46 = vld [vmem:[#allocation2 + $0xe0] sm:$0xff]  ;;  %v424_v47 = vpop.permute.xlu2 %423 }
 0x102   : > { %787 = vst.msk [vmem:[#allocation2 + $0x4e] sm:$0x3] %vm774_vm7, %v637_v44  ;;  %980 = vmatmul.f32.gmra.mxu3 %v2402_v46 }
 0x103   : > { %817 = vst.msk [vmem:[#allocation2 + $0xee] sm:$0x3] %vm774_vm7, %v697_v18 }
 0x104   : > { %571 = vst.msk [vmem:[#allocation2 + $0x5f] sm:$0x1] %vm555_vm6, %v424_v47 }
 0x106   : > { %449 = vrot.lane.b32.xlu0 %v274_v13, %s1720_s26  ;;  %451 = vrot.lane.b32.xlu1 %v2362_v14, %s1720_s26 }
 0x107   : > { %668 = vrot.lane.b32.xlu2 %v274_v13, %s1721_s27 }
 0x108   : > { %v420_v49 = vpop.permute.xlu0 %419  ;;  %v422_v50 = vpop.permute.xlu1 %421 }
 0x109   : > { %569 = vst.msk [vmem:[#allocation2 + $0x4f] sm:$0xfe] %vm551_vm2, %v420_v49  ;;  %v841_v52 = vld [vmem:[#allocation2 + $0x48] sm:$0xff]  ;;  %v703_v53 = vpop.permute.xlu2 %702 }
 0x10a   : > { %570 = vst.msk [vmem:[#allocation2 + $0x57] sm:$0xff] %vm553_vm4, %v422_v50  ;;  %923 = vmatmul.f32.gmra.mxu0 %v841_v52  ;;  %1112 = vmatmul.f32.gmra.mxu1 %v841_v52  ;;  %v2414_v55 = vld [vmem:[#allocation2 + $0xe8] sm:$0xff] }
 0x10b   : > { %1301 = vmatmul.f32.gmra.mxu2 %v841_v52  ;;  %983 = vmatmul.f32.gmra.mxu3 %v2414_v55  ;;  %789 = vst.msk [vmem:[#allocation2 + $0x56] sm:$0xff] %vm772_vm5, %v641_v39 }
 0x10e   : > { %670 = vrot.lane.b32.xlu0 %v2362_v14, %s1721_s27  ;;  %453 = vrot.lane.b32.xlu1 %v276_v56, %s1720_s26 }
 0x10f   : > { %672 = vrot.lane.b32.xlu2 %v276_v56, %s1721_s27 }
 0x110   : > { %v482_v19 = vpop.permute.xlu0 %481  ;;  %v639_v20 = vpop.permute.xlu1 %638 }
 0x111   : > { %600 = vst.msk [vmem:[#allocation2 + $0xf7] sm:$0xff] %vm553_vm4, %v482_v19  ;;  %v645_v22 = vpop.permute.xlu2 %644 }
 0x112   : > { %788 = vst.msk [vmem:[#allocation2 + $0x4e] sm:$0xfc] %vm770_vm3, %v639_v20 }
 0x116   : > { %455 = vrot.lane.b32.xlu0 %v277_v28, %s1720_s26  ;;  %457 = vrot.lane.b32.xlu1 %v2390_v32, %s1720_s26 }
 0x117   : > { %674 = vrot.lane.b32.xlu2 %v277_v28, %s1721_s27 }
 0x118   : > { %v699_v26 = vpop.permute.xlu0 %698  ;;  %v701_v29 = vpop.permute.xlu1 %700 }
 0x119   : > { %818 = vst.msk [vmem:[#allocation2 + $0xee] sm:$0xfc] %vm770_vm3, %v699_v26  ;;  %v1034_v58 = vld [vmem:[#allocation2 + $0x50] sm:$0xff]  ;;  %v649_v59 = vpop.permute.xlu2 %648 }
 0x11a   : > { %819 = vst.msk [vmem:[#allocation2 + $0xf6] sm:$0xff] %vm772_vm5, %v701_v29  ;;  %1115 = vmatmul.f32.gmra.mxu1 %v1034_v58  ;;  %1304 = vmatmul.f32.gmra.mxu2 %v1034_v58 }
 0x11b   : > { %926 = vmatmul.f32.gmra.mxu0 %v1034_v58 }
 0x11e   : > { %676 = vrot.lane.b32.xlu0 %v2390_v32, %s1721_s27  ;;  %459 = vrot.lane.b32.xlu1 %v279_v31, %s1720_s26  ;;  %v1287_v4 = vpop.f32.mrf.mxu2 }
 0x11f   : > { %678 = vrot.lane.b32.xlu2 %v279_v31, %s1721_s27 }
 0x120   : > { %v484_v60 = vpop.permute.xlu0 %483  ;;  %v643_v33 = vpop.permute.xlu1 %642 }
 0x121   : > { %601 = vst.msk [vmem:[#allocation2 + $0xff] sm:$0x1] %vm555_vm6, %v484_v60  ;;  %v2441_v36 = vld [vmem:[#allocation2 + $0xf0] sm:$0xff]  ;;  %v651_v38 = vpop.permute.xlu2 %650 }
 0x122   : > { %790 = vst.msk [vmem:[#allocation2 + $0x5e] sm:$0x3] %vm774_vm7, %v643_v33  ;;  %986 = vmatmul.f32.gmra.mxu3 %v2441_v36 }
 0x123   : > { %820 = vst.msk [vmem:[#allocation2 + $0xfe] sm:$0x3] %vm774_vm7, %v703_v53 }
 0x126   : > { %491 = vrot.lane.b32.xlu0 %v295_v57, %s1720_s26  ;;  %493 = vrot.lane.b32.xlu1 %v296_v23, %s1720_s26 }
 0x127   : > { %710 = vrot.lane.b32.xlu2 %v295_v57, %s1721_s27 }
 0x128   : > { %v426_v40 = vpop.permute.xlu0 %425  ;;  %v428_v43 = vpop.permute.xlu1 %427 }
 0x129   : > { %572 = vst.msk [vmem:[#allocation2 + $0x5f] sm:$0xfe] %vm551_vm2, %v426_v40  ;;  %v843_v45 = vld [vmem:[#allocation2 + $0x58] sm:$0xff]  ;;  %v655_v48 = vpop.permute.xlu2 %654  ;;  %v897_v51 = vpop.f32.mrf.mxu0 }
 0x12a   : > { %573 = vst.msk [vmem:[#allocation2 + $0x67] sm:$0xff] %vm553_vm4, %v428_v43  ;;  %929 = vmatmul.f32.gmra.mxu0 %v843_v45  ;;  %1118 = vmatmul.f32.gmra.mxu1 %v843_v45  ;;  %v2451_v61 = vld [vmem:[#allocation2 + $0xf8] sm:$0xff]  ;;  %v993_v2 = vadd.f32 %v2466_v54, %v897_v51 }
 0x12b   : > { %791 = vst.msk [vmem:[#allocation2 + $0x5e] sm:$0xfc] %vm770_vm3, %v645_v22  ;;  %1307 = vmatmul.f32.gmra.mxu2 %v843_v45  ;;  %989 = vmatmul.f32.gmra.mxu3 %v2451_v61 }
 0x12e   : > { %712 = vrot.lane.b32.xlu0 %v296_v23, %s1721_s27  ;;  %495 = vrot.lane.b32.xlu1 %v297_v62, %s1720_s26  ;;  %s2474_s26 = scalar_lea.vmem %s2666_s3, %s1550_s12 }
 0x12f   : > { %714 = vrot.lane.b32.xlu2 %v297_v62, %s1721_s27 }
 0x130   : > { %v647_v63 = vpop.permute.xlu0 %646  ;;  %v430_v0 = vpop.permute.xlu1 %429 }
 0x131   : > { %792 = vst.msk [vmem:[#allocation2 + $0x66] sm:$0xff] %vm772_vm5, %v647_v63  ;;  %v657_v1 = vpop.permute.xlu2 %656  ;;  %v2514_v63 = vpop.f32.mrf.mxu3 }
 0x132   : > { %574 = vst.msk [vmem:[#allocation2 + $0x6f] sm:$0x1] %vm555_vm6, %v430_v0 }
 0x133   : > { %793 = vst.msk [vmem:[#allocation2 + $0x6e] sm:$0x3] %vm774_vm7, %v649_v59  ;;  %1163 = vmatmul.f32.vlgmr.msrb.gmra.mxu3 %v2349_v11 }
 0x136   : > { %v1092_v3 = vpop.f32.mrf.mxu1 }
 0x137   : > { %v1188_v5 = vadd.f32 %v1092_v3, %v993_v2 }
 0x138   : > { %v432_v6 = vpop.permute.xlu0 %431  ;;  %v434_v7 = vpop.permute.xlu1 %433  ;;  %v844_v8 = vld [vmem:[#allocation2 + $0x60] sm:$0xff] }
 0x139   : > { %v1383_v9 = vadd.f32 %v1287_v4, %v1188_v5  ;;  %575 = vst.msk [vmem:[#allocation2 + $0x6f] sm:$0xfe] %vm551_vm2, %v432_v6  ;;  %932 = vmatmul.f32.gmra.mxu0 %v844_v8  ;;  %1121 = vmatmul.f32.gmra.mxu1 %v844_v8  ;;  %v661_v10 = vpop.permute.xlu2 %660 }
 0x13a   : > { %576 = vst.msk [vmem:[#allocation2 + $0x77] sm:$0xff] %vm553_vm4, %v434_v7  ;;  %1310 = vmatmul.f32.gmra.mxu2 %v844_v8  ;;  %v845_v14 = vld [vmem:[#allocation2 + $0x68] sm:$0xff] }
 0x13b   : > { %1415 = vst [vmem:[%s2474_s26] sm:$0xff] %v1383_v9  ;;  %1166 = vmatmul.f32.gmra.mxu3 %v2370_v21 }
 0x13c   : > { %794 = vst.msk [vmem:[#allocation2 + $0x6e] sm:$0xfc] %vm770_vm3, %v651_v38 }
 0x140   : > { %v653_v12 = vpop.permute.xlu0 %652  ;;  %v436_v13 = vpop.permute.xlu1 %435 }
 0x141   : > { %795 = vst.msk [vmem:[#allocation2 + $0x76] sm:$0xff] %vm772_vm5, %v653_v12  ;;  %935 = vmatmul.f32.gmra.mxu0 %v845_v14  ;;  %1124 = vmatmul.f32.gmra.mxu1 %v845_v14  ;;  %v486_v15 = vpop.permute.xlu2 %485 }
 0x142   : > { %577 = vst.msk [vmem:[#allocation2 + $0x7f] sm:$0x1] %vm555_vm6, %v436_v13  ;;  %1313 = vmatmul.f32.gmra.mxu2 %v845_v14 }
 0x143   : > { %796 = vst.msk [vmem:[#allocation2 + $0x7e] sm:$0x3] %vm774_vm7, %v655_v48  ;;  %1169 = vmatmul.f32.gmra.mxu3 %v2402_v46 }
 0x144   : > { %602 = vst.msk [vmem:[#allocation2 + $0xff] sm:$0xfe] %vm551_vm2, %v486_v15  ;;  %v1290_v32 = vpop.f32.mrf.mxu2 }
 0x145   : > { %v2522_v7 = vpop.f32.mrf.mxu3 }
 0x146   : > { %v900_v16 = vpop.f32.mrf.mxu0 }
 0x147   : > { %v994_v17 = vadd.f32 %v2466_v54, %v900_v16 }
 0x148   : > { %v1095_v18 = vpop.f32.mrf.mxu1  ;;  %v438_v24 = vpop.permute.xlu0 %437  ;;  %v846_v25 = vld [vmem:[#allocation2 + $0x70] sm:$0xff] }
 0x149   : > { %v1189_v27 = vadd.f32 %v1095_v18, %v994_v17  ;;  %578 = vst.msk [vmem:[#allocation2 + $0x7f] sm:$0xfe] %vm551_vm2, %v438_v24  ;;  %v440_v28 = vpop.permute.xlu1 %439  ;;  %938 = vmatmul.f32.gmra.mxu0 %v846_v25  ;;  %1127 = vmatmul.f32.gmra.mxu1 %v846_v25  ;;  %v665_v30 = vpop.permute.xlu2 %664 }
 0x14a   : > { %579 = vst.msk [vmem:[#allocation2 + $0x87] sm:$0xff] %vm553_vm4, %v440_v28  ;;  %1316 = vmatmul.f32.gmra.mxu2 %v846_v25  ;;  %v847_v37 = vld [vmem:[#allocation2 + $0x78] sm:$0xff] }
 0x14b   : > { %v1384_v34 = vadd.f32 %v1290_v32, %v1189_v27  ;;  %797 = vst.msk [vmem:[#allocation2 + $0x7e] sm:$0xfc] %vm770_vm3, %v657_v1  ;;  %1172 = vmatmul.f32.gmra.mxu3 %v2414_v55 }
 0x14d   : > { %1416 = vst [vmem:[%s2474_s26 + $0x8] sm:$0xff] %v1384_v34 }
 0x14e   : > { %v903_v42 = vpop.f32.mrf.mxu0 }
 0x14f   : > { %v995_v44 = vadd.f32 %v2466_v54, %v903_v42 }
 0x150   : > { %v659_v35 = vpop.permute.xlu0 %658  ;;  %v1098_v50 = vpop.f32.mrf.mxu1 }
 0x151   : > { %798 = vst.msk [vmem:[#allocation2 + $0x86] sm:$0xff] %vm772_vm5, %v659_v35  ;;  %v442_v39 = vpop.permute.xlu1 %441  ;;  %941 = vmatmul.f32.gmra.mxu0 %v847_v37  ;;  %1130 = vmatmul.f32.gmra.mxu1 %v847_v37  ;;  %v448_v41 = vpop.permute.xlu2 %447  ;;  %v1190_v53 = vadd.f32 %v1098_v50, %v995_v44 }
 0x152   : > { %580 = vst.msk [vmem:[#allocation2 + $0x8f] sm:$0x1] %vm555_vm6, %v442_v39  ;;  %1319 = vmatmul.f32.gmra.mxu2 %v847_v37 }
 0x153   : > { %799 = vst.msk [vmem:[#allocation2 + $0x8e] sm:$0x3] %vm774_vm7, %v661_v10  ;;  %1175 = vmatmul.f32.gmra.mxu3 %v2441_v36 }
 0x154   : > { %583 = vst.msk [vmem:[#allocation2 + $0x9f] sm:$0x1] %vm555_vm6, %v448_v41 }
 0x156   : > { %v906_v23 = vpop.f32.mrf.mxu0 }
 0x157   : > { %v996_v29 = vadd.f32 %v2466_v54, %v906_v23 }
 0x158   : > { %v444_v47 = vpop.permute.xlu0 %443  ;;  %v848_v49 = vld [vmem:[#allocation2 + $0x80] sm:$0xff]  ;;  %v1101_v59 = vpop.f32.mrf.mxu1 }
 0x159   : > { %581 = vst.msk [vmem:[#allocation2 + $0x8f] sm:$0xfe] %vm551_vm2, %v444_v47  ;;  %v446_v52 = vpop.permute.xlu1 %445  ;;  %944 = vmatmul.f32.gmra.mxu0 %v848_v49  ;;  %1133 = vmatmul.f32.gmra.mxu1 %v848_v49  ;;  %v709_v26 = vpop.permute.xlu2 %708  ;;  %v1191_v33 = vadd.f32 %v1101_v59, %v996_v29 }
 0x15a   : > { %582 = vst.msk [vmem:[#allocation2 + $0x97] sm:$0xff] %vm553_vm4, %v446_v52  ;;  %1322 = vmatmul.f32.gmra.mxu2 %v848_v49  ;;  %v849_v20 = vld [vmem:[#allocation2 + $0x88] sm:$0xff] }
 0x15b   : > { %1178 = vmatmul.f32.gmra.mxu3 %v2451_v61  ;;  %801 = vst.msk [vmem:[#allocation2 + $0x96] sm:$0xff] %vm772_vm5, %v665_v30 }
 0x15d   : > { %v1293_v56 = vpop.f32.mrf.mxu2 }
 0x15e   : > { %v1385_v57 = vadd.f32 %v1293_v56, %v1190_v53  ;;  %v909_v0 = vpop.f32.mrf.mxu0 }
 0x15f   : > { %v997_v1 = vadd.f32 %v2466_v54, %v909_v0 }
 0x160   : > { %1417 = vst [vmem:[%s2474_s26 + $0x10] sm:$0xff] %v1385_v57  ;;  %v488_v19 = vpop.permute.xlu0 %487  ;;  %v1104_v2 = vpop.f32.mrf.mxu1 }
 0x161   : > { %603 = vst.msk [vmem:[#allocation2 + $0x107] sm:$0xff] %vm553_vm4, %v488_v19  ;;  %v663_v22 = vpop.permute.xlu1 %662  ;;  %947 = vmatmul.f32.gmra.mxu0 %v849_v20  ;;  %1136 = vmatmul.f32.gmra.mxu1 %v849_v20  ;;  %v669_v45 = vpop.permute.xlu2 %668  ;;  %v1192_v8 = vadd.f32 %v1104_v2, %v997_v1 }
 0x162   : > { %800 = vst.msk [vmem:[#allocation2 + $0x8e] sm:$0xfc] %vm770_vm3, %v663_v22  ;;  %1325 = vmatmul.f32.gmra.mxu2 %v849_v20 }
 0x165   : > { %v2529_v14 = vpop.f32.mrf.mxu3 }
 0x166   : > { %v912_v16 = vpop.f32.mrf.mxu0 }
 0x167   : > { %v998_v24 = vadd.f32 %v2466_v54, %v912_v16 }
 0x168   : > { %v705_v58 = vpop.permute.xlu0 %704  ;;  %v1107_v27 = vpop.f32.mrf.mxu1 }
 0x169   : > { %821 = vst.msk [vmem:[#allocation2 + $0xfe] sm:$0xfc] %vm770_vm3, %v705_v58  ;;  %v707_v31 = vpop.permute.xlu1 %706  ;;  %v1042_v60 = vld [vmem:[#allocation2 + $0x90] sm:$0xff]  ;;  %v673_v6 = vpop.permute.xlu2 %672  ;;  %v1048_v58 = vld [vmem:[#allocation2 + $0xc0] sm:$0xff] }
 0x16a   : > { %822 = vst.msk [vmem:[#allocation2 + $0x106] sm:$0xff] %vm772_vm5, %v707_v31  ;;  %1139 = vmatmul.f32.gmra.mxu1 %v1042_v60  ;;  %1328 = vmatmul.f32.gmra.mxu2 %v1042_v60 }
 0x16b   : > { %950 = vmatmul.f32.gmra.mxu0 %v1042_v60 }
 0x16d   : > { %v1296_v38 = vpop.f32.mrf.mxu2 }
 0x16e   : > { %v1386_v40 = vadd.f32 %v1296_v38, %v1191_v33  ;;  %v2538_v28 = vpop.f32.mrf.mxu3  ;;  %v915_v42 = vpop.f32.mrf.mxu0 }
 0x16f   : > { %v999_v52 = vadd.f32 %v2466_v54, %v915_v42 }
 0x170   : > { %1418 = vst [vmem:[%s2474_s26 + $0x18] sm:$0xff] %v1386_v40  ;;  %v490_v43 = vpop.permute.xlu0 %489 }
 0x171   : > { %604 = vst.msk [vmem:[#allocation2 + $0x10f] sm:$0x1] %vm555_vm6, %v490_v43  ;;  %v667_v48 = vpop.permute.xlu1 %666  ;;  %v2510_v62 = vld [vmem:[#allocation2 + $0x100] sm:$0xff]  ;;  %v675_v15 = vpop.permute.xlu2 %674 }
 0x172   : > { %802 = vst.msk [vmem:[#allocation2 + $0x9e] sm:$0x3] %vm774_vm7, %v667_v48  ;;  %1181 = vmatmul.f32.gmra.mxu3 %v2510_v62  ;;  %v1049_v48 = vld [vmem:[#allocation2 + $0xc8] sm:$0xff] }
 0x173   : > { %823 = vst.msk [vmem:[#allocation2 + $0x10e] sm:$0x3] %vm774_vm7, %v709_v26 }
 0x177   : > { %v1110_v47 = vpop.f32.mrf.mxu1 }
 0x178   : > { %v450_v51 = vpop.permute.xlu0 %449 }
 0x179   : > { %584 = vst.msk [vmem:[#allocation2 + $0x9f] sm:$0xfe] %vm551_vm2, %v450_v51  ;;  %v452_v3 = vpop.permute.xlu1 %451  ;;  %v1043_v4 = vld [vmem:[#allocation2 + $0x98] sm:$0xff]  ;;  %v679_v32 = vpop.permute.xlu2 %678 }
 0x17a   : > { %585 = vst.msk [vmem:[#allocation2 + $0xa7] sm:$0xff] %vm553_vm4, %v452_v3  ;;  %1142 = vmatmul.f32.gmra.mxu1 %v1043_v4  ;;  %1331 = vmatmul.f32.gmra.mxu2 %v1043_v4  ;;  %v2520_v5 = vld [vmem:[#allocation2 + $0x108] sm:$0xff] }
 0x17b   : > { %803 = vst.msk [vmem:[#allocation2 + $0x9e] sm:$0xfc] %vm770_vm3, %v669_v45  ;;  %953 = vmatmul.f32.gmra.mxu0 %v1043_v4  ;;  %1184 = vmatmul.f32.gmra.mxu3 %v2520_v5 }
 0x17d   : > { %v1299_v9 = vpop.f32.mrf.mxu2 }
 0x17e   : > { %v1387_v10 = vadd.f32 %v1299_v9, %v1192_v8 }
 0x180   : > { %1419 = vst [vmem:[%s2474_s26 + $0x20] sm:$0xff] %v1387_v10  ;;  %v671_v12 = vpop.permute.xlu0 %670 }
 0x181   : > { %804 = vst.msk [vmem:[#allocation2 + $0xa6] sm:$0xff] %vm772_vm5, %v671_v12  ;;  %v454_v13 = vpop.permute.xlu1 %453  ;;  %v711_v41 = vpop.permute.xlu2 %710 }
 0x182   : > { %586 = vst.msk [vmem:[#allocation2 + $0xaf] sm:$0x1] %vm555_vm6, %v454_v13 }
 0x183   : > { %805 = vst.msk [vmem:[#allocation2 + $0xae] sm:$0x3] %vm774_vm7, %v673_v6  ;;  %1358 = vmatmul.f32.vlgmr.msra.gmra.mxu3 %v2402_v46  ;;  %v1193_v46 = vadd.f32 %v1107_v27, %v998_v24 }
 0x187   : > { %v1113_v29 = vpop.f32.mrf.mxu1 }
 0x188   : > { %v456_v17 = vpop.permute.xlu0 %455  ;;  %v1044_v18 = vld [vmem:[#allocation2 + $0xa0] sm:$0xff] }
 0x189   : > { %587 = vst.msk [vmem:[#allocation2 + $0xaf] sm:$0xfe] %vm551_vm2, %v456_v17  ;;  %v458_v25 = vpop.permute.xlu1 %457  ;;  %1145 = vmatmul.f32.gmra.mxu1 %v1044_v18  ;;  %1334 = vmatmul.f32.gmra.mxu2 %v1044_v18  ;;  %v715_v20 = vpop.permute.xlu2 %714 }
 0x18a   : > { %588 = vst.msk [vmem:[#allocation2 + $0xb7] sm:$0xff] %vm553_vm4, %v458_v25  ;;  %956 = vmatmul.f32.gmra.mxu0 %v1044_v18  ;;  %v1045_v37 = vld [vmem:[#allocation2 + $0xa8] sm:$0xff] }
 0x18b   : > { %806 = vst.msk [vmem:[#allocation2 + $0xae] sm:$0xfc] %vm770_vm3, %v675_v15  ;;  %1361 = vmatmul.f32.gmra.mxu3 %v2414_v55  ;;  %v2545_v55 = vpop.f32.mrf.mxu3 }
 0x18e   : > { %v1302_v30 = vpop.f32.mrf.mxu2 }
 0x18f   : > { %v1388_v34 = vadd.f32 %v1302_v30, %v1193_v46 }
 0x190   : > { %v677_v35 = vpop.permute.xlu0 %676 }
 0x191   : > { %1420 = vst [vmem:[%s2474_s26 + $0x28] sm:$0xff] %v1388_v34  ;;  %v460_v39 = vpop.permute.xlu1 %459  ;;  %1148 = vmatmul.f32.gmra.mxu1 %v1045_v37  ;;  %1337 = vmatmul.f32.gmra.mxu2 %v1045_v37 }
 0x192   : > { %807 = vst.msk [vmem:[#allocation2 + $0xb6] sm:$0xff] %vm772_vm5, %v677_v35  ;;  %959 = vmatmul.f32.gmra.mxu0 %v1045_v37 }
 0x193   : > { %589 = vst.msk [vmem:[#allocation2 + $0xbf] sm:$0x1] %vm555_vm6, %v460_v39  ;;  %1364 = vmatmul.f32.gmra.mxu3 %v2441_v36  ;;  %v1194_v36 = vadd.f32 %v1110_v47, %v999_v52  ;;  %v2552_v57 = vpop.f32.mrf.mxu3 }
 0x194   : > { %808 = vst.msk [vmem:[#allocation2 + $0xbe] sm:$0x3] %vm774_vm7, %v679_v32 }
 0x197   : > { %v1116_v43 = vpop.f32.mrf.mxu1 }
 0x198   : > { %v492_v44 = vpop.permute.xlu0 %491 }
 0x199   : > { %v854_v49 = vld [vmem:[#allocation2 + $0xb0] sm:$0xff]  ;;  %605 = vst.msk [vmem:[#allocation2 + $0x10f] sm:$0xfe] %vm551_vm2, %v492_v44  ;;  %v494_v50 = vpop.permute.xlu1 %493 }
 0x19a   : > { %962 = vmatmul.f32.gmra.mxu0 %v854_v49  ;;  %1151 = vmatmul.f32.gmra.mxu1 %v854_v49  ;;  %606 = vst.msk [vmem:[#allocation2 + $0x117] sm:$0xff] %vm553_vm4, %v494_v50 }
 0x19b   : > { %1340 = vmatmul.f32.gmra.mxu2 %v854_v49  ;;  %1367 = vmatmul.f32.gmra.mxu3 %v2451_v61  ;;  %824 = vst.msk [vmem:[#allocation2 + $0x10e] sm:$0xfc] %vm770_vm3, %v711_v41  ;;  %v855_v22 = vld [vmem:[#allocation2 + $0xb8] sm:$0xff]  ;;  %v918_v61 = vpop.f32.mrf.mxu0 }
 0x19c   : > { %v1000_v59 = vadd.f32 %v2466_v54, %v918_v61 }
 0x19d   : > { %v1305_v53 = vpop.f32.mrf.mxu2 }
 0x19e   : > { %v1389_v56 = vadd.f32 %v1305_v53, %v1194_v36  ;;  %v1195_v31 = vadd.f32 %v1113_v29, %v1000_v59 }
 0x1a0   : > { %1421 = vst [vmem:[%s2474_s26 + $0x30] sm:$0xff] %v1389_v56  ;;  %v713_v19 = vpop.permute.xlu0 %712 }
 0x1a1   : > { %825 = vst.msk [vmem:[#allocation2 + $0x116] sm:$0xff] %vm772_vm5, %v713_v19  ;;  %v496_v23 = vpop.permute.xlu1 %495 }
 0x1a2   : > { %965 = vmatmul.f32.gmra.mxu0 %v855_v22  ;;  %1154 = vmatmul.f32.gmra.mxu1 %v855_v22  ;;  %607 = vst.msk [vmem:[#allocation2 + $0x11f] sm:$0x1] %vm555_vm6, %v496_v23 }
 0x1a3   : > { %1343 = vmatmul.f32.gmra.mxu2 %v855_v22  ;;  %1370 = vmatmul.f32.gmra.mxu3 %v2510_v62  ;;  %826 = vst.msk [vmem:[#allocation2 + $0x11e] sm:$0x3] %vm774_vm7, %v715_v20  ;;  %v921_v33 = vpop.f32.mrf.mxu0 }
 0x1a4   : > { %v1001_v51 = vadd.f32 %v2466_v54, %v921_v33 }
 0x1a5   : > { %v2559_v26 = vpop.f32.mrf.mxu3 }
 0x1a6   : > { %v1196_v3 = vadd.f32 %v1116_v43, %v1001_v51 }
 0x1a7   : > { %v1119_v1 = vpop.f32.mrf.mxu1 }
 0x1a8   : > { %v1251_v40 = vld [vmem:[#allocation2 + $0x110] sm:$0xff] }
 0x1aa   : > { %1157 = vmatmul.f32.gmra.mxu1 %v1048_v58  ;;  %v1252_v62 = vld [vmem:[#allocation2 + $0x118] sm:$0xff] }
 0x1ab   : > { %1346 = vmatmul.f32.gmra.mxu2 %v1048_v58  ;;  %1373 = vmatmul.f32.gmra.mxu3 %v2520_v5  ;;  %v924_v0 = vpop.f32.mrf.mxu0 }
 0x1ac   : > { %v1002_v9 = vadd.f32 %v2466_v54, %v924_v0 }
 0x1ae   : > { %v1308_v60 = vpop.f32.mrf.mxu2  ;;  %v2564_v45 = vpop.f32.mrf.mxu3  ;;  %v1197_v10 = vadd.f32 %v1119_v1, %v1002_v9  ;;  %v1017_v1 = vadd.f32 %v2466_v54, %v2514_v63  ;;  %v1018_v9 = vadd.f32 %v2466_v54, %v2522_v7 }
 0x1af   : > { %v1390_v38 = vadd.f32 %v1308_v60, %v1195_v31 }
 0x1b1   : > { %1422 = vst [vmem:[%s2474_s26 + $0x38] sm:$0xff] %v1390_v38 }
 0x1b2   : > { %1160 = vmatmul.f32.gmra.mxu1 %v1049_v48 }
 0x1b3   : > { %1349 = vmatmul.f32.gmra.mxu2 %v1049_v48  ;;  %1376 = vmatmul.f32.gmra.mxu3 %v1251_v40  ;;  %v927_v6 = vpop.f32.mrf.mxu0 }
 0x1b6   : > { %v2567_v2 = vpop.f32.mrf.mxu3  ;;  %v1122_v8 = vpop.f32.mrf.mxu1 }
 0x1b7   : > { %v1212_v51 = vadd.f32 %v2567_v2, %v1017_v1 }
 0x1bb   : > { %1352 = vmatmul.f32.gmra.mxu2 %v2349_v11  ;;  %1379 = vmatmul.f32.gmra.mxu3 %v1252_v62  ;;  %v1003_v11 = vadd.f32 %v2466_v54, %v927_v6  ;;  %v930_v16 = vpop.f32.mrf.mxu0 }
 0x1bd   : > { %v1311_v4 = vpop.f32.mrf.mxu2  ;;  %v1198_v18 = vadd.f32 %v1122_v8, %v1003_v11 }
 0x1be   : > { %v1391_v5 = vadd.f32 %v1311_v4, %v1196_v3  ;;  %v2573_v12 = vpop.f32.mrf.mxu3  ;;  %v1125_v17 = vpop.f32.mrf.mxu1 }
 0x1c0   : > { %1423 = vst [vmem:[%s2474_s26 + $0x40] sm:$0xff] %v1391_v5 }
 0x1c3   : > { %1355 = vmatmul.f32.gmra.mxu2 %v2370_v21  ;;  %v1004_v21 = vadd.f32 %v2466_v54, %v930_v16  ;;  %v933_v46 = vpop.f32.mrf.mxu0 }
 0x1c4   : > { %v1005_v39 = vadd.f32 %v2466_v54, %v933_v46 }
 0x1c5   : > { %v1314_v13 = vpop.f32.mrf.mxu2  ;;  %v1199_v30 = vadd.f32 %v1125_v17, %v1004_v21 }
 0x1c6   : > { %v1392_v15 = vadd.f32 %v1314_v13, %v1197_v10  ;;  %v2577_v27 = vpop.f32.mrf.mxu3  ;;  %v1128_v32 = vpop.f32.mrf.mxu1 }
 0x1c7   : > { %v1200_v41 = vadd.f32 %v1128_v32, %v1005_v39 }
 0x1c8   : > { %1424 = vst [vmem:[%s2474_s26 + $0x48] sm:$0xff] %v1392_v15  ;;  %v1213_v15 = vadd.f32 %v2573_v12, %v1018_v9 }
 0x1cb   : > { %v936_v42 = vpop.f32.mrf.mxu0 }
 0x1cc   : > { %v1006_v50 = vadd.f32 %v2466_v54, %v936_v42 }
 0x1cd   : > { %v1317_v24 = vpop.f32.mrf.mxu2 }
 0x1ce   : > { %v1393_v25 = vadd.f32 %v1317_v24, %v1198_v18  ;;  %v2582_v37 = vpop.f32.mrf.mxu3  ;;  %v1131_v49 = vpop.f32.mrf.mxu1  ;;  %v1019_v24 = vadd.f32 %v2466_v54, %v2529_v14 }
 0x1cf   : > { %v1201_v36 = vadd.f32 %v1131_v49, %v1006_v50  ;;  %v1021_v50 = vadd.f32 %v2466_v54, %v2545_v55 }
 0x1d0   : > { %1425 = vst [vmem:[%s2474_s26 + $0x50] sm:$0xff] %v1393_v25  ;;  %v1214_v21 = vadd.f32 %v2577_v27, %v1019_v24 }
 0x1d3   : > { %v939_v19 = vpop.f32.mrf.mxu0 }
 0x1d4   : > { %v1007_v22 = vadd.f32 %v2466_v54, %v939_v19 }
 0x1d5   : > { %v1320_v34 = vpop.f32.mrf.mxu2 }
 0x1d6   : > { %v1394_v35 = vadd.f32 %v1320_v34, %v1199_v30  ;;  %v2587_v52 = vpop.f32.mrf.mxu3  ;;  %v1134_v20 = vpop.f32.mrf.mxu1 }
 0x1d7   : > { %v1202_v23 = vadd.f32 %v1134_v20, %v1007_v22 }
 0x1d8   : > { %1426 = vst [vmem:[%s2474_s26 + $0x58] sm:$0xff] %v1394_v35  ;;  %v1020_v35 = vadd.f32 %v2466_v54, %v2538_v28 }
 0x1da   : > { %v1215_v14 = vadd.f32 %v2582_v37, %v1020_v35 }
 0x1db   : > { %v942_v59 = vpop.f32.mrf.mxu0 }
 0x1dc   : > { %v1008_v33 = vadd.f32 %v2466_v54, %v942_v59 }
 0x1dd   : > { %v1323_v44 = vpop.f32.mrf.mxu2 }
 0x1de   : > { %v1395_v47 = vadd.f32 %v1323_v44, %v1200_v41  ;;  %v2591_v61 = vpop.f32.mrf.mxu3  ;;  %v1137_v31 = vpop.f32.mrf.mxu1 }
 0x1df   : > { %v1203_v38 = vadd.f32 %v1137_v31, %v1008_v33 }
 0x1e0   : > { %1427 = vst [vmem:[%s2474_s26 + $0x60] sm:$0xff] %v1395_v47 }
 0x1e3   : > { %v945_v40 = vpop.f32.mrf.mxu0 }
 0x1e4   : > { %v1009_v8 = vadd.f32 %v2466_v54, %v945_v40 }
 0x1e5   : > { %v1326_v53 = vpop.f32.mrf.mxu2 }
 0x1e6   : > { %v1396_v56 = vadd.f32 %v1326_v53, %v1201_v36  ;;  %v1216_v53 = vadd.f32 %v2587_v52, %v1021_v50 }
 0x1e7   : > { %v1140_v0 = vpop.f32.mrf.mxu1 }
 0x1e8   : > { %1428 = vst [vmem:[%s2474_s26 + $0x68] sm:$0xff] %v1396_v56  ;;  %v1204_v10 = vadd.f32 %v1140_v0, %v1009_v8 }
 0x1eb   : > { %v948_v4 = vpop.f32.mrf.mxu0 }
 0x1ec   : > { %v1010_v18 = vadd.f32 %v2466_v54, %v948_v4 }
 0x1ed   : > { %v1329_v29 = vpop.f32.mrf.mxu2 }
 0x1ee   : > { %v1397_v58 = vadd.f32 %v1329_v29, %v1202_v23  ;;  %v1022_v23 = vadd.f32 %v2466_v54, %v2552_v57 }
 0x1f0   : > { %1429 = vst [vmem:[%s2474_s26 + $0x70] sm:$0xff] %v1397_v58  ;;  %v1217_v58 = vadd.f32 %v2591_v61, %v1022_v23 }
 0x1f3   : > { %v951_v16 = vpop.f32.mrf.mxu0 }
 0x1f4   : > { %v1011_v39 = vadd.f32 %v2466_v54, %v951_v16 }
 0x1f5   : > { %v2594_v60 = vpop.f32.mrf.mxu3 }
 0x1f7   : > { %v1143_v5 = vpop.f32.mrf.mxu1 }
 0x1f8   : > { %v1205_v25 = vadd.f32 %v1143_v5, %v1010_v18 }
 0x1fb   : > { %v954_v32 = vpop.f32.mrf.mxu0 }
 0x1fc   : > { %v1012_v36 = vadd.f32 %v2466_v54, %v954_v32 }
 0x1fd   : > { %v1332_v43 = vpop.f32.mrf.mxu2 }
 0x1fe   : > { %v1398_v48 = vadd.f32 %v1332_v43, %v1203_v38  ;;  %v2597_v62 = vpop.f32.mrf.mxu3  ;;  %v1023_v43 = vadd.f32 %v2466_v54, %v2559_v26 }
 0x200   : > { %1430 = vst [vmem:[%s2474_s26 + $0x78] sm:$0xff] %v1398_v48  ;;  %v1218_v48 = vadd.f32 %v2594_v60, %v1023_v43 }
 0x206   : > { %v1359_v3 = vpop.f32.mrf.mxu3  ;;  %v1146_v2 = vpop.f32.mrf.mxu1 }
 0x207   : > { %v1407_v6 = vadd.f32 %v1359_v3, %v1212_v51  ;;  %v1206_v41 = vadd.f32 %v1146_v2, %v1011_v39  ;;  %v957_v49 = vpop.f32.mrf.mxu0 }
 0x208   : > { %v1013_v29 = vadd.f32 %v2466_v54, %v957_v49 }
 0x209   : > { %1439 = vst [vmem:[%s2474_s26 + $0xc0] sm:$0xff] %v1407_v6  ;;  %v1024_v6 = vadd.f32 %v2466_v54, %v2564_v45 }
 0x20b   : > { %v1219_v8 = vadd.f32 %v2597_v62, %v1024_v6 }
 0x20c   : > { %v1335_v13 = vpop.f32.mrf.mxu2 }
 0x20d   : > { %v1399_v63 = vadd.f32 %v1335_v13, %v1204_v10 }
 0x20e   : > { %v1362_v11 = vpop.f32.mrf.mxu3  ;;  %v1149_v34 = vpop.f32.mrf.mxu1 }
 0x20f   : > { %1431 = vst [vmem:[%s2474_s26 + $0x80] sm:$0xff] %v1399_v63  ;;  %v1408_v17 = vadd.f32 %v1362_v11, %v1213_v15  ;;  %v1207_v56 = vadd.f32 %v1149_v34, %v1012_v36  ;;  %v960_v55 = vpop.f32.mrf.mxu0 }
 0x210   : > { %v1014_v57 = vadd.f32 %v2466_v54, %v960_v55 }
 0x211   : > { %1440 = vst [vmem:[%s2474_s26 + $0xc8] sm:$0xff] %v1408_v17 }
 0x214   : > { %v1338_v7 = vpop.f32.mrf.mxu2 }
 0x215   : > { %v1400_v46 = vadd.f32 %v1338_v7, %v1205_v25 }
 0x216   : > { %v1365_v12 = vpop.f32.mrf.mxu3 }
 0x217   : > { %1432 = vst [vmem:[%s2474_s26 + $0x88] sm:$0xff] %v1400_v46  ;;  %v1409_v30 = vadd.f32 %v1365_v12, %v1214_v21  ;;  %v1152_v28 = vpop.f32.mrf.mxu1  ;;  %v963_v0 = vpop.f32.mrf.mxu0 }
 0x218   : > { %v1208_v59 = vadd.f32 %v1152_v28, %v1013_v29  ;;  %v1015_v26 = vadd.f32 %v2466_v54, %v963_v0 }
 0x219   : > { %1441 = vst [vmem:[%s2474_s26 + $0xd0] sm:$0xff] %v1409_v30 }
 0x21e   : > { %v1341_v42 = vpop.f32.mrf.mxu2  ;;  %v1368_v27 = vpop.f32.mrf.mxu3 }
 0x21f   : > { %v1401_v44 = vadd.f32 %v1341_v42, %v1206_v41  ;;  %v1410_v47 = vadd.f32 %v1368_v27, %v1215_v14  ;;  %v1155_v31 = vpop.f32.mrf.mxu1  ;;  %v966_v63 = vpop.f32.mrf.mxu0 }
 0x220   : > { %v1209_v1 = vadd.f32 %v1155_v31, %v1014_v57  ;;  %v1016_v16 = vadd.f32 %v2466_v54, %v966_v63 }
 0x221   : > { %1433 = vst [vmem:[%s2474_s26 + $0x90] sm:$0xff] %v1401_v44 }
 0x222   : > { %1442 = vst [vmem:[%s2474_s26 + $0xd8] sm:$0xff] %v1410_v47 }
 0x226   : > { %v1344_v37 = vpop.f32.mrf.mxu2  ;;  %v1371_v19 = vpop.f32.mrf.mxu3 }
 0x227   : > { %v1402_v20 = vadd.f32 %v1344_v37, %v1207_v56  ;;  %v1411_v22 = vadd.f32 %v1371_v19, %v1216_v53  ;;  %v1158_v5 = vpop.f32.mrf.mxu1 }
 0x228   : > { %v1210_v60 = vadd.f32 %v1158_v5, %v1015_v26 }
 0x229   : > { %1434 = vst [vmem:[%s2474_s26 + $0x98] sm:$0xff] %v1402_v20 }
 0x22a   : > { %1443 = vst [vmem:[%s2474_s26 + $0xe0] sm:$0xff] %v1411_v22 }
 0x22e   : > { %v1347_v52 = vpop.f32.mrf.mxu2  ;;  %v1374_v33 = vpop.f32.mrf.mxu3 }
 0x22f   : > { %v1403_v38 = vadd.f32 %v1347_v52, %v1208_v59  ;;  %v1412_v40 = vadd.f32 %v1374_v33, %v1217_v58  ;;  %v1161_v11 = vpop.f32.mrf.mxu1 }
 0x230   : > { %v1211_v2 = vadd.f32 %v1161_v11, %v1016_v16 }
 0x231   : > { %1435 = vst [vmem:[%s2474_s26 + $0xa0] sm:$0xff] %v1403_v38 }
 0x232   : > { %1444 = vst [vmem:[%s2474_s26 + $0xe8] sm:$0xff] %v1412_v40 }
 0x236   : > { %v1350_v61 = vpop.f32.mrf.mxu2  ;;  %v1377_v51 = vpop.f32.mrf.mxu3 }
 0x237   : > { %v1404_v3 = vadd.f32 %v1350_v61, %v1209_v1  ;;  %v1413_v4 = vadd.f32 %v1377_v51, %v1218_v48 }
 0x239   : > { %1436 = vst [vmem:[%s2474_s26 + $0xa8] sm:$0xff] %v1404_v3 }
 0x23a   : > { %1445 = vst [vmem:[%s2474_s26 + $0xf0] sm:$0xff] %v1413_v4 }
 0x23e   : > { %v1353_v9 = vpop.f32.mrf.mxu2  ;;  %v1380_v10 = vpop.f32.mrf.mxu3 }
 0x23f   : > { %v1405_v13 = vadd.f32 %v1353_v9, %v1210_v60  ;;  %v1414_v15 = vadd.f32 %v1380_v10, %v1219_v8 }
 0x241   : > { %1437 = vst [vmem:[%s2474_s26 + $0xb0] sm:$0xff] %v1405_v13 }
 0x242   : > { %1446 = vst [vmem:[%s2474_s26 + $0xf8] sm:$0xff] %v1414_v15 }
 0x246   : > { %v1356_v17 = vpop.f32.mrf.mxu2 }
 0x247   : > { %v1406_v18 = vadd.f32 %v1356_v17, %v1211_v2 }
 0x249   : > { %1438 = vst [vmem:[%s2474_s26 + $0xb8] sm:$0xff] %v1406_v18 }
 0x24a PF: > { %s13_s16 = sadd.s32 1, %s1717_s16   ;;  %s2667_s12 = smov %s1709_s14 }
 0x24b   : > { %p10_p7 = scmp.ge.s32.totalorder %s13_s16, 18   ;;  %s2668_s13 = smov %s1713_s15 }
 0x24c   : > { %s2669_s14 = smov %s2672_s17  ;;  %s2670_s15 = smov %s2676_s18 }
 0x24d   :  { %12 = sbr.rel (!%p10_p7) target bundleno = 3 (0x3), region = 66 }

// kernel: a_call__.5
= control target key start
LH: loop header
LB: loop body
LE: loop exit
PB: predicated region body
PF: predicated region fallthrough
CT: control target
= control target key end

     0   :  { %9 = vsyncpa [#allocation5], 0  ;;  %s6115_s0 = inlined_call_operand.vmem [shape: f32[2,8,256,128], index: 0, kind: input, shape index: {}]   ;;  %s6116_s1 = inlined_call_operand.vmem [shape: f32[3,128,128], index: 1, kind: input, shape index: {}]   ;;  %s6117_s2 = inlined_call_operand.vmem [shape: f32[2,8,256,32], index: 2, kind: output, shape index: {0}]   ;;  %s6118_s3 = inlined_call_operand.hbm [shape: f32[2,256,32], index: 3, kind: output, shape index: {1}]  }
   0x1   :  { %11 = vsyncpa [#allocation5 + $0x1], 0  ;;  %s3710_s12 = smov 0   ;;  %s3712_s13 = smov 0  }
   0x2   :  { %s3714_s14 = smov 0   ;;  %s3716_s15 = smov 0  }
   0x3   :  { %s3718_s16 = smov 0   ;;  %s3720_s17 = smov 0  }
   0x4   :  { %s3722_s18 = smov 0   ;;  %s3724_s19 = smov 0  }
   0x5 LB: > { %s3150_s20 = sadd.s32 4294967295, %s3680_s19   ;;  %s3151_s21 = sadd.s32 4294967294, %s3680_s19   ;;  %s3680_s19 = sphi %s3724_s19, %s17_s19   ;;  %s3676_s18 = sphi %s3722_s18, %s6220_s18   ;;  %s3672_s17 = sphi %s3720_s17, %s6219_s17   ;;  %s3668_s16 = sphi %s3718_s16, %s6218_s16   ;;  %s3664_s15 = sphi %s3716_s15, %s6217_s15   ;;  %s3660_s14 = sphi %s3714_s14, %s6216_s14   ;;  %s3656_s13 = sphi %s3712_s13, %s6215_s13   ;;  %s3652_s12 = sphi %s3710_s12, %s6214_s12  }
   0x6   : > { %s26_s22 = sadd.s32 1, %s3672_s17  ;;  %s29_s23 = sadd.s32 1, %s3676_s18 }
   0x7   : > { %p27_p0 = scmp.ge.s32.totalorder %s26_s22, 8  ;;  %p123_p1 = scmp.ne.s32.totalorder %s3660_s14, %s3656_s13 }
   0x8   : > { %p124_p2 = scmp.eq.s32.totalorder %s3150_s20, 15  ;;  %p129_p4 = scmp.ne.s32.totalorder %s3656_s13, %s3652_s12 }
   0x9   : > { %s6222_s22 = smov (%p27_p0, %s26_s22), 0  ;;  %s6224_s23 = smov (!%p27_p0, %s29_s23), %s3676_s18 }
   0xa   : > { %p3759_p3 = por %p124_p2, %p123_p1  ;;  %p31_p5 = scmp.ge.s32.totalorder %s6224_s23, 2 }
   0xb   : > { %p130_p6 = scmp.eq.s32.totalorder %s3151_s21, 15  ;;  %p3154_p7 = scmp.ge.s32.totalorder %s3680_s19, 1 }
   0xc   : > { %p163_p8 = scmp.lt.s32.totalorder %s3680_s19, 17  ;;  %s6226_s23 = smov (%p31_p5, %s6224_s23), 0 }
   0xd   : > { %6121 = sst [smem:[#allocation7_spill]] %s6226_s23  ;;  %p3769_p9 = por %p130_p6, %p129_p4 }
   0xe   : > { %p164_p10 = pnand %p3154_p7, %p163_p8  ;;  %s110_s26 = ssub.s32 %s3676_s18, %s6226_s23 }
   0xf   : > { %s113_s27 = sadd.s32 1, %s3660_s14  ;;  %p111_p11 = scmp.eq.s32.totalorder %s110_s26, 0 }
  0x10   : > { %167 = sbr.rel (%p164_p10) target bundleno = 1318 (0x526), region = 28 }
  0x11   : > { %s3777_s28 = scalar_select %p111_p11, %s3660_s14, %s113_s27  }
  0x15   : > { %s197_s29 = sand.u32 1, %s3656_s13   ;;  %p200_p12 = scmp.lt.s32.totalorder %s3668_s16, 1 }
  0x16   : > { %s3155_s30 = sshll.u32 %s197_s29, 8  ;;  %p202_p13 = scmp.lt.s32.totalorder %s3664_s15, 7 }
  0x17   : > { %s201_s4 = scalar_select %p200_p12, %s3668_s16, 1 }
  0x18   : > { %s203_s5 = scalar_select %p202_p13, %s3664_s15, 7 }
  0x19   : > { %s3157_s6 = sshll.u32 %s201_s4, 8  ;;  %s3796_s23 = scalar_lea.vmem [#allocation4], %s3155_s30 }
  0x1a   : > { %s3156_s7 = sshll.u32 %s203_s5, 5  ;;  %p3162_p0 = scmp.ne.s32.totalorder %s3664_s15, 0 }
  0x1b   : > { %s206_s8 = sadd.s32 %s3157_s6, %s3156_s7 }
  0x1c   : > { %s3158_s9 = sshll.u32 %s206_s8, 3  ;;  %221 = sbr.rel (%p3162_p0) target bundleno = 102 (0x66), region = 32 }
  0x1d   : > { %s3789_s20 = scalar_lea.vmem %s6115_s0, %s3158_s9  ;;  %s3794_s27 = scalar_lea.vmem %s6117_s2, %s3158_s9 }
  0x21   : > { %v3682_v0 = vmov 0.0   ;;  %vm258_vm0 = vcmask 261120  }
  0x22   : > { %222 = vst [vmem:[#allocation2] sm:$0xff] %v3682_v0 }
  0x23   : > { %223 = vst [vmem:[#allocation2 + $0x8] sm:$0xff] %v3682_v0 }
  0x24   : > { %224 = vst [vmem:[#allocation2 + $0x10] sm:$0xff] %v3682_v0 }
  0x25   : > { %225 = vst [vmem:[#allocation2 + $0x18] sm:$0xff] %v3682_v0 }
  0x26   : > { %226 = vst [vmem:[#allocation2 + $0x20] sm:$0xff] %v3682_v0 }
  0x27   : > { %227 = vst [vmem:[#allocation2 + $0x28] sm:$0xff] %v3682_v0 }
  0x28   : > { %228 = vst [vmem:[#allocation2 + $0x30] sm:$0xff] %v3682_v0 }
  0x29   : > { %229 = vst [vmem:[#allocation2 + $0x38] sm:$0xff] %v3682_v0 }
  0x2a   : > { %230 = vst [vmem:[#allocation2 + $0x40] sm:$0xff] %v3682_v0 }
  0x2b   : > { %231 = vst [vmem:[#allocation2 + $0x48] sm:$0xff] %v3682_v0 }
  0x2c   : > { %232 = vst [vmem:[#allocation2 + $0x50] sm:$0xff] %v3682_v0 }
  0x2d   : > { %233 = vst [vmem:[#allocation2 + $0x58] sm:$0xff] %v3682_v0 }
  0x2e   : > { %234 = vst [vmem:[#allocation2 + $0x60] sm:$0xff] %v3682_v0 }
  0x2f   : > { %235 = vst [vmem:[#allocation2 + $0x68] sm:$0xff] %v3682_v0 }
  0x30   : > { %236 = vst [vmem:[#allocation2 + $0x70] sm:$0xff] %v3682_v0 }
  0x31   : > { %237 = vst [vmem:[#allocation2 + $0x78] sm:$0xff] %v3682_v0 }
  0x32   : > { %238 = vst [vmem:[#allocation2 + $0x80] sm:$0xff] %v3682_v0 }
  0x33   : > { %239 = vst [vmem:[#allocation2 + $0x88] sm:$0xff] %v3682_v0 }
  0x34   : > { %240 = vst [vmem:[#allocation2 + $0x90] sm:$0xff] %v3682_v0 }
  0x35   : > { %241 = vst [vmem:[#allocation2 + $0x98] sm:$0xff] %v3682_v0 }
  0x36   : > { %242 = vst [vmem:[#allocation2 + $0xa0] sm:$0xff] %v3682_v0 }
  0x37   : > { %243 = vst [vmem:[#allocation2 + $0xa8] sm:$0xff] %v3682_v0 }
  0x38   : > { %244 = vst [vmem:[#allocation2 + $0xb0] sm:$0xff] %v3682_v0 }
  0x39   : > { %245 = vst [vmem:[#allocation2 + $0xb8] sm:$0xff] %v3682_v0 }
  0x3a   : > { %246 = vst [vmem:[#allocation2 + $0xc0] sm:$0xff] %v3682_v0 }
  0x3b   : > { %247 = vst [vmem:[#allocation2 + $0xc8] sm:$0xff] %v3682_v0 }
  0x3c   : > { %248 = vst [vmem:[#allocation2 + $0xd0] sm:$0xff] %v3682_v0 }
  0x3d   : > { %249 = vst [vmem:[#allocation2 + $0xd8] sm:$0xff] %v3682_v0 }
  0x3e   : > { %250 = vst [vmem:[#allocation2 + $0xe0] sm:$0xff] %v3682_v0 }
  0x3f   : > { %251 = vst [vmem:[#allocation2 + $0xe8] sm:$0xff] %v3682_v0 }
  0x40   : > { %252 = vst [vmem:[#allocation2 + $0xf0] sm:$0xff] %v3682_v0 }
  0x41   : > { %253 = vst [vmem:[#allocation2 + $0xf8] sm:$0xff] %v3682_v0 }
  0x42   : > { %254 = vst [vmem:[#allocation2 + $0x100] sm:$0xff] %v3682_v0 }
  0x43   : > { %255 = vst [vmem:[#allocation2 + $0x108] sm:$0xff] %v3682_v0 }
  0x44   : > { %256 = vst [vmem:[#allocation2 + $0x110] sm:$0xff] %v3682_v0 }
  0x45   : > { %257 = vst [vmem:[#allocation2 + $0x118] sm:$0xff] %v3682_v0 }
  0x46   : > { %259 = vst.msk [vmem:[#allocation3] sm:$0xff] %vm258_vm0, %v3682_v0 }
  0x47   : > { %260 = vst.msk [vmem:[#allocation3 + $0x8] sm:$0xff] %vm258_vm0, %v3682_v0 }
  0x48   : > { %261 = vst.msk [vmem:[#allocation3 + $0x10] sm:$0xff] %vm258_vm0, %v3682_v0 }
  0x49   : > { %262 = vst.msk [vmem:[#allocation3 + $0x18] sm:$0xff] %vm258_vm0, %v3682_v0 }
  0x4a   : > { %263 = vst.msk [vmem:[#allocation3 + $0x20] sm:$0xff] %vm258_vm0, %v3682_v0 }
  0x4b   : > { %264 = vst.msk [vmem:[#allocation3 + $0x28] sm:$0xff] %vm258_vm0, %v3682_v0 }
  0x4c   : > { %265 = vst.msk [vmem:[#allocation3 + $0x30] sm:$0xff] %vm258_vm0, %v3682_v0 }
  0x4d   : > { %266 = vst.msk [vmem:[#allocation3 + $0x38] sm:$0xff] %vm258_vm0, %v3682_v0 }
  0x4e   : > { %267 = vst.msk [vmem:[#allocation3 + $0x40] sm:$0xff] %vm258_vm0, %v3682_v0 }
  0x4f   : > { %268 = vst.msk [vmem:[#allocation3 + $0x48] sm:$0xff] %vm258_vm0, %v3682_v0 }
  0x50   : > { %269 = vst.msk [vmem:[#allocation3 + $0x50] sm:$0xff] %vm258_vm0, %v3682_v0 }
  0x51   : > { %270 = vst.msk [vmem:[#allocation3 + $0x58] sm:$0xff] %vm258_vm0, %v3682_v0 }
  0x52   : > { %271 = vst.msk [vmem:[#allocation3 + $0x60] sm:$0xff] %vm258_vm0, %v3682_v0 }
  0x53   : > { %272 = vst.msk [vmem:[#allocation3 + $0x68] sm:$0xff] %vm258_vm0, %v3682_v0 }
  0x54   : > { %273 = vst.msk [vmem:[#allocation3 + $0x70] sm:$0xff] %vm258_vm0, %v3682_v0 }
  0x55   : > { %274 = vst.msk [vmem:[#allocation3 + $0x78] sm:$0xff] %vm258_vm0, %v3682_v0 }
  0x56   : > { %275 = vst.msk [vmem:[#allocation3 + $0x80] sm:$0xff] %vm258_vm0, %v3682_v0 }
  0x57   : > { %276 = vst.msk [vmem:[#allocation3 + $0x88] sm:$0xff] %vm258_vm0, %v3682_v0 }
  0x58   : > { %277 = vst.msk [vmem:[#allocation3 + $0x90] sm:$0xff] %vm258_vm0, %v3682_v0 }
  0x59   : > { %278 = vst.msk [vmem:[#allocation3 + $0x98] sm:$0xff] %vm258_vm0, %v3682_v0 }
  0x5a   : > { %279 = vst.msk [vmem:[#allocation3 + $0xa0] sm:$0xff] %vm258_vm0, %v3682_v0 }
  0x5b   : > { %280 = vst.msk [vmem:[#allocation3 + $0xa8] sm:$0xff] %vm258_vm0, %v3682_v0 }
  0x5c   : > { %281 = vst.msk [vmem:[#allocation3 + $0xb0] sm:$0xff] %vm258_vm0, %v3682_v0 }
  0x5d   : > { %282 = vst.msk [vmem:[#allocation3 + $0xb8] sm:$0xff] %vm258_vm0, %v3682_v0 }
  0x5e   : > { %283 = vst.msk [vmem:[#allocation3 + $0xc0] sm:$0xff] %vm258_vm0, %v3682_v0 }
  0x5f   : > { %284 = vst.msk [vmem:[#allocation3 + $0xc8] sm:$0xff] %vm258_vm0, %v3682_v0 }
  0x60   : > { %285 = vst.msk [vmem:[#allocation3 + $0xd0] sm:$0xff] %vm258_vm0, %v3682_v0 }
  0x61   : > { %286 = vst.msk [vmem:[#allocation3 + $0xd8] sm:$0xff] %vm258_vm0, %v3682_v0 }
  0x62   : > { %287 = vst.msk [vmem:[#allocation3 + $0xe0] sm:$0xff] %vm258_vm0, %v3682_v0 }
  0x63   : > { %288 = vst.msk [vmem:[#allocation3 + $0xe8] sm:$0xff] %vm258_vm0, %v3682_v0 }
  0x64   : > { %289 = vst.msk [vmem:[#allocation3 + $0xf0] sm:$0xff] %vm258_vm0, %v3682_v0 }
  0x65   : > { %290 = vst.msk [vmem:[#allocation3 + $0xf8] sm:$0xff] %vm258_vm0, %v3682_v0 }
  0x66 PF: > { %v370_v1 = vld [vmem:[%s6116_s1 + $0x78] sm:$0xff]  ;;  %v369_v3 = vld [vmem:[%s6116_s1 + $0x70] sm:$0xff]  ;;  %v368_v6 = vld [vmem:[%s6116_s1 + $0x68] sm:$0xff]  ;;  %s3683_s11 = smov 32   ;;  %s3685_s21 = smov 64  }
  0x67   : > { %v3905_v2 = vld [vmem:[%s6116_s1 + $0x178] sm:$0xff]  ;;  %3203 = vmatpush.msra.mxu3 %v370_v1  ;;  %v3914_v4 = vld [vmem:[%s6116_s1 + $0x170] sm:$0xff]  ;;  %371 = vmatpush.msra.mxu0 %v370_v1  ;;  %v3928_v7 = vld [vmem:[%s6116_s1 + $0x168] sm:$0xff]  ;;  %p3195_p1 = scmp.ge.s32.totalorder %s3664_s15, 7 }
  0x68   : > { %761 = vmatpush.msra.mxu2 %v3905_v2  ;;  %v3919_v5 = vld [vmem:[%s6116_s1 + $0xf8] sm:$0xff]  ;;  %v3933_v8 = vld [vmem:[%s6116_s1 + $0xf0] sm:$0xff]  ;;  %v3939_v9 = vld [vmem:[%s6116_s1 + $0xe8] sm:$0xff]  ;;  %s3686_s26 = smov (!%p3195_p1), 32  }
  0x69   : > { %566 = vmatpush.msra.mxu1 %v3919_v5  ;;  %3204 = vmatpush.msra.mxu3 %v369_v3  ;;  %v367_v10 = vld [vmem:[%s6116_s1 + $0x60] sm:$0xff]  ;;  %v366_v13 = vld [vmem:[%s6116_s1 + $0x58] sm:$0xff]  ;;  %v365_v16 = vld [vmem:[%s6116_s1 + $0x50] sm:$0xff] }
  0x6a   : > { %762 = vmatpush.msra.mxu2 %v3914_v4  ;;  %372 = vmatpush.msra.mxu0 %v369_v3  ;;  %v3948_v11 = vld [vmem:[%s6116_s1 + $0x160] sm:$0xff]  ;;  %v3963_v14 = vld [vmem:[%s6116_s1 + $0x158] sm:$0xff]  ;;  %v3978_v17 = vld [vmem:[%s6116_s1 + $0x150] sm:$0xff] }
  0x6b   : > { %567 = vmatpush.msra.mxu1 %v3933_v8  ;;  %3205 = vmatpush.msra.mxu3 %v368_v6  ;;  %v3954_v12 = vld [vmem:[%s6116_s1 + $0xe0] sm:$0xff]  ;;  %v3969_v15 = vld [vmem:[%s6116_s1 + $0xd8] sm:$0xff]  ;;  %v3984_v18 = vld [vmem:[%s6116_s1 + $0xd0] sm:$0xff] }
  0x6c   : > { %763 = vmatpush.msra.mxu2 %v3928_v7  ;;  %373 = vmatpush.msra.mxu0 %v368_v6  ;;  %v364_v19 = vld [vmem:[%s6116_s1 + $0x48] sm:$0xff]  ;;  %v363_v22 = vld [vmem:[%s6116_s1 + $0x40] sm:$0xff]  ;;  %v362_v25 = vld [vmem:[%s6116_s1 + $0x38] sm:$0xff] }
  0x6d   : > { %568 = vmatpush.msra.mxu1 %v3939_v9  ;;  %3206 = vmatpush.msra.mxu3 %v367_v10  ;;  %v3993_v20 = vld [vmem:[%s6116_s1 + $0x148] sm:$0xff]  ;;  %v4008_v23 = vld [vmem:[%s6116_s1 + $0x140] sm:$0xff]  ;;  %v4023_v26 = vld [vmem:[%s6116_s1 + $0x138] sm:$0xff] }
  0x6e   : > { %764 = vmatpush.msra.mxu2 %v3948_v11  ;;  %374 = vmatpush.msra.mxu0 %v367_v10  ;;  %v3999_v21 = vld [vmem:[%s6116_s1 + $0xc8] sm:$0xff]  ;;  %v4014_v24 = vld [vmem:[%s6116_s1 + $0xc0] sm:$0xff]  ;;  %v4029_v27 = vld [vmem:[%s6116_s1 + $0xb8] sm:$0xff] }
  0x6f   : > { %569 = vmatpush.msra.mxu1 %v3954_v12  ;;  %3207 = vmatpush.msra.mxu3 %v366_v13  ;;  %v361_v28 = vld [vmem:[%s6116_s1 + $0x30] sm:$0xff]  ;;  %v360_v31 = vld [vmem:[%s6116_s1 + $0x28] sm:$0xff]  ;;  %v359_v34 = vld [vmem:[%s6116_s1 + $0x20] sm:$0xff] }
  0x70   : > { %765 = vmatpush.msra.mxu2 %v3963_v14  ;;  %375 = vmatpush.msra.mxu0 %v366_v13  ;;  %v4038_v29 = vld [vmem:[%s6116_s1 + $0x130] sm:$0xff]  ;;  %v4053_v32 = vld [vmem:[%s6116_s1 + $0x128] sm:$0xff]  ;;  %v4068_v35 = vld [vmem:[%s6116_s1 + $0x120] sm:$0xff] }
  0x71   : > { %570 = vmatpush.msra.mxu1 %v3969_v15  ;;  %3208 = vmatpush.msra.mxu3 %v365_v16  ;;  %v4044_v30 = vld [vmem:[%s6116_s1 + $0xb0] sm:$0xff]  ;;  %v4059_v33 = vld [vmem:[%s6116_s1 + $0xa8] sm:$0xff]  ;;  %v4074_v36 = vld [vmem:[%s6116_s1 + $0xa0] sm:$0xff] }
  0x72   : > { %766 = vmatpush.msra.mxu2 %v3978_v17  ;;  %376 = vmatpush.msra.mxu0 %v365_v16  ;;  %v358_v37 = vld [vmem:[%s6116_s1 + $0x18] sm:$0xff]  ;;  %v357_v40 = vld [vmem:[%s6116_s1 + $0x10] sm:$0xff]  ;;  %v356_v43 = vld [vmem:[%s6116_s1 + $0x8] sm:$0xff] }
  0x73   : > { %571 = vmatpush.msra.mxu1 %v3984_v18  ;;  %3209 = vmatpush.msra.mxu3 %v364_v19  ;;  %v4083_v38 = vld [vmem:[%s6116_s1 + $0x118] sm:$0xff]  ;;  %v4098_v41 = vld [vmem:[%s6116_s1 + $0x110] sm:$0xff]  ;;  %v4113_v44 = vld [vmem:[%s6116_s1 + $0x108] sm:$0xff] }
  0x74   : > { %767 = vmatpush.msra.mxu2 %v3993_v20  ;;  %377 = vmatpush.msra.mxu0 %v364_v19  ;;  %v4089_v39 = vld [vmem:[%s6116_s1 + $0x98] sm:$0xff]  ;;  %v4104_v42 = vld [vmem:[%s6116_s1 + $0x90] sm:$0xff]  ;;  %v4119_v45 = vld [vmem:[%s6116_s1 + $0x88] sm:$0xff] }
  0x75   : > { %572 = vmatpush.msra.mxu1 %v3999_v21  ;;  %3210 = vmatpush.msra.mxu3 %v363_v22  ;;  %v355_v46 = vld [vmem:[%s6116_s1] sm:$0xff]  ;;  %v517_v52 = vld [vmem:[#allocation2 + $0x10] sm:$0xff]  ;;  %v4140_v53 = vld [vmem:[#allocation2 + $0xc8] sm:$0xff] }
  0x76   : > { %768 = vmatpush.msra.mxu2 %v4008_v23  ;;  %378 = vmatpush.msra.mxu0 %v363_v22  ;;  %v4128_v47 = vld [vmem:[%s6116_s1 + $0x100] sm:$0xff]  ;;  %v713_v54 = vld [vmem:[#allocation2 + $0x28] sm:$0xff]  ;;  %v518_v56 = vld [vmem:[#allocation2 + $0x18] sm:$0xff] }
  0x77   : > { %573 = vmatpush.msra.mxu1 %v4014_v24  ;;  %3211 = vmatpush.msra.mxu3 %v362_v25  ;;  %v4131_v48 = vld [vmem:[#allocation2 + $0xc0] sm:$0xff]  ;;  %v324_v55 = vld [vmem:[#allocation2 + $0x8] sm:$0xff]  ;;  %v4147_v57 = vld [vmem:[#allocation2 + $0xd0] sm:$0xff] }
  0x78   : > { %769 = vmatpush.msra.mxu2 %v4023_v26  ;;  %379 = vmatpush.msra.mxu0 %v362_v25  ;;  %v712_v49 = vld [vmem:[#allocation2 + $0x20] sm:$0xff]  ;;  %v714_v58 = vld [vmem:[#allocation2 + $0x30] sm:$0xff]  ;;  %v4155_v60 = vld [vmem:[#allocation2 + $0xd8] sm:$0xff] }
  0x79   : > { %574 = vmatpush.msra.mxu1 %v4029_v27  ;;  %3212 = vmatpush.msra.mxu3 %v361_v28  ;;  %v3163_v50 = vld [vmem:[%s6116_s1 + $0x80] sm:$0xff]  ;;  %v715_v61 = vld [vmem:[#allocation2 + $0x38] sm:$0xff]  ;;  %v1227_v62 = vld [vmem:[#allocation3 + $0x8] sm:$0xff] }
  0x7a   : > { %770 = vmatpush.msra.mxu2 %v4038_v29  ;;  %380 = vmatpush.msra.mxu0 %v361_v28  ;;  %v323_v51 = vld [vmem:[#allocation2] sm:$0xff]  ;;  %v1228_v63 = vld [vmem:[#allocation3 + $0x10] sm:$0xff]  ;;  %v4172_v6 = vld [vmem:[#allocation2 + $0xe8] sm:$0xff] }
  0x7b   : > { %575 = vmatpush.msra.mxu1 %v4044_v30  ;;  %3213 = vmatpush.msra.mxu3 %v360_v31  ;;  %v1226_v59 = vld [vmem:[#allocation3] sm:$0xff]  ;;  %v1233_v10 = vld [vmem:[#allocation3 + $0x38] sm:$0xff]  ;;  %v1236_v13 = vld [vmem:[#allocation3 + $0x50] sm:$0xff] }
  0x7c   : > { %771 = vmatpush.msra.mxu2 %v4053_v32  ;;  %381 = vmatpush.msra.mxu0 %v360_v31  ;;  %v4164_v0 = vld [vmem:[#allocation2 + $0xe0] sm:$0xff]  ;;  %v1237_v16 = vld [vmem:[#allocation3 + $0x58] sm:$0xff]  ;;  %v2064_v28 = vld [vmem:[#allocation3 + $0xa8] sm:$0xff] }
  0x7d   : > { %576 = vmatpush.msra.mxu1 %v4059_v33  ;;  %3214 = vmatpush.msra.mxu3 %v359_v34  ;;  %v716_v1 = vld [vmem:[#allocation2 + $0x40] sm:$0xff]  ;;  %v1241_v22 = vld [vmem:[#allocation3 + $0x78] sm:$0xff] }
  0x7e   : > { %772 = vmatpush.msra.mxu2 %v4068_v35  ;;  %382 = vmatpush.msra.mxu0 %v359_v34  ;;  %v1230_v3 = vld [vmem:[#allocation3 + $0x20] sm:$0xff]  ;;  %v723_v31 = vld [vmem:[#allocation2 + $0x78] sm:$0xff]  ;;  %v2065_v34 = vld [vmem:[#allocation3 + $0xb0] sm:$0xff] }
  0x7f   : > { %577 = vmatpush.msra.mxu1 %v4074_v36  ;;  %3215 = vmatpush.msra.mxu3 %v358_v37  ;;  %v720_v19 = vld [vmem:[#allocation2 + $0x60] sm:$0xff] }
  0x80   : > { %773 = vmatpush.msra.mxu2 %v4083_v38  ;;  %383 = vmatpush.msra.mxu0 %v358_v37  ;;  %v2063_v25 = vld [vmem:[#allocation3 + $0xa0] sm:$0xff]  ;;  %v2072_v37 = vld [vmem:[#allocation3 + $0xe8] sm:$0xff] }
  0x81   : > { %578 = vmatpush.msra.mxu1 %v4089_v39  ;;  %3216 = vmatpush.msra.mxu3 %v357_v40 }
  0x82   : > { %774 = vmatpush.msra.mxu2 %v4098_v41  ;;  %384 = vmatpush.msra.mxu0 %v357_v40  ;;  %v2073_v40 = vld [vmem:[#allocation3 + $0xf0] sm:$0xff] }
  0x83   : > { %579 = vmatpush.msra.mxu1 %v4104_v42  ;;  %3217 = vmatpush.msra.mxu3 %v356_v43 }
  0x84   : > { %775 = vmatpush.msra.mxu2 %v4113_v44  ;;  %385 = vmatpush.msra.mxu0 %v356_v43  ;;  %v726_v43 = vld [vmem:[#allocation2 + $0x90] sm:$0xff] }
  0x85   : > { %580 = vmatpush.msra.mxu1 %v4119_v45  ;;  %3218 = vmatpush.msra.mxu3 %v355_v46 }
  0x86   : > { %776 = vmatpush.msra.mxu2 %v4128_v47  ;;  %459 = vmatmul.f32.vlgmr.msra.gmra.mxu3 %v4131_v48 }
  0x87   : > { %777 = vmatmul.f32.vlgmr.msra.gmra.mxu2 %v712_v49  ;;  %386 = vmatpush.msra.mxu0 %v355_v46  ;;  %v727_v46 = vld [vmem:[#allocation2 + $0x98] sm:$0xff] }
  0x88   : > { %581 = vmatpush.msra.mxu1 %v3163_v50  ;;  %387 = vmatmul.f32.vlgmr.msra.gmra.mxu0 %v323_v51 }
  0x89   : > { %582 = vmatmul.f32.vlgmr.msra.gmra.mxu1 %v517_v52  ;;  %3219 = vmatpush.msrb.mxu3 %v3919_v5  ;;  %v1229_v5 = vld [vmem:[#allocation3 + $0x18] sm:$0xff] }
  0x8a   : > { %1258 = vrot.lane.b32.xlu0 %v1226_v59, %s3683_s11  ;;  %1262 = vrot.lane.b32.xlu1 %v1228_v63, %s3683_s11  ;;  %v292_v59 = vld [vmem:[%s3789_s20 + $0x8] sm:$0xff] }
  0x8b   : > { %3220 = vmatpush.msrb.mxu3 %v3933_v8  ;;  %1266 = vrot.lane.b32.xlu2 %v1230_v3, %s3683_s11  ;;  %v717_v8 = vld [vmem:[#allocation2 + $0x48] sm:$0xff] }
  0x8d   : > { %3221 = vmatpush.msrb.mxu3 %v3939_v9  ;;  %v1231_v9 = vld [vmem:[#allocation3 + $0x28] sm:$0xff] }
  0x8e   : > { %462 = vmatmul.f32.gmra.mxu3 %v4140_v53 }
  0x8f   : > { %780 = vmatmul.f32.gmra.mxu2 %v713_v54  ;;  %3222 = vmatpush.msrb.mxu3 %v3954_v12  ;;  %v1232_v12 = vld [vmem:[#allocation3 + $0x30] sm:$0xff] }
  0x90   : > { %390 = vmatmul.f32.gmra.mxu0 %v324_v55 }
  0x91   : > { %585 = vmatmul.f32.gmra.mxu1 %v518_v56  ;;  %3223 = vmatpush.msrb.mxu3 %v3969_v15  ;;  %v1235_v15 = vld [vmem:[#allocation3 + $0x48] sm:$0xff] }
  0x92   : > { %1260 = vrot.lane.b32.xlu0 %v1227_v62, %s3683_s11  ;;  %1264 = vrot.lane.b32.xlu1 %v1229_v5, %s3683_s11 }
  0x93   : > { %3224 = vmatpush.msrb.mxu3 %v3984_v18  ;;  %1268 = vrot.lane.b32.xlu2 %v1231_v9, %s3683_s11  ;;  %v1238_v18 = vld [vmem:[#allocation3 + $0x60] sm:$0xff] }
  0x95   : > { %3225 = vmatpush.msrb.mxu3 %v3999_v21  ;;  %v2060_v21 = vld [vmem:[#allocation3 + $0x88] sm:$0xff] }
  0x96   : > { %465 = vmatmul.f32.gmra.mxu3 %v4147_v57 }
  0x97   : > { %783 = vmatmul.f32.gmra.mxu2 %v714_v58  ;;  %3226 = vmatpush.msrb.mxu3 %v4014_v24  ;;  %v2061_v24 = vld [vmem:[#allocation3 + $0x90] sm:$0xff] }
  0x98   : > { %393 = vmatmul.f32.gmra.mxu0 %v517_v52 }
  0x99   : > { %588 = vmatmul.f32.gmra.mxu1 %v712_v49  ;;  %3227 = vmatpush.msrb.mxu3 %v4029_v27  ;;  %v722_v27 = vld [vmem:[#allocation2 + $0x70] sm:$0xff] }
  0x9a   : > { %1272 = vrot.lane.b32.xlu1 %v1233_v10, %s3683_s11  ;;  %1270 = vrot.lane.b32.xlu0 %v1232_v12, %s3683_s11  ;;  %v293_v10 = vld [vmem:[%s3789_s20 + $0x10] sm:$0xff] }
  0x9b   : > { %3228 = vmatpush.msrb.mxu3 %v4044_v30  ;;  %v2062_v30 = vld [vmem:[#allocation3 + $0x98] sm:$0xff]  ;;  %v4256_v12 = vld [vmem:[#allocation2 + $0xb0] sm:$0xff] }
  0x9d   : > { %3229 = vmatpush.msrb.mxu3 %v4059_v33  ;;  %v2069_v33 = vld [vmem:[#allocation3 + $0xd0] sm:$0xff] }
  0x9e   : > { %468 = vmatmul.f32.gmra.mxu3 %v4155_v60 }
  0x9f   : > { %786 = vmatmul.f32.gmra.mxu2 %v715_v61  ;;  %3230 = vmatpush.msrb.mxu3 %v4074_v36  ;;  %v2070_v36 = vld [vmem:[#allocation3 + $0xd8] sm:$0xff] }
  0xa0   : > { %396 = vmatmul.f32.gmra.mxu0 %v518_v56 }
  0xa1   : > { %591 = vmatmul.f32.gmra.mxu1 %v713_v54  ;;  %3231 = vmatpush.msrb.mxu3 %v4089_v39  ;;  %v725_v39 = vld [vmem:[#allocation2 + $0x88] sm:$0xff] }
  0xa2   : > { %1278 = vrot.lane.b32.xlu1 %v1236_v13, %s3683_s11  ;;  %1276 = vrot.lane.b32.xlu0 %v1235_v15, %s3683_s11 }
  0xa3   : > { %3232 = vmatpush.msrb.mxu3 %v4104_v42  ;;  %v4226_v42 = vld [vmem:[#allocation2 + $0x100] sm:$0xff] }
  0xa5   : > { %3233 = vmatpush.msrb.mxu3 %v4119_v45  ;;  %v4231_v45 = vld [vmem:[#allocation2 + $0x108] sm:$0xff] }
  0xa6   : > { %471 = vmatmul.f32.gmra.mxu3 %v4164_v0 }
  0xa7   : > { %789 = vmatmul.f32.gmra.mxu2 %v716_v1  ;;  %3234 = vmatpush.msrb.mxu3 %v3163_v50 }
  0xa8   : > { %399 = vmatmul.f32.gmra.mxu0 %v712_v49  ;;  %v4236_v49 = vld [vmem:[#allocation2 + $0xa0] sm:$0xff] }
  0xa9   : > { %594 = vmatmul.f32.gmra.mxu1 %v714_v58  ;;  %3235 = vmatpush.msra.mxu3 %v3905_v2  ;;  %v4181_v2 = vld [vmem:[#allocation2 + $0xf0] sm:$0xff] }
  0xaa   : > { %1282 = vrot.lane.b32.xlu0 %v1238_v18, %s3683_s11  ;;  %v294_v18 = vld [vmem:[%s3789_s20 + $0x18] sm:$0xff] }
  0xab   : > { %3236 = vmatpush.msra.mxu3 %v3914_v4  ;;  %v718_v4 = vld [vmem:[#allocation2 + $0x50] sm:$0xff] }
  0xad   : > { %3237 = vmatpush.msra.mxu3 %v3928_v7  ;;  %v1234_v7 = vld [vmem:[#allocation3 + $0x40] sm:$0xff] }
  0xae   : > { %474 = vmatmul.f32.gmra.mxu3 %v4172_v6  ;;  %1274 = vrot.lane.b32.xlu2 %v1234_v7, %s3683_s11 }
  0xaf   : > { %792 = vmatmul.f32.gmra.mxu2 %v717_v8  ;;  %3238 = vmatpush.msra.mxu3 %v3948_v11  ;;  %v4190_v11 = vld [vmem:[#allocation2 + $0xf8] sm:$0xff] }
  0xb0   : > { %402 = vmatmul.f32.gmra.mxu0 %v713_v54 }
  0xb1   : > { %597 = vmatmul.f32.gmra.mxu1 %v715_v61  ;;  %3239 = vmatpush.msra.mxu3 %v3963_v14  ;;  %v719_v14 = vld [vmem:[#allocation2 + $0x58] sm:$0xff] }
  0xb2   : > { %1288 = vrot.lane.b32.xlu0 %v1241_v22, %s3683_s11 }
  0xb3   : > { %3240 = vmatpush.msra.mxu3 %v3978_v17  ;;  %v1239_v17 = vld [vmem:[#allocation3 + $0x68] sm:$0xff] }
  0xb4   : > { %1284 = vrot.lane.b32.xlu1 %v1239_v17, %s3683_s11 }
  0xb5   : > { %3241 = vmatpush.msra.mxu3 %v3993_v20  ;;  %v1240_v20 = vld [vmem:[#allocation3 + $0x70] sm:$0xff] }
  0xb6   : > { %477 = vmatmul.f32.gmra.mxu3 %v4181_v2  ;;  %1280 = vrot.lane.b32.xlu2 %v1237_v16, %s3683_s11 }
  0xb7   : > { %795 = vmatmul.f32.gmra.mxu2 %v718_v4  ;;  %3242 = vmatpush.msra.mxu3 %v4008_v23  ;;  %v721_v23 = vld [vmem:[#allocation2 + $0x68] sm:$0xff] }
  0xb8   : > { %405 = vmatmul.f32.gmra.mxu0 %v714_v58 }
  0xb9   : > { %600 = vmatmul.f32.gmra.mxu1 %v716_v1  ;;  %3243 = vmatpush.msra.mxu3 %v4023_v26  ;;  %v2059_v26 = vld [vmem:[#allocation3 + $0x80] sm:$0xff] }
  0xba   : > { %2091 = vrot.lane.b32.xlu0 %v2059_v26, %s3683_s11 }
  0xbb   : > { %3244 = vmatpush.msra.mxu3 %v4038_v29  ;;  %v2066_v29 = vld [vmem:[#allocation3 + $0xb8] sm:$0xff] }
  0xbc   : > { %2093 = vrot.lane.b32.xlu1 %v2060_v21, %s3683_s11 }
  0xbd   : > { %3245 = vmatpush.msra.mxu3 %v4053_v32  ;;  %v2067_v32 = vld [vmem:[#allocation3 + $0xc0] sm:$0xff] }
  0xbe   : > { %480 = vmatmul.f32.gmra.mxu3 %v4190_v11  ;;  %1286 = vrot.lane.b32.xlu2 %v1240_v20, %s3683_s11 }
  0xbf   : > { %798 = vmatmul.f32.gmra.mxu2 %v719_v14  ;;  %3246 = vmatpush.msra.mxu3 %v4068_v35  ;;  %v724_v35 = vld [vmem:[#allocation2 + $0x80] sm:$0xff] }
  0xc0   : > { %408 = vmatmul.f32.gmra.mxu0 %v715_v61  ;;  %v4245_v61 = vld [vmem:[#allocation2 + $0xa8] sm:$0xff] }
  0xc1   : > { %603 = vmatmul.f32.gmra.mxu1 %v717_v8  ;;  %3247 = vmatpush.msra.mxu3 %v4083_v38  ;;  %v2068_v38 = vld [vmem:[#allocation3 + $0xc8] sm:$0xff] }
  0xc2   : > { %2097 = vrot.lane.b32.xlu0 %v2062_v30, %s3683_s11  ;;  %v295_v30 = vld [vmem:[%s3789_s20 + $0x20] sm:$0xff] }
  0xc3   : > { %3248 = vmatpush.msra.mxu3 %v4098_v41  ;;  %v2071_v41 = vld [vmem:[#allocation3 + $0xe0] sm:$0xff] }
  0xc4   : > { %2099 = vrot.lane.b32.xlu1 %v2063_v25, %s3683_s11 }
  0xc5   : > { %3249 = vmatpush.msra.mxu3 %v4113_v44  ;;  %v2074_v44 = vld [vmem:[#allocation3 + $0xf8] sm:$0xff] }
  0xc6   : > { %654 = vmatmul.f32.vlgmr.msrb.gmra.mxu3 %v4147_v57  ;;  %2095 = vrot.lane.b32.xlu2 %v2061_v24, %s3683_s11 }
  0xc7   : > { %801 = vmatmul.f32.gmra.mxu2 %v720_v19  ;;  %3250 = vmatpush.msra.mxu3 %v4128_v47  ;;  %v291_v47 = vld [vmem:[%s3789_s20] sm:$0xff] }
  0xc8   : > { %411 = vmatmul.f32.gmra.mxu0 %v716_v1 }
  0xc9   : > { %606 = vmatmul.f32.gmra.mxu1 %v718_v4 }
  0xca   : > { %2103 = vrot.lane.b32.xlu0 %v2065_v34, %s3683_s11 }
  0xcc   : > { %2105 = vrot.lane.b32.xlu1 %v2066_v29, %s3683_s11 }
  0xce   : > { %657 = vmatmul.f32.gmra.mxu3 %v4155_v60  ;;  %2101 = vrot.lane.b32.xlu2 %v2064_v28, %s3683_s11 }
  0xcf   : > { %804 = vmatmul.f32.gmra.mxu2 %v721_v23 }
  0xd0   : > { %414 = vmatmul.f32.gmra.mxu0 %v717_v8 }
  0xd1   : > { %609 = vmatmul.f32.gmra.mxu1 %v719_v14 }
  0xd2   : > { %2109 = vrot.lane.b32.xlu0 %v2068_v38, %s3683_s11 }
  0xd4   : > { %2111 = vrot.lane.b32.xlu1 %v2069_v33, %s3683_s11 }
  0xd6   : > { %660 = vmatmul.f32.gmra.mxu3 %v4164_v0  ;;  %2107 = vrot.lane.b32.xlu2 %v2067_v32, %s3683_s11 }
  0xd7   : > { %807 = vmatmul.f32.gmra.mxu2 %v722_v27 }
  0xd8   : > { %417 = vmatmul.f32.gmra.mxu0 %v718_v4 }
  0xd9   : > { %612 = vmatmul.f32.gmra.mxu1 %v720_v19 }
  0xda   : > { %2115 = vrot.lane.b32.xlu0 %v2071_v41, %s3683_s11 }
  0xdc   : > { %2117 = vrot.lane.b32.xlu1 %v2072_v37, %s3683_s11 }
  0xde   : > { %663 = vmatmul.f32.gmra.mxu3 %v4172_v6  ;;  %2113 = vrot.lane.b32.xlu2 %v2070_v36, %s3683_s11 }
  0xdf   : > { %810 = vmatmul.f32.gmra.mxu2 %v723_v31 }
  0xe0   : > { %420 = vmatmul.f32.gmra.mxu0 %v719_v14 }
  0xe1   : > { %615 = vmatmul.f32.gmra.mxu1 %v721_v23 }
  0xe2   : > { %2121 = vrot.lane.b32.xlu0 %v2074_v44, %s3683_s11 }
  0xe5   : > { %v4282_v29 = vpop.permute.xlu2 %1266 }
  0xe6   : > { %666 = vmatmul.f32.gmra.mxu3 %v4181_v2  ;;  %2119 = vrot.lane.b32.xlu2 %v2073_v40, %s3683_s11  ;;  %v296_v40 = vld [vmem:[%s3789_s20 + $0x28] sm:$0xff] }
  0xe7   : > { %813 = vmatmul.f32.gmra.mxu2 %v724_v35 }
  0xe8   : > { %423 = vmatmul.f32.gmra.mxu0 %v720_v19  ;;  %v4268_v19 = vld [vmem:[#allocation2 + $0xb8] sm:$0xff] }
  0xe9   : > { %618 = vmatmul.f32.gmra.mxu1 %v722_v27 }
  0xed   : > { %v4302_v41 = vpop.permute.xlu2 %1268 }
  0xee   : > { %669 = vmatmul.f32.gmra.mxu3 %v4190_v11 }
  0xef   : > { %816 = vmatmul.f32.gmra.mxu2 %v725_v39 }
  0xf0   : > { %426 = vmatmul.f32.gmra.mxu0 %v721_v23 }
  0xf1   : > { %621 = vmatmul.f32.gmra.mxu1 %v723_v31 }
  0xf6   : > { %672 = vmatmul.f32.gmra.mxu3 %v4226_v42 }
  0xf7   : > { %819 = vmatmul.f32.gmra.mxu2 %v726_v43 }
  0xf8   : > { %429 = vmatmul.f32.gmra.mxu0 %v722_v27 }
  0xf9   : > { %624 = vmatmul.f32.gmra.mxu1 %v724_v35 }
  0xfc   : > { %v4274_v23 = vpop.permute.xlu0 %1258  ;;  %v4276_v24 = vpop.permute.xlu1 %1262 }
  0xfe   : > { %675 = vmatmul.f32.gmra.mxu3 %v4231_v45 }
  0xff   : > { %822 = vmatmul.f32.gmra.mxu2 %v727_v46 }
 0x100   : > { %432 = vmatmul.f32.gmra.mxu0 %v723_v31 }
 0x101   : > { %627 = vmatmul.f32.gmra.mxu1 %v725_v39 }
 0x104   : > { %v4295_v38 = vpop.permute.xlu0 %1260 }
 0x105   : > { %v388_v50 = vpop.f32.mrf.mxu0 }
 0x106   : > { %v583_v51 = vpop.f32.mrf.mxu1  ;;  %v484_v52 = vadd.f32 %v388_v50, %v291_v47  ;;  %849 = vmatmul.f32.vlgmr.msra.gmra.mxu3 %v4164_v0 }
 0x107   : > { %825 = vmatmul.f32.gmra.mxu2 %v4236_v49 }
 0x108   : > { %v679_v54 = vadd.f32 %v583_v51, %v484_v52  ;;  %435 = vmatmul.f32.gmra.mxu0 %v724_v35 }
 0x109   : > { %630 = vmatmul.f32.gmra.mxu1 %v726_v43  ;;  %v4240_v55 = vpop.f32.mrf.mxu3 }
 0x10a   : > { %v778_v56 = vpop.f32.mrf.mxu2 }
 0x10b   : > { %v4242_v58 = vadd.f32 %v778_v56, %v679_v54  ;;  %v297_v54 = vld [vmem:[%s3789_s20 + $0x30] sm:$0xff] }
 0x10c   : > { %v4312_v52 = vpop.permute.xlu0 %1270  ;;  %v742_v56 = vld [vmem:[#allocation2 + $0x110] sm:$0xff] }
 0x10d   : > { %3330 = vtanh.f32 %v4242_v58  ;;  %v391_v62 = vpop.f32.mrf.mxu0 }
 0x10e   : > { %v586_v63 = vpop.f32.mrf.mxu1  ;;  %v485_v1 = vadd.f32 %v391_v62, %v292_v59  ;;  %852 = vmatmul.f32.gmra.mxu3 %v4172_v6  ;;  %v4319_v62 = vpop.permute.xlu2 %1274 }
 0x10f   : > { %828 = vmatmul.f32.gmra.mxu2 %v4245_v61 }
 0x110   : > { %v680_v0 = vadd.f32 %v586_v63, %v485_v1  ;;  %438 = vmatmul.f32.gmra.mxu0 %v725_v39  ;;  %v4297_v39 = vpop.permute.xlu1 %1264 }
 0x111   : > { %633 = vmatmul.f32.gmra.mxu1 %v727_v46  ;;  %v4250_v3 = vpop.f32.mrf.mxu3 }
 0x112   : > { %v781_v5 = vpop.f32.mrf.mxu2 }
 0x113   : > { %v3331_v8 = vpop.eup %3330  ;;  %v4252_v9 = vadd.f32 %v781_v5, %v680_v0 }
 0x114   : > { %1338 = vrot.lane.b32.xlu1 %v3331_v8, %s3683_s11 }
 0x115   : > { %3332 = vtanh.f32 %v4252_v9  ;;  %v394_v4 = vpop.f32.mrf.mxu0 }
 0x116   : > { %v589_v7 = vpop.f32.mrf.mxu1  ;;  %v486_v6 = vadd.f32 %v394_v4, %v293_v10  ;;  %855 = vmatmul.f32.gmra.mxu3 %v4181_v2  ;;  %v298_v4 = vld [vmem:[%s3789_s20 + $0x38] sm:$0xff] }
 0x117   : > { %831 = vmatmul.f32.gmra.mxu2 %v4256_v12 }
 0x118   : > { %v681_v13 = vadd.f32 %v589_v7, %v486_v6  ;;  %441 = vmatmul.f32.gmra.mxu0 %v726_v43  ;;  %v743_v7 = vld [vmem:[#allocation2 + $0x118] sm:$0xff]  ;;  %v4331_v6 = vpop.permute.xlu0 %1276 }
 0x119   : > { %636 = vmatmul.f32.gmra.mxu1 %v4236_v49  ;;  %v4262_v15 = vpop.f32.mrf.mxu3 }
 0x11a   : > { %v784_v14 = vpop.f32.mrf.mxu2 }
 0x11b   : > { %v3333_v16 = vpop.eup %3332  ;;  %v4264_v17 = vadd.f32 %v784_v14, %v681_v13  ;;  %v4336_v14 = vpop.permute.xlu2 %1280 }
 0x11c   : > { %1340 = vrot.lane.b32.xlu2 %v3333_v16, %s3683_s11  ;;  %6124 = vst [vmem:[#allocation9_spill] sm:$0xff] %v4336_v14 }
 0x11d   : > { %3334 = vtanh.f32 %v4264_v17  ;;  %v397_v20 = vpop.f32.mrf.mxu0 }
 0x11e   : > { %v592_v2 = vpop.f32.mrf.mxu1  ;;  %v487_v21 = vadd.f32 %v397_v20, %v294_v18  ;;  %858 = vmatmul.f32.gmra.mxu3 %v4190_v11 }
 0x11f   : > { %834 = vmatmul.f32.gmra.mxu2 %v4268_v19 }
 0x120   : > { %v682_v22 = vadd.f32 %v592_v2, %v487_v21  ;;  %444 = vmatmul.f32.gmra.mxu0 %v727_v46 }
 0x121   : > { %639 = vmatmul.f32.gmra.mxu1 %v4245_v61  ;;  %v4278_v25 = vpop.f32.mrf.mxu3 }
 0x122   : > { %v787_v26 = vpop.f32.mrf.mxu2 }
 0x123   : > { %v3335_v27 = vpop.eup %3334  ;;  %v4280_v28 = vadd.f32 %v787_v26, %v682_v22 }
 0x124   : > { %1342 = vrot.lane.b32.xlu0 %v3335_v27, %s3683_s11 }
 0x125   : > { %3336 = vtanh.f32 %v4280_v28  ;;  %v400_v11 = vpop.f32.mrf.mxu0 }
 0x126   : > { %v595_v31 = vpop.f32.mrf.mxu1  ;;  %v488_v32 = vadd.f32 %v400_v11, %v295_v30  ;;  %861 = vmatmul.f32.gmra.mxu3 %v4226_v42  ;;  %v4347_v30 = vpop.permute.xlu0 %1282 }
 0x127   : > { %837 = vmatmul.f32.gmra.mxu2 %v4131_v48 }
 0x128   : > { %v683_v33 = vadd.f32 %v595_v31, %v488_v32  ;;  %447 = vmatmul.f32.gmra.mxu0 %v4236_v49 }
 0x129   : > { %642 = vmatmul.f32.gmra.mxu1 %v4256_v12  ;;  %v4291_v34 = vpop.f32.mrf.mxu3 }
 0x12a   : > { %v790_v35 = vpop.f32.mrf.mxu2 }
 0x12b   : > { %v3337_v36 = vpop.eup %3336  ;;  %v4293_v37 = vadd.f32 %v790_v35, %v683_v33  ;;  %v4353_v33 = vpop.permute.xlu2 %1286 }
 0x12c   : > { %1344 = vrot.lane.b32.xlu1 %v3337_v36, %s3683_s11  ;;  %6126 = vst [vmem:[#allocation11_spill] sm:$0xff] %v4353_v33  ;;  %v300_v36 = vld [vmem:[%s3789_s20 + $0x48] sm:$0xff] }
 0x12d   : > { %3338 = vtanh.f32 %v4293_v37  ;;  %v403_v42 = vpop.f32.mrf.mxu0 }
 0x12e   : > { %v598_v43 = vpop.f32.mrf.mxu1  ;;  %v489_v44 = vadd.f32 %v403_v42, %v296_v40  ;;  %864 = vmatmul.f32.gmra.mxu3 %v4231_v45  ;;  %v4317_v45 = vpop.permute.xlu1 %1272  ;;  %v316_v40 = vld [vmem:[%s3789_s20 + $0xc8] sm:$0xff] }
 0x12f   : > { %840 = vmatmul.f32.gmra.mxu2 %v4140_v53 }
 0x130   : > { %v684_v46 = vadd.f32 %v598_v43, %v489_v44  ;;  %450 = vmatmul.f32.gmra.mxu0 %v4245_v61 }
 0x131   : > { %645 = vmatmul.f32.gmra.mxu1 %v4268_v19  ;;  %v4308_v47 = vpop.f32.mrf.mxu3 }
 0x132   : > { %v793_v49 = vpop.f32.mrf.mxu2 }
 0x133   : > { %v3339_v50 = vpop.eup %3338  ;;  %v4310_v51 = vadd.f32 %v793_v49, %v684_v46  ;;  %v509_v46 = vadd.f32 %v4250_v3, %v316_v40  ;;  %v317_v3 = vld [vmem:[%s3789_s20 + $0xd0] sm:$0xff] }
 0x134   : > { %1346 = vrot.lane.b32.xlu2 %v3339_v50, %s3683_s11  ;;  %v4362_v50 = vpop.permute.xlu0 %1288 }
 0x135   : > { %3340 = vtanh.f32 %v4310_v51  ;;  %v406_v59 = vpop.f32.mrf.mxu0  ;;  %6127 = vst [vmem:[#allocation12_spill] sm:$0xff] %v4362_v50 }
 0x136   : > { %v601_v61 = vpop.f32.mrf.mxu1  ;;  %v490_v63 = vadd.f32 %v406_v59, %v297_v54  ;;  %867 = vmatmul.f32.gmra.mxu3 %v742_v56 }
 0x137   : > { %843 = vmatmul.f32.gmra.mxu2 %v4147_v57 }
 0x138   : > { %v685_v1 = vadd.f32 %v601_v61, %v490_v63  ;;  %453 = vmatmul.f32.gmra.mxu0 %v4256_v12 }
 0x139   : > { %648 = vmatmul.f32.gmra.mxu1 %v4131_v48  ;;  %v4324_v0 = vpop.f32.mrf.mxu3  ;;  %v4334_v48 = vpop.permute.xlu1 %1278 }
 0x13a   : > { %v796_v5 = vpop.f32.mrf.mxu2  ;;  %6123 = vst [vmem:[#allocation8_spill] sm:$0xff] %v4334_v48 }
 0x13b   : > { %v3341_v8 = vpop.eup %3340  ;;  %v4326_v10 = vadd.f32 %v796_v5, %v685_v1  ;;  %v301_v5 = vld [vmem:[%s3789_s20 + $0x50] sm:$0xff] }
 0x13c   : > { %1348 = vrot.lane.b32.xlu0 %v3341_v8, %s3683_s11  ;;  %v906_v8 = vsub.f32 0.0, %v4242_v58 }
 0x13d   : > { %3342 = vtanh.f32 %v4326_v10  ;;  %v409_v57 = vpop.f32.mrf.mxu0 }
 0x13e   : > { %v604_v13 = vpop.f32.mrf.mxu1  ;;  %v491_v12 = vadd.f32 %v409_v57, %v298_v4  ;;  %870 = vmatmul.f32.gmra.mxu3 %v743_v7  ;;  %v4373_v4 = vpop.permute.xlu2 %2095 }
 0x13f   : > { %846 = vmatmul.f32.gmra.mxu2 %v4155_v60  ;;  %v299_v60 = vld [vmem:[%s3789_s20 + $0x40] sm:$0xff]  ;;  %6129 = vst [vmem:[#allocation14_spill] sm:$0xff] %v4373_v4  ;;  %v912_v4 = vsub.f32 0.0, %v4326_v10 }
 0x140   : > { %v686_v16 = vadd.f32 %v604_v13, %v491_v12  ;;  %456 = vmatmul.f32.gmra.mxu0 %v4268_v19  ;;  %v907_v13 = vsub.f32 0.0, %v4252_v9 }
 0x141   : > { %651 = vmatmul.f32.gmra.mxu1 %v4140_v53  ;;  %v4340_v18 = vpop.f32.mrf.mxu3  ;;  %v4349_v53 = vpop.permute.xlu1 %1284 }
 0x142   : > { %v799_v20 = vpop.f32.mrf.mxu2  ;;  %6125 = vst [vmem:[#allocation10_spill] sm:$0xff] %v4349_v53  ;;  %v924_v58 = vmul.f32 1.442695, %v907_v13 }
 0x143   : > { %v3343_v2 = vpop.eup %3342  ;;  %v4342_v21 = vadd.f32 %v799_v20, %v686_v16  ;;  %v922_v16 = vmul.f32 1.442695, %v906_v8  ;;  %v510_v20 = vadd.f32 %v4262_v15, %v317_v3  ;;  %v303_v3 = vld [vmem:[%s3789_s20 + $0x60] sm:$0xff] }
 0x144   : > { %1350 = vrot.lane.b32.xlu1 %v3343_v2, %s3683_s11 }
 0x145   : > { %3344 = vtanh.f32 %v4342_v21  ;;  %v412_v22 = vpop.f32.mrf.mxu0 }
 0x146   : > { %v607_v26 = vpop.f32.mrf.mxu1  ;;  %v492_v27 = vadd.f32 %v412_v22, %v299_v60 }
 0x148   : > { %v687_v19 = vadd.f32 %v607_v26, %v492_v27 }
 0x149   : > { %v4351_v11 = vpop.f32.mrf.mxu3  ;;  %v4368_v1 = vpop.permute.xlu1 %2093 }
 0x14a   : > { %v802_v31 = vpop.f32.mrf.mxu2  ;;  %6128 = vst [vmem:[#allocation13_spill] sm:$0xff] %v4368_v1 }
 0x14b   : > { %v3345_v32 = vpop.eup %3344  ;;  %v4355_v35 = vadd.f32 %v802_v31, %v687_v19  ;;  %v4381_v19 = vpop.permute.xlu0 %2091 }
 0x14c   : > { %1352 = vrot.lane.b32.xlu2 %v3345_v32, %s3683_s11  ;;  %6130 = vst [vmem:[#allocation15_spill] sm:$0xff] %v4381_v19  ;;  %v302_v32 = vld [vmem:[%s3789_s20 + $0x58] sm:$0xff] }
 0x14d   : > { %3346 = vtanh.f32 %v4355_v35  ;;  %v415_v42 = vpop.f32.mrf.mxu0 }
 0x14e   : > { %v610_v43 = vpop.f32.mrf.mxu1  ;;  %v493_v44 = vadd.f32 %v415_v42, %v300_v36  ;;  %v318_v36 = vld [vmem:[%s3789_s20 + $0xd8] sm:$0xff]  ;;  %v4391_v42 = vpop.permute.xlu2 %2101 }
 0x14f   : > { %6132 = vst [vmem:[#allocation17_spill] sm:$0xff] %v4391_v42 }
 0x150   : > { %v688_v49 = vadd.f32 %v610_v43, %v493_v44  ;;  %v511_v44 = vadd.f32 %v4278_v25, %v318_v36  ;;  %v319_v25 = vld [vmem:[%s3789_s20 + $0xe0] sm:$0xff] }
 0x151   : > { %v658_v54 = vpop.f32.mrf.mxu3  ;;  %v4387_v9 = vpop.permute.xlu1 %2099 }
 0x152   : > { %v805_v56 = vpop.f32.mrf.mxu2  ;;  %v4364_v61 = vadd.f32 %v658_v54, %v509_v46  ;;  %6131 = vst [vmem:[#allocation16_spill] sm:$0xff] %v4387_v9 }
 0x153   : > { %v3347_v59 = vpop.eup %3346  ;;  %v4366_v63 = vadd.f32 %v805_v56, %v688_v49 }
 0x154   : > { %1354 = vrot.lane.b32.xlu0 %v3347_v59, %s3683_s11 }
 0x155   : > { %3348 = vtanh.f32 %v4366_v63  ;;  %v418_v7 = vpop.f32.mrf.mxu0 }
 0x156   : > { %v613_v57 = vpop.f32.mrf.mxu1  ;;  %v494_v12 = vadd.f32 %v418_v7, %v301_v5  ;;  %3350 = vpow2.f32 %v922_v16 }
 0x158   : > { %v689_v2 = vadd.f32 %v613_v57, %v494_v12  ;;  %v4401_v57 = vpop.permute.xlu0 %2097 }
 0x159   : > { %v661_v60 = vpop.f32.mrf.mxu3  ;;  %6133 = vst [vmem:[#allocation18_spill] sm:$0xff] %v4401_v57 }
 0x15a   : > { %v808_v22 = vpop.f32.mrf.mxu2  ;;  %v4379_v27 = vadd.f32 %v661_v60, %v510_v20  ;;  %v908_v20 = vsub.f32 0.0, %v4264_v17  ;;  %v4407_v60 = vpop.permute.xlu1 %2105 }
 0x15b   : > { %v3349_v26 = vpop.eup %3348  ;;  %v4383_v31 = vadd.f32 %v808_v22, %v689_v2  ;;  %6134 = vst [vmem:[#allocation19_spill] sm:$0xff] %v4407_v60 }
 0x15c   : > { %1356 = vrot.lane.b32.xlu1 %v3349_v26, %s3683_s11  ;;  %v3351_v56 = vpop.eup %3350  ;;  %v512_v26 = vadd.f32 %v4291_v34, %v319_v25  ;;  %v320_v34 = vld [vmem:[%s3789_s20 + $0xe8] sm:$0xff] }
 0x15d   : > { %3352 = vtanh.f32 %v4383_v31  ;;  %v421_v15 = vpop.f32.mrf.mxu0  ;;  %v4403_v13 = vadd.f32 1.0, %v3351_v56  ;;  %v909_v56 = vsub.f32 0.0, %v4280_v28  ;;  %v513_v25 = vadd.f32 %v4308_v47, %v320_v34  ;;  %v305_v47 = vld [vmem:[%s3789_s20 + $0x70] sm:$0xff] }
 0x15e   : > { %v616_v40 = vpop.f32.mrf.mxu1  ;;  %3354 = vpow2.f32 %v924_v58  ;;  %v495_v43 = vadd.f32 %v421_v15, %v302_v32  ;;  %v4412_v58 = vpop.permute.xlu2 %2107  ;;  %v910_v34 = vsub.f32 0.0, %v4293_v37 }
 0x15f   : > { %6135 = vst [vmem:[#allocation20_spill] sm:$0xff] %v4412_v58  ;;  %vm975_vm2 = vweird.f32 %v4403_v13  ;;  %v934_v58 = vmul.f32 1.442695, %v912_v4 }
 0x160   : > { %v690_v46 = vadd.f32 %v616_v40, %v495_v43  ;;  %v926_v43 = vmul.f32 1.442695, %v908_v20 }
 0x161   : > { %v664_v49 = vpop.f32.mrf.mxu3 }
 0x162   : > { %v811_v54 = vpop.f32.mrf.mxu2  ;;  %v4394_v59 = vadd.f32 %v664_v49, %v511_v44 }
 0x163   : > { %v4396_v5 = vadd.f32 %v811_v54, %v690_v46  ;;  %v3353_v8 = vpop.eup %3352  ;;  %v304_v46 = vld [vmem:[%s3789_s20 + $0x68] sm:$0xff] }
 0x164   : > { %v3355_v7 = vpop.eup %3354  ;;  %1358 = vrot.lane.b32.xlu2 %v3353_v8, %s3683_s11 }
 0x165   : > { %3356 = vtanh.f32 %v4396_v5  ;;  %v424_v12 = vpop.f32.mrf.mxu0  ;;  %v4409_v22 = vadd.f32 1.0, %v3355_v7 }
 0x166   : > { %v619_v16 = vpop.f32.mrf.mxu1  ;;  %v496_v2 = vadd.f32 %v424_v12, %v303_v3  ;;  %3358 = vrcp.f32 %v4403_v13  ;;  %v4425_v3 = vpop.permute.xlu0 %2103 }
 0x167   : > { %3360 = vrcp.f32 %v4409_v22  ;;  %6136 = vst [vmem:[#allocation21_spill] sm:$0xff] %v4425_v3  ;;  %v930_v3 = vmul.f32 1.442695, %v910_v34  ;;  %v981_v34 = vand.u32 2147483648, %v4403_v13  ;;  %vm990_vm5 = vweird.f32 %v4409_v22 }
 0x168   : > { %v691_v32 = vadd.f32 %v619_v16, %v496_v2  ;;  %v4430_v16 = vpop.permute.xlu1 %2111  ;;  %v994_v57 = vand.u32 2147483647, %v4409_v22 }
 0x169   : > { %v667_v36 = vpop.f32.mrf.mxu3  ;;  %6137 = vst [vmem:[#allocation22_spill] sm:$0xff] %v4430_v16 }
 0x16a   : > { %v814_v15 = vpop.f32.mrf.mxu2  ;;  %v4415_v44 = vadd.f32 %v667_v36, %v512_v26  ;;  %v928_v36 = vmul.f32 1.442695, %v909_v56  ;;  %vm995_vm8 = vcmp.eq.f32.partialorder %v994_v57, 8.507059e+37 }
 0x16b   : > { %v3357_v40 = vpop.eup %3356  ;;  %v4417_v17 = vadd.f32 %v814_v15, %v691_v32  ;;  %v4436_v15 = vpop.permute.xlu2 %2113 }
 0x16c   : > { %1360 = vrot.lane.b32.xlu0 %v3357_v40, %s3683_s11  ;;  %v4427_v7 = vpop.eup %3358  ;;  %6138 = vst [vmem:[#allocation23_spill] sm:$0xff] %v4436_v15 }
 0x16d   : > { %3362 = vtanh.f32 %v4417_v17  ;;  %v427_v49 = vpop.f32.mrf.mxu0  ;;  %v4432_v20 = vpop.eup %3360  ;;  %v971_v28 = vmul.f32 %v4427_v7, %v4403_v13  ;;  %vm976_vm1 = vweird.f32 %v4427_v7 }
 0x16e   : > { %v622_v54 = vpop.f32.mrf.mxu1  ;;  %3364 = vpow2.f32 %v926_v43  ;;  %v497_v8 = vadd.f32 %v427_v49, %v304_v46  ;;  %v986_v49 = vmul.f32 %v4432_v20, %v4409_v22  ;;  %vm4480_vm3 = vmor %vm975_vm2, %vm976_vm1  ;;  %vm991_vm4 = vweird.f32 %v4432_v20 }
 0x16f   : > { %vm4505_vm7 = vmor %vm990_vm5, %vm991_vm4 }
 0x170   : > { %v692_v12 = vadd.f32 %v622_v54, %v497_v8  ;;  %v321_v54 = vld [vmem:[%s3789_s20 + $0xf0] sm:$0xff]  ;;  %v972_v8 = vsub.f32 1.0, %v971_v28  ;;  %v987_v42 = vsub.f32 1.0, %v986_v49 }
 0x171   : > { %v670_v2 = vpop.f32.mrf.mxu3 }
 0x172   : > { %v817_v26 = vpop.f32.mrf.mxu2  ;;  %v4438_v40 = vadd.f32 %v670_v2, %v513_v25  ;;  %v514_v2 = vadd.f32 %v4324_v0, %v321_v54  ;;  %v973_v16 = vmul.f32 %v4427_v7, %v972_v8  ;;  %v4461_v0 = vpop.permute.xlu1 %2117  ;;  %v988_v49 = vmul.f32 %v4432_v20, %v987_v42  ;;  %v322_v54 = vld [vmem:[%s3789_s20 + $0xf8] sm:$0xff] }
 0x173   : > { %v3363_v32 = vpop.eup %3362  ;;  %v4440_v43 = vadd.f32 %v817_v26, %v692_v12  ;;  %6140 = vst [vmem:[#allocation25_spill] sm:$0xff] %v4461_v0  ;;  %v315_v0 = vld [vmem:[%s3789_s20 + $0xc0] sm:$0xff] }
 0x174   : > { %1362 = vrot.lane.b32.xlu1 %v3363_v32, %s3683_s11  ;;  %v3365_v46 = vpop.eup %3364  ;;  %v4452_v32 = vpop.permute.xlu0 %2109 }
 0x175   : > { %3366 = vtanh.f32 %v4440_v43  ;;  %v430_v56 = vpop.f32.mrf.mxu0  ;;  %v4449_v12 = vadd.f32 1.0, %v3365_v46  ;;  %6139 = vst [vmem:[#allocation24_spill] sm:$0xff] %v4452_v32  ;;  %v4464_v46 = vpop.permute.xlu2 %2119 }
 0x176   : > { %3368 = vpow2.f32 %v928_v36  ;;  %v498_v60 = vadd.f32 %v430_v56, %v305_v47  ;;  %v625_v25 = vpop.f32.mrf.mxu1  ;;  %6141 = vst [vmem:[#allocation26_spill] sm:$0xff] %v4464_v46  ;;  %v974_v56 = vadd.f32 %v4427_v7, %v973_v16  ;;  %v982_v46 = vor.u32 1.1754944e-38, %v981_v34  ;;  %v307_v16 = vld [vmem:[%s3789_s20 + $0x80] sm:$0xff] }
 0x177   : > { %3370 = vrcp.f32 %v4449_v12  ;;  %vm1005_vm10 = vweird.f32 %v4449_v12 }
 0x178   : > { %v693_v26 = vadd.f32 %v625_v25, %v498_v60  ;;  %v306_v60 = vld [vmem:[%s3789_s20 + $0x78] sm:$0xff] }
 0x179   : > { %v673_v37 = vpop.f32.mrf.mxu3 }
 0x17a   : > { %v820_v15 = vpop.f32.mrf.mxu2  ;;  %v4455_v36 = vadd.f32 %v673_v37, %v514_v2 }
 0x17b   : > { %v3367_v9 = vpop.eup %3366  ;;  %v4457_v28 = vadd.f32 %v820_v15, %v693_v26  ;;  %v979_v26 = vand.u32 2147483647, %v4403_v13 }
 0x17c   : > { %1364 = vrot.lane.b32.xlu2 %v3367_v9, %s3683_s11  ;;  %v3369_v47 = vpop.eup %3368  ;;  %v911_v9 = vsub.f32 0.0, %v4310_v51  ;;  %v989_v51 = vadd.f32 %v4432_v20, %v988_v49  ;;  %v4495_v34 = vpop.permute.xlu0 %2115 }
 0x17d   : > { %3372 = vtanh.f32 %v4457_v28  ;;  %v433_v15 = vpop.f32.mrf.mxu0  ;;  %v4473_v2 = vadd.f32 1.0, %v3369_v47  ;;  %v4478_v37 = vpop.eup %3370  ;;  %6144 = vst [vmem:[#allocation27_spill] sm:$0xff] %v4495_v34  ;;  %vm980_vm6 = vcmp.eq.f32.partialorder %v979_v26, 8.507059e+37 }
 0x17e   : > { %3374 = vpow2.f32 %v930_v3  ;;  %v499_v8 = vadd.f32 %v433_v15, %v306_v60  ;;  %v628_v25 = vpop.f32.mrf.mxu1  ;;  %v515_v3 = vadd.f32 %v4340_v18, %v322_v54  ;;  %v996_v60 = vand.u32 2147483648, %v4409_v22 }
 0x17f   : > { %v978_v18 = vsel %vm4480_vm3, %v4427_v7, %v974_v56  ;;  %v932_v54 = vmul.f32 1.442695, %v911_v9  ;;  %3376 = vrcp.f32 %v4473_v2  ;;  %v1001_v56 = vmul.f32 %v4478_v37, %v4449_v12 }
 0x180   : > { %v694_v42 = vadd.f32 %v628_v25, %v499_v8  ;;  %v508_v9 = vadd.f32 %v4240_v55, %v315_v0  ;;  %v4513_v22 = vsel %vm980_vm6, %v982_v46, %v978_v18  ;;  %v993_v10 = vsel %vm4505_vm7, %v4432_v20, %v989_v51 }
 0x181   : > { %v676_v47 = vpop.f32.mrf.mxu3  ;;  %v997_v26 = vor.u32 1.1754944e-38, %v996_v60  ;;  %v1002_v0 = vsub.f32 1.0, %v1001_v56  ;;  %v913_v56 = vsub.f32 0.0, %v4342_v21  ;;  %vm1006_vm9 = vweird.f32 %v4478_v37 }
 0x182   : > { %v823_v15 = vpop.f32.mrf.mxu2  ;;  %v4491_v8 = vadd.f32 %v676_v47, %v515_v3  ;;  %v703_v46 = vadd.f32 %v4351_v11, %v508_v9  ;;  %v308_v11 = vld [vmem:[%s3789_s20 + $0x88] sm:$0xff]  ;;  %vm4555_vm11 = vmor %vm1005_vm10, %vm1006_vm9  ;;  %vm1020_vm14 = vweird.f32 %v4473_v2 }
 0x183   : > { %v3373_v13 = vpop.eup %3372  ;;  %v4493_v25 = vadd.f32 %v823_v15, %v694_v42  ;;  %v1341_v15 = vpop.permute.xlu2 %1340  ;;  %v4521_v55 = vsel %vm995_vm8, %v997_v26, %v993_v10 }
 0x184   : > { %v3375_v49 = vpop.eup %3374  ;;  %1366 = vrot.lane.b32.xlu0 %v3373_v13, %s3683_s11  ;;  %v1387_v60 = vmul.f32 %v1341_v15, %v4521_v55 }
 0x185   : > { %3378 = vtanh.f32 %v4493_v25  ;;  %v436_v3 = vpop.f32.mrf.mxu0  ;;  %v4518_v47 = vadd.f32 1.0, %v3375_v49  ;;  %v4525_v51 = vpop.eup %3376 }
 0x186   : > { %v1339_v42 = vpop.permute.xlu1 %1338  ;;  %3380 = vpow2.f32 %v932_v54  ;;  %v500_v13 = vadd.f32 %v436_v3, %v307_v16  ;;  %v631_v32 = vpop.f32.mrf.mxu1  ;;  %v1016_v7 = vmul.f32 %v4525_v51, %v4473_v2  ;;  %vm1021_vm13 = vweird.f32 %v4525_v51 }
 0x187   : > { %v1386_v34 = vmul.f32 %v1339_v42, %v4513_v22  ;;  %3382 = vrcp.f32 %v4518_v47  ;;  %v4538_v16 = vpop.permute.xlu0 %2121  ;;  %vm4596_vm15 = vmor %vm1020_vm14, %vm1021_vm13  ;;  %vm1035_vm2 = vweird.f32 %v4518_v47 }
 0x188   : > { %v695_v20 = vadd.f32 %v631_v32, %v500_v13  ;;  %3384 = vpow2.f32 %v934_v58  ;;  %6147 = vst [vmem:[#allocation28_spill] sm:$0xff] %v4538_v16 }
 0x189   : > { %1418 = vrot.lane.b32.xlu2 %v1386_v34, %s3683_s11  ;;  %v850_v54 = vpop.f32.mrf.mxu3  ;;  %v1003_v34 = vmul.f32 %v4478_v37, %v1002_v0  ;;  %v1017_v0 = vsub.f32 1.0, %v1016_v7 }
 0x18a   : > { %v826_v18 = vpop.f32.mrf.mxu2  ;;  %v4531_v4 = vadd.f32 %v850_v54, %v703_v46  ;;  %v936_v46 = vmul.f32 1.442695, %v913_v56 }
 0x18b   : > { %v3379_v49 = vpop.eup %3378  ;;  %v4529_v57 = vadd.f32 %v826_v18, %v695_v20  ;;  %v1004_v42 = vadd.f32 %v4478_v37, %v1003_v34  ;;  %v1011_v18 = vand.u32 2147483648, %v4449_v12  ;;  %v309_v34 = vld [vmem:[%s3789_s20 + $0x90] sm:$0xff]  ;;  %v1018_v56 = vmul.f32 %v4525_v51, %v1017_v0 }
 0x18c   : > { %1420 = vrot.lane.b32.xlu0 %v1387_v60, %s3683_s11  ;;  %1368 = vrot.lane.b32.xlu1 %v3379_v49, %s3683_s11  ;;  %v3381_v32 = vpop.eup %3380 }
 0x18d   : > { %3386 = vtanh.f32 %v4529_v57  ;;  %v439_v58 = vpop.f32.mrf.mxu0  ;;  %v4544_v26 = vadd.f32 1.0, %v3381_v32  ;;  %v4546_v3 = vpop.eup %3382  ;;  %v1009_v32 = vand.u32 2147483647, %v4449_v12  ;;  %v1008_v7 = vsel %vm4555_vm11, %v4478_v37, %v1004_v42 }
 0x18e   : > { %3388 = vtanh.f32 %v4531_v4  ;;  %v501_v9 = vadd.f32 %v439_v58, %v308_v11  ;;  %v634_v10 = vpop.f32.mrf.mxu1  ;;  %v3385_v13 = vpop.eup %3384  ;;  %v914_v58 = vsub.f32 0.0, %v4355_v35  ;;  %vm1036_vm1 = vweird.f32 %v4546_v3 }
 0x18f   : > { %3390 = vrcp.f32 %v4544_v26  ;;  %vm1010_vm12 = vcmp.eq.f32.partialorder %v1009_v32, 8.507059e+37  ;;  %vm4631_vm3 = vmor %vm1035_vm2, %vm1036_vm1  ;;  %vm1050_vm6 = vweird.f32 %v4544_v26 }
 0x190   : > { %v696_v15 = vadd.f32 %v634_v10, %v501_v9  ;;  %v1031_v9 = vmul.f32 %v4546_v3, %v4518_v47  ;;  %v1012_v10 = vor.u32 1.1754944e-38, %v1011_v18 }
 0x191   : > { %v853_v21 = vpop.f32.mrf.mxu3 }
 0x192   : > { %v829_v20 = vpop.f32.mrf.mxu2  ;;  %v4574_v37 = vadd.f32 %v853_v21, %v4364_v61  ;;  %v4576_v42 = vsel %vm1010_vm12, %v1012_v10, %v1008_v7  ;;  %v1026_v61 = vand.u32 2147483648, %v4473_v2  ;;  %v1024_v10 = vand.u32 2147483647, %v4473_v2 }
 0x193   : > { %v3387_v60 = vpop.eup %3386  ;;  %v4552_v54 = vadd.f32 %v829_v20, %v696_v15  ;;  %v4571_v15 = vadd.f32 1.0, %v3385_v13  ;;  %v1032_v13 = vsub.f32 1.0, %v1031_v9 }
 0x194   : > { %v3389_v49 = vpop.eup %3388  ;;  %2171 = vrot.lane.b32.xlu1 %v3387_v60, %s3683_s11  ;;  %vm1025_vm0 = vcmp.eq.f32.partialorder %v1024_v10, 8.507059e+37 }
 0x195   : > { %3392 = vtanh.f32 %v4552_v54  ;;  %2187 = vrot.lane.b32.xlu0 %v3389_v49, %s3683_s11  ;;  %v442_v12 = vpop.f32.mrf.mxu0  ;;  %v4579_v35 = vpop.eup %3390  ;;  %v938_v49 = vmul.f32 1.442695, %v914_v58  ;;  %v310_v58 = vld [vmem:[%s3789_s20 + $0x98] sm:$0xff]  ;;  %vm1065_vm10 = vweird.f32 %v4571_v15 }
 0x196   : > { %3394 = vpow2.f32 %v936_v46  ;;  %v502_v20 = vadd.f32 %v442_v12, %v309_v34  ;;  %v1343_v60 = vpop.permute.xlu0 %1342  ;;  %v637_v11 = vpop.f32.mrf.mxu1  ;;  %v1019_v46 = vadd.f32 %v4525_v51, %v1018_v56  ;;  %v916_v56 = vsub.f32 0.0, %v4383_v31 }
 0x197   : > { %v1388_v18 = vmul.f32 %v1343_v60, %v4576_v42  ;;  %3396 = vrcp.f32 %v4571_v15  ;;  %v1033_v31 = vmul.f32 %v4546_v3, %v1032_v13  ;;  %v1046_v60 = vmul.f32 %v4579_v35, %v4544_v26 }
 0x198   : > { %v697_v0 = vadd.f32 %v637_v11, %v502_v20  ;;  %3398 = vtanh.f32 %v4574_v37  ;;  %v1023_v2 = vsel %vm4596_vm15, %v4525_v51, %v1019_v46  ;;  %v1027_v11 = vor.u32 1.1754944e-38, %v1026_v61 }
 0x199   : > { %v856_v12 = vpop.f32.mrf.mxu3  ;;  %v915_v51 = vsub.f32 0.0, %v4366_v63  ;;  %v1041_v46 = vand.u32 2147483648, %v4518_v47  ;;  %v1034_v9 = vadd.f32 %v4546_v3, %v1033_v31  ;;  %v1039_v31 = vand.u32 2147483647, %v4518_v47 }
 0x19a   : > { %v832_v34 = vpop.f32.mrf.mxu2  ;;  %v4611_v19 = vsel %vm1025_vm0, %v1027_v11, %v1023_v2  ;;  %v4618_v61 = vadd.f32 %v856_v12, %v4379_v27  ;;  %v311_v27 = vld [vmem:[%s3789_s20 + $0xa0] sm:$0xff]  ;;  %vm1051_vm5 = vweird.f32 %v4579_v35 }
 0x19b   : > { %v3393_v32 = vpop.eup %3392  ;;  %v4585_v21 = vadd.f32 %v832_v34, %v697_v0  ;;  %v940_v12 = vmul.f32 1.442695, %v915_v51  ;;  %v1038_v47 = vsel %vm4631_vm3, %v4546_v3, %v1034_v9  ;;  %v919_v51 = vsub.f32 0.0, %v4440_v43  ;;  %vm4674_vm7 = vmor %vm1050_vm6, %vm1051_vm5 }
 0x19c   : > { %v3395_v7 = vpop.eup %3394  ;;  %1422 = vrot.lane.b32.xlu1 %v1388_v18, %s3683_s11  ;;  %2173 = vrot.lane.b32.xlu2 %v3393_v32, %s3683_s11  ;;  %v942_v32 = vmul.f32 1.442695, %v916_v56  ;;  %v1047_v56 = vsub.f32 1.0, %v1046_v60  ;;  %vm1040_vm4 = vcmp.eq.f32.partialorder %v1039_v31, 8.507059e+37 }
 0x19d   : > { %3400 = vtanh.f32 %v4585_v21  ;;  %v445_v20 = vpop.f32.mrf.mxu0  ;;  %v4607_v0 = vadd.f32 1.0, %v3395_v7  ;;  %v4609_v1 = vpop.eup %3396 }
 0x19e   : > { %3402 = vpow2.f32 %v938_v49  ;;  %v503_v18 = vadd.f32 %v445_v20, %v310_v58  ;;  %v640_v34 = vpop.f32.mrf.mxu1  ;;  %v1345_v16 = vpop.permute.xlu1 %1344  ;;  %vm1066_vm9 = vweird.f32 %v4609_v1 }
 0x19f   : > { %v3399_v13 = vpop.eup %3398  ;;  %3404 = vrcp.f32 %v4607_v0  ;;  %v1389_v63 = vmul.f32 %v1345_v16, %v4611_v19  ;;  %v1042_v16 = vor.u32 1.1754944e-38, %v1041_v46  ;;  %vm4712_vm11 = vmor %vm1065_vm10, %vm1066_vm9  ;;  %vm1080_vm14 = vweird.f32 %v4607_v0 }
 0x1a0   : > { %v698_v49 = vadd.f32 %v640_v34, %v503_v18  ;;  %3406 = vpow2.f32 %v942_v32  ;;  %v1048_v18 = vmul.f32 %v4579_v35, %v1047_v56  ;;  %v1061_v34 = vmul.f32 %v4609_v1, %v4571_v15 }
 0x1a1   : > { %v859_v10 = vpop.f32.mrf.mxu3  ;;  %v4652_v46 = vsel %vm1040_vm4, %v1042_v16, %v1038_v47  ;;  %v1056_v56 = vand.u32 2147483648, %v4544_v26 }
 0x1a2   : > { %v835_v7 = vpop.f32.mrf.mxu2  ;;  %v1049_v31 = vadd.f32 %v4579_v35, %v1048_v18 }
 0x1a3   : > { %v3401_v58 = vpop.eup %3400  ;;  %v4622_v2 = vadd.f32 %v835_v7, %v698_v49  ;;  %v1347_v49 = vpop.permute.xlu2 %1346 }
 0x1a4   : > { %v3403_v20 = vpop.eup %3402  ;;  %2175 = vrot.lane.b32.xlu0 %v3401_v58, %s3683_s11  ;;  %2189 = vrot.lane.b32.xlu1 %v3399_v13, %s3683_s11  ;;  %v4648_v58 = vadd.f32 %v859_v10, %v4394_v59  ;;  %v1390_v43 = vmul.f32 %v1347_v49, %v4652_v46  ;;  %v1062_v10 = vsub.f32 1.0, %v1061_v34  ;;  %v313_v34 = vld [vmem:[%s3789_s20 + $0xb0] sm:$0xff] }
 0x1a5   : > { %3408 = vtanh.f32 %v4622_v2  ;;  %1424 = vrot.lane.b32.xlu2 %v1389_v63, %s3683_s11  ;;  %v448_v11 = vpop.f32.mrf.mxu0  ;;  %v4644_v32 = vadd.f32 1.0, %v3403_v20  ;;  %v4650_v3 = vpop.eup %3404  ;;  %v917_v20 = vsub.f32 0.0, %v4396_v5  ;;  %v312_v5 = vld [vmem:[%s3789_s20 + $0xa8] sm:$0xff] }
 0x1a6   : > { %3410 = vtanh.f32 %v4618_v61  ;;  %v504_v13 = vadd.f32 %v448_v11, %v311_v27  ;;  %v643_v7 = vpop.f32.mrf.mxu1  ;;  %v3407_v63 = vpop.eup %3406  ;;  %v1054_v11 = vand.u32 2147483647, %v4544_v26  ;;  %v1076_v18 = vmul.f32 %v4650_v3, %v4607_v0 }
 0x1a7   : > { %3412 = vpow2.f32 %v940_v12  ;;  %v948_v12 = vmul.f32 1.442695, %v919_v51  ;;  %v944_v51 = vmul.f32 1.442695, %v917_v20  ;;  %v1057_v26 = vor.u32 1.1754944e-38, %v1056_v56 }
 0x1a8   : > { %v699_v9 = vadd.f32 %v643_v7, %v504_v13  ;;  %3414 = vrcp.f32 %v4644_v32  ;;  %v1053_v13 = vsel %vm4674_vm7, %v4579_v35, %v1049_v31  ;;  %vm1055_vm8 = vcmp.eq.f32.partialorder %v1054_v11, 8.507059e+37 }
 0x1a9   : > { %v862_v60 = vpop.f32.mrf.mxu3  ;;  %3416 = vtanh.f32 %v4648_v58  ;;  %v1077_v33 = vsub.f32 1.0, %v1076_v18  ;;  %v4689_v53 = vsel %vm1055_vm8, %v1057_v26, %v1053_v13  ;;  %v1071_v18 = vand.u32 2147483648, %v4571_v15 }
 0x1aa   : > { %v838_v27 = vpop.f32.mrf.mxu2  ;;  %v4685_v50 = vadd.f32 %v862_v60, %v4415_v44  ;;  %v1069_v13 = vand.u32 2147483647, %v4571_v15  ;;  %vm1081_vm12 = vweird.f32 %v4650_v3  ;;  %vm1095_vm2 = vweird.f32 %v4644_v32 }
 0x1ab   : > { %v3409_v59 = vpop.eup %3408  ;;  %v4660_v47 = vadd.f32 %v838_v27, %v699_v9  ;;  %v1063_v9 = vmul.f32 %v4609_v1, %v1062_v10  ;;  %vm4742_vm15 = vmor %vm1080_vm14, %vm1081_vm12 }
 0x1ac   : > { %v3411_v16 = vpop.eup %3410  ;;  %1426 = vrot.lane.b32.xlu0 %v1390_v43, %s3683_s11  ;;  %2177 = vrot.lane.b32.xlu1 %v3409_v59, %s3683_s11  ;;  %v4682_v43 = vadd.f32 1.0, %v3407_v63  ;;  %vm1070_vm13 = vcmp.eq.f32.partialorder %v1069_v13, 8.507059e+37 }
 0x1ad   : > { %3418 = vtanh.f32 %v4660_v47  ;;  %2191 = vrot.lane.b32.xlu2 %v3411_v16, %s3683_s11  ;;  %v451_v49 = vpop.f32.mrf.mxu0  ;;  %v3413_v7 = vpop.eup %3412  ;;  %v1064_v60 = vadd.f32 %v4609_v1, %v1063_v9 }
 0x1ae   : > { %3420 = vpow2.f32 %v948_v12  ;;  %v505_v27 = vadd.f32 %v451_v49, %v312_v5  ;;  %v1349_v59 = vpop.permute.xlu0 %1348  ;;  %v646_v16 = vpop.f32.mrf.mxu1  ;;  %v4692_v63 = vadd.f32 1.0, %v3413_v7  ;;  %v918_v5 = vsub.f32 0.0, %v4417_v17 }
 0x1af   : > { %v4687_v20 = vpop.eup %3414  ;;  %3422 = vpow2.f32 %v944_v51  ;;  %v1391_v31 = vmul.f32 %v1349_v59, %v4689_v53  ;;  %v1078_v49 = vmul.f32 %v4650_v3, %v1077_v33  ;;  %v1068_v15 = vsel %vm4712_vm11, %v4609_v1, %v1064_v60 }
 0x1b0   : > { %v700_v35 = vadd.f32 %v646_v16, %v505_v27  ;;  %v3417_v56 = vpop.eup %3416  ;;  %3424 = vrcp.f32 %v4682_v43  ;;  %v1091_v33 = vmul.f32 %v4687_v20, %v4644_v32  ;;  %v946_v7 = vmul.f32 1.442695, %v918_v5 }
 0x1b1   : > { %v865_v12 = vpop.f32.mrf.mxu3  ;;  %3426 = vtanh.f32 %v4685_v50  ;;  %v1072_v16 = vor.u32 1.1754944e-38, %v1071_v18  ;;  %vm1096_vm1 = vweird.f32 %v4687_v20  ;;  %vm1125_vm7 = vweird.f32 %v4682_v43 }
 0x1b2   : > { %v841_v10 = vpop.f32.mrf.mxu2  ;;  %v4732_v60 = vadd.f32 %v865_v12, %v4438_v40  ;;  %v1092_v18 = vsub.f32 1.0, %v1091_v33  ;;  %v1084_v40 = vand.u32 2147483647, %v4607_v0  ;;  %v314_v33 = vld [vmem:[%s3789_s20 + $0xb8] sm:$0xff]  ;;  %vm4789_vm3 = vmor %vm1095_vm2, %vm1096_vm1  ;;  %vm1110_vm9 = vweird.f32 %v4692_v63  ;;  %s3684_s20 = smov 96  }
 0x1b3   : > { %v3419_v44 = vpop.eup %3418  ;;  %v4698_v11 = vadd.f32 %v841_v10, %v700_v35  ;;  %v1079_v10 = vadd.f32 %v4650_v3, %v1078_v49  ;;  %v4729_v1 = vsel %vm1070_vm13, %v1072_v16, %v1068_v15  ;;  %v1353_v16 = vpop.permute.xlu2 %1352 }
 0x1b4   : > { %2193 = vrot.lane.b32.xlu0 %v3417_v56, %s3683_s11  ;;  %1428 = vrot.lane.b32.xlu1 %v1391_v31, %s3683_s11  ;;  %v3421_v51 = vpop.eup %3420  ;;  %vm1085_vm0 = vcmp.eq.f32.partialorder %v1084_v40, 8.507059e+37 }
 0x1b5   : > { %3428 = vtanh.f32 %v4698_v11  ;;  %2179 = vrot.lane.b32.xlu2 %v3419_v44, %s3683_s11  ;;  %v454_v26 = vpop.f32.mrf.mxu0  ;;  %v3423_v59 = vpop.eup %3422  ;;  %v4722_v35 = vadd.f32 1.0, %v3421_v51  ;;  %v1086_v51 = vand.u32 2147483648, %v4607_v0  ;;  %v1083_v15 = vsel %vm4742_vm15, %v4650_v3, %v1079_v10 }
 0x1b6   : > { %3430 = vrcp.f32 %v4692_v63  ;;  %v506_v9 = vadd.f32 %v454_v26, %v313_v34  ;;  %v649_v27 = vpop.f32.mrf.mxu1  ;;  %v1351_v56 = vpop.permute.xlu1 %1350 }
 0x1b7   : > { %v4724_v31 = vpop.eup %3424  ;;  %3432 = vpow2.f32 %v946_v7  ;;  %v1392_v49 = vmul.f32 %v1351_v56, %v4729_v1  ;;  %v4756_v7 = vadd.f32 1.0, %v3423_v59  ;;  %vm1170_vm14 = vweird.f32 %v4722_v35 }
 0x1b8   : > { %v701_v44 = vadd.f32 %v649_v27, %v506_v9  ;;  %v3427_v48 = vpop.eup %3426  ;;  %3434 = vrcp.f32 %v4722_v35  ;;  %v1121_v9 = vmul.f32 %v4724_v31, %v4682_v43  ;;  %v1093_v27 = vmul.f32 %v4687_v20, %v1092_v18 }
 0x1b9   : > { %v868_v12 = vpop.f32.mrf.mxu3  ;;  %vm1126_vm5 = vweird.f32 %v4724_v31  ;;  %vm1140_vm2 = vweird.f32 %v4756_v7 }
 0x1ba   : > { %v844_v5 = vpop.f32.mrf.mxu2  ;;  %v4765_v10 = vadd.f32 %v868_v12, %v4455_v36  ;;  %v920_v36 = vsub.f32 0.0, %v4457_v28  ;;  %v1129_v28 = vand.u32 2147483647, %v4682_v43  ;;  %vm4826_vm8 = vmor %vm1125_vm7, %vm1126_vm5 }
 0x1bb   : > { %v3429_v34 = vpop.eup %3428  ;;  %v4736_v17 = vadd.f32 %v844_v5, %v701_v44 }
 0x1bc   : > { %v4738_v13 = vpop.eup %3430  ;;  %2181 = vrot.lane.b32.xlu0 %v3429_v34, %s3683_s11  ;;  %2195 = vrot.lane.b32.xlu1 %v3427_v48, %s3683_s11  ;;  %v1087_v48 = vor.u32 1.1754944e-38, %v1086_v51  ;;  %v1122_v51 = vsub.f32 1.0, %v1121_v9  ;;  %v1099_v9 = vand.u32 2147483647, %v4644_v32  ;;  %vm1130_vm11 = vcmp.eq.f32.partialorder %v1129_v28, 8.507059e+37 }
 0x1bd   : > { %3436 = vtanh.f32 %v4736_v17  ;;  %1430 = vrot.lane.b32.xlu2 %v1392_v49, %s3683_s11  ;;  %v457_v0 = vpop.f32.mrf.mxu0  ;;  %v1106_v3 = vmul.f32 %v4738_v13, %v4692_v63  ;;  %v3433_v59 = vpop.eup %3432  ;;  %vm1111_vm6 = vweird.f32 %v4738_v13 }
 0x1be   : > { %3438 = vtanh.f32 %v4732_v60  ;;  %v507_v56 = vadd.f32 %v457_v0, %v314_v33  ;;  %v652_v44 = vpop.f32.mrf.mxu1  ;;  %v4767_v5 = vsel %vm1085_vm0, %v1087_v48, %v1083_v15  ;;  %v4770_v49 = vpop.eup %3434  ;;  %v1094_v33 = vadd.f32 %v4687_v20, %v1093_v27  ;;  %vm4839_vm10 = vmor %vm1110_vm9, %vm1111_vm6 }
 0x1bf   : > { %3440 = vrcp.f32 %v4756_v7  ;;  %v1393_v18 = vmul.f32 %v1353_v16, %v4767_v5  ;;  %v1101_v15 = vand.u32 2147483648, %v4644_v32  ;;  %v1107_v0 = vsub.f32 1.0, %v1106_v3 }
 0x1c0   : > { %v702_v34 = vadd.f32 %v652_v44, %v507_v56  ;;  %v1740_v56 = vsub.f32 0.0, %v4552_v54  ;;  %3442 = vtanh.f32 %v4765_v10  ;;  %v4793_v54 = vadd.f32 1.0, %v3433_v59 }
 0x1c1   : > { %v1123_v27 = vmul.f32 %v4724_v31, %v1122_v51  ;;  %v871_v16 = vpop.f32.mrf.mxu3  ;;  %v1098_v44 = vsel %vm4789_vm3, %v4687_v20, %v1094_v33  ;;  %v1166_v32 = vmul.f32 %v4770_v49, %v4722_v35  ;;  %v950_v3 = vmul.f32 1.442695, %v920_v36 }
 0x1c2   : > { %v847_v26 = vpop.f32.mrf.mxu2  ;;  %vm1100_vm4 = vcmp.eq.f32.partialorder %v1099_v9, 8.507059e+37  ;;  %v4806_v59 = vadd.f32 %v871_v16, %v4491_v8  ;;  %v921_v16 = vsub.f32 0.0, %v4493_v25  ;;  %vm1171_vm13 = vweird.f32 %v4770_v49 }
 0x1c3   : > { %v3437_v40 = vpop.eup %3436  ;;  %v4776_v12 = vadd.f32 %v847_v26, %v702_v34  ;;  %v1102_v34 = vor.u32 1.1754944e-38, %v1101_v15  ;;  %v1108_v26 = vmul.f32 %v4738_v13, %v1107_v0  ;;  %v1124_v33 = vadd.f32 %v4724_v31, %v1123_v27  ;;  %vm1172_vm15 = vmor %vm1170_vm14, %vm1171_vm13 }
 0x1c4   : > { %v3439_v48 = vpop.eup %3438  ;;  %1432 = vrot.lane.b32.xlu0 %v1393_v18, %s3683_s11  ;;  %2183 = vrot.lane.b32.xlu1 %v3437_v40, %s3683_s11  ;;  %v1167_v15 = vsub.f32 1.0, %v1166_v32  ;;  %v1116_v27 = vand.u32 2147483648, %v4692_v63  ;;  %vm1155_vm6 = vweird.f32 %v4793_v54 }
 0x1c5   : > { %3444 = vtanh.f32 %v4776_v12  ;;  %2197 = vrot.lane.b32.xlu2 %v3439_v48, %s3683_s11  ;;  %v4802_v40 = vpop.eup %3440  ;;  %v1757_v48 = vmul.f32 1.442695, %v1740_v56  ;;  %v4808_v51 = vsel %vm1100_vm4, %v1102_v34, %v1098_v44  ;;  %v1131_v56 = vand.u32 2147483648, %v4682_v43 }
 0x1c6   : > { %v1355_v18 = vpop.permute.xlu0 %1354  ;;  %v3443_v20 = vpop.eup %3442  ;;  %3446 = vrcp.f32 %v4793_v54  ;;  %v1109_v9 = vadd.f32 %v4738_v13, %v1108_v26  ;;  %v1136_v8 = vmul.f32 %v4802_v40, %v4756_v7  ;;  %v1114_v43 = vand.u32 2147483647, %v4692_v63 }
 0x1c7   : > { %v1394_v36 = vmul.f32 %v1355_v18, %v4808_v51  ;;  %3448 = vpow2.f32 %v950_v3  ;;  %v1128_v32 = vsel %vm4826_vm8, %v4724_v31, %v1124_v33  ;;  %v1168_v3 = vmul.f32 %v4770_v49, %v1167_v15  ;;  %v1359_v18 = vpop.permute.xlu2 %1358 }
 0x1c8   : > { %3450 = vpow2.f32 %v1757_v48  ;;  %v1132_v34 = vor.u32 1.1754944e-38, %v1131_v56  ;;  %v1113_v26 = vsel %vm4839_vm10, %v4738_v13, %v1109_v9  ;;  %v1137_v48 = vsub.f32 1.0, %v1136_v8 }
 0x1c9   : > { %3452 = vtanh.f32 %v4806_v59  ;;  %vm1115_vm12 = vcmp.eq.f32.partialorder %v1114_v43, 8.507059e+37  ;;  %v1169_v14 = vadd.f32 %v4770_v49, %v1168_v3  ;;  %v1176_v8 = vand.u32 2147483648, %v4722_v35 }
 0x1ca   : > { %v1138_v28 = vmul.f32 %v4802_v40, %v1137_v48  ;;  %vm1141_vm0 = vweird.f32 %v4802_v40 }
 0x1cb   : > { %v3445_v0 = vpop.eup %3444  ;;  %v1173_v3 = vsel %vm1172_vm15, %v4770_v49, %v1169_v14  ;;  %vm1142_vm3 = vmor %vm1140_vm2, %vm1141_vm0 }
 0x1cc   : > { %2199 = vrot.lane.b32.xlu0 %v3443_v20, %s3683_s11  ;;  %1434 = vrot.lane.b32.xlu1 %v1394_v36, %s3683_s11  ;;  %v4847_v63 = vpop.eup %3446  ;;  %v1117_v20 = vor.u32 1.1754944e-38, %v1116_v27  ;;  %v952_v36 = vmul.f32 1.442695, %v921_v16  ;;  %v1174_v16 = vand.u32 2147483647, %v4722_v35  ;;  %v1146_v35 = vand.u32 2147483648, %v4756_v7 }
 0x1cd   : > { %2185 = vrot.lane.b32.xlu2 %v3445_v0, %s3683_s11  ;;  %v3449_v33 = vpop.eup %3448  ;;  %v4849_v0 = vsel %vm1130_vm11, %v1132_v34, %v1128_v32  ;;  %v1151_v27 = vmul.f32 %v4847_v63, %v4793_v54  ;;  %v1739_v32 = vsub.f32 0.0, %v4529_v57  ;;  %v1177_v34 = vor.u32 1.1754944e-38, %v1176_v8 }
 0x1ce   : > { %v1357_v31 = vpop.permute.xlu1 %1356  ;;  %v3451_v44 = vpop.eup %3450  ;;  %v1396_v15 = vmul.f32 %v1359_v18, %v4849_v0  ;;  %v4852_v56 = vsel %vm1115_vm12, %v1117_v20, %v1113_v26  ;;  %v4865_v43 = vadd.f32 1.0, %v3449_v33  ;;  %3454 = vpow2.f32 %v952_v36 }
 0x1cf   : > { %v3453_v13 = vpop.eup %3452  ;;  %v1395_v9 = vmul.f32 %v1357_v31, %v4852_v56  ;;  %v4869_v25 = vadd.f32 1.0, %v3451_v44  ;;  %v1139_v26 = vadd.f32 %v4802_v40, %v1138_v28  ;;  %v1152_v48 = vsub.f32 1.0, %v1151_v27 }
 0x1d0   : > { %vm1175_vm1 = vcmp.eq.f32.partialorder %v1174_v16, 8.507059e+37  ;;  %3456 = vrcp.f32 %v4865_v43  ;;  %v1755_v57 = vmul.f32 1.442695, %v1739_v32  ;;  %v1144_v31 = vand.u32 2147483647, %v4756_v7 }
 0x1d1   : > { %v4877_v20 = vsel %vm1175_vm1, %v1177_v34, %v1173_v3  ;;  %3458 = vrcp.f32 %v4869_v25  ;;  %v1143_v33 = vsel %vm1142_vm3, %v4802_v40, %v1139_v26  ;;  %v1153_v36 = vmul.f32 %v4847_v63, %v1152_v48 }
 0x1d2   : > { %v1747_v44 = vsub.f32 0.0, %v4531_v4  ;;  %3460 = vpow2.f32 %v1755_v57  ;;  %vm1145_vm4 = vcmp.eq.f32.partialorder %v1144_v31, 8.507059e+37  ;;  %vm1156_vm5 = vweird.f32 %v4847_v63 }
 0x1d3   : > { %v1154_v40 = vadd.f32 %v4847_v63, %v1153_v36  ;;  %v1161_v16 = vand.u32 2147483648, %v4793_v54  ;;  %v1159_v32 = vand.u32 2147483647, %v4793_v54  ;;  %v1306_v3 = vmul.f32 %v4274_v23, %v4513_v22  ;;  %vm1157_vm7 = vmor %vm1155_vm6, %vm1156_vm5 }
 0x1d4   : > { %1438 = vrot.lane.b32.xlu0 %v1396_v15, %s3683_s11  ;;  %2201 = vrot.lane.b32.xlu1 %v3453_v13, %s3683_s11  ;;  %v3455_v49 = vpop.eup %3454  ;;  %v1147_v15 = vor.u32 1.1754944e-38, %v1146_v35  ;;  %v1771_v4 = vmul.f32 1.442695, %v1747_v44  ;;  %v1741_v57 = vsub.f32 0.0, %v4585_v21  ;;  %vm1823_vm10 = vweird.f32 %v4869_v25 }
 0x1d5   : > { %1436 = vrot.lane.b32.xlu2 %v1395_v9, %s3683_s11  ;;  %v4886_v13 = vadd.f32 1.0, %v3455_v49  ;;  %v1158_v48 = vsel %vm1157_vm7, %v4847_v63, %v1154_v40  ;;  %v1162_v31 = vor.u32 1.1754944e-38, %v1161_v16  ;;  %vm1160_vm8 = vcmp.eq.f32.partialorder %v1159_v32, 8.507059e+37 }
 0x1d6   : > { %v1365_v18 = vpop.permute.xlu2 %1364  ;;  %v4888_v7 = vsel %vm1145_vm4, %v1147_v15, %v1143_v33  ;;  %v4890_v8 = vpop.eup %3456  ;;  %v1759_v21 = vmul.f32 1.442695, %v1741_v57  ;;  %v1748_v16 = vsub.f32 0.0, %v4574_v37  ;;  %vm1185_vm12 = vweird.f32 %v4865_v43 }
 0x1d7   : > { %v1399_v14 = vmul.f32 %v1365_v18, %v4877_v20  ;;  %v4895_v27 = vpop.eup %3458  ;;  %3462 = vrcp.f32 %v4886_v13  ;;  %v1181_v34 = vmul.f32 %v4890_v8, %v4865_v43  ;;  %vm1186_vm9 = vweird.f32 %v4890_v8 }
 0x1d8   : > { %v3461_v18 = vpop.eup %3460  ;;  %v1819_v35 = vmul.f32 %v4895_v27, %v4869_v25  ;;  %3464 = vpow2.f32 %v1771_v4  ;;  %vm1824_vm11 = vweird.f32 %v4895_v27  ;;  %v1829_v37 = vand.u32 2147483648, %v4869_v25  ;;  %vm4942_vm13 = vmor %vm1185_vm12, %vm1186_vm9 }
 0x1d9   : > { %v4912_v23 = vadd.f32 1.0, %v3461_v18  ;;  %v1182_v63 = vsub.f32 1.0, %v1181_v34  ;;  %vm4948_vm14 = vmor %vm1823_vm10, %vm1824_vm11  ;;  %vm1200_vm2 = vweird.f32 %v4886_v13  ;;  %v1204_v57 = vand.u32 2147483647, %v4886_v13 }
 0x1da   : > { %v1820_v36 = vsub.f32 1.0, %v1819_v35  ;;  %v1773_v35 = vmul.f32 1.442695, %v1748_v16 }
 0x1db   : > { %3466 = vrcp.f32 %v4912_v23  ;;  %vm1205_vm4 = vcmp.eq.f32.partialorder %v1204_v57, 8.507059e+37  ;;  %vm1808_vm6 = vweird.f32 %v4912_v23 }
 0x1dc   : > { %1444 = vrot.lane.b32.xlu0 %v1399_v14, %s3683_s11  ;;  %v4914_v14 = vsel %vm1160_vm8, %v1162_v31, %v1158_v48  ;;  %3468 = vpow2.f32 %v1759_v21  ;;  %v1191_v48 = vand.u32 2147483648, %v4865_v43  ;;  %v1189_v31 = vand.u32 2147483647, %v4865_v43 }
 0x1dd   : > { %v4919_v44 = vpop.eup %3462 }
 0x1de   : > { %v1361_v9 = vpop.permute.xlu0 %1360  ;;  %v3465_v15 = vpop.eup %3464  ;;  %v1196_v40 = vmul.f32 %v4919_v44, %v4886_v13  ;;  %vm1190_vm15 = vcmp.eq.f32.partialorder %v1189_v31, 8.507059e+37  ;;  %vm1201_vm1 = vweird.f32 %v4919_v44 }
 0x1df   : > { %v1397_v28 = vmul.f32 %v1361_v9, %v4888_v7  ;;  %v1183_v9 = vmul.f32 %v4890_v8, %v1182_v63  ;;  %v4927_v4 = vadd.f32 1.0, %v3465_v15  ;;  %vm1202_vm3 = vmor %vm1200_vm2, %vm1201_vm1 }
 0x1e0   : > { %v1197_v34 = vsub.f32 1.0, %v1196_v40 }
 0x1e1   : > { %1440 = vrot.lane.b32.xlu1 %v1397_v28, %s3683_s11  ;;  %v1821_v28 = vmul.f32 %v4895_v27, %v1820_v36  ;;  %v1184_v32 = vadd.f32 %v4890_v8, %v1183_v9  ;;  %v4935_v18 = vpop.eup %3466  ;;  %3470 = vrcp.f32 %v4927_v4  ;;  %v1192_v9 = vor.u32 1.1754944e-38, %v1191_v48 }
 0x1e2   : > { %v3469_v63 = vpop.eup %3468  ;;  %v1198_v21 = vmul.f32 %v4919_v44, %v1197_v34  ;;  %v1804_v43 = vmul.f32 %v4935_v18, %v4912_v23  ;;  %3472 = vpow2.f32 %v1773_v35  ;;  %v1206_v35 = vand.u32 2147483648, %v4886_v13 }
 0x1e3   : > { %v1419_v26 = vpop.permute.xlu2 %1418  ;;  %v4962_v40 = vadd.f32 1.0, %v3469_v63  ;;  %v1743_v63 = vsub.f32 0.0, %v4660_v47  ;;  %vm1809_vm5 = vweird.f32 %v4935_v18  ;;  %vm1928_vm10 = vweird.f32 %v4927_v4 }
 0x1e4   : > { %v4910_v54 = vadd.f32 %v1419_v26, %v1306_v3  ;;  %v1822_v3 = vadd.f32 %v4895_v27, %v1821_v28  ;;  %v1749_v26 = vsub.f32 0.0, %v4618_v61  ;;  %v1830_v28 = vor.u32 1.1754944e-38, %v1829_v37  ;;  %vm1810_vm7 = vmor %vm1808_vm6, %vm1809_vm5 }
 0x1e5   : > { %v1805_v48 = vsub.f32 1.0, %v1804_v43 }
 0x1e6   : > { %v1363_v49 = vpop.permute.xlu1 %1362  ;;  %1498 = vrot.lane.b32.xlu0 %v4910_v54, %s3684_s20  ;;  %v1826_v36 = vsel %vm4948_vm14, %v4895_v27, %v1822_v3  ;;  %v1775_v15 = vmul.f32 1.442695, %v1749_v26  ;;  %v1199_v26 = vadd.f32 %v4919_v44, %v1198_v21  ;;  %v1750_v21 = vsub.f32 0.0, %v4648_v58 }
 0x1e7   : > { %v1398_v33 = vmul.f32 %v1363_v49, %v4914_v14  ;;  %v1827_v49 = vand.u32 2147483647, %v4869_v25  ;;  %v1742_v25 = vsub.f32 0.0, %v4622_v2  ;;  %v4969_v3 = vpop.eup %3470  ;;  %v1814_v58 = vand.u32 2147483648, %v4912_v23 }
 0x1e8   : > { %3474 = vpow2.f32 %v1775_v15  ;;  %v1924_v31 = vmul.f32 %v4969_v3, %v4927_v4  ;;  %v1203_v61 = vsel %vm1202_vm3, %v4919_v44, %v1199_v26  ;;  %vm1929_vm9 = vweird.f32 %v4969_v3 }
 0x1e9   : > { %1442 = vrot.lane.b32.xlu2 %v1398_v33, %s3683_s11  ;;  %v1188_v33 = vsel %vm4942_vm13, %v4890_v8, %v1184_v32  ;;  %vm1828_vm0 = vcmp.eq.f32.partialorder %v1827_v49, 8.507059e+37  ;;  %v1761_v37 = vmul.f32 1.442695, %v1742_v25  ;;  %3476 = vrcp.f32 %v4962_v40  ;;  %v3473_v49 = vpop.eup %3472  ;;  %vm1930_vm11 = vmor %vm1928_vm10, %vm1929_vm9 }
 0x1ea   : > { %v4964_v8 = vsel %vm1190_vm15, %v1192_v9, %v1188_v33  ;;  %v4966_v32 = vsel %vm1828_vm0, %v1830_v28, %v1826_v36  ;;  %3478 = vtanh.f32 %v4910_v54  ;;  %v1806_v33 = vmul.f32 %v4935_v18, %v1805_v48 }
 0x1eb   : > { %3480 = vpow2.f32 %v1761_v37  ;;  %v1207_v36 = vor.u32 1.1754944e-38, %v1206_v35  ;;  %v4989_v54 = vadd.f32 1.0, %v3473_v49  ;;  %v1925_v25 = vsub.f32 1.0, %v1924_v31 }
 0x1ec   : > { %v1763_v28 = vmul.f32 1.442695, %v1743_v63  ;;  %v1807_v44 = vadd.f32 %v4935_v18, %v1806_v33  ;;  %v1307_v31 = vmul.f32 %v4295_v38, %v4521_v55  ;;  %v1815_v49 = vor.u32 1.1754944e-38, %v1814_v58 }
 0x1ed   : > { %v4991_v43 = vsel %vm1205_vm4, %v1207_v36, %v1203_v61  ;;  %3482 = vrcp.f32 %v4989_v54  ;;  %v1926_v48 = vmul.f32 %v4969_v3, %v1925_v25  ;;  %vm1838_vm13 = vweird.f32 %v4962_v40 }
 0x1ee   : > { %v3475_v13 = vpop.eup %3474  ;;  %3484 = vpow2.f32 %v1763_v28  ;;  %v1811_v35 = vsel %vm1810_vm7, %v4935_v18, %v1807_v44  ;;  %v1932_v28 = vand.u32 2147483647, %v4927_v4  ;;  %vm1943_vm2 = vweird.f32 %v4989_v54 }
 0x1ef   : > { %v4993_v9 = vpop.eup %3476  ;;  %v5005_v37 = vadd.f32 1.0, %v3475_v13  ;;  %v1927_v18 = vadd.f32 %v4969_v3, %v1926_v48  ;;  %v1751_v48 = vsub.f32 0.0, %v4685_v50 }
 0x1f0   : > { %v1834_v57 = vmul.f32 %v4993_v9, %v4962_v40  ;;  %vm1933_vm12 = vcmp.eq.f32.partialorder %v1932_v28, 8.507059e+37  ;;  %vm1839_vm14 = vweird.f32 %v4993_v9 }
 0x1f1   : > { %v1931_v44 = vsel %vm1930_vm11, %v4969_v3, %v1927_v18  ;;  %vm1840_vm15 = vmor %vm1838_vm13, %vm1839_vm14  ;;  %vm1958_vm3 = vweird.f32 %v5005_v37 }
 0x1f2   : > { %v1835_v38 = vsub.f32 1.0, %v1834_v57 }
 0x1f6   : > { %v1367_v16 = vpop.permute.xlu0 %1366  ;;  %v2174_v27 = vpop.permute.xlu2 %2173 }
 0x1f7   : > { %v1400_v34 = vmul.f32 %v1367_v16, %v4964_v8  ;;  %v2220_v2 = vmul.f32 %v2174_v27, %v4966_v32  ;;  %v3479_v16 = vpop.eup %3478  ;;  %v1777_v27 = vmul.f32 1.442695, %v1750_v21 }
 0x1f9   : > { %1446 = vrot.lane.b32.xlu1 %v1400_v34, %s3683_s11  ;;  %2253 = vrot.lane.b32.xlu0 %v2220_v2, %s3683_s11  ;;  %v1812_v34 = vand.u32 2147483647, %v4912_v23  ;;  %v3481_v2 = vpop.eup %3480  ;;  %v1744_v23 = vsub.f32 0.0, %v4698_v11  ;;  %3486 = vpow2.f32 %v1777_v27 }
 0x1fa   : > { %v5013_v63 = vadd.f32 1.0, %v3481_v2  ;;  %3488 = vrcp.f32 %v5005_v37  ;;  %v5021_v13 = vpop.eup %3482 }
 0x1fb   : > { %vm1813_vm8 = vcmp.eq.f32.partialorder %v1812_v34, 8.507059e+37  ;;  %v1765_v11 = vmul.f32 1.442695, %v1744_v23  ;;  %v3485_v25 = vpop.eup %3484  ;;  %v1939_v58 = vmul.f32 %v5021_v13, %v4989_v54  ;;  %vm1944_vm1 = vweird.f32 %v5021_v13 }
 0x1fc   : > { %v5016_v33 = vsel %vm1813_vm8, %v1815_v49, %v1811_v35  ;;  %3490 = vrcp.f32 %v5013_v63  ;;  %v5035_v27 = vadd.f32 1.0, %v3485_v25  ;;  %v1752_v25 = vsub.f32 0.0, %v4732_v60  ;;  %vm5100_vm4 = vmor %vm1943_vm2, %vm1944_vm1 }
 0x1fd   : > { %vm1853_vm7 = vweird.f32 %v5013_v63 }
 0x1fe   : > { %v1369_v15 = vpop.permute.xlu1 %1368  ;;  %v1421_v26 = vpop.permute.xlu0 %1420  ;;  %vm1868_vm11 = vweird.f32 %v5035_v27 }
 0x1ff   : > { %v1401_v47 = vmul.f32 %v1369_v15, %v4991_v43  ;;  %v1467_v61 = vadd.f32 %v1421_v26, %v1307_v31  ;;  %v1934_v15 = vand.u32 2147483648, %v4927_v4  ;;  %v1308_v26 = vmul.f32 %v4276_v24, %v4576_v42  ;;  %v1425_v23 = vpop.permute.xlu2 %1424 }
 0x201   : > { %1448 = vrot.lane.b32.xlu2 %v1401_v47, %s3683_s11  ;;  %1595 = vrot.lane.b32.xlu1 %v3479_v16, %s3683_s11  ;;  %3492 = vtanh.f32 %v1467_v61  ;;  %v3487_v47 = vpop.eup %3486  ;;  %v1836_v16 = vmul.f32 %v4993_v9, %v1835_v38  ;;  %v1935_v4 = vor.u32 1.1754944e-38, %v1934_v15  ;;  %v1779_v38 = vmul.f32 1.442695, %v1751_v48 }
 0x202   : > { %3494 = vpow2.f32 %v1765_v11  ;;  %v5037_v2 = vpop.eup %3488  ;;  %v5042_v35 = vadd.f32 1.0, %v3487_v47  ;;  %v1842_v11 = vand.u32 2147483647, %v4962_v40 }
 0x203   : > { %v5044_v3 = vsel %vm1933_vm12, %v1935_v4, %v1931_v44  ;;  %v5048_v31 = vpop.eup %3490  ;;  %v1837_v24 = vadd.f32 %v4993_v9, %v1836_v16  ;;  %3496 = vrcp.f32 %v5035_v27  ;;  %v1954_v18 = vmul.f32 %v5037_v2, %v5005_v37 }
 0x204   : > { %v1849_v44 = vmul.f32 %v5048_v31, %v5013_v63  ;;  %v1309_v16 = vmul.f32 %v4297_v39, %v4611_v19  ;;  %vm1843_vm0 = vcmp.eq.f32.partialorder %v1842_v11, 8.507059e+37  ;;  %vm1959_vm5 = vweird.f32 %v5037_v2 }
 0x205   : > { %v1841_v28 = vsel %vm1840_vm15, %v4993_v9, %v1837_v24  ;;  %v1955_v4 = vsub.f32 1.0, %v1954_v18  ;;  %vm1854_vm8 = vweird.f32 %v5048_v31  ;;  %vm5128_vm9 = vmor %vm1958_vm3, %vm1959_vm5  ;;  %vm1973_vm2 = vweird.f32 %v5042_v35 }
 0x206   : > { %v2172_v36 = vpop.permute.xlu1 %2171  ;;  %v1469_v9 = vadd.f32 %v1425_v23, %v1309_v16  ;;  %v1964_v16 = vand.u32 2147483648, %v5005_v37  ;;  %vm5155_vm13 = vmor %vm1853_vm7, %vm1854_vm8 }
 0x207   : > { %v2219_v21 = vmul.f32 %v2172_v36, %v5016_v33  ;;  %v2188_v34 = vpop.permute.xlu0 %2187  ;;  %v1940_v36 = vsub.f32 1.0, %v1939_v58  ;;  %v3493_v50 = vpop.eup %3492  ;;  %v1745_v58 = vsub.f32 0.0, %v4736_v17  ;;  %v1850_v17 = vsub.f32 1.0, %v1849_v44 }
 0x208   : > { %v2227_v49 = vmul.f32 %v2188_v34, %v5044_v3  ;;  %v3495_v15 = vpop.eup %3494  ;;  %v5087_v23 = vpop.permute.xlu2 %2191 }
 0x209   : > { %2251 = vrot.lane.b32.xlu2 %v2219_v21, %s3683_s11  ;;  %1500 = vrot.lane.b32.xlu1 %v1467_v61, %s3684_s20  ;;  %v1844_v21 = vand.u32 2147483648, %v4962_v40  ;;  %v1941_v47 = vmul.f32 %v5021_v13, %v1940_v36  ;;  %v5072_v60 = vadd.f32 1.0, %v3495_v15  ;;  %v5074_v40 = vpop.eup %3496  ;;  %v1767_v18 = vmul.f32 1.442695, %v1745_v58 }
 0x20a   : > { %v1864_v11 = vmul.f32 %v5074_v40, %v5035_v27  ;;  %v1947_v15 = vand.u32 2147483647, %v4989_v54  ;;  %vm1869_vm12 = vweird.f32 %v5074_v40 }
 0x20b   : > { %v1845_v34 = vor.u32 1.1754944e-38, %v1844_v21  ;;  %v1942_v39 = vadd.f32 %v5021_v13, %v1941_v47  ;;  %v1956_v21 = vmul.f32 %v5037_v2, %v1955_v4  ;;  %v1753_v4 = vsub.f32 0.0, %v4765_v10  ;;  %vm5181_vm15 = vmor %vm1868_vm11, %vm1869_vm12 }
 0x20c   : > { %vm1948_vm6 = vcmp.eq.f32.partialorder %v1947_v15, 8.507059e+37  ;;  %v1965_v15 = vor.u32 1.1754944e-38, %v1964_v16  ;;  %vm1883_vm5 = vweird.f32 %v5072_v60 }
 0x20d   : > { %v5076_v48 = vsel %vm1843_vm0, %v1845_v34, %v1841_v28  ;;  %v1962_v28 = vand.u32 2147483647, %v5005_v37  ;;  %v1957_v34 = vadd.f32 %v5037_v2, %v1956_v21 }
 0x20e   : > { %v1423_v57 = vpop.permute.xlu1 %1422 }
 0x20f   : > { %v1468_v61 = vadd.f32 %v1423_v57, %v1308_v26  ;;  %v1781_v26 = vmul.f32 1.442695, %v1752_v25  ;;  %v1746_v25 = vsub.f32 0.0, %v4776_v12  ;;  %vm5132_vm10 = vcmp.eq.f32.partialorder %v1962_v28, 8.507059e+37 }
 0x210   : > { %v1961_v37 = vsel %vm5128_vm9, %v5037_v2, %v1957_v34 }
 0x211   : > { %3498 = vtanh.f32 %v1468_v61  ;;  %1597 = vrot.lane.b32.xlu2 %v3493_v50, %s3683_s11  ;;  %2267 = vrot.lane.b32.xlu1 %v2227_v49, %s3683_s11 }
 0x212   : > { %3500 = vrcp.f32 %v5042_v35 }
 0x213   : > { %3502 = vpow2.f32 %v1779_v38  ;;  %v1949_v38 = vand.u32 2147483648, %v4989_v54  ;;  %v1946_v54 = vsel %vm5100_vm4, %v5021_v13, %v1942_v39  ;;  %v1769_v13 = vmul.f32 1.442695, %v1746_v25 }
 0x214   : > { %3504 = vrcp.f32 %v5072_v60  ;;  %v1859_v25 = vand.u32 2147483648, %v5013_v63 }
 0x215   : > { %3506 = vtanh.f32 %v1469_v9  ;;  %v1950_v58 = vor.u32 1.1754944e-38, %v1949_v38 }
 0x216   : > { %v2176_v57 = vpop.permute.xlu0 %2175  ;;  %v2190_v49 = vpop.permute.xlu1 %2189  ;;  %3508 = vpow2.f32 %v1781_v26  ;;  %v1865_v26 = vsub.f32 1.0, %v1864_v11 }
 0x217   : > { %v3499_v24 = vpop.eup %3498  ;;  %v2221_v36 = vmul.f32 %v2176_v57, %v5076_v48  ;;  %3510 = vpow2.f32 %v1767_v18 }
 0x218   : > { %v5081_v50 = vpop.eup %3500  ;;  %1599 = vrot.lane.b32.xlu0 %v3499_v24, %s3683_s11  ;;  %v5116_v24 = vsel %vm1948_vm6, %v1950_v58, %v1946_v54  ;;  %v1783_v54 = vmul.f32 1.442695, %v1753_v4  ;;  %v1866_v28 = vmul.f32 %v5074_v40, %v1865_v26  ;;  %v1874_v26 = vand.u32 2147483648, %v5035_v27 }
 0x219   : > { %1502 = vrot.lane.b32.xlu2 %v1468_v61, %s3684_s20  ;;  %2255 = vrot.lane.b32.xlu1 %v2221_v36, %s3683_s11  ;;  %v3503_v44 = vpop.eup %3502  ;;  %v1851_v61 = vmul.f32 %v5048_v31, %v1850_v17  ;;  %v1969_v12 = vmul.f32 %v5081_v50, %v5042_v35  ;;  %v2228_v17 = vmul.f32 %v2190_v49, %v5116_v24  ;;  %vm1974_vm0 = vweird.f32 %v5081_v50 }
 0x21a   : > { %v5114_v57 = vadd.f32 1.0, %v3503_v44  ;;  %v5119_v39 = vpop.eup %3504  ;;  %v1310_v49 = vmul.f32 %v4282_v29, %v4652_v46  ;;  %vm5209_vm3 = vmor %vm1973_vm2, %vm1974_vm0 }
 0x21b   : > { %v1852_v18 = vadd.f32 %v5048_v31, %v1851_v61  ;;  %v1970_v10 = vsub.f32 1.0, %v1969_v12  ;;  %v3507_v21 = vpop.eup %3506  ;;  %v1857_v61 = vand.u32 2147483647, %v5013_v63  ;;  %v2180_v12 = vpop.permute.xlu2 %2179  ;;  %v1879_v4 = vmul.f32 %v5119_v39, %v5072_v60 }
 0x21c   : > { %v3509_v44 = vpop.eup %3508  ;;  %3512 = vrcp.f32 %v5114_v57  ;;  %v5169_v63 = vsel %vm5132_vm10, %v1965_v15, %v1961_v37  ;;  %v1977_v37 = vand.u32 2147483647, %v5042_v35  ;;  %vm1884_vm6 = vweird.f32 %v5119_v39 }
 0x21d   : > { %v3511_v29 = vpop.eup %3510  ;;  %3514 = vpow2.f32 %v1769_v13  ;;  %v1856_v16 = vsel %vm5155_vm13, %v5048_v31, %v1852_v18  ;;  %v1971_v58 = vmul.f32 %v5081_v50, %v1970_v10  ;;  %v5165_v34 = vadd.f32 1.0, %v3509_v44  ;;  %vm5248_vm7 = vmor %vm1883_vm5, %vm1884_vm6 }
 0x21e   : > { %v1427_v36 = vpop.permute.xlu0 %1426  ;;  %v2178_v47 = vpop.permute.xlu1 %2177  ;;  %v5172_v13 = vadd.f32 1.0, %v3511_v29  ;;  %3516 = vpow2.f32 %v1783_v54  ;;  %vm1858_vm14 = vcmp.eq.f32.partialorder %v1857_v61, 8.507059e+37  ;;  %v2229_v31 = vmul.f32 %v5087_v23, %v5169_v63 }
 0x21f   : > { %v1470_v10 = vadd.f32 %v1427_v36, %v1310_v49  ;;  %v1880_v44 = vsub.f32 1.0, %v1879_v4  ;;  %3518 = vrcp.f32 %v5165_v34  ;;  %v1875_v54 = vor.u32 1.1754944e-38, %v1874_v26 }
 0x220   : > { %1504 = vrot.lane.b32.xlu0 %v1469_v9, %s3684_s20  ;;  %v1872_v9 = vand.u32 2147483647, %v5035_v27  ;;  %v1979_v36 = vand.u32 2147483648, %v5042_v35  ;;  %3520 = vrcp.f32 %v5172_v13  ;;  %v1311_v35 = vmul.f32 %v4302_v41, %v4689_v53 }
 0x221   : > { %2269 = vrot.lane.b32.xlu2 %v2228_v17, %s3683_s11  ;;  %1601 = vrot.lane.b32.xlu1 %v3507_v21, %s3683_s11  ;;  %v1860_v17 = vor.u32 1.1754944e-38, %v1859_v25  ;;  %v1867_v21 = vadd.f32 %v5074_v40, %v1866_v28  ;;  %v1972_v25 = vadd.f32 %v5081_v50, %v1971_v58  ;;  %3522 = vtanh.f32 %v1470_v10 }
 0x222   : > { %v5190_v23 = vpop.eup %3512  ;;  %vm5193_vm1 = vcmp.eq.f32.partialorder %v1872_v9, 8.507059e+37  ;;  %v1881_v9 = vmul.f32 %v5119_v39, %v1880_v44  ;;  %v1754_v58 = vsub.f32 0.0, %v4806_v59  ;;  %v1980_v26 = vor.u32 1.1754944e-38, %v1979_v36 }
 0x223   : > { %v5185_v38 = vsel %vm1858_vm14, %v1860_v17, %v1856_v16  ;;  %v3515_v49 = vpop.eup %3514  ;;  %v1984_v2 = vmul.f32 %v5190_v23, %v5114_v57  ;;  %v1431_v17 = vpop.permute.xlu2 %1430  ;;  %vm1978_vm4 = vcmp.eq.f32.partialorder %v1977_v37, 8.507059e+37  ;;  %v1889_v59 = vand.u32 2147483648, %v5072_v60 }
 0x224   : > { %v2222_v15 = vmul.f32 %v2178_v47, %v5185_v38  ;;  %v1871_v47 = vsel %vm5181_vm15, %v5074_v40, %v1867_v21  ;;  %v3517_v29 = vpop.eup %3516  ;;  %v1976_v40 = vsel %vm5209_vm3, %v5081_v50, %v1972_v25  ;;  %v5221_v16 = vadd.f32 1.0, %v3515_v49 }
 0x225   : > { %v5226_v4 = vsel %vm5193_vm1, %v1875_v54, %v1871_v47  ;;  %v5230_v41 = vpop.eup %3518  ;;  %v5232_v21 = vadd.f32 1.0, %v3517_v29  ;;  %v5235_v18 = vsel %vm1978_vm4, %v1980_v26, %v1976_v40  ;;  %v1882_v44 = vadd.f32 %v5119_v39, %v1881_v9 }
 0x226   : > { %v2194_v11 = vpop.permute.xlu0 %2193  ;;  %v1429_v61 = vpop.permute.xlu1 %1428  ;;  %v1887_v27 = vand.u32 2147483647, %v5072_v60  ;;  %v1985_v54 = vsub.f32 1.0, %v1984_v2  ;;  %3524 = vrcp.f32 %v5221_v16  ;;  %v1785_v49 = vmul.f32 1.442695, %v1754_v58 }
 0x227   : > { %v1471_v50 = vadd.f32 %v1429_v61, %v1311_v35  ;;  %v2230_v25 = vmul.f32 %v2194_v11, %v5235_v18  ;;  %v1999_v11 = vmul.f32 %v5230_v41, %v5165_v34  ;;  %v1890_v47 = vor.u32 1.1754944e-38, %v1889_v59 }
 0x228   : > { %2271 = vrot.lane.b32.xlu0 %v2229_v31, %s3683_s11  ;;  %v2223_v31 = vmul.f32 %v2180_v12, %v5226_v4  ;;  %v1886_v37 = vsel %vm5248_vm7, %v5119_v39, %v1882_v44  ;;  %vm1888_vm8 = vcmp.eq.f32.partialorder %v1887_v27, 8.507059e+37  ;;  %v1986_v28 = vmul.f32 %v5190_v23, %v1985_v54 }
 0x229   : > { %2257 = vrot.lane.b32.xlu2 %v2222_v15, %s3683_s11  ;;  %1506 = vrot.lane.b32.xlu1 %v1470_v10, %s3684_s20  ;;  %v5238_v15 = vpop.eup %3520  ;;  %3526 = vtanh.f32 %v1471_v50  ;;  %v1312_v61 = vmul.f32 %v4312_v52, %v4729_v1  ;;  %v2000_v40 = vsub.f32 1.0, %v1999_v11  ;;  %v5268_v2 = vsel %vm1888_vm8, %v1890_v47, %v1886_v37 }
 0x22a   : > { %v3523_v36 = vpop.eup %3522  ;;  %3528 = vrcp.f32 %v5232_v21  ;;  %v1894_v60 = vmul.f32 %v5238_v15, %v5172_v13  ;;  %vm1989_vm9 = vweird.f32 %v5190_v23  ;;  %v1994_v44 = vand.u32 2147483648, %v5114_v57 }
 0x22b   : > { %3530 = vpow2.f32 %v1785_v49  ;;  %v1472_v9 = vadd.f32 %v1431_v17, %v1312_v61  ;;  %v2198_v59 = vpop.permute.xlu2 %2197  ;;  %v2001_v17 = vmul.f32 %v5230_v41, %v2000_v40  ;;  %vm1988_vm10 = vweird.f32 %v5114_v57 }
 0x22c   : > { %v5266_v35 = vpop.eup %3524  ;;  %v1895_v26 = vsub.f32 1.0, %v1894_v60  ;;  %v1992_v27 = vand.u32 2147483647, %v5114_v57  ;;  %vm1990_vm11 = vmor %vm1988_vm10, %vm1989_vm9  ;;  %vm2004_vm12 = vweird.f32 %v5230_v41  ;;  %v1995_v57 = vor.u32 1.1754944e-38, %v1994_v44 }
 0x22d   : > { %3532 = vtanh.f32 %v1472_v9  ;;  %v1909_v54 = vmul.f32 %v5266_v35, %v5221_v16  ;;  %vm1898_vm13 = vweird.f32 %v5172_v13  ;;  %vm1899_vm14 = vweird.f32 %v5238_v15 }
 0x22e   : > { %v2182_v10 = vpop.permute.xlu0 %2181  ;;  %v2196_v29 = vpop.permute.xlu1 %2195  ;;  %v2002_v11 = vadd.f32 %v5230_v41, %v2001_v17  ;;  %vm1993_vm15 = vcmp.eq.f32.partialorder %v1992_v27, 8.507059e+37  ;;  %v1904_v47 = vand.u32 2147483648, %v5172_v13  ;;  %vm5305_vm0 = vmor %vm1898_vm13, %vm1899_vm14  ;;  %vm2003_vm1 = vweird.f32 %v5165_v34 }
 0x22f   : > { %v2224_v39 = vmul.f32 %v2182_v10, %v5268_v2  ;;  %v1910_v60 = vsub.f32 1.0, %v1909_v54  ;;  %v2007_v17 = vand.u32 2147483647, %v5165_v34  ;;  %vm5315_vm2 = vmor %vm2003_vm1, %vm2004_vm12  ;;  %vm1913_vm5 = vweird.f32 %v5221_v16 }
 0x230   : > { %2259 = vrot.lane.b32.xlu0 %v2223_v31, %s3683_s11  ;;  %v3527_v31 = vpop.eup %3526  ;;  %v1905_v27 = vor.u32 1.1754944e-38, %v1904_v47  ;;  %vm1914_vm6 = vweird.f32 %v5266_v35  ;;  %v1917_v47 = vand.u32 2147483647, %v5221_v16  ;;  %vm2018_vm9 = vweird.f32 %v5232_v21 }
 0x231   : > { %1603 = vrot.lane.b32.xlu2 %v3523_v36, %s3683_s11  ;;  %2273 = vrot.lane.b32.xlu1 %v2230_v25, %s3683_s11  ;;  %v1987_v25 = vadd.f32 %v5190_v23, %v1986_v28  ;;  %v5275_v52 = vpop.eup %3528  ;;  %v1896_v36 = vmul.f32 %v5238_v15, %v1895_v26  ;;  %v1902_v28 = vand.u32 2147483647, %v5172_v13  ;;  %v2009_v26 = vand.u32 2147483648, %v5165_v34  ;;  %vm5346_vm7 = vmor %vm1913_vm5, %vm1914_vm6 }
 0x232   : > { %v3531_v10 = vpop.eup %3530  ;;  %v2014_v12 = vmul.f32 %v5275_v52, %v5232_v21  ;;  %v2006_v34 = vsel %vm5315_vm2, %v5230_v41, %v2002_v11  ;;  %vm2008_vm4 = vcmp.eq.f32.partialorder %v2007_v17, 8.507059e+37  ;;  %v1919_v41 = vand.u32 2147483648, %v5221_v16 }
 0x233   : > { %v1991_v49 = vsel %vm1990_vm11, %v5190_v23, %v1987_v25  ;;  %v1897_v23 = vadd.f32 %v5238_v15, %v1896_v36  ;;  %v3533_v44 = vpop.eup %3532  ;;  %vm1903_vm3 = vcmp.eq.f32.partialorder %v1902_v28, 8.507059e+37  ;;  %v2010_v54 = vor.u32 1.1754944e-38, %v2009_v26 }
 0x234   : > { %v5297_v37 = vsel %vm1993_vm15, %v1995_v57, %v1991_v49  ;;  %v2015_v25 = vsub.f32 1.0, %v2014_v12  ;;  %v1313_v49 = vmul.f32 %v4317_v45, %v4767_v5  ;;  %vm2019_vm8 = vweird.f32 %v5275_v52 }
 0x235   : > { %v5333_v12 = vsel %vm2008_vm4, %v2010_v54, %v2006_v34  ;;  %v1920_v16 = vor.u32 1.1754944e-38, %v1919_v41  ;;  %vm1918_vm10 = vcmp.eq.f32.partialorder %v1917_v47, 8.507059e+37  ;;  %vm2020_vm11 = vmor %vm2018_vm9, %vm2019_vm8  ;;  %v1314_v17 = vmul.f32 %v4319_v62, %v4808_v51 }
 0x236   : > { %v5270_v58 = vpop.permute.xlu0 %1432  ;;  %v2184_v61 = vpop.permute.xlu1 %2183  ;;  %v2016_v36 = vmul.f32 %v5275_v52, %v2015_v25  ;;  %v1315_v13 = vmul.f32 %v4331_v6, %v4852_v56  ;;  %vm1546_vm13 = vcmask 261120  }
 0x238   : > { %1605 = vrot.lane.b32.xlu0 %v3527_v31, %s3683_s11  ;;  %v2231_v31 = vmul.f32 %v2196_v29, %v5297_v37  ;;  %v2186_v29 = vpop.permute.xlu2 %2185 }
 0x239   : > { %1508 = vrot.lane.b32.xlu2 %v1471_v50, %s3684_s20  ;;  %2261 = vrot.lane.b32.xlu1 %v2224_v39, %s3683_s11  ;;  %v5293_v50 = vadd.f32 1.0, %v3531_v10  ;;  %v1901_v10 = vsel %vm5305_vm0, %v5238_v15, %v1897_v23  ;;  %v2232_v15 = vmul.f32 %v2198_v59, %v5333_v12  ;;  %v2024_v59 = vand.u32 2147483648, %v5232_v21 }
 0x23a   : > { %v5336_v57 = vsel %vm1903_vm3, %v1905_v27, %v1901_v10 }
 0x23b   : > { %3534 = vrcp.f32 %v5293_v50  ;;  %v2225_v26 = vmul.f32 %v2184_v61, %v5336_v57  ;;  %v2025_v27 = vor.u32 1.1754944e-38, %v2024_v59  ;;  %v2039_v47 = vand.u32 2147483648, %v5293_v50 }
 0x23c   : > { %vm2033_vm15 = vweird.f32 %v5293_v50  ;;  %v2037_v28 = vand.u32 2147483647, %v5293_v50 }
 0x23e   : > { %v5301_v40 = vpop.permute.xlu0 %2199  ;;  %v1435_v39 = vpop.permute.xlu1 %1434  ;;  %vm2038_vm1 = vcmp.eq.f32.partialorder %v2037_v28, 8.507059e+37  ;;  %v6197_v28 = vld [vmem:[#allocation15_spill] sm:$0xff] }
 0x240   : > { %1510 = vrot.lane.b32.xlu0 %v1472_v9, %s3684_s20  ;;  %v1911_v9 = vmul.f32 %v5266_v35, %v1910_v60  ;;  %v1473_v60 = vadd.f32 %v5270_v58, %v1313_v49  ;;  %v2022_v58 = vand.u32 2147483647, %v5232_v21  ;;  %v1437_v25 = vpop.permute.xlu2 %1436 }
 0x241   : > { %2275 = vrot.lane.b32.xlu2 %v2231_v31, %s3683_s11  ;;  %1607 = vrot.lane.b32.xlu1 %v3533_v44, %s3683_s11  ;;  %v5344_v23 = vpop.eup %3534  ;;  %v2017_v31 = vadd.f32 %v5275_v52, %v2016_v36  ;;  %v1475_v10 = vadd.f32 %v1437_v25, %v1315_v13 }
 0x242   : > { %v1912_v11 = vadd.f32 %v5266_v35, %v1911_v9  ;;  %3536 = vtanh.f32 %v1473_v60  ;;  %v2029_v21 = vmul.f32 %v5344_v23, %v5293_v50  ;;  %vm2023_vm12 = vcmp.eq.f32.partialorder %v2022_v58, 8.507059e+37  ;;  %v6193_v50 = vld [vmem:[#allocation8_spill] sm:$0xff] }
 0x243   : > { %v2021_v44 = vsel %vm2020_vm11, %v5275_v52, %v2017_v31  ;;  %vm2034_vm14 = vweird.f32 %v5344_v23  ;;  %v1316_v25 = vmul.f32 %v6193_v50, %v4849_v0 }
 0x244   : > { %v1916_v61 = vsel %vm5346_vm7, %v5266_v35, %v1912_v11  ;;  %v1474_v35 = vadd.f32 %v1435_v39, %v1314_v17  ;;  %v5372_v54 = vsel %vm2023_vm12, %v2025_v27, %v2021_v44  ;;  %v2030_v62 = vsub.f32 1.0, %v2029_v21  ;;  %vm2035_vm0 = vmor %vm2033_vm15, %vm2034_vm14  ;;  %v6192_v39 = vld [vmem:[#allocation9_spill] sm:$0xff] }
 0x245   : > { %v5369_v34 = vsel %vm1918_vm10, %v1920_v16, %v1916_v61  ;;  %v2233_v52 = vmul.f32 %v5301_v40, %v5372_v54  ;;  %v1317_v16 = vmul.f32 %v6192_v39, %v4888_v7  ;;  %v2040_v44 = vor.u32 1.1754944e-38, %v2039_v47 }
 0x246   : > { %v5342_v45 = vpop.permute.xlu0 %1438  ;;  %v2226_v9 = vmul.f32 %v2186_v29, %v5369_v34  ;;  %3538 = vtanh.f32 %v1474_v35  ;;  %v2202_v6 = vpop.permute.xlu1 %2201  ;;  %v2031_v29 = vmul.f32 %v5344_v23, %v2030_v62 }
 0x247   : > { %3540 = vtanh.f32 %v1475_v10  ;;  %v1476_v21 = vadd.f32 %v5342_v45, %v1316_v25  ;;  %v6194_v45 = vld [vmem:[#allocation10_spill] sm:$0xff] }
 0x248   : > { %2277 = vrot.lane.b32.xlu0 %v2232_v15, %s3683_s11  ;;  %v3537_v36 = vpop.eup %3536  ;;  %v1443_v41 = vpop.permute.xlu2 %1442  ;;  %v2032_v11 = vadd.f32 %v5344_v23, %v2031_v29  ;;  %v6196_v29 = vld [vmem:[#allocation12_spill] sm:$0xff] }
 0x249   : > { %2263 = vrot.lane.b32.xlu2 %v2225_v26, %s3683_s11  ;;  %1512 = vrot.lane.b32.xlu1 %v1473_v60, %s3684_s20  ;;  %v1318_v26 = vmul.f32 %v4347_v30, %v4914_v14 }
 0x24a   : > { %v2036_v59 = vsel %vm2035_vm0, %v5344_v23, %v2032_v11 }
 0x24b   : > { %v1478_v61 = vadd.f32 %v1443_v41, %v1318_v26  ;;  %v5397_v13 = vsel %vm2038_vm1, %v2040_v44, %v2036_v59  ;;  %v2139_v26 = vmul.f32 %v6197_v28, %v5016_v33 }
 0x24c   : > { %v3539_v15 = vpop.eup %3538  ;;  %v2234_v30 = vmul.f32 %v2202_v6, %v5397_v13 }
 0x24d   : > { %v3541_v40 = vpop.eup %3540  ;;  %3542 = vtanh.f32 %v1478_v61 }
 0x24e   : > { %v1445_v49 = vpop.permute.xlu0 %1444 }
 0x250   : > { %2265 = vrot.lane.b32.xlu0 %v2226_v9, %s3683_s11 }
 0x251   : > { %1609 = vrot.lane.b32.xlu2 %v3537_v36, %s3683_s11  ;;  %2279 = vrot.lane.b32.xlu1 %v2233_v52, %s3683_s11  ;;  %v1319_v52 = vmul.f32 %v6194_v45, %v4877_v20 }
 0x253   : > { %v1441_v31 = vpop.permute.xlu1 %1440  ;;  %v3543_v27 = vpop.eup %3542  ;;  %v1479_v41 = vadd.f32 %v1445_v49, %v1319_v52 }
 0x254   : > { %v1477_v17 = vadd.f32 %v1441_v31, %v1317_v16 }
 0x256   : > { %3544 = vtanh.f32 %v1477_v17 }
 0x257   : > { %3546 = vtanh.f32 %v1476_v21 }
 0x258   : > { %1611 = vrot.lane.b32.xlu0 %v3539_v15, %s3683_s11  ;;  %v1499_v60 = vpop.permute.xlu0 %1498  ;;  %v1321_v15 = vmul.f32 %v6196_v29, %v4991_v43  ;;  %3548 = vtanh.f32 %v1479_v41 }
 0x259   : > { %1547 = vst.msk [vmem:[#allocation3] sm:$0xff] %vm1546_vm13, %v1499_v60  ;;  %1514 = vrot.lane.b32.xlu2 %v1474_v35, %s3684_s20  ;;  %1613 = vrot.lane.b32.xlu1 %v3541_v40, %s3683_s11 }
 0x25b   : > { %v1449_v58 = vpop.permute.xlu2 %1448 }
 0x25c   : > { %v3545_v35 = vpop.eup %3544  ;;  %v1481_v40 = vadd.f32 %v1449_v58, %v1321_v15 }
 0x25d   : > { %v3547_v9 = vpop.eup %3546 }
 0x25e   : > { %v3549_v49 = vpop.eup %3548 }
 0x260   : > { %1516 = vrot.lane.b32.xlu0 %v1475_v10, %s3684_s20  ;;  %v6195_v10 = vld [vmem:[#allocation11_spill] sm:$0xff] }
 0x261   : > { %2281 = vrot.lane.b32.xlu2 %v2234_v30, %s3683_s11  ;;  %1518 = vrot.lane.b32.xlu1 %v1476_v21, %s3684_s20  ;;  %v1320_v62 = vmul.f32 %v6195_v10, %v4964_v8  ;;  %v6200_v10 = vld [vmem:[#allocation24_spill] sm:$0xff] }
 0x263   : > { %v2252_v23 = vpop.permute.xlu2 %2251 }
 0x264   : > { %v2299_v31 = vadd.f32 %v2252_v23, %v2139_v26 }
 0x268   : > { %1617 = vrot.lane.b32.xlu0 %v3545_v35, %s3683_s11  ;;  %v6199_v35 = vld [vmem:[#allocation20_spill] sm:$0xff] }
 0x269   : > { %1615 = vrot.lane.b32.xlu2 %v3547_v9, %s3683_s11  ;;  %1619 = vrot.lane.b32.xlu1 %v3543_v27, %s3683_s11  ;;  %v2147_v9 = vmul.f32 %v6199_v35, %v5044_v3 }
 0x26b   : > { %v1447_v36 = vpop.permute.xlu1 %1446  ;;  %v1598_v6 = vpop.permute.xlu2 %1597 }
 0x26c   : > { %v1480_v11 = vadd.f32 %v1447_v36, %v1320_v62  ;;  %v2254_v50 = vpop.permute.xlu0 %2253  ;;  %v2148_v62 = vmul.f32 %v6200_v10, %v5116_v24 }
 0x26e   : > { %3550 = vtanh.f32 %v1480_v11 }
 0x26f   : > { %3552 = vtanh.f32 %v1481_v40 }
 0x270   : > { %1522 = vrot.lane.b32.xlu0 %v1478_v61, %s3684_s20  ;;  %3554 = vtanh.f32 %v2299_v31 }
 0x271   : > { %1520 = vrot.lane.b32.xlu2 %v1477_v17, %s3684_s20  ;;  %1524 = vrot.lane.b32.xlu1 %v1479_v41, %s3684_s20  ;;  %v6198_v17 = vld [vmem:[#allocation13_spill] sm:$0xff] }
 0x272   : > { %v2140_v21 = vmul.f32 %v6198_v17, %v4966_v32 }
 0x273   : > { %v1503_v47 = vpop.permute.xlu2 %1502  ;;  %v1596_v60 = vpop.permute.xlu1 %1595 }
 0x274   : > { %1549 = vst.msk [vmem:[#allocation3 + $0x10] sm:$0xff] %vm1546_vm13, %v1503_v47  ;;  %v3551_v59 = vpop.eup %3550  ;;  %v2300_v30 = vadd.f32 %v2254_v50, %v2140_v21  ;;  %v1643_v23 = vmul.f32 %v1596_v60, %v4513_v22  ;;  %v1644_v22 = vmul.f32 %v1598_v6, %v4521_v55  ;;  %v6201_v60 = vld [vmem:[#allocation14_spill] sm:$0xff] }
 0x275   : > { %v3553_v39 = vpop.eup %3552  ;;  %v2141_v28 = vmul.f32 %v6201_v60, %v5076_v48 }
 0x276   : > { %v3555_v61 = vpop.eup %3554  ;;  %3556 = vtanh.f32 %v2300_v30 }
 0x278   : > { %1623 = vrot.lane.b32.xlu0 %v3551_v59, %s3683_s11 }
 0x279   : > { %1621 = vrot.lane.b32.xlu2 %v3549_v49, %s3683_s11  ;;  %1625 = vrot.lane.b32.xlu1 %v3553_v39, %s3683_s11 }
 0x27b   : > { %v2270_v16 = vpop.permute.xlu2 %2269  ;;  %v1501_v58 = vpop.permute.xlu1 %1500 }
 0x27c   : > { %1548 = vst.msk [vmem:[#allocation3 + $0x8] sm:$0xff] %vm1546_vm13, %v1501_v58  ;;  %v2308_v41 = vadd.f32 %v2270_v16, %v2148_v62  ;;  %v3557_v55 = vpop.eup %3556  ;;  %v6203_v16 = vld [vmem:[#allocation22_spill] sm:$0xff] }
 0x27d   : > { %v2149_v58 = vmul.f32 %v6203_v16, %v5169_v63 }
 0x280   : > { %1528 = vrot.lane.b32.xlu0 %v1481_v40, %s3684_s20 }
 0x281   : > { %1526 = vrot.lane.b32.xlu2 %v1480_v11, %s3684_s20  ;;  %2427 = vrot.lane.b32.xlu1 %v3555_v61, %s3683_s11 }
 0x283   : > { %v2258_v25 = vpop.permute.xlu2 %2257  ;;  %v2268_v44 = vpop.permute.xlu1 %2267 }
 0x284   : > { %v2307_v36 = vadd.f32 %v2268_v44, %v2147_v9 }
 0x286   : > { %3558 = vtanh.f32 %v2307_v36 }
 0x287   : > { %3560 = vtanh.f32 %v2308_v41 }
 0x288   : > { %2331 = vrot.lane.b32.xlu0 %v2299_v31, %s3684_s20  ;;  %v6202_v31 = vld [vmem:[#allocation18_spill] sm:$0xff] }
 0x289   : > { %2333 = vrot.lane.b32.xlu1 %v2300_v30, %s3684_s20  ;;  %1675 = vrot.lane.b32.xlu2 %v1643_v23, %s3685_s21  ;;  %v2142_v59 = vmul.f32 %v6202_v31, %v5185_v38 }
 0x28a   : > { %v1600_v27 = vpop.permute.xlu0 %1599 }
 0x28b   : > { %v5433_v45 = vpop.permute.xlu2 %1603  ;;  %v2256_v52 = vpop.permute.xlu1 %2255  ;;  %v1645_v29 = vmul.f32 %v1600_v27, %v4576_v42  ;;  %v2302_v61 = vadd.f32 %v2258_v25, %v2142_v59 }
 0x28c   : > { %v3559_v6 = vpop.eup %3558  ;;  %v2301_v39 = vadd.f32 %v2256_v52, %v2141_v28  ;;  %v6204_v52 = vld [vmem:[#allocation16_spill] sm:$0xff] }
 0x28d   : > { %v3561_v47 = vpop.eup %3560  ;;  %v2143_v10 = vmul.f32 %v6204_v52, %v5226_v4 }
 0x28e   : > { %3562 = vtanh.f32 %v2301_v39 }
 0x28f   : > { %3564 = vtanh.f32 %v2302_v61 }
 0x290   : > { %1677 = vrot.lane.b32.xlu0 %v1644_v22, %s3685_s21 }
 0x291   : > { %1679 = vrot.lane.b32.xlu1 %v1645_v29, %s3685_s21  ;;  %2347 = vrot.lane.b32.xlu2 %v2307_v36, %s3684_s20  ;;  %v6206_v29 = vld [vmem:[#allocation23_spill] sm:$0xff] }
 0x292   : > { %v1505_v15 = vpop.permute.xlu0 %1504 }
 0x293   : > { %1550 = vst.msk [vmem:[#allocation3 + $0x18] sm:$0xff] %vm1546_vm13, %v1505_v15  ;;  %v1509_v11 = vpop.permute.xlu2 %1508  ;;  %v1602_v40 = vpop.permute.xlu1 %1601  ;;  %v2150_v15 = vmul.f32 %v6206_v29, %v5235_v18 }
 0x294   : > { %1552 = vst.msk [vmem:[#allocation3 + $0x28] sm:$0xff] %vm1546_vm13, %v1509_v11  ;;  %v3563_v30 = vpop.eup %3562  ;;  %v1646_v23 = vmul.f32 %v1602_v40, %v4611_v19  ;;  %v6205_v19 = vld [vmem:[#allocation27_spill] sm:$0xff] }
 0x295   : > { %v3565_v27 = vpop.eup %3564  ;;  %v2151_v22 = vmul.f32 %v6205_v19, %v5297_v37 }
 0x298   : > { %2443 = vrot.lane.b32.xlu0 %v3559_v6, %s3683_s11 }
 0x299   : > { %2445 = vrot.lane.b32.xlu1 %v3561_v47, %s3683_s11  ;;  %2429 = vrot.lane.b32.xlu2 %v3557_v55, %s3683_s11  ;;  %v1647_v47 = vmul.f32 %v5433_v45, %v4652_v46  ;;  %v6207_v46 = vld [vmem:[#allocation17_spill] sm:$0xff] }
 0x29a   : > { %v2272_v42 = vpop.permute.xlu0 %2271  ;;  %v2144_v45 = vmul.f32 %v6207_v46, %v5268_v2 }
 0x29b   : > { %v2276_v26 = vpop.permute.xlu2 %2275  ;;  %v1507_v49 = vpop.permute.xlu1 %1506  ;;  %v2309_v50 = vadd.f32 %v2272_v42, %v2149_v58  ;;  %v6208_v58 = vld [vmem:[#allocation21_spill] sm:$0xff] }
 0x29c   : > { %1551 = vst.msk [vmem:[#allocation3 + $0x20] sm:$0xff] %vm1546_vm13, %v1507_v49  ;;  %v2311_v55 = vadd.f32 %v2276_v26, %v2151_v22  ;;  %v6210_v22 = vld [vmem:[#allocation19_spill] sm:$0xff] }
 0x29d   : > { %3566 = vtanh.f32 %v2309_v50 }
 0x29e   : > { %3568 = vtanh.f32 %v2311_v55 }
 0x2a0   : > { %2349 = vrot.lane.b32.xlu0 %v2308_v41, %s3684_s20 }
 0x2a1   : > { %2351 = vrot.lane.b32.xlu1 %v2309_v50, %s3684_s20  ;;  %2335 = vrot.lane.b32.xlu2 %v2301_v39, %s3684_s20 }
 0x2a2   : > { %v2260_v44 = vpop.permute.xlu0 %2259 }
 0x2a3   : > { %v2264_v17 = vpop.permute.xlu2 %2263  ;;  %v2274_v21 = vpop.permute.xlu1 %2273  ;;  %v2303_v62 = vadd.f32 %v2260_v44, %v2143_v10  ;;  %v6209_v44 = vld [vmem:[#allocation25_spill] sm:$0xff] }
 0x2a4   : > { %v3567_v36 = vpop.eup %3566  ;;  %v2310_v6 = vadd.f32 %v2274_v21, %v2150_v15  ;;  %v2152_v21 = vmul.f32 %v6209_v44, %v5333_v12  ;;  %v6211_v15 = vld [vmem:[#allocation28_spill] sm:$0xff] }
 0x2a5   : > { %v3569_v49 = vpop.eup %3568 }
 0x2a6   : > { %3570 = vtanh.f32 %v2310_v6 }
 0x2a7   : > { %3572 = vtanh.f32 %v2303_v62 }
 0x2a8   : > { %2431 = vrot.lane.b32.xlu0 %v3563_v30, %s3683_s11 }
 0x2a9   : > { %2433 = vrot.lane.b32.xlu1 %v3565_v27, %s3683_s11  ;;  %1681 = vrot.lane.b32.xlu2 %v1646_v23, %s3685_s21 }
 0x2aa   : > { %v1606_v25 = vpop.permute.xlu0 %1605 }
 0x2ab   : > { %v5461_v35 = vpop.permute.xlu2 %1609  ;;  %v2262_v9 = vpop.permute.xlu1 %2261  ;;  %v1648_v42 = vmul.f32 %v1606_v25, %v4689_v53 }
 0x2ac   : > { %v3571_v31 = vpop.eup %3570  ;;  %v2304_v50 = vadd.f32 %v2262_v9, %v2144_v45 }
 0x2ad   : > { %v3573_v59 = vpop.eup %3572 }
 0x2ae   : > { %3574 = vtanh.f32 %v2304_v50 }
 0x2b0   : > { %2337 = vrot.lane.b32.xlu0 %v2302_v61, %s3684_s20  ;;  %v2145_v61 = vmul.f32 %v6208_v58, %v5336_v57 }
 0x2b1   : > { %2339 = vrot.lane.b32.xlu1 %v2303_v62, %s3684_s20  ;;  %2447 = vrot.lane.b32.xlu2 %v3567_v36, %s3683_s11 }
 0x2b2   : > { %v1511_v41 = vpop.permute.xlu0 %1510  ;;  %v2305_v30 = vadd.f32 %v2264_v17, %v2145_v61 }
 0x2b3   : > { %1553 = vst.msk [vmem:[#allocation3 + $0x30] sm:$0xff] %vm1546_vm13, %v1511_v41  ;;  %v1515_v11 = vpop.permute.xlu2 %1514  ;;  %v1608_v40 = vpop.permute.xlu1 %1607  ;;  %v2146_v41 = vmul.f32 %v6210_v22, %v5369_v34 }
 0x2b4   : > { %1555 = vst.msk [vmem:[#allocation3 + $0x40] sm:$0xff] %vm1546_vm13, %v1515_v11  ;;  %3576 = vtanh.f32 %v2305_v30  ;;  %v3575_v10 = vpop.eup %3574  ;;  %v1649_v9 = vmul.f32 %v1608_v40, %v4729_v1  ;;  %v2154_v11 = vmul.f32 %v6211_v15, %v5397_v13 }
 0x2b8   : > { %1683 = vrot.lane.b32.xlu0 %v1647_v47, %s3685_s21 }
 0x2b9   : > { %1685 = vrot.lane.b32.xlu1 %v1648_v42, %s3685_s21  ;;  %2353 = vrot.lane.b32.xlu2 %v2310_v6, %s3684_s20 }
 0x2ba   : > { %v2278_v60 = vpop.permute.xlu0 %2277  ;;  %v3577_v62 = vpop.eup %3576 }
 0x2bb   : > { %v2282_v28 = vpop.permute.xlu2 %2281  ;;  %v1513_v26 = vpop.permute.xlu1 %1512  ;;  %v2312_v23 = vadd.f32 %v2278_v60, %v2152_v21 }
 0x2bc   : > { %1554 = vst.msk [vmem:[#allocation3 + $0x38] sm:$0xff] %vm1546_vm13, %v1513_v26  ;;  %v2314_v60 = vadd.f32 %v2282_v28, %v2154_v11 }
 0x2bd   : > { %3578 = vtanh.f32 %v2312_v23 }
 0x2be   : > { %3580 = vtanh.f32 %v2314_v60 }
 0x2c0   : > { %2449 = vrot.lane.b32.xlu0 %v3571_v31, %s3683_s11 }
 0x2c1   : > { %2451 = vrot.lane.b32.xlu1 %v3569_v49, %s3683_s11  ;;  %2435 = vrot.lane.b32.xlu2 %v3573_v59, %s3683_s11  ;;  %v1650_v49 = vmul.f32 %v5461_v35, %v4767_v5 }
 0x2c2   : > { %v2266_v53 = vpop.permute.xlu0 %2265 }
 0x2c3   : > { %v5486_v39 = vpop.permute.xlu2 %1615  ;;  %v2280_v16 = vpop.permute.xlu1 %2279  ;;  %v2306_v29 = vadd.f32 %v2266_v53, %v2146_v41 }
 0x2c4   : > { %v3579_v1 = vpop.eup %3578 }
 0x2c5   : > { %v3581_v5 = vpop.eup %3580 }
 0x2c8   : > { %2355 = vrot.lane.b32.xlu0 %v2311_v55, %s3684_s20  ;;  %v6212_v55 = vld [vmem:[#allocation26_spill] sm:$0xff] }
 0x2c9   : > { %2357 = vrot.lane.b32.xlu1 %v2312_v23, %s3684_s20  ;;  %2341 = vrot.lane.b32.xlu2 %v2304_v50, %s3684_s20  ;;  %v2153_v6 = vmul.f32 %v6212_v55, %v5372_v54 }
 0x2ca   : > { %v1612_v27 = vpop.permute.xlu0 %1611 }
 0x2cb   : > { %v1521_v25 = vpop.permute.xlu2 %1520  ;;  %v1614_v52 = vpop.permute.xlu1 %1613  ;;  %v2313_v26 = vadd.f32 %v2280_v16, %v2153_v6  ;;  %v1651_v31 = vmul.f32 %v1612_v27, %v4808_v51 }
 0x2cc   : > { %1558 = vst.msk [vmem:[#allocation3 + $0x58] sm:$0xff] %vm1546_vm13, %v1521_v25  ;;  %v1652_v58 = vmul.f32 %v1614_v52, %v4852_v56 }
 0x2cd   : > { %3582 = vtanh.f32 %v2313_v26 }
 0x2ce   : > { %3584 = vtanh.f32 %v2306_v29 }
 0x2d0   : > { %2437 = vrot.lane.b32.xlu0 %v3575_v10, %s3683_s11 }
 0x2d1   : > { %2439 = vrot.lane.b32.xlu1 %v3577_v62, %s3683_s11  ;;  %1687 = vrot.lane.b32.xlu2 %v1649_v9, %s3685_s21 }
 0x2d2   : > { %v1517_v17 = vpop.permute.xlu0 %1516 }
 0x2d3   : > { %1556 = vst.msk [vmem:[#allocation3 + $0x48] sm:$0xff] %vm1546_vm13, %v1517_v17  ;;  %v1622_v36 = vpop.permute.xlu2 %1621  ;;  %v1519_v19 = vpop.permute.xlu1 %1518 }
 0x2d4   : > { %1557 = vst.msk [vmem:[#allocation3 + $0x50] sm:$0xff] %vm1546_vm13, %v1519_v19  ;;  %v3583_v51 = vpop.eup %3582 }
 0x2d5   : > { %v3585_v35 = vpop.eup %3584 }
 0x2d8   : > { %2343 = vrot.lane.b32.xlu0 %v2305_v30, %s3684_s20  ;;  %v1653_v30 = vmul.f32 %v5486_v39, %v4849_v0  ;;  %v1656_v0 = vmul.f32 %v1622_v36, %v4877_v20 }
 0x2d9   : > { %2345 = vrot.lane.b32.xlu1 %v2306_v29, %s3684_s20  ;;  %2453 = vrot.lane.b32.xlu2 %v3579_v1, %s3683_s11 }
 0x2da   : > { %v1618_v40 = vpop.permute.xlu0 %1617 }
 0x2db   : > { %v1527_v47 = vpop.permute.xlu2 %1526  ;;  %v1620_v42 = vpop.permute.xlu1 %1619  ;;  %v1654_v61 = vmul.f32 %v1618_v40, %v4888_v7 }
 0x2dc   : > { %1561 = vst.msk [vmem:[#allocation3 + $0x70] sm:$0xff] %vm1546_vm13, %v1527_v47  ;;  %v1655_v23 = vmul.f32 %v1620_v42, %v4914_v14 }
 0x2e0   : > { %1689 = vrot.lane.b32.xlu0 %v1650_v49, %s3685_s21 }
 0x2e1   : > { %1691 = vrot.lane.b32.xlu1 %v1651_v31, %s3685_s21  ;;  %2359 = vrot.lane.b32.xlu2 %v2313_v26, %s3684_s20 }
 0x2e2   : > { %v1523_v59 = vpop.permute.xlu0 %1522 }
 0x2e3   : > { %1559 = vst.msk [vmem:[#allocation3 + $0x60] sm:$0xff] %vm1546_vm13, %v1523_v59  ;;  %v1676_v28 = vpop.permute.xlu2 %1675  ;;  %v1525_v53 = vpop.permute.xlu1 %1524 }
 0x2e4   : > { %1723 = vst.msk [vmem:[%s3794_s27] sm:$0xff] %vm1546_vm13, %v1676_v28 }
 0x2e5   : > { %1560 = vst.msk [vmem:[#allocation3 + $0x68] sm:$0xff] %vm1546_vm13, %v1525_v53 }
 0x2e8   : > { %2455 = vrot.lane.b32.xlu0 %v3583_v51, %s3683_s11 }
 0x2e9   : > { %2457 = vrot.lane.b32.xlu1 %v3581_v5, %s3683_s11  ;;  %2441 = vrot.lane.b32.xlu2 %v3585_v35, %s3683_s11 }
 0x2ea   : > { %v1624_v46 = vpop.permute.xlu0 %1623 }
 0x2eb   : > { %v2348_v45 = vpop.permute.xlu2 %2347  ;;  %v1626_v16 = vpop.permute.xlu1 %1625  ;;  %v1657_v56 = vmul.f32 %v1624_v46, %v4964_v8 }
 0x2ec   : > { %2387 = vst.msk [vmem:[#allocation3 + $0xc0] sm:$0xff] %vm1546_vm13, %v2348_v45  ;;  %v1658_v14 = vmul.f32 %v1626_v16, %v4991_v43 }
 0x2f0   : > { %2361 = vrot.lane.b32.xlu0 %v2314_v60, %s3684_s20 }
 0x2f1   : > { %1697 = vrot.lane.b32.xlu1 %v1654_v61, %s3685_s21  ;;  %1693 = vrot.lane.b32.xlu2 %v1652_v58, %s3685_s21 }
 0x2f2   : > { %v1529_v50 = vpop.permute.xlu0 %1528 }
 0x2f3   : > { %1562 = vst.msk [vmem:[#allocation3 + $0x78] sm:$0xff] %vm1546_vm13, %v1529_v50  ;;  %v2430_v44 = vpop.permute.xlu2 %2429  ;;  %v2428_v21 = vpop.permute.xlu1 %2427 }
 0x2f4   : > { %v2476_v10 = vmul.f32 %v2430_v44, %v4966_v32  ;;  %v2475_v9 = vmul.f32 %v2428_v21, %v5016_v33 }
 0x2f8   : > { %1695 = vrot.lane.b32.xlu0 %v1653_v30, %s3685_s21 }
 0x2f9   : > { %1703 = vrot.lane.b32.xlu1 %v1657_v56, %s3685_s21  ;;  %1699 = vrot.lane.b32.xlu2 %v1655_v23, %s3685_s21 }
 0x2fa   : > { %v2332_v7 = vpop.permute.xlu0 %2331 }
 0x2fb   : > { %2379 = vst.msk [vmem:[#allocation3 + $0x80] sm:$0xff] %vm1546_vm13, %v2332_v7  ;;  %v2336_v27 = vpop.permute.xlu2 %2335  ;;  %v2334_v25 = vpop.permute.xlu1 %2333 }
 0x2fc   : > { %2381 = vst.msk [vmem:[#allocation3 + $0x90] sm:$0xff] %vm1546_vm13, %v2336_v27 }
 0x2fd   : > { %2380 = vst.msk [vmem:[#allocation3 + $0x88] sm:$0xff] %vm1546_vm13, %v2334_v25 }
 0x300   : > { %1701 = vrot.lane.b32.xlu0 %v1656_v0, %s3685_s21 }
 0x301   : > { %1705 = vrot.lane.b32.xlu2 %v1658_v14, %s3685_s21 }
 0x302   : > { %v1678_v8 = vpop.permute.xlu0 %1677 }
 0x303   : > { %1724 = vst.msk [vmem:[%s3794_s27 + $0x8] sm:$0xff] %vm1546_vm13, %v1678_v8  ;;  %v1682_v39 = vpop.permute.xlu2 %1681  ;;  %v1680_v52 = vpop.permute.xlu1 %1679 }
 0x304   : > { %1726 = vst.msk [vmem:[%s3794_s27 + $0x18] sm:$0xff] %vm1546_vm13, %v1682_v39 }
 0x305   : > { %1725 = vst.msk [vmem:[%s3794_s27 + $0x10] sm:$0xff] %vm1546_vm13, %v1680_v52 }
 0x308   : > { %2509 = vrot.lane.b32.xlu0 %v2476_v10, %s3685_s21 }
 0x309   : > { %2507 = vrot.lane.b32.xlu2 %v2475_v9, %s3685_s21 }
 0x30a   : > { %v2444_v20 = vpop.permute.xlu0 %2443 }
 0x30b   : > { %v2483_v43 = vmul.f32 %v2444_v20, %v5044_v3  ;;  %v2448_v62 = vpop.permute.xlu2 %2447  ;;  %v2446_v17 = vpop.permute.xlu1 %2445 }
 0x30c   : > { %v2485_v36 = vmul.f32 %v2448_v62, %v5169_v63  ;;  %v2484_v19 = vmul.f32 %v2446_v17, %v5116_v24 }
 0x30d   : > { %2523 = vrot.lane.b32.xlu1 %v2483_v43, %s3685_s21 }
 0x310   : > { %2527 = vrot.lane.b32.xlu0 %v2485_v36, %s3685_s21 }
 0x311   : > { %2525 = vrot.lane.b32.xlu2 %v2484_v19, %s3685_s21 }
 0x312   : > { %v2350_v32 = vpop.permute.xlu0 %2349 }
 0x313   : > { %2388 = vst.msk [vmem:[#allocation3 + $0xc8] sm:$0xff] %vm1546_vm13, %v2350_v32  ;;  %v2354_v33 = vpop.permute.xlu2 %2353  ;;  %v2352_v22 = vpop.permute.xlu1 %2351 }
 0x314   : > { %2390 = vst.msk [vmem:[#allocation3 + $0xd8] sm:$0xff] %vm1546_vm13, %v2354_v33 }
 0x315   : > { %2389 = vst.msk [vmem:[#allocation3 + $0xd0] sm:$0xff] %vm1546_vm13, %v2352_v22 }
 0x31a   : > { %v2432_v3 = vpop.permute.xlu0 %2431 }
 0x31b   : > { %v2477_v41 = vmul.f32 %v2432_v3, %v5076_v48  ;;  %v2436_v63 = vpop.permute.xlu2 %2435  ;;  %v2434_v29 = vpop.permute.xlu1 %2433 }
 0x31c   : > { %v2479_v24 = vmul.f32 %v2436_v63, %v5226_v4  ;;  %v2478_v1 = vmul.f32 %v2434_v29, %v5185_v38 }
 0x31d   : > { %2511 = vrot.lane.b32.xlu1 %v2477_v41, %s3685_s21 }
 0x31e   : > { %2515 = vrot.lane.b32.xlu0 %v2479_v24, %s3685_s21  ;;  %2513 = vrot.lane.b32.xlu2 %v2478_v1, %s3685_s21 }
 0x322   : > { %v2338_v15 = vpop.permute.xlu0 %2337 }
 0x323   : > { %2382 = vst.msk [vmem:[#allocation3 + $0x98] sm:$0xff] %vm1546_vm13, %v2338_v15  ;;  %v2342_v11 = vpop.permute.xlu2 %2341  ;;  %v2340_v40 = vpop.permute.xlu1 %2339 }
 0x324   : > { %2384 = vst.msk [vmem:[#allocation3 + $0xa8] sm:$0xff] %vm1546_vm13, %v2342_v11 }
 0x325   : > { %2383 = vst.msk [vmem:[#allocation3 + $0xa0] sm:$0xff] %vm1546_vm13, %v2340_v40 }
 0x32a   : > { %v1684_v48 = vpop.permute.xlu0 %1683 }
 0x32b   : > { %1727 = vst.msk [vmem:[%s3794_s27 + $0x20] sm:$0xff] %vm1546_vm13, %v1684_v48  ;;  %v1688_v4 = vpop.permute.xlu2 %1687  ;;  %v1686_v38 = vpop.permute.xlu1 %1685 }
 0x32c   : > { %1729 = vst.msk [vmem:[%s3794_s27 + $0x30] sm:$0xff] %vm1546_vm13, %v1688_v4 }
 0x32d   : > { %1728 = vst.msk [vmem:[%s3794_s27 + $0x28] sm:$0xff] %vm1546_vm13, %v1686_v38 }
 0x332   : > { %v2450_v55 = vpop.permute.xlu0 %2449 }
 0x333   : > { %v2486_v6 = vmul.f32 %v2450_v55, %v5235_v18  ;;  %v2454_v47 = vpop.permute.xlu2 %2453  ;;  %v2452_v42 = vpop.permute.xlu1 %2451 }
 0x334   : > { %v2487_v60 = vmul.f32 %v2452_v42, %v5297_v37  ;;  %v2488_v46 = vmul.f32 %v2454_v47, %v5333_v12 }
 0x335   : > { %2529 = vrot.lane.b32.xlu1 %v2486_v6, %s3685_s21 }
 0x336   : > { %2531 = vrot.lane.b32.xlu2 %v2487_v60, %s3685_s21 }
 0x33a   : > { %v2356_v26 = vpop.permute.xlu0 %2355 }
 0x33b   : > { %2391 = vst.msk [vmem:[#allocation3 + $0xe0] sm:$0xff] %vm1546_vm13, %v2356_v26  ;;  %v2360_v49 = vpop.permute.xlu2 %2359  ;;  %v2358_v31 = vpop.permute.xlu1 %2357 }
 0x33c   : > { %2393 = vst.msk [vmem:[#allocation3 + $0xf0] sm:$0xff] %vm1546_vm13, %v2360_v49 }
 0x33d   : > { %2392 = vst.msk [vmem:[#allocation3 + $0xe8] sm:$0xff] %vm1546_vm13, %v2358_v31 }
 0x342   : > { %v2438_v59 = vpop.permute.xlu0 %2437 }
 0x343   : > { %v2480_v18 = vmul.f32 %v2438_v59, %v5268_v2  ;;  %v2442_v28 = vpop.permute.xlu2 %2441  ;;  %v2440_v37 = vpop.permute.xlu1 %2439 }
 0x344   : > { %v2482_v53 = vmul.f32 %v2442_v28, %v5369_v34  ;;  %v2481_v5 = vmul.f32 %v2440_v37, %v5336_v57 }
 0x345   : > { %2517 = vrot.lane.b32.xlu1 %v2480_v18, %s3685_s21 }
 0x346   : > { %2521 = vrot.lane.b32.xlu0 %v2482_v53, %s3685_s21  ;;  %2519 = vrot.lane.b32.xlu2 %v2481_v5, %s3685_s21 }
 0x34a   : > { %v2344_v51 = vpop.permute.xlu0 %2343 }
 0x34b   : > { %2385 = vst.msk [vmem:[#allocation3 + $0xb0] sm:$0xff] %vm1546_vm13, %v2344_v51  ;;  %v1694_v35 = vpop.permute.xlu2 %1693  ;;  %v2346_v2 = vpop.permute.xlu1 %2345 }
 0x34c   : > { %1732 = vst.msk [vmem:[%s3794_s27 + $0x48] sm:$0xff] %vm1546_vm13, %v1694_v35 }
 0x34d   : > { %2386 = vst.msk [vmem:[#allocation3 + $0xb8] sm:$0xff] %vm1546_vm13, %v2346_v2 }
 0x34e   : > { %2533 = vrot.lane.b32.xlu0 %v2488_v46, %s3685_s21 }
 0x352   : > { %v1690_v57 = vpop.permute.xlu0 %1689 }
 0x353   : > { %1730 = vst.msk [vmem:[%s3794_s27 + $0x38] sm:$0xff] %vm1546_vm13, %v1690_v57  ;;  %v1700_v34 = vpop.permute.xlu2 %1699  ;;  %v1692_v45 = vpop.permute.xlu1 %1691 }
 0x354   : > { %1735 = vst.msk [vmem:[%s3794_s27 + $0x60] sm:$0xff] %vm1546_vm13, %v1700_v34 }
 0x355   : > { %1731 = vst.msk [vmem:[%s3794_s27 + $0x40] sm:$0xff] %vm1546_vm13, %v1692_v45 }
 0x35a   : > { %v2456_v16 = vpop.permute.xlu0 %2455 }
 0x35b   : > { %v2489_v12 = vmul.f32 %v2456_v16, %v5372_v54  ;;  %v1706_v58 = vpop.permute.xlu2 %1705  ;;  %v2458_v61 = vpop.permute.xlu1 %2457 }
 0x35c   : > { %1738 = vst.msk [vmem:[%s3794_s27 + $0x78] sm:$0xff] %vm1546_vm13, %v1706_v58  ;;  %v2490_v50 = vmul.f32 %v2458_v61, %v5397_v13 }
 0x35d   : > { %2535 = vrot.lane.b32.xlu1 %v2489_v12, %s3685_s21 }
 0x35e   : > { %2537 = vrot.lane.b32.xlu2 %v2490_v50, %s3685_s21 }
 0x362   : > { %v2362_v44 = vpop.permute.xlu0 %2361 }
 0x363   : > { %2394 = vst.msk [vmem:[#allocation3 + $0xf8] sm:$0xff] %vm1546_vm13, %v2362_v44  ;;  %v2508_v21 = vpop.permute.xlu2 %2507  ;;  %v1698_v54 = vpop.permute.xlu1 %1697 }
 0x364   : > { %2555 = vst.msk [vmem:[%s3794_s27 + $0x80] sm:$0xff] %vm1546_vm13, %v2508_v21 }
 0x365   : > { %1734 = vst.msk [vmem:[%s3794_s27 + $0x58] sm:$0xff] %vm1546_vm13, %v1698_v54 }
 0x36a   : > { %v1696_v30 = vpop.permute.xlu0 %1695 }
 0x36b   : > { %1733 = vst.msk [vmem:[%s3794_s27 + $0x50] sm:$0xff] %vm1546_vm13, %v1696_v30  ;;  %v2526_v13 = vpop.permute.xlu2 %2525  ;;  %v1704_v23 = vpop.permute.xlu1 %1703 }
 0x36c   : > { %2564 = vst.msk [vmem:[%s3794_s27 + $0xc8] sm:$0xff] %vm1546_vm13, %v2526_v13 }
 0x36d   : > { %1737 = vst.msk [vmem:[%s3794_s27 + $0x70] sm:$0xff] %vm1546_vm13, %v1704_v23 }
 0x372   : > { %v1702_v56 = vpop.permute.xlu0 %1701 }
 0x373   : > { %1736 = vst.msk [vmem:[%s3794_s27 + $0x68] sm:$0xff] %vm1546_vm13, %v1702_v56 }
 0x378   : > { %v2514_v7 = vpop.permute.xlu2 %2513 }
 0x379   : > { %2558 = vst.msk [vmem:[%s3794_s27 + $0x98] sm:$0xff] %vm1546_vm13, %v2514_v7 }
 0x37a   : > { %v2510_v27 = vpop.permute.xlu0 %2509 }
 0x37b   : > { %2556 = vst.msk [vmem:[%s3794_s27 + $0x88] sm:$0xff] %vm1546_vm13, %v2510_v27 }
 0x37f   : > { %v2524_v25 = vpop.permute.xlu1 %2523 }
 0x380   : > { %2563 = vst.msk [vmem:[%s3794_s27 + $0xc0] sm:$0xff] %vm1546_vm13, %v2524_v25 }
 0x382   : > { %v2528_v0 = vpop.permute.xlu0 %2527 }
 0x383   : > { %2565 = vst.msk [vmem:[%s3794_s27 + $0xd0] sm:$0xff] %vm1546_vm13, %v2528_v0 }
 0x38f   : > { %v2512_v14 = vpop.permute.xlu1 %2511 }
 0x390   : > { %2557 = vst.msk [vmem:[%s3794_s27 + $0x90] sm:$0xff] %vm1546_vm13, %v2512_v14  ;;  %v2516_v8 = vpop.permute.xlu0 %2515  ;;  %v2532_v39 = vpop.permute.xlu2 %2531 }
 0x391   : > { %2559 = vst.msk [vmem:[%s3794_s27 + $0xa0] sm:$0xff] %vm1546_vm13, %v2516_v8 }
 0x392   : > { %2567 = vst.msk [vmem:[%s3794_s27 + $0xe0] sm:$0xff] %vm1546_vm13, %v2532_v39 }
 0x3a0   : > { %v2520_v52 = vpop.permute.xlu2 %2519 }
 0x3a1   : > { %2561 = vst.msk [vmem:[%s3794_s27 + $0xb0] sm:$0xff] %vm1546_vm13, %v2520_v52 }
 0x3a7   : > { %v2530_v10 = vpop.permute.xlu1 %2529 }
 0x3a8   : > { %2566 = vst.msk [vmem:[%s3794_s27 + $0xd8] sm:$0xff] %vm1546_vm13, %v2530_v10 }
 0x3b7   : > { %v2518_v9 = vpop.permute.xlu1 %2517 }
 0x3b8   : > { %2560 = vst.msk [vmem:[%s3794_s27 + $0xa8] sm:$0xff] %vm1546_vm13, %v2518_v9  ;;  %v2522_v20 = vpop.permute.xlu0 %2521  ;;  %v2538_v43 = vpop.permute.xlu2 %2537 }
 0x3b9   : > { %2562 = vst.msk [vmem:[%s3794_s27 + $0xb8] sm:$0xff] %vm1546_vm13, %v2522_v20 }
 0x3ba   : > { %2570 = vst.msk [vmem:[%s3794_s27 + $0xf8] sm:$0xff] %vm1546_vm13, %v2538_v43 }
 0x3c0   : > { %v2534_v62 = vpop.permute.xlu0 %2533 }
 0x3c1   : > { %2568 = vst.msk [vmem:[%s3794_s27 + $0xe8] sm:$0xff] %vm1546_vm13, %v2534_v62 }
 0x3cc   : > { %2574 = sbr.rel (%p3195_p1) target bundleno = 1262 (0x4ee), region = 36 }
 0x3cf   : > { %v2536_v17 = vpop.permute.xlu1 %2535 }
 0x3d0   : > { %2569 = vst.msk [vmem:[%s3794_s27 + $0xf0] sm:$0xff] %vm1546_vm13, %v2536_v17 }
 0x3d1   : > { %v5654_v36 = vld [vmem:[%s3794_s27] sm:$0xff]  ;;  %v5657_v19 = vld [vmem:[%s3794_s27 + $0x10] sm:$0xff]  ;;  %vm2608_vm2 = vcmask 260096   ;;  %v5668_v32 = vld [vmem:[%s3794_s27 + $0x8] sm:$0xff]  ;;  %vm2768_vm3 = vcmask 523520   ;;  %vm2897_vm4 = vcmask 785921  }
 0x3d2   : > { %2672 = vrot.lane.b32.xlu0 %v5654_v36, %s3686_s26  ;;  %2607 = vst.msk [vmem:[#allocation2 + $0x11] sm:$0xff] %vm1546_vm13, %v5654_v36  ;;  %2676 = vrot.lane.b32.xlu1 %v5657_v19, %s3686_s26  ;;  %v5671_v33 = vld [vmem:[%s3794_s27 + $0x20] sm:$0xff]  ;;  %v5676_v22 = vld [vmem:[%s3794_s27 + $0x18] sm:$0xff]  ;;  %vm2899_vm5 = vcmask 785920  }
 0x3d3   : > { %2610 = vst.msk [vmem:[#allocation2 + $0x21] sm:$0xff] %vm1546_vm13, %v5657_v19  ;;  %2680 = vrot.lane.b32.xlu2 %v5671_v33, %s3686_s26  ;;  %v5683_v3 = vld [vmem:[%s3794_s27 + $0x30] sm:$0xff]  ;;  %v5688_v41 = vld [vmem:[%s3794_s27 + $0x38] sm:$0xff]  ;;  %v5693_v63 = vld [vmem:[%s3794_s27 + $0x48] sm:$0xff] }
 0x3d4   : > { %2609 = vst.msk [vmem:[#allocation2 + $0x19] sm:$0x7f] %vm2608_vm2, %v5668_v32  ;;  %v5700_v29 = vld [vmem:[%s3794_s27 + $0x50] sm:$0xff]  ;;  %v5703_v24 = vld [vmem:[%s3794_s27 + $0x28] sm:$0xff]  ;;  %v5712_v1 = vld [vmem:[%s3794_s27 + $0x60] sm:$0xff] }
 0x3d5   : > { %2611 = vst.msk [vmem:[#allocation2 + $0x29] sm:$0x7f] %vm2608_vm2, %v5676_v22  ;;  %v5721_v15 = vld [vmem:[%s3794_s27 + $0x68] sm:$0xff]  ;;  %v5726_v11 = vld [vmem:[%s3794_s27 + $0x78] sm:$0xff]  ;;  %v5731_v40 = vld [vmem:[%s3794_s27 + $0x40] sm:$0xff] }
 0x3d6   : > { %2614 = vst.msk [vmem:[#allocation2 + $0x41] sm:$0xff] %vm1546_vm13, %v5683_v3  ;;  %v5736_v48 = vld [vmem:[%s3794_s27 + $0x80] sm:$0xff]  ;;  %v5741_v4 = vld [vmem:[%s3794_s27 + $0x90] sm:$0xff]  ;;  %v5750_v38 = vld [vmem:[%s3794_s27 + $0x58] sm:$0xff] }
 0x3d7   : > { %2615 = vst.msk [vmem:[#allocation2 + $0x49] sm:$0x7f] %vm2608_vm2, %v5688_v41  ;;  %v5755_v55 = vld [vmem:[%s3794_s27 + $0x98] sm:$0xff]  ;;  %v5762_v6 = vld [vmem:[%s3794_s27 + $0xa8] sm:$0xff]  ;;  %v5771_v47 = vld [vmem:[%s3794_s27 + $0x70] sm:$0xff] }
 0x3d8   : > { %2617 = vst.msk [vmem:[#allocation2 + $0x59] sm:$0x7f] %vm2608_vm2, %v5693_v63  ;;  %v5776_v42 = vld [vmem:[%s3794_s27 + $0xb0] sm:$0xff]  ;;  %v5783_v60 = vld [vmem:[%s3794_s27 + $0xc0] sm:$0xff]  ;;  %v5792_v26 = vld [vmem:[%s3794_s27 + $0x88] sm:$0xff] }
 0x3d9   : > { %2612 = vst.msk [vmem:[#allocation2 + $0x31] sm:$0xff] %vm1546_vm13, %v5671_v33  ;;  %v5797_v49 = vld [vmem:[%s3794_s27 + $0xc8] sm:$0xff]  ;;  %v5804_v31 = vld [vmem:[%s3794_s27 + $0xd8] sm:$0xff]  ;;  %v5813_v59 = vld [vmem:[%s3794_s27 + $0xa0] sm:$0xff] }
 0x3da   : > { %2674 = vrot.lane.b32.xlu0 %v5668_v32, %s3686_s26  ;;  %2678 = vrot.lane.b32.xlu1 %v5676_v22, %s3686_s26  ;;  %2618 = vst.msk [vmem:[#allocation2 + $0x61] sm:$0xff] %vm1546_vm13, %v5700_v29  ;;  %v5818_v18 = vld [vmem:[%s3794_s27 + $0xe0] sm:$0xff]  ;;  %v5825_v28 = vld [vmem:[%s3794_s27 + $0xf0] sm:$0xff] }
 0x3db   : > { %2620 = vst.msk [vmem:[#allocation2 + $0x71] sm:$0xff] %vm1546_vm13, %v5712_v1  ;;  %2682 = vrot.lane.b32.xlu2 %v5703_v24, %s3686_s26  ;;  %v5834_v37 = vld [vmem:[%s3794_s27 + $0xb8] sm:$0xff]  ;;  %v5850_v5 = vld [vmem:[%s3794_s27 + $0xd0] sm:$0xff]  ;;  %v5861_v51 = vld [vmem:[%s3794_s27 + $0xe8] sm:$0xff] }
 0x3dc   : > { %2613 = vst.msk [vmem:[#allocation2 + $0x39] sm:$0x7f] %vm2608_vm2, %v5703_v24  ;;  %v5839_v53 = vld [vmem:[%s3794_s27 + $0xf8] sm:$0xff]  ;;  %s3687_s27 = smov 64  }
 0x3dd   : > { %2621 = vst.msk [vmem:[#allocation2 + $0x79] sm:$0x7f] %vm2608_vm2, %v5721_v15 }
 0x3de   : > { %2623 = vst.msk [vmem:[#allocation2 + $0x89] sm:$0x7f] %vm2608_vm2, %v5726_v11 }
 0x3df   : > { %2616 = vst.msk [vmem:[#allocation2 + $0x51] sm:$0xff] %vm1546_vm13, %v5731_v40 }
 0x3e0   : > { %2624 = vst.msk [vmem:[#allocation2 + $0x91] sm:$0xff] %vm1546_vm13, %v5736_v48 }
 0x3e1   : > { %2626 = vst.msk [vmem:[#allocation2 + $0xa1] sm:$0xff] %vm1546_vm13, %v5741_v4 }
 0x3e2   : > { %2684 = vrot.lane.b32.xlu0 %v5683_v3, %s3686_s26  ;;  %2686 = vrot.lane.b32.xlu1 %v5688_v41, %s3686_s26  ;;  %2619 = vst.msk [vmem:[#allocation2 + $0x69] sm:$0x7f] %vm2608_vm2, %v5750_v38 }
 0x3e3   : > { %2688 = vrot.lane.b32.xlu2 %v5731_v40, %s3686_s26  ;;  %2627 = vst.msk [vmem:[#allocation2 + $0xa9] sm:$0x7f] %vm2608_vm2, %v5755_v55 }
 0x3e4   : > { %2629 = vst.msk [vmem:[#allocation2 + $0xb9] sm:$0x7f] %vm2608_vm2, %v5762_v6 }
 0x3e5   : > { %2622 = vst.msk [vmem:[#allocation2 + $0x81] sm:$0xff] %vm1546_vm13, %v5771_v47 }
 0x3e6   : > { %2630 = vst.msk [vmem:[#allocation2 + $0xc1] sm:$0xff] %vm1546_vm13, %v5776_v42 }
 0x3e7   : > { %2632 = vst.msk [vmem:[#allocation2 + $0xd1] sm:$0xff] %vm1546_vm13, %v5783_v60 }
 0x3e8   : > { %2625 = vst.msk [vmem:[#allocation2 + $0x99] sm:$0x7f] %vm2608_vm2, %v5792_v26 }
 0x3e9   : > { %2633 = vst.msk [vmem:[#allocation2 + $0xd9] sm:$0x7f] %vm2608_vm2, %v5797_v49 }
 0x3ea   : > { %2690 = vrot.lane.b32.xlu0 %v5693_v63, %s3686_s26  ;;  %2692 = vrot.lane.b32.xlu1 %v5700_v29, %s3686_s26  ;;  %2635 = vst.msk [vmem:[#allocation2 + $0xe9] sm:$0x7f] %vm2608_vm2, %v5804_v31 }
 0x3eb   : > { %2694 = vrot.lane.b32.xlu2 %v5750_v38, %s3686_s26  ;;  %2628 = vst.msk [vmem:[#allocation2 + $0xb1] sm:$0xff] %vm1546_vm13, %v5813_v59 }
 0x3ec   : > { %2636 = vst.msk [vmem:[#allocation2 + $0xf1] sm:$0xff] %vm1546_vm13, %v5818_v18 }
 0x3ed   : > { %2638 = vst.msk [vmem:[#allocation2 + $0x101] sm:$0xff] %vm1546_vm13, %v5825_v28 }
 0x3ee   : > { %2631 = vst.msk [vmem:[#allocation2 + $0xc9] sm:$0x7f] %vm2608_vm2, %v5834_v37 }
 0x3ef   : > { %2639 = vst.msk [vmem:[#allocation2 + $0x109] sm:$0x7f] %vm2608_vm2, %v5839_v53 }
 0x3f0   : > { %2634 = vst.msk [vmem:[#allocation2 + $0xe1] sm:$0xff] %vm1546_vm13, %v5850_v5 }
 0x3f1   : > { %2637 = vst.msk [vmem:[#allocation2 + $0xf9] sm:$0x7f] %vm2608_vm2, %v5861_v51 }
 0x3f2   : > { %2696 = vrot.lane.b32.xlu0 %v5712_v1, %s3686_s26  ;;  %2698 = vrot.lane.b32.xlu1 %v5721_v15, %s3686_s26 }
 0x3f3   : > { %2700 = vrot.lane.b32.xlu2 %v5771_v47, %s3686_s26 }
 0x3fa   : > { %2702 = vrot.lane.b32.xlu0 %v5726_v11, %s3686_s26  ;;  %2704 = vrot.lane.b32.xlu1 %v5736_v48, %s3686_s26 }
 0x3fb   : > { %2706 = vrot.lane.b32.xlu2 %v5792_v26, %s3686_s26 }
 0x402   : > { %2708 = vrot.lane.b32.xlu0 %v5741_v4, %s3686_s26  ;;  %2710 = vrot.lane.b32.xlu1 %v5755_v55, %s3686_s26 }
 0x403   : > { %2712 = vrot.lane.b32.xlu2 %v5813_v59, %s3686_s26 }
 0x40a   : > { %2714 = vrot.lane.b32.xlu0 %v5762_v6, %s3686_s26  ;;  %2716 = vrot.lane.b32.xlu1 %v5776_v42, %s3686_s26 }
 0x40b   : > { %2718 = vrot.lane.b32.xlu2 %v5834_v37, %s3686_s26 }
 0x412   : > { %2720 = vrot.lane.b32.xlu0 %v5783_v60, %s3686_s26  ;;  %2722 = vrot.lane.b32.xlu1 %v5797_v49, %s3686_s26 }
 0x413   : > { %2724 = vrot.lane.b32.xlu2 %v5850_v5, %s3686_s26 }
 0x41a   : > { %2726 = vrot.lane.b32.xlu0 %v5804_v31, %s3686_s26  ;;  %2728 = vrot.lane.b32.xlu1 %v5818_v18, %s3686_s26 }
 0x41b   : > { %2730 = vrot.lane.b32.xlu2 %v5861_v51, %s3686_s26 }
 0x422   : > { %2732 = vrot.lane.b32.xlu0 %v5825_v28, %s3686_s26  ;;  %2734 = vrot.lane.b32.xlu1 %v5839_v53, %s3686_s26 }
 0x423   : > { %2801 = vrot.lane.b32.xlu2 %v5654_v36, %s3687_s27 }
 0x42a   : > { %2803 = vrot.lane.b32.xlu0 %v5668_v32, %s3687_s27  ;;  %2805 = vrot.lane.b32.xlu1 %v5657_v19, %s3687_s27 }
 0x42b   : > { %2807 = vrot.lane.b32.xlu2 %v5676_v22, %s3687_s27 }
 0x42d   : > { %v2681_v35 = vpop.permute.xlu2 %2680 }
 0x42e   : > { %2773 = vst.msk [vmem:[#allocation2 + $0x30] sm:$0xff] %vm2768_vm3, %v2681_v35 }
 0x432   : > { %2809 = vrot.lane.b32.xlu0 %v5671_v33, %s3687_s27  ;;  %2811 = vrot.lane.b32.xlu1 %v5703_v24, %s3687_s27 }
 0x433   : > { %2813 = vrot.lane.b32.xlu2 %v5683_v3, %s3687_s27 }
 0x435   : > { %v2683_v2 = vpop.permute.xlu2 %2682 }
 0x436   : > { %2774 = vst.msk [vmem:[#allocation2 + $0x38] sm:$0xff] %vm2768_vm3, %v2683_v2 }
 0x43a   : > { %2815 = vrot.lane.b32.xlu0 %v5688_v41, %s3687_s27  ;;  %2817 = vrot.lane.b32.xlu1 %v5731_v40, %s3687_s27 }
 0x43b   : > { %2819 = vrot.lane.b32.xlu2 %v5693_v63, %s3687_s27 }
 0x43d   : > { %v2689_v46 = vpop.permute.xlu2 %2688 }
 0x43e   : > { %2777 = vst.msk [vmem:[#allocation2 + $0x50] sm:$0xff] %vm2768_vm3, %v2689_v46 }
 0x442   : > { %2821 = vrot.lane.b32.xlu0 %v5700_v29, %s3687_s27  ;;  %2823 = vrot.lane.b32.xlu1 %v5750_v38, %s3687_s27 }
 0x443   : > { %2825 = vrot.lane.b32.xlu2 %v5712_v1, %s3687_s27 }
 0x444   : > { %v2673_v57 = vpop.permute.xlu0 %2672  ;;  %v2677_v34 = vpop.permute.xlu1 %2676 }
 0x445   : > { %2769 = vst.msk [vmem:[#allocation2 + $0x10] sm:$0xff] %vm2768_vm3, %v2673_v57  ;;  %v2695_v45 = vpop.permute.xlu2 %2694 }
 0x446   : > { %2771 = vst.msk [vmem:[#allocation2 + $0x20] sm:$0xff] %vm2768_vm3, %v2677_v34 }
 0x447   : > { %2780 = vst.msk [vmem:[#allocation2 + $0x68] sm:$0xff] %vm2768_vm3, %v2695_v45 }
 0x44a   : > { %2827 = vrot.lane.b32.xlu0 %v5721_v15, %s3687_s27  ;;  %2829 = vrot.lane.b32.xlu1 %v5771_v47, %s3687_s27 }
 0x44b   : > { %2831 = vrot.lane.b32.xlu2 %v5726_v11, %s3687_s27 }
 0x44c   : > { %v2675_v16 = vpop.permute.xlu0 %2674  ;;  %v2679_v12 = vpop.permute.xlu1 %2678 }
 0x44d   : > { %2770 = vst.msk [vmem:[#allocation2 + $0x18] sm:$0xff] %vm2768_vm3, %v2675_v16  ;;  %v2701_v58 = vpop.permute.xlu2 %2700 }
 0x44e   : > { %2772 = vst.msk [vmem:[#allocation2 + $0x28] sm:$0xff] %vm2768_vm3, %v2679_v12 }
 0x44f   : > { %2783 = vst.msk [vmem:[#allocation2 + $0x80] sm:$0xff] %vm2768_vm3, %v2701_v58 }
 0x452   : > { %2833 = vrot.lane.b32.xlu0 %v5736_v48, %s3687_s27  ;;  %2835 = vrot.lane.b32.xlu1 %v5792_v26, %s3687_s27 }
 0x453   : > { %2837 = vrot.lane.b32.xlu2 %v5741_v4, %s3687_s27 }
 0x454   : > { %v2685_v61 = vpop.permute.xlu0 %2684  ;;  %v2687_v50 = vpop.permute.xlu1 %2686 }
 0x455   : > { %2775 = vst.msk [vmem:[#allocation2 + $0x40] sm:$0xff] %vm2768_vm3, %v2685_v61  ;;  %v2707_v44 = vpop.permute.xlu2 %2706 }
 0x456   : > { %2776 = vst.msk [vmem:[#allocation2 + $0x48] sm:$0xff] %vm2768_vm3, %v2687_v50 }
 0x457   : > { %2786 = vst.msk [vmem:[#allocation2 + $0x98] sm:$0xff] %vm2768_vm3, %v2707_v44 }
 0x45a   : > { %2839 = vrot.lane.b32.xlu0 %v5755_v55, %s3687_s27  ;;  %2841 = vrot.lane.b32.xlu1 %v5813_v59, %s3687_s27 }
 0x45b   : > { %2843 = vrot.lane.b32.xlu2 %v5762_v6, %s3687_s27 }
 0x45c   : > { %v2691_v21 = vpop.permute.xlu0 %2690  ;;  %v2693_v54 = vpop.permute.xlu1 %2692 }
 0x45d   : > { %2778 = vst.msk [vmem:[#allocation2 + $0x58] sm:$0xff] %vm2768_vm3, %v2691_v21  ;;  %v2713_v30 = vpop.permute.xlu2 %2712 }
 0x45e   : > { %2779 = vst.msk [vmem:[#allocation2 + $0x60] sm:$0xff] %vm2768_vm3, %v2693_v54 }
 0x45f   : > { %2789 = vst.msk [vmem:[#allocation2 + $0xb0] sm:$0xff] %vm2768_vm3, %v2713_v30 }
 0x462   : > { %2845 = vrot.lane.b32.xlu0 %v5776_v42, %s3687_s27  ;;  %2847 = vrot.lane.b32.xlu1 %v5834_v37, %s3687_s27 }
 0x463   : > { %2849 = vrot.lane.b32.xlu2 %v5783_v60, %s3687_s27 }
 0x464   : > { %v2697_v13 = vpop.permute.xlu0 %2696  ;;  %v2699_v23 = vpop.permute.xlu1 %2698 }
 0x465   : > { %2781 = vst.msk [vmem:[#allocation2 + $0x70] sm:$0xff] %vm2768_vm3, %v2697_v13  ;;  %v2719_v56 = vpop.permute.xlu2 %2718 }
 0x466   : > { %2782 = vst.msk [vmem:[#allocation2 + $0x78] sm:$0xff] %vm2768_vm3, %v2699_v23 }
 0x467   : > { %2792 = vst.msk [vmem:[#allocation2 + $0xc8] sm:$0xff] %vm2768_vm3, %v2719_v56 }
 0x46a   : > { %2851 = vrot.lane.b32.xlu0 %v5797_v49, %s3687_s27  ;;  %2853 = vrot.lane.b32.xlu1 %v5850_v5, %s3687_s27 }
 0x46b   : > { %2855 = vrot.lane.b32.xlu2 %v5804_v31, %s3687_s27 }
 0x46c   : > { %v2703_v7 = vpop.permute.xlu0 %2702  ;;  %v2705_v27 = vpop.permute.xlu1 %2704 }
 0x46d   : > { %2784 = vst.msk [vmem:[#allocation2 + $0x88] sm:$0xff] %vm2768_vm3, %v2703_v7  ;;  %v2725_v25 = vpop.permute.xlu2 %2724 }
 0x46e   : > { %2785 = vst.msk [vmem:[#allocation2 + $0x90] sm:$0xff] %vm2768_vm3, %v2705_v27 }
 0x46f   : > { %2795 = vst.msk [vmem:[#allocation2 + $0xe0] sm:$0xff] %vm2768_vm3, %v2725_v25 }
 0x472   : > { %2857 = vrot.lane.b32.xlu0 %v5818_v18, %s3687_s27  ;;  %2859 = vrot.lane.b32.xlu1 %v5861_v51, %s3687_s27 }
 0x473   : > { %2861 = vrot.lane.b32.xlu2 %v5825_v28, %s3687_s27 }
 0x474   : > { %v2709_v0 = vpop.permute.xlu0 %2708  ;;  %v2711_v14 = vpop.permute.xlu1 %2710 }
 0x475   : > { %2787 = vst.msk [vmem:[#allocation2 + $0xa0] sm:$0xff] %vm2768_vm3, %v2709_v0  ;;  %v2731_v8 = vpop.permute.xlu2 %2730 }
 0x476   : > { %2788 = vst.msk [vmem:[#allocation2 + $0xa8] sm:$0xff] %vm2768_vm3, %v2711_v14 }
 0x477   : > { %2798 = vst.msk [vmem:[#allocation2 + $0xf8] sm:$0xff] %vm2768_vm3, %v2731_v8 }
 0x47a   : > { %2863 = vrot.lane.b32.xlu0 %v5839_v53, %s3687_s27 }
 0x47c   : > { %v2715_v39 = vpop.permute.xlu0 %2714  ;;  %v2717_v52 = vpop.permute.xlu1 %2716 }
 0x47d   : > { %2790 = vst.msk [vmem:[#allocation2 + $0xb8] sm:$0xff] %vm2768_vm3, %v2715_v39  ;;  %v2802_v10 = vpop.permute.xlu2 %2801 }
 0x47e   : > { %2791 = vst.msk [vmem:[#allocation2 + $0xc0] sm:$0xff] %vm2768_vm3, %v2717_v52 }
 0x47f   : > { %2898 = vst.msk [vmem:[#allocation2 + $0xf] sm:$0xfe] %vm2897_vm4, %v2802_v10 }
 0x484   : > { %v2721_v9 = vpop.permute.xlu0 %2720  ;;  %v2723_v20 = vpop.permute.xlu1 %2722 }
 0x485   : > { %2793 = vst.msk [vmem:[#allocation2 + $0xd0] sm:$0xff] %vm2768_vm3, %v2721_v9  ;;  %v2808_v43 = vpop.permute.xlu2 %2807 }
 0x486   : > { %2794 = vst.msk [vmem:[#allocation2 + $0xd8] sm:$0xff] %vm2768_vm3, %v2723_v20 }
 0x487   : > { %2902 = vst.msk [vmem:[#allocation2 + $0x27] sm:$0xff] %vm2899_vm5, %v2808_v43 }
 0x48c   : > { %v2727_v62 = vpop.permute.xlu0 %2726  ;;  %v2729_v17 = vpop.permute.xlu1 %2728 }
 0x48d   : > { %2796 = vst.msk [vmem:[#allocation2 + $0xe8] sm:$0xff] %vm2768_vm3, %v2727_v62  ;;  %v2814_v36 = vpop.permute.xlu2 %2813 }
 0x48e   : > { %2797 = vst.msk [vmem:[#allocation2 + $0xf0] sm:$0xff] %vm2768_vm3, %v2729_v17 }
 0x48f   : > { %2905 = vst.msk [vmem:[#allocation2 + $0x3f] sm:$0xfe] %vm2897_vm4, %v2814_v36 }
 0x494   : > { %v2733_v19 = vpop.permute.xlu0 %2732  ;;  %v2735_v32 = vpop.permute.xlu1 %2734 }
 0x495   : > { %2799 = vst.msk [vmem:[#allocation2 + $0x100] sm:$0xff] %vm2768_vm3, %v2733_v19  ;;  %v2820_v33 = vpop.permute.xlu2 %2819 }
 0x496   : > { %2800 = vst.msk [vmem:[#allocation2 + $0x108] sm:$0xff] %vm2768_vm3, %v2735_v32 }
 0x497   : > { %2908 = vst.msk [vmem:[#allocation2 + $0x57] sm:$0xff] %vm2899_vm5, %v2820_v33 }
 0x49c   : > { %v2804_v22 = vpop.permute.xlu0 %2803  ;;  %v2806_v3 = vpop.permute.xlu1 %2805 }
 0x49d   : > { %2900 = vst.msk [vmem:[#allocation2 + $0x17] sm:$0xff] %vm2899_vm5, %v2804_v22  ;;  %v2826_v41 = vpop.permute.xlu2 %2825 }
 0x49e   : > { %2901 = vst.msk [vmem:[#allocation2 + $0x1f] sm:$0xfe] %vm2897_vm4, %v2806_v3 }
 0x49f   : > { %2911 = vst.msk [vmem:[#allocation2 + $0x6f] sm:$0xfe] %vm2897_vm4, %v2826_v41 }
 0x4a4   : > { %v2810_v63 = vpop.permute.xlu0 %2809  ;;  %v2812_v29 = vpop.permute.xlu1 %2811 }
 0x4a5   : > { %2903 = vst.msk [vmem:[#allocation2 + $0x2f] sm:$0xfe] %vm2897_vm4, %v2810_v63  ;;  %v2832_v24 = vpop.permute.xlu2 %2831 }
 0x4a6   : > { %2904 = vst.msk [vmem:[#allocation2 + $0x37] sm:$0xff] %vm2899_vm5, %v2812_v29 }
 0x4a7   : > { %2914 = vst.msk [vmem:[#allocation2 + $0x87] sm:$0xff] %vm2899_vm5, %v2832_v24 }
 0x4ac   : > { %v2816_v1 = vpop.permute.xlu0 %2815  ;;  %v2818_v15 = vpop.permute.xlu1 %2817 }
 0x4ad   : > { %2906 = vst.msk [vmem:[#allocation2 + $0x47] sm:$0xff] %vm2899_vm5, %v2816_v1  ;;  %v2838_v11 = vpop.permute.xlu2 %2837 }
 0x4ae   : > { %2907 = vst.msk [vmem:[#allocation2 + $0x4f] sm:$0xfe] %vm2897_vm4, %v2818_v15 }
 0x4af   : > { %2917 = vst.msk [vmem:[#allocation2 + $0x9f] sm:$0xfe] %vm2897_vm4, %v2838_v11 }
 0x4b4   : > { %v2822_v40 = vpop.permute.xlu0 %2821  ;;  %v2824_v48 = vpop.permute.xlu1 %2823 }
 0x4b5   : > { %2909 = vst.msk [vmem:[#allocation2 + $0x5f] sm:$0xfe] %vm2897_vm4, %v2822_v40  ;;  %v2844_v4 = vpop.permute.xlu2 %2843 }
 0x4b6   : > { %2910 = vst.msk [vmem:[#allocation2 + $0x67] sm:$0xff] %vm2899_vm5, %v2824_v48 }
 0x4b7   : > { %2920 = vst.msk [vmem:[#allocation2 + $0xb7] sm:$0xff] %vm2899_vm5, %v2844_v4 }
 0x4bc   : > { %v2828_v38 = vpop.permute.xlu0 %2827  ;;  %v2830_v55 = vpop.permute.xlu1 %2829 }
 0x4bd   : > { %2912 = vst.msk [vmem:[#allocation2 + $0x77] sm:$0xff] %vm2899_vm5, %v2828_v38  ;;  %v2850_v6 = vpop.permute.xlu2 %2849 }
 0x4be   : > { %2913 = vst.msk [vmem:[#allocation2 + $0x7f] sm:$0xfe] %vm2897_vm4, %v2830_v55 }
 0x4bf   : > { %2923 = vst.msk [vmem:[#allocation2 + $0xcf] sm:$0xfe] %vm2897_vm4, %v2850_v6 }
 0x4c4   : > { %v2834_v47 = vpop.permute.xlu0 %2833  ;;  %v2836_v42 = vpop.permute.xlu1 %2835 }
 0x4c5   : > { %2915 = vst.msk [vmem:[#allocation2 + $0x8f] sm:$0xfe] %vm2897_vm4, %v2834_v47  ;;  %v2856_v60 = vpop.permute.xlu2 %2855 }
 0x4c6   : > { %2916 = vst.msk [vmem:[#allocation2 + $0x97] sm:$0xff] %vm2899_vm5, %v2836_v42 }
 0x4c7   : > { %2926 = vst.msk [vmem:[#allocation2 + $0xe7] sm:$0xff] %vm2899_vm5, %v2856_v60 }
 0x4cc   : > { %v2840_v26 = vpop.permute.xlu0 %2839  ;;  %v2842_v49 = vpop.permute.xlu1 %2841 }
 0x4cd   : > { %2918 = vst.msk [vmem:[#allocation2 + $0xa7] sm:$0xff] %vm2899_vm5, %v2840_v26  ;;  %v2862_v31 = vpop.permute.xlu2 %2861 }
 0x4ce   : > { %2919 = vst.msk [vmem:[#allocation2 + $0xaf] sm:$0xfe] %vm2897_vm4, %v2842_v49 }
 0x4cf   : > { %2929 = vst.msk [vmem:[#allocation2 + $0xff] sm:$0xfe] %vm2897_vm4, %v2862_v31 }
 0x4d4   : > { %v2846_v59 = vpop.permute.xlu0 %2845  ;;  %v2848_v18 = vpop.permute.xlu1 %2847 }
 0x4d5   : > { %2921 = vst.msk [vmem:[#allocation2 + $0xbf] sm:$0xfe] %vm2897_vm4, %v2846_v59 }
 0x4d6   : > { %2922 = vst.msk [vmem:[#allocation2 + $0xc7] sm:$0xff] %vm2899_vm5, %v2848_v18 }
 0x4dc   : > { %v2852_v28 = vpop.permute.xlu0 %2851  ;;  %v2854_v37 = vpop.permute.xlu1 %2853 }
 0x4dd   : > { %2924 = vst.msk [vmem:[#allocation2 + $0xd7] sm:$0xff] %vm2899_vm5, %v2852_v28 }
 0x4de   : > { %2925 = vst.msk [vmem:[#allocation2 + $0xdf] sm:$0xfe] %vm2897_vm4, %v2854_v37 }
 0x4e4   : > { %v2858_v53 = vpop.permute.xlu0 %2857  ;;  %v2860_v5 = vpop.permute.xlu1 %2859 }
 0x4e5   : > { %2927 = vst.msk [vmem:[#allocation2 + $0xef] sm:$0xfe] %vm2897_vm4, %v2858_v53 }
 0x4e6   : > { %2928 = vst.msk [vmem:[#allocation2 + $0xf7] sm:$0xff] %vm2899_vm5, %v2860_v5 }
 0x4ec   : > { %v2864_v51 = vpop.permute.xlu0 %2863 }
 0x4ed   : > { %2930 = vst.msk [vmem:[#allocation2 + $0x107] sm:$0xff] %vm2899_vm5, %v2864_v51 }
 0x4ee PF: > { %p3196_p2 = scmp.ne.s32.totalorder %s3664_s15, 7 }
 0x4f0   : > { %2934 = sbr.rel (%p3196_p2) target bundleno = 1302 (0x516), region = 40 }
 0x4f5   : > { %v2935_v35 = vld [vmem:[#allocation3] sm:$0xff]  ;;  %v2936_v2 = vld [vmem:[#allocation3 + $0x8] sm:$0xff]  ;;  %v2937_v46 = vld [vmem:[#allocation3 + $0x10] sm:$0xff] }
 0x4f6   : > { %2967 = vst.msk [vmem:[%s3796_s23] sm:$0xff] %vm1546_vm13, %v2935_v35  ;;  %v2938_v57 = vld [vmem:[#allocation3 + $0x18] sm:$0xff]  ;;  %v2939_v34 = vld [vmem:[#allocation3 + $0x20] sm:$0xff]  ;;  %v2940_v45 = vld [vmem:[#allocation3 + $0x28] sm:$0xff] }
 0x4f7   : > { %2968 = vst.msk [vmem:[%s3796_s23 + $0x8] sm:$0xff] %vm1546_vm13, %v2936_v2  ;;  %v2941_v16 = vld [vmem:[#allocation3 + $0x30] sm:$0xff]  ;;  %v2942_v12 = vld [vmem:[#allocation3 + $0x38] sm:$0xff]  ;;  %v2943_v58 = vld [vmem:[#allocation3 + $0x40] sm:$0xff] }
 0x4f8   : > { %2969 = vst.msk [vmem:[%s3796_s23 + $0x10] sm:$0xff] %vm1546_vm13, %v2937_v46  ;;  %v2944_v61 = vld [vmem:[#allocation3 + $0x48] sm:$0xff]  ;;  %v2945_v50 = vld [vmem:[#allocation3 + $0x50] sm:$0xff]  ;;  %v2946_v44 = vld [vmem:[#allocation3 + $0x58] sm:$0xff] }
 0x4f9   : > { %2970 = vst.msk [vmem:[%s3796_s23 + $0x18] sm:$0xff] %vm1546_vm13, %v2938_v57  ;;  %v2947_v21 = vld [vmem:[#allocation3 + $0x60] sm:$0xff]  ;;  %v2948_v54 = vld [vmem:[#allocation3 + $0x68] sm:$0xff]  ;;  %v2949_v30 = vld [vmem:[#allocation3 + $0x70] sm:$0xff] }
 0x4fa   : > { %2971 = vst.msk [vmem:[%s3796_s23 + $0x20] sm:$0xff] %vm1546_vm13, %v2939_v34  ;;  %v2950_v13 = vld [vmem:[#allocation3 + $0x78] sm:$0xff]  ;;  %v2951_v23 = vld [vmem:[#allocation3 + $0x80] sm:$0xff]  ;;  %v2952_v56 = vld [vmem:[#allocation3 + $0x88] sm:$0xff] }
 0x4fb   : > { %2972 = vst.msk [vmem:[%s3796_s23 + $0x28] sm:$0xff] %vm1546_vm13, %v2940_v45  ;;  %v2953_v7 = vld [vmem:[#allocation3 + $0x90] sm:$0xff]  ;;  %v2954_v27 = vld [vmem:[#allocation3 + $0x98] sm:$0xff]  ;;  %v2955_v25 = vld [vmem:[#allocation3 + $0xa0] sm:$0xff] }
 0x4fc   : > { %2973 = vst.msk [vmem:[%s3796_s23 + $0x30] sm:$0xff] %vm1546_vm13, %v2941_v16  ;;  %v2956_v0 = vld [vmem:[#allocation3 + $0xa8] sm:$0xff]  ;;  %v2957_v14 = vld [vmem:[#allocation3 + $0xb0] sm:$0xff]  ;;  %v2958_v8 = vld [vmem:[#allocation3 + $0xb8] sm:$0xff] }
 0x4fd   : > { %2974 = vst.msk [vmem:[%s3796_s23 + $0x38] sm:$0xff] %vm1546_vm13, %v2942_v12  ;;  %v2959_v39 = vld [vmem:[#allocation3 + $0xc0] sm:$0xff]  ;;  %v2960_v52 = vld [vmem:[#allocation3 + $0xc8] sm:$0xff]  ;;  %v2961_v10 = vld [vmem:[#allocation3 + $0xd0] sm:$0xff] }
 0x4fe   : > { %2975 = vst.msk [vmem:[%s3796_s23 + $0x40] sm:$0xff] %vm1546_vm13, %v2943_v58  ;;  %v2962_v9 = vld [vmem:[#allocation3 + $0xd8] sm:$0xff]  ;;  %v2963_v20 = vld [vmem:[#allocation3 + $0xe0] sm:$0xff]  ;;  %v2964_v43 = vld [vmem:[#allocation3 + $0xe8] sm:$0xff] }
 0x4ff   : > { %2976 = vst.msk [vmem:[%s3796_s23 + $0x48] sm:$0xff] %vm1546_vm13, %v2944_v61  ;;  %v2965_v62 = vld [vmem:[#allocation3 + $0xf0] sm:$0xff]  ;;  %v2966_v17 = vld [vmem:[#allocation3 + $0xf8] sm:$0xff] }
 0x500   : > { %2977 = vst.msk [vmem:[%s3796_s23 + $0x50] sm:$0xff] %vm1546_vm13, %v2945_v50 }
 0x501   : > { %2978 = vst.msk [vmem:[%s3796_s23 + $0x58] sm:$0xff] %vm1546_vm13, %v2946_v44 }
 0x502   : > { %2979 = vst.msk [vmem:[%s3796_s23 + $0x60] sm:$0xff] %vm1546_vm13, %v2947_v21 }
 0x503   : > { %2980 = vst.msk [vmem:[%s3796_s23 + $0x68] sm:$0xff] %vm1546_vm13, %v2948_v54 }
 0x504   : > { %2981 = vst.msk [vmem:[%s3796_s23 + $0x70] sm:$0xff] %vm1546_vm13, %v2949_v30 }
 0x505   : > { %2982 = vst.msk [vmem:[%s3796_s23 + $0x78] sm:$0xff] %vm1546_vm13, %v2950_v13 }
 0x506   : > { %2983 = vst.msk [vmem:[%s3796_s23 + $0x80] sm:$0xff] %vm1546_vm13, %v2951_v23 }
 0x507   : > { %2984 = vst.msk [vmem:[%s3796_s23 + $0x88] sm:$0xff] %vm1546_vm13, %v2952_v56 }
 0x508   : > { %2985 = vst.msk [vmem:[%s3796_s23 + $0x90] sm:$0xff] %vm1546_vm13, %v2953_v7 }
 0x509   : > { %2986 = vst.msk [vmem:[%s3796_s23 + $0x98] sm:$0xff] %vm1546_vm13, %v2954_v27 }
 0x50a   : > { %2987 = vst.msk [vmem:[%s3796_s23 + $0xa0] sm:$0xff] %vm1546_vm13, %v2955_v25 }
 0x50b   : > { %2988 = vst.msk [vmem:[%s3796_s23 + $0xa8] sm:$0xff] %vm1546_vm13, %v2956_v0 }
 0x50c   : > { %2989 = vst.msk [vmem:[%s3796_s23 + $0xb0] sm:$0xff] %vm1546_vm13, %v2957_v14 }
 0x50d   : > { %2990 = vst.msk [vmem:[%s3796_s23 + $0xb8] sm:$0xff] %vm1546_vm13, %v2958_v8 }
 0x50e   : > { %2991 = vst.msk [vmem:[%s3796_s23 + $0xc0] sm:$0xff] %vm1546_vm13, %v2959_v39 }
 0x50f   : > { %2992 = vst.msk [vmem:[%s3796_s23 + $0xc8] sm:$0xff] %vm1546_vm13, %v2960_v52 }
 0x510   : > { %2993 = vst.msk [vmem:[%s3796_s23 + $0xd0] sm:$0xff] %vm1546_vm13, %v2961_v10 }
 0x511   : > { %2994 = vst.msk [vmem:[%s3796_s23 + $0xd8] sm:$0xff] %vm1546_vm13, %v2962_v9 }
 0x512   : > { %2995 = vst.msk [vmem:[%s3796_s23 + $0xe0] sm:$0xff] %vm1546_vm13, %v2963_v20 }
 0x513   : > { %2996 = vst.msk [vmem:[%s3796_s23 + $0xe8] sm:$0xff] %vm1546_vm13, %v2964_v43 }
 0x514   : > { %2997 = vst.msk [vmem:[%s3796_s23 + $0xf0] sm:$0xff] %vm1546_vm13, %v2965_v62 }
 0x515   : > { %2998 = vst.msk [vmem:[%s3796_s23 + $0xf8] sm:$0xff] %vm1546_vm13, %v2966_v17 }
 0x516 PF: > { %s3202_s15 = sshll.u32 %s3668_s16, 8  ;;  %s3024_s6 = sshll.u32 %s3796_s23, 4  ;;  %s3025_s6 = int_to_ptr.vmem [resolvable:$true] %s3024_s6 }
 0x517   : > { %s3023_s5 = scalar_lea.hbm %s6118_s3, %s3202_s15  ;;  %s3009_s8 = scalar_lea.sflag [#allocation5], %s197_s29 }
 0x518   : > { %s3026_s7 = sshll.u32 %s3023_s5, 4  ;;  %s3606_s16 = scalar_lea.hbm %s6118_s3, 512  ;;  %s3027_s7 = int_to_ptr.hbm [resolvable:$true] %s3026_s7 }
 0x519   : > { %s3600_s9 = sshra.s32 %s3027_s7, 4  ;;  %s3601_s9 = int_to_ptr.hbm [resolvable:$true] %s3600_s9 }
 0x51a   : > { %s3602_s10 = scalar_lea.hbm %s3601_s9, 256  ;;  %p3607_p7 = scmp.lt.s32.totalorder %s3601_s9, %s6118_s3 }
 0x51b   : > { %p3603_p4 = scmp.ne.s32.totalorder %s3601_s9, %s3602_s10  ;;  %p3608_p8 = scmp.lt.s32.totalorder %s3606_s16, %s3602_s10 }
 0x51d   : > { %p3604_p5 = pnand %p3603_p4, %p3759_p3  ;;  %p3609_p10 = por %p3608_p8, %p3607_p7 }
 0x51f   : > { %p3605_p6 = pneg %p3604_p5 }
 0x521   : > { %p3610_p11 = pnand %p3609_p10, %p3605_p6 }
 0x523   : > { %3613 = shalt.err (!%p3610_p11)
}
 0x524   : > { %s3688_s23 = smov 128   ;;  %s3689_s29 = smov 8  }
 0x525   : > { %3251 = dma.vmem_to_hbm [thread:$0]  (%p3759_p3), %s3025_s6, 4096, %s3027_s7, %s3009_s8, %s3688_s23, %s3688_s23, %s3689_s29  }
 0x526 PF: > { %p3257_p12 = scmp.ge.s32.totalorder %s3680_s19, 2  ;;  %s3053_s27 = sand.u32 1, %s3652_s12  }
 0x527   : > { %s3054_s15 = scalar_lea.sflag [#allocation5], %s3053_s27 }
 0x528   : > { %p3254_p13 = pnand %p3257_p12, %p3769_p9 }
 0x52a   : > { %p3255_p0 = pneg %p3254_p13 }
 0x52c   : > { %3647 = dma.done.wait (%p3255_p0), %s3054_s15, 4096  }
 0x52d   : > { %3649 = vsyncadd (%p3255_p0), %s3054_s15, 4294963200  ;;  %s17_s19 = sadd.s32 1, %s3680_s19   ;;  %s6213_s24 = sld [smem:[#allocation7_spill]] }
 0x52e   : > { %p14_p1 = scmp.ge.s32.totalorder %s17_s19, 18   ;;  %s6214_s12 = smov %s3656_s13 }
 0x52f   : > { %s6215_s13 = smov %s3660_s14  ;;  %s6216_s14 = smov %s3777_s28 }
 0x530   : > { %s6217_s15 = smov %s3672_s17  ;;  %s6218_s16 = smov %s3676_s18 }
 0x531   : > { %s6219_s17 = smov %s6222_s22  ;;  %16 = sbr.rel (!%p14_p1) target bundleno = 5 (0x5), region = 91 }
 0x533   : > { %s6220_s18 = smov %s6213_s24 }
 0x536   :  { %3060 = vsyncpa [#allocation5], 1 }
 0x537   :  { %3062 = vsyncpa [#allocation5 + $0x1], 1 }

// kernel: a_call__.6
= control target key start
LH: loop header
LB: loop body
LE: loop exit
PB: predicated region body
PF: predicated region fallthrough
CT: control target
= control target key end

     0   :  { %s1742_s12 = smov 0   ;;  %s1744_s13 = smov 0   ;;  %s2663_s0 = inlined_call_operand.vmem [shape: f32[2,8,18,18,32], index: 0, kind: input, shape index: {}]   ;;  %s2664_s1 = inlined_call_operand.vmem [shape: f32[3,128,128], index: 1, kind: input, shape index: {}]   ;;  %s2665_s2 = inlined_call_operand.vmem [shape: f32[1,128], index: 2, kind: input, shape index: {}]   ;;  %s2666_s3 = inlined_call_operand.vmem [shape: f32[2,8,256,128], index: 3, kind: output, shape index: {}]  }
   0x1   :  { %s1746_s14 = smov 0   ;;  %s1748_s15 = smov 0  }
   0x2   :  { %s1750_s16 = smov 0  }
   0x3 LB: > { %s22_s17 = sadd.s32 1, %s1709_s14  ;;  %s25_s18 = sadd.s32 1, %s1713_s15  ;;  %s1717_s16 = sphi %s1750_s16, %s13_s16   ;;  %s1713_s15 = sphi %s1748_s15, %s2670_s15   ;;  %s1709_s14 = sphi %s1746_s14, %s2669_s14   ;;  %s1705_s13 = sphi %s1744_s13, %s2668_s13   ;;  %s1701_s12 = sphi %s1742_s12, %s2667_s12  }
   0x4   : > { %p23_p0 = scmp.ge.s32.totalorder %s22_s17, 8  ;;  %p1546_p1 = scmp.ge.s32.totalorder %s1717_s16, 1 }
   0x5   : > { %p157_p2 = scmp.lt.s32.totalorder %s1717_s16, 17 }
   0x6   : > { %s2672_s17 = smov (%p23_p0, %s22_s17), 0  ;;  %s2674_s18 = smov (!%p23_p0, %s25_s18), %s1713_s15 }
   0x7   : > { %p158_p3 = pnand %p1546_p1, %p157_p2  ;;  %p27_p4 = scmp.ge.s32.totalorder %s2674_s18, 2 }
   0x8   : > { %p189_p5 = scmp.lt.s32.totalorder (!%p158_p3), %s1705_s13, 1  ;;  %p191_p6 = scmp.lt.s32.totalorder (!%p158_p3), %s1701_s12, 7 }
   0x9   : > { %s2676_s18 = smov (%p27_p4, %s2674_s18), 0  ;;  %161 = sbr.rel (%p158_p3) target bundleno = 586 (0x24a), region = 32 }
   0xa   : > { %s1720_s26 = smov (!%p158_p3), 32   ;;  %s1721_s27 = smov (!%p158_p3), 64  }
   0xe   : > { %vm207_vm0 = vcmask 1048320   ;;  %v1719_v0 = vmov 0.0   ;;  %s2678_s13 = smov (!%p189_p5, %s1705_s13), 1  ;;  %s2680_s12 = smov (!%p191_p6, %s1701_s12), 7  ;;  %vm298_vm1 = vcmask 261120   ;;  %v1922_v19 = vld [vmem:[%s2664_s1 + $0x178] sm:$0xff] }
   0xf   : > { %233 = vst.msk [vmem:[#allocation2 + $0xc8] sm:$0xff] %vm207_vm0, %v1719_v0  ;;  %s1634_s19 = smul.u32 432, %s2678_s13  ;;  %v1927_v20 = vld [vmem:[%s2664_s1 + $0x170] sm:$0xff]  ;;  %1270 = vmatpush.msra.mxu2 %v1922_v19  ;;  %v1942_v22 = vld [vmem:[%s2664_s1 + $0x168] sm:$0xff]  ;;  %v1947_v23 = vld [vmem:[%s2664_s1 + $0x160] sm:$0xff]  ;;  %vm551_vm2 = vcmask 523521  }
  0x10   : > { %208 = vst.msk [vmem:[#allocation2] sm:$0xff] %vm207_vm0, %v1719_v0  ;;  %s1633_s20 = smul.u32 54, %s2680_s12  ;;  %v879_v24 = vld [vmem:[%s2664_s1 + $0x78] sm:$0xff]  ;;  %v878_v25 = vld [vmem:[%s2664_s1 + $0x70] sm:$0xff]  ;;  %v877_v28 = vld [vmem:[%s2664_s1 + $0x68] sm:$0xff]  ;;  %vm770_vm3 = vcmask 785922  }
  0x11   : > { %209 = vst.msk [vmem:[#allocation2 + $0x8] sm:$0xff] %vm207_vm0, %v1719_v0  ;;  %1271 = vmatpush.msra.mxu2 %v1927_v20  ;;  %1585 = vmatpush.msra.mxu3 %v879_v24  ;;  %v1960_v26 = vld [vmem:[%s2664_s1 + $0x158] sm:$0xff]  ;;  %v1974_v29 = vld [vmem:[%s2664_s1 + $0x150] sm:$0xff]  ;;  %v1984_v31 = vld [vmem:[%s2664_s1 + $0x148] sm:$0xff]  ;;  %vm553_vm4 = vcmask 523520   ;;  %vm772_vm5 = vcmask 785920  }
  0x12   : > { %210 = vst.msk [vmem:[#allocation2 + $0x10] sm:$0xff] %vm207_vm0, %v1719_v0  ;;  %s195_s21 = sadd.s32 %s1634_s19, %s1633_s20  ;;  %880 = vmatpush.msra.mxu0 %v879_v24  ;;  %v876_v32 = vld [vmem:[%s2664_s1 + $0x60] sm:$0xff]  ;;  %v875_v34 = vld [vmem:[%s2664_s1 + $0x58] sm:$0xff]  ;;  %v874_v37 = vld [vmem:[%s2664_s1 + $0x50] sm:$0xff]  ;;  %vm555_vm6 = vcmask 516352   ;;  %vm774_vm7 = vcmask 779776  }
  0x13   : > { %211 = vst.msk [vmem:[#allocation2 + $0x18] sm:$0xff] %vm207_vm0, %v1719_v0  ;;  %s1547_s22 = sshll.u32 %s195_s21, 3  ;;  %1272 = vmatpush.msra.mxu2 %v1942_v22  ;;  %1586 = vmatpush.msra.mxu3 %v878_v25  ;;  %v1994_v33 = vld [vmem:[%s2664_s1 + $0x140] sm:$0xff]  ;;  %v2004_v36 = vld [vmem:[%s2664_s1 + $0x138] sm:$0xff]  ;;  %v2013_v38 = vld [vmem:[%s2664_s1 + $0x130] sm:$0xff]  ;;  %s1548_s19 = sshll.u32 %s2680_s12, 5 }
  0x14   : > { %212 = vst.msk [vmem:[#allocation2 + $0x20] sm:$0xff] %vm207_vm0, %v1719_v0  ;;  %s1797_s25 = scalar_lea.vmem %s2663_s0, %s1547_s22  ;;  %881 = vmatpush.msra.mxu0 %v878_v25  ;;  %v873_v39 = vld [vmem:[%s2664_s1 + $0x48] sm:$0xff]  ;;  %v872_v41 = vld [vmem:[%s2664_s1 + $0x40] sm:$0xff]  ;;  %v871_v44 = vld [vmem:[%s2664_s1 + $0x38] sm:$0xff]  ;;  %s1549_s20 = sshll.u32 %s2678_s13, 8 }
  0x15   : > { %213 = vst.msk [vmem:[#allocation2 + $0x28] sm:$0xff] %vm207_vm0, %v1719_v0  ;;  %v280_v1 = vld [vmem:[%s1797_s25 + $0x120] sm:$0xff]  ;;  %v250_v2 = vld [vmem:[%s1797_s25 + $0x30] sm:$0xff]  ;;  %v281_v3 = vld [vmem:[%s1797_s25 + $0x128] sm:$0xff]  ;;  %1273 = vmatpush.msra.mxu2 %v1947_v23  ;;  %1587 = vmatpush.msra.mxu3 %v877_v28  ;;  %s204_s21 = sadd.s32 %s1549_s20, %s1548_s19 }
  0x16   : > { %214 = vst.msk [vmem:[#allocation2 + $0x30] sm:$0xff] %vm207_vm0, %v1719_v0  ;;  %461 = vrot.lane.b32.xlu1 %v280_v1, %s1720_s26  ;;  %401 = vrot.lane.b32.xlu0 %v250_v2, %s1720_s26  ;;  %v251_v4 = vld [vmem:[%s1797_s25 + $0x38] sm:$0xff]  ;;  %v244_v5 = vld [vmem:[%s1797_s25] sm:$0xff]  ;;  %s1550_s12 = sshll.u32 %s204_s21, 3 }
  0x17   : > { %215 = vst.msk [vmem:[#allocation2 + $0x38] sm:$0xff] %vm207_vm0, %v1719_v0  ;;  %620 = vrot.lane.b32.xlu2 %v250_v2, %s1721_s27  ;;  %v245_v6 = vld [vmem:[%s1797_s25 + $0x8] sm:$0xff]  ;;  %v247_v7 = vld [vmem:[%s1797_s25 + $0x18] sm:$0xff]  ;;  %v248_v8 = vld [vmem:[%s1797_s25 + $0x20] sm:$0xff]  ;;  %1274 = vmatpush.msra.mxu2 %v1960_v26 }
  0x18   : > { %216 = vst.msk [vmem:[#allocation2 + $0x40] sm:$0xff] %vm207_vm0, %v1719_v0  ;;  %v253_v9 = vld [vmem:[%s1797_s25 + $0x48] sm:$0xff]  ;;  %v254_v10 = vld [vmem:[%s1797_s25 + $0x50] sm:$0xff]  ;;  %v284_v11 = vld [vmem:[%s1797_s25 + $0x140] sm:$0xff]  ;;  %882 = vmatpush.msra.mxu0 %v877_v28  ;;  %1588 = vmatpush.msra.mxu3 %v876_v32 }
  0x19   : > { %324 = vst.msk [vmem:[#allocation2 + $0xc8] sm:$0xff] %vm298_vm1, %v281_v3  ;;  %v252_v12 = vld [vmem:[%s1797_s25 + $0x40] sm:$0x3]  ;;  %v282_v13 = vld [vmem:[%s1797_s25 + $0x130] sm:$0x3]  ;;  %v283_v14 = vld [vmem:[%s1797_s25 + $0x138] sm:$0xff]  ;;  %1275 = vmatpush.msra.mxu2 %v1974_v29 }
  0x1a   : > { %217 = vst.msk [vmem:[#allocation2 + $0x48] sm:$0xff] %vm207_vm0, %v1719_v0  ;;  %v246_v15 = vld [vmem:[%s1797_s25 + $0x10] sm:$0x3]  ;;  %v249_v16 = vld [vmem:[%s1797_s25 + $0x28] sm:$0x3]  ;;  %v1907_v17 = vld [vmem:[%s1797_s25 + $0x60] sm:$0xff]  ;;  %883 = vmatpush.msra.mxu0 %v876_v32  ;;  %1589 = vmatpush.msra.mxu3 %v875_v34 }
  0x1b   : > { %218 = vst.msk [vmem:[#allocation2 + $0x50] sm:$0xff] %vm207_vm0, %v1719_v0  ;;  %v1913_v18 = vld [vmem:[%s1797_s25 + $0x68] sm:$0xff]  ;;  %v1932_v21 = vld [vmem:[%s1797_s25 + $0x158] sm:$0xff]  ;;  %v1963_v27 = vld [vmem:[%s1797_s25 + $0x150] sm:$0xff]  ;;  %1276 = vmatpush.msra.mxu2 %v1984_v31 }
  0x1c   : > { %219 = vst.msk [vmem:[#allocation2 + $0x58] sm:$0xff] %vm207_vm0, %v1719_v0  ;;  %v255_v30 = vld [vmem:[%s1797_s25 + $0x58] sm:$0x3]  ;;  %v285_v35 = vld [vmem:[%s1797_s25 + $0x148] sm:$0x3]  ;;  %884 = vmatpush.msra.mxu0 %v875_v34  ;;  %1590 = vmatpush.msra.mxu3 %v874_v37  ;;  %v2036_v43 = vld [vmem:[%s2664_s1 + $0x120] sm:$0xff] }
  0x1d   : > { %220 = vst.msk [vmem:[#allocation2 + $0x60] sm:$0xff] %vm207_vm0, %v1719_v0  ;;  %1277 = vmatpush.msra.mxu2 %v1994_v33  ;;  %v2023_v40 = vld [vmem:[%s2664_s1 + $0x128] sm:$0xff]  ;;  %v2045_v45 = vld [vmem:[%s2664_s1 + $0x118] sm:$0xff]  ;;  %v870_v46 = vld [vmem:[%s2664_s1 + $0x30] sm:$0xff] }
  0x1e   : > { %221 = vst.msk [vmem:[#allocation2 + $0x68] sm:$0xff] %vm207_vm0, %v1719_v0  ;;  %463 = vrot.lane.b32.xlu1 %v281_v3, %s1720_s26  ;;  %403 = vrot.lane.b32.xlu0 %v251_v4, %s1720_s26  ;;  %v2051_v47 = vld [vmem:[%s1797_s25 + $0x78] sm:$0xff]  ;;  %v2057_v48 = vld [vmem:[%s2664_s1 + $0x110] sm:$0xff] }
  0x1f   : > { %222 = vst.msk [vmem:[#allocation2 + $0x70] sm:$0xff] %vm207_vm0, %v1719_v0  ;;  %622 = vrot.lane.b32.xlu2 %v251_v4, %s1721_s27  ;;  %1278 = vmatpush.msra.mxu2 %v2004_v36  ;;  %v869_v49 = vld [vmem:[%s2664_s1 + $0x28] sm:$0xff]  ;;  %v2069_v50 = vld [vmem:[%s1797_s25 + $0x80] sm:$0xff]  ;;  %v867_v55 = vld [vmem:[%s2664_s1 + $0x18] sm:$0xff] }
  0x20   : > { %223 = vst.msk [vmem:[#allocation2 + $0x78] sm:$0xff] %vm207_vm0, %v1719_v0  ;;  %885 = vmatpush.msra.mxu0 %v874_v37  ;;  %1591 = vmatpush.msra.mxu3 %v873_v39  ;;  %v2078_v51 = vld [vmem:[%s2664_s1 + $0x108] sm:$0xff]  ;;  %v868_v52 = vld [vmem:[%s2664_s1 + $0x20] sm:$0xff]  ;;  %v1566_v56 = vld [vmem:[%s2664_s1 + $0xf8] sm:$0xff] }
  0x21   : > { %224 = vst.msk [vmem:[#allocation2 + $0x80] sm:$0xff] %vm207_vm0, %v1719_v0  ;;  %1279 = vmatpush.msra.mxu2 %v2013_v38  ;;  %v2089_v54 = vld [vmem:[%s2664_s1 + $0x100] sm:$0xff]  ;;  %1075 = vmatpush.msra.mxu1 %v1566_v56  ;;  %v1565_v57 = vld [vmem:[%s2664_s1 + $0xf0] sm:$0xff]  ;;  %v1564_v60 = vld [vmem:[%s2664_s1 + $0xe8] sm:$0xff] }
  0x22   : > { %225 = vst.msk [vmem:[#allocation2 + $0x88] sm:$0xff] %vm207_vm0, %v1719_v0  ;;  %886 = vmatpush.msra.mxu0 %v873_v39  ;;  %1592 = vmatpush.msra.mxu3 %v872_v41  ;;  %v866_v58 = vld [vmem:[%s2664_s1 + $0x10] sm:$0xff]  ;;  %v865_v61 = vld [vmem:[%s2664_s1 + $0x8] sm:$0xff]  ;;  %v1563_v62 = vld [vmem:[%s2664_s1 + $0xe0] sm:$0xff] }
  0x23   : > { %226 = vst.msk [vmem:[#allocation2 + $0x90] sm:$0xff] %vm207_vm0, %v1719_v0  ;;  %1280 = vmatpush.msra.mxu2 %v2023_v40  ;;  %v2106_v59 = vld [vmem:[%s1797_s25 + $0x170] sm:$0xff]  ;;  %1076 = vmatpush.msra.mxu1 %v1565_v57  ;;  %v864_v63 = vld [vmem:[%s2664_s1] sm:$0xff]  ;;  %v1552_v25 = vld [vmem:[%s2664_s1 + $0x88] sm:$0xff] }
  0x24   : > { %227 = vst.msk [vmem:[#allocation2 + $0x98] sm:$0xff] %vm207_vm0, %v1719_v0  ;;  %887 = vmatpush.msra.mxu0 %v872_v41  ;;  %1593 = vmatpush.msra.mxu3 %v871_v44  ;;  %v1553_v24 = vld [vmem:[%s2664_s1 + $0x90] sm:$0xff]  ;;  %v1551_v32 = vld [vmem:[%s2664_s1 + $0x80] sm:$0xff] }
  0x25   : > { %228 = vst.msk [vmem:[#allocation2 + $0xa0] sm:$0xff] %vm207_vm0, %v1719_v0  ;;  %1281 = vmatpush.msra.mxu2 %v2036_v43  ;;  %1077 = vmatpush.msra.mxu1 %v1564_v60 }
  0x26   : > { %229 = vst.msk [vmem:[#allocation2 + $0xa8] sm:$0xff] %vm207_vm0, %v1719_v0  ;;  %682 = vrot.lane.b32.xlu1 %v281_v3, %s1721_s27  ;;  %680 = vrot.lane.b32.xlu0 %v280_v1, %s1721_s27  ;;  %v1561_v3 = vld [vmem:[%s2664_s1 + $0xd0] sm:$0xff] }
  0x27   : > { %230 = vst.msk [vmem:[#allocation2 + $0xb0] sm:$0xff] %vm207_vm0, %v1719_v0  ;;  %389 = vrot.lane.b32.xlu2 %v244_v5, %s1720_s26  ;;  %888 = vmatpush.msra.mxu0 %v871_v44  ;;  %v2226_v44 = vld [vmem:[%s1797_s25 + $0xa8] sm:$0xff] }
  0x28   : > { %231 = vst.msk [vmem:[#allocation2 + $0xb8] sm:$0xff] %vm207_vm0, %v1719_v0  ;;  %1282 = vmatpush.msra.mxu2 %v2045_v45  ;;  %1594 = vmatpush.msra.mxu3 %v870_v46 }
  0x29   : > { %232 = vst.msk [vmem:[#allocation2 + $0xc0] sm:$0xff] %vm207_vm0, %v1719_v0  ;;  %889 = vmatpush.msra.mxu0 %v870_v46  ;;  %1078 = vmatpush.msra.mxu1 %v1563_v62  ;;  %v261_v46 = vld [vmem:[%s1797_s25 + $0x88] sm:$0x3] }
  0x2a   : > { %234 = vst.msk [vmem:[#allocation2 + $0xd0] sm:$0xff] %vm207_vm0, %v1719_v0  ;;  %1283 = vmatpush.msra.mxu2 %v2057_v48  ;;  %1595 = vmatpush.msra.mxu3 %v869_v49 }
  0x2b   : > { %235 = vst.msk [vmem:[#allocation2 + $0xd8] sm:$0xff] %vm207_vm0, %v1719_v0  ;;  %890 = vmatpush.msra.mxu0 %v869_v49 }
  0x2c   : > { %236 = vst.msk [vmem:[#allocation2 + $0xe0] sm:$0xff] %vm207_vm0, %v1719_v0  ;;  %1284 = vmatpush.msra.mxu2 %v2078_v51  ;;  %1596 = vmatpush.msra.mxu3 %v868_v52 }
  0x2d   : > { %237 = vst.msk [vmem:[#allocation2 + $0xe8] sm:$0xff] %vm207_vm0, %v1719_v0  ;;  %891 = vmatpush.msra.mxu0 %v868_v52 }
  0x2e   : > { %238 = vst.msk [vmem:[#allocation2 + $0xf0] sm:$0xff] %vm207_vm0, %v1719_v0  ;;  %391 = vrot.lane.b32.xlu0 %v245_v6, %s1720_s26  ;;  %608 = vrot.lane.b32.xlu1 %v244_v5, %s1721_s27 }
  0x2f   : > { %239 = vst.msk [vmem:[#allocation2 + $0xf8] sm:$0xff] %vm207_vm0, %v1719_v0  ;;  %610 = vrot.lane.b32.xlu2 %v245_v6, %s1721_s27  ;;  %1285 = vmatpush.msra.mxu2 %v2089_v54 }
  0x30   : > { %240 = vst.msk [vmem:[#allocation2 + $0x100] sm:$0xff] %vm207_vm0, %v1719_v0  ;;  %1597 = vmatpush.msra.mxu3 %v867_v55  ;;  %892 = vmatpush.msra.mxu0 %v867_v55  ;;  %v291_v55 = vld [vmem:[%s1797_s25 + $0x178] sm:$0x3] }
  0x31   : > { %241 = vst.msk [vmem:[#allocation2 + $0x108] sm:$0xff] %vm207_vm0, %v1719_v0 }
  0x32   : > { %242 = vst.msk [vmem:[#allocation2 + $0x110] sm:$0xff] %vm207_vm0, %v1719_v0  ;;  %1598 = vmatpush.msra.mxu3 %v866_v58  ;;  %893 = vmatpush.msra.mxu0 %v866_v58 }
  0x33   : > { %243 = vst.msk [vmem:[#allocation2 + $0x118] sm:$0xff] %vm207_vm0, %v1719_v0 }
  0x34   : > { %304 = vst.msk [vmem:[#allocation2 + $0x28] sm:$0xff] %vm298_vm1, %v251_v4  ;;  %1599 = vmatpush.msra.mxu3 %v865_v61  ;;  %894 = vmatpush.msra.mxu0 %v865_v61  ;;  %v258_v4 = vld [vmem:[%s1797_s25 + $0x70] sm:$0x3] }
  0x35   : > { %303 = vst.msk [vmem:[#allocation2 + $0x20] sm:$0xff] %vm298_vm1, %v250_v2  ;;  %v2133_v2 = vld [vmem:[%s1797_s25 + $0x168] sm:$0xff] }
  0x36   : > { %323 = vst.msk [vmem:[#allocation2 + $0xc0] sm:$0xff] %vm298_vm1, %v280_v1  ;;  %395 = vrot.lane.b32.xlu0 %v247_v7, %s1720_s26  ;;  %397 = vrot.lane.b32.xlu1 %v248_v8, %s1720_s26  ;;  %v1562_v1 = vld [vmem:[%s2664_s1 + $0xd8] sm:$0xff] }
  0x37   : > { %300 = vst.msk [vmem:[#allocation2 + $0x8] sm:$0xff] %vm298_vm1, %v245_v6  ;;  %614 = vrot.lane.b32.xlu2 %v247_v7, %s1721_s27  ;;  %1600 = vmatpush.msra.mxu3 %v864_v63 }
  0x38   : > { %299 = vst.msk [vmem:[#allocation2] sm:$0xff] %vm298_vm1, %v244_v5  ;;  %1079 = vmatpush.msra.mxu1 %v1562_v1  ;;  %v1560_v5 = vld [vmem:[%s2664_s1 + $0xc8] sm:$0xff]  ;;  %895 = vmatpush.msra.mxu0 %v864_v63 }
  0x39   : > { %301 = vst.msk [vmem:[#allocation2 + $0x10] sm:$0xff] %vm298_vm1, %v247_v7  ;;  %1601 = vmatpush.msrb.mxu3 %v1566_v56 }
  0x3a   : > { %302 = vst.msk [vmem:[#allocation2 + $0x18] sm:$0xff] %vm298_vm1, %v248_v8  ;;  %1080 = vmatpush.msra.mxu1 %v1561_v3 }
  0x3b   : > { %305 = vst.msk [vmem:[#allocation2 + $0x30] sm:$0xff] %vm298_vm1, %v253_v9  ;;  %1602 = vmatpush.msrb.mxu3 %v1565_v57 }
  0x3c   : > { %306 = vst.msk [vmem:[#allocation2 + $0x38] sm:$0xff] %vm298_vm1, %v254_v10  ;;  %1081 = vmatpush.msra.mxu1 %v1560_v5 }
  0x3d   : > { %326 = vst.msk [vmem:[#allocation2 + $0xd8] sm:$0xff] %vm298_vm1, %v284_v11  ;;  %1603 = vmatpush.msrb.mxu3 %v1564_v60 }
  0x3e   : > { %616 = vrot.lane.b32.xlu0 %v248_v8, %s1721_s27  ;;  %405 = vrot.lane.b32.xlu1 %v252_v12, %s1720_s26  ;;  %325 = vst.msk [vmem:[#allocation2 + $0xd0] sm:$0xff] %vm298_vm1, %v283_v14  ;;  %v1559_v8 = vld [vmem:[%s2664_s1 + $0xc0] sm:$0xff] }
  0x3f   : > { %465 = vrot.lane.b32.xlu2 %v282_v13, %s1720_s26  ;;  %307 = vst.msk [vmem:[#allocation2 + $0x40] sm:$0xff] %vm298_vm1, %v1907_v17  ;;  %1082 = vmatpush.msra.mxu1 %v1559_v8 }
  0x40   : > { %308 = vst.msk [vmem:[#allocation2 + $0x48] sm:$0xff] %vm298_vm1, %v1913_v18  ;;  %1604 = vmatpush.msrb.mxu3 %v1563_v62 }
  0x41   : > { %328 = vst.msk [vmem:[#allocation2 + $0xe8] sm:$0xff] %vm298_vm1, %v1932_v21 }
  0x42   : > { %327 = vst.msk [vmem:[#allocation2 + $0xe0] sm:$0xff] %vm298_vm1, %v1963_v27  ;;  %1605 = vmatpush.msrb.mxu3 %v1562_v1  ;;  %v2319_v1 = vld [vmem:[%s1797_s25 + $0x188] sm:$0xff] }
  0x43   : > { %309 = vst.msk [vmem:[#allocation2 + $0x50] sm:$0xff] %vm298_vm1, %v2051_v47 }
  0x44   : > { %310 = vst.msk [vmem:[#allocation2 + $0x58] sm:$0xff] %vm298_vm1, %v2069_v50  ;;  %1606 = vmatpush.msrb.mxu3 %v1561_v3  ;;  %v292_v3 = vld [vmem:[%s1797_s25 + $0x180] sm:$0xff] }
  0x45   : > { %330 = vst.msk [vmem:[#allocation2 + $0xf8] sm:$0xff] %vm298_vm1, %v2106_v59 }
  0x46   : > { %624 = vrot.lane.b32.xlu0 %v252_v12, %s1721_s27  ;;  %684 = vrot.lane.b32.xlu1 %v282_v13, %s1721_s27  ;;  %329 = vst.msk [vmem:[#allocation2 + $0xf0] sm:$0xff] %vm298_vm1, %v2133_v2  ;;  %v1557_v12 = vld [vmem:[%s2664_s1 + $0xb0] sm:$0xff]  ;;  %v1556_v13 = vld [vmem:[%s2664_s1 + $0xa8] sm:$0xff] }
  0x47   : > { %393 = vrot.lane.b32.xlu2 %v246_v15, %s1720_s26  ;;  %1607 = vmatpush.msrb.mxu3 %v1560_v5  ;;  %313 = vst.msk [vmem:[#allocation2 + $0x70] sm:$0xff] %vm298_vm1, %v2226_v44 }
  0x48   : > { %332 = vst.msk [vmem:[#allocation2 + $0x108] sm:$0xff] %vm298_vm1, %v2319_v1 }
  0x49   : > { %1608 = vmatpush.msrb.mxu3 %v1559_v8  ;;  %331 = vst.msk [vmem:[#allocation2 + $0x100] sm:$0xff] %vm298_vm1, %v292_v3  ;;  %v270_v8 = vld [vmem:[%s1797_s25 + $0xd0] sm:$0x3] }
  0x4e   : > { %612 = vrot.lane.b32.xlu0 %v246_v15, %s1721_s27  ;;  %399 = vrot.lane.b32.xlu1 %v249_v16, %s1720_s26 }
  0x4f   : > { %618 = vrot.lane.b32.xlu2 %v249_v16, %s1721_s27  ;;  %v1555_v16 = vld [vmem:[%s2664_s1 + $0xa0] sm:$0xff] }
  0x56   : > { %407 = vrot.lane.b32.xlu0 %v253_v9, %s1720_s26  ;;  %409 = vrot.lane.b32.xlu1 %v254_v10, %s1720_s26 }
  0x57   : > { %467 = vrot.lane.b32.xlu2 %v283_v14, %s1720_s26 }
  0x5e   : > { %469 = vrot.lane.b32.xlu0 %v284_v11, %s1720_s26  ;;  %626 = vrot.lane.b32.xlu1 %v253_v9, %s1721_s27 }
  0x5f   : > { %628 = vrot.lane.b32.xlu2 %v254_v10, %s1721_s27  ;;  %v1558_v10 = vld [vmem:[%s2664_s1 + $0xb8] sm:$0xff] }
  0x60   : > { %1083 = vmatpush.msra.mxu1 %v1558_v10  ;;  %1609 = vmatpush.msrb.mxu3 %v1558_v10 }
  0x62   : > { %1084 = vmatpush.msra.mxu1 %v1557_v12  ;;  %1610 = vmatpush.msrb.mxu3 %v1557_v12 }
  0x64   : > { %1085 = vmatpush.msra.mxu1 %v1556_v13  ;;  %1611 = vmatpush.msrb.mxu3 %v1556_v13  ;;  %v274_v13 = vld [vmem:[%s1797_s25 + $0xf0] sm:$0xff] }
  0x65   : > { %319 = vst.msk [vmem:[#allocation2 + $0xa0] sm:$0xff] %vm298_vm1, %v274_v13 }
  0x66   : > { %686 = vrot.lane.b32.xlu0 %v283_v14, %s1721_s27  ;;  %688 = vrot.lane.b32.xlu1 %v284_v11, %s1721_s27  ;;  %v288_v11 = vld [vmem:[%s1797_s25 + $0x160] sm:$0x3] }
  0x67   : > { %411 = vrot.lane.b32.xlu2 %v255_v30, %s1720_s26  ;;  %1086 = vmatpush.msra.mxu1 %v1555_v16 }
  0x68   : > { %1612 = vmatpush.msrb.mxu3 %v1555_v16 }
  0x6e   : > { %471 = vrot.lane.b32.xlu0 %v285_v35, %s1720_s26  ;;  %630 = vrot.lane.b32.xlu1 %v255_v30, %s1721_s27 }
  0x6f   : > { %690 = vrot.lane.b32.xlu2 %v285_v35, %s1721_s27 }
  0x71   : > { %v2030_v42 = vpop.permute.xlu2 %620 }
  0x76   : > { %413 = vrot.lane.b32.xlu0 %v1907_v17, %s1720_s26  ;;  %415 = vrot.lane.b32.xlu1 %v1913_v18, %s1720_s26 }
  0x77   : > { %473 = vrot.lane.b32.xlu2 %v1963_v27, %s1720_s26 }
  0x79   : > { %v2084_v53 = vpop.permute.xlu2 %622 }
  0x7e   : > { %475 = vrot.lane.b32.xlu0 %v1932_v21, %s1720_s26  ;;  %632 = vrot.lane.b32.xlu1 %v1907_v17, %s1721_s27 }
  0x7f   : > { %634 = vrot.lane.b32.xlu2 %v1913_v18, %s1721_s27  ;;  %v1554_v18 = vld [vmem:[%s2664_s1 + $0x98] sm:$0xff] }
  0x80   : > { %1087 = vmatpush.msra.mxu1 %v1554_v18  ;;  %1613 = vmatpush.msrb.mxu3 %v1554_v18 }
  0x81   : > { %v390_v0 = vpop.permute.xlu2 %389 }
  0x82   : > { %552 = vst.msk [vmem:[#allocation2 - $0x1] sm:$0xfe] %vm551_vm2, %v390_v0  ;;  %1088 = vmatpush.msra.mxu1 %v1553_v24  ;;  %1614 = vmatpush.msrb.mxu3 %v1553_v24  ;;  %v267_v0 = vld [vmem:[%s1797_s25 + $0xb8] sm:$0x3] }
  0x84   : > { %1089 = vmatpush.msra.mxu1 %v1552_v25  ;;  %1615 = vmatpush.msrb.mxu3 %v1552_v25 }
  0x86   : > { %692 = vrot.lane.b32.xlu0 %v1963_v27, %s1721_s27  ;;  %694 = vrot.lane.b32.xlu1 %v1932_v21, %s1721_s27  ;;  %v2184_v21 = vld [vmem:[%s1797_s25 + $0x90] sm:$0xff]  ;;  %v2199_v27 = vld [vmem:[%s1797_s25 + $0x98] sm:$0xff] }
  0x87   : > { %417 = vrot.lane.b32.xlu2 %v258_v4, %s1720_s26  ;;  %311 = vst.msk [vmem:[#allocation2 + $0x60] sm:$0xff] %vm298_vm1, %v2184_v21  ;;  %1090 = vmatpush.msra.mxu1 %v1551_v32 }
  0x88   : > { %v462_v6 = vpop.permute.xlu1 %461  ;;  %v402_v7 = vpop.permute.xlu0 %401  ;;  %312 = vst.msk [vmem:[#allocation2 + $0x68] sm:$0xff] %vm298_vm1, %v2199_v27  ;;  %1616 = vmatpush.msrb.mxu3 %v1551_v32  ;;  %v2390_v32 = vld [vmem:[%s1797_s25 + $0x110] sm:$0xff] }
  0x89   : > { %590 = vst.msk [vmem:[#allocation2 + $0xbf] sm:$0xfe] %vm551_vm2, %v462_v6  ;;  %v2153_v9 = vpop.permute.xlu2 %610 }
  0x8a   : > { %560 = vst.msk [vmem:[#allocation2 + $0x1f] sm:$0xfe] %vm551_vm2, %v402_v7 }
  0x8b   : > { %779 = vst.msk [vmem:[#allocation2 + $0x1e] sm:$0xfc] %vm770_vm3, %v2030_v42 }
  0x8c   : > { %322 = vst.msk [vmem:[#allocation2 + $0xb8] sm:$0xff] %vm298_vm1, %v2390_v32 }
  0x8e   : > { %477 = vrot.lane.b32.xlu0 %v288_v11, %s1720_s26  ;;  %636 = vrot.lane.b32.xlu1 %v258_v4, %s1721_s27 }
  0x8f   : > { %696 = vrot.lane.b32.xlu2 %v288_v11, %s1721_s27 }
  0x90   : > { %v464_v14 = vpop.permute.xlu1 %463  ;;  %v404_v15 = vpop.permute.xlu0 %403 }
  0x91   : > { %591 = vst.msk [vmem:[#allocation2 + $0xc7] sm:$0xff] %vm553_vm4, %v464_v14  ;;  %v2175_v17 = vpop.permute.xlu2 %614  ;;  %v2362_v14 = vld [vmem:[%s1797_s25 + $0xf8] sm:$0xff] }
  0x92   : > { %561 = vst.msk [vmem:[#allocation2 + $0x27] sm:$0xff] %vm553_vm4, %v404_v15 }
  0x93   : > { %780 = vst.msk [vmem:[#allocation2 + $0x26] sm:$0xff] %vm772_vm5, %v2084_v53 }
  0x94   : > { %320 = vst.msk [vmem:[#allocation2 + $0xa8] sm:$0xff] %vm298_vm1, %v2362_v14 }
  0x96   : > { %419 = vrot.lane.b32.xlu0 %v2051_v47, %s1720_s26  ;;  %421 = vrot.lane.b32.xlu1 %v2069_v50, %s1720_s26 }
  0x97   : > { %479 = vrot.lane.b32.xlu2 %v2133_v2, %s1720_s26 }
  0x98   : > { %v683_v28 = vpop.permute.xlu1 %682  ;;  %v681_v30 = vpop.permute.xlu0 %680 }
  0x99   : > { %810 = vst.msk [vmem:[#allocation2 + $0xc6] sm:$0xff] %vm772_vm5, %v683_v28  ;;  %v466_v34 = vpop.permute.xlu2 %465  ;;  %v277_v28 = vld [vmem:[%s1797_s25 + $0x108] sm:$0xff] }
  0x9a   : > { %809 = vst.msk [vmem:[#allocation2 + $0xbe] sm:$0xfc] %vm770_vm3, %v681_v30  ;;  %v2210_v35 = vld [vmem:[#allocation2 + $0x20] sm:$0xff]  ;;  %v273_v30 = vld [vmem:[%s1797_s25 + $0xe8] sm:$0x3] }
  0x9b   : > { %1286 = vmatmul.f32.vlgmr.msra.gmra.mxu2 %v2210_v35  ;;  %592 = vst.msk [vmem:[#allocation2 + $0xcf] sm:$0x1] %vm555_vm6, %v466_v34 }
  0x9c   : > { %321 = vst.msk [vmem:[#allocation2 + $0xb0] sm:$0xff] %vm298_vm1, %v277_v28 }
  0x9e   : > { %481 = vrot.lane.b32.xlu0 %v2106_v59, %s1720_s26  ;;  %638 = vrot.lane.b32.xlu1 %v2051_v47, %s1721_s27  ;;  %v2236_v47 = vld [vmem:[%s1797_s25 + $0xb0] sm:$0xff] }
  0x9f   : > { %640 = vrot.lane.b32.xlu2 %v2069_v50, %s1721_s27  ;;  %314 = vst.msk [vmem:[#allocation2 + $0x78] sm:$0xff] %vm298_vm1, %v2236_v47 }
  0xa0   : > { %v392_v37 = vpop.permute.xlu0 %391  ;;  %v609_v39 = vpop.permute.xlu1 %608 }
  0xa1   : > { %554 = vst.msk [vmem:[#allocation2 + $0x7] sm:$0xff] %vm553_vm4, %v392_v37  ;;  %v856_v41 = vld [vmem:[#allocation2 + $0xc0] sm:$0xff]  ;;  %v394_v42 = vpop.permute.xlu2 %393 }
  0xa2   : > { %771 = vst.msk [vmem:[#allocation2 - $0x2] sm:$0xfc] %vm770_vm3, %v609_v39  ;;  %968 = vmatmul.f32.vlgmr.msra.gmra.mxu3 %v856_v41  ;;  %v294_v41 = vld [vmem:[%s1797_s25 + $0x190] sm:$0x3] }
  0xa3   : > { %773 = vst.msk [vmem:[#allocation2 + $0x6] sm:$0xff] %vm772_vm5, %v2153_v9  ;;  %1617 = vmatpush.msra.mxu3 %v1922_v19 }
  0xa4   : > { %556 = vst.msk [vmem:[#allocation2 + $0xf] sm:$0x1] %vm555_vm6, %v394_v42 }
  0xa5   : > { %1618 = vmatpush.msra.mxu3 %v1927_v20  ;;  %v2257_v20 = vld [vmem:[%s1797_s25 + $0xc0] sm:$0xff] }
  0xa6   : > { %698 = vrot.lane.b32.xlu0 %v2133_v2, %s1721_s27  ;;  %700 = vrot.lane.b32.xlu1 %v2106_v59, %s1721_s27  ;;  %315 = vst.msk [vmem:[#allocation2 + $0x80] sm:$0xff] %vm298_vm1, %v2257_v20  ;;  %v264_v59 = vld [vmem:[%s1797_s25 + $0xa0] sm:$0x3] }
  0xa7   : > { %423 = vrot.lane.b32.xlu2 %v261_v46, %s1720_s26  ;;  %1619 = vmatpush.msra.mxu3 %v1942_v22  ;;  %v2268_v22 = vld [vmem:[%s1797_s25 + $0xc8] sm:$0xff] }
  0xa8   : > { %v396_v49 = vpop.permute.xlu0 %395  ;;  %v398_v50 = vpop.permute.xlu1 %397  ;;  %316 = vst.msk [vmem:[#allocation2 + $0x88] sm:$0xff] %vm298_vm1, %v2268_v22 }
  0xa9   : > { %557 = vst.msk [vmem:[#allocation2 + $0xf] sm:$0xfe] %vm551_vm2, %v396_v49  ;;  %v619_v52 = vpop.permute.xlu2 %618  ;;  %1620 = vmatpush.msra.mxu3 %v1947_v23 }
  0xaa   : > { %558 = vst.msk [vmem:[#allocation2 + $0x17] sm:$0xff] %vm553_vm4, %v398_v50  ;;  %v832_v53 = vld [vmem:[#allocation2] sm:$0xff] }
  0xab   : > { %776 = vst.msk [vmem:[#allocation2 + $0xe] sm:$0xfc] %vm770_vm3, %v2175_v17  ;;  %896 = vmatmul.f32.vlgmr.msra.gmra.mxu0 %v832_v53  ;;  %1621 = vmatpush.msra.mxu3 %v1960_v26 }
  0xad   : > { %1622 = vmatpush.msra.mxu3 %v1974_v29 }
  0xae   : > { %483 = vrot.lane.b32.xlu0 %v291_v55, %s1720_s26  ;;  %642 = vrot.lane.b32.xlu1 %v261_v46, %s1721_s27 }
  0xaf   : > { %702 = vrot.lane.b32.xlu2 %v291_v55, %s1721_s27  ;;  %1623 = vmatpush.msra.mxu3 %v1984_v31 }
  0xb0   : > { %v617_v56 = vpop.permute.xlu0 %616  ;;  %v406_v57 = vpop.permute.xlu1 %405 }
  0xb1   : > { %777 = vst.msk [vmem:[#allocation2 + $0x16] sm:$0xff] %vm772_vm5, %v617_v56  ;;  %v468_v19 = vpop.permute.xlu2 %467  ;;  %1624 = vmatpush.msra.mxu3 %v1994_v33  ;;  %v276_v56 = vld [vmem:[%s1797_s25 + $0x100] sm:$0x3] }
  0xb2   : > { %562 = vst.msk [vmem:[#allocation2 + $0x2f] sm:$0x1] %vm555_vm6, %v406_v57  ;;  %v295_v57 = vld [vmem:[%s1797_s25 + $0x198] sm:$0xff] }
  0xb3   : > { %593 = vst.msk [vmem:[#allocation2 + $0xcf] sm:$0xfe] %vm551_vm2, %v468_v19  ;;  %1625 = vmatpush.msra.mxu3 %v2004_v36 }
  0xb4   : > { %333 = vst.msk [vmem:[#allocation2 + $0x110] sm:$0xff] %vm298_vm1, %v295_v57 }
  0xb5   : > { %1626 = vmatpush.msra.mxu3 %v2013_v38 }
  0xb6   : > { %425 = vrot.lane.b32.xlu0 %v2184_v21, %s1720_s26  ;;  %427 = vrot.lane.b32.xlu1 %v2199_v27, %s1720_s26 }
  0xb7   : > { %644 = vrot.lane.b32.xlu2 %v2184_v21, %s1721_s27  ;;  %1627 = vmatpush.msra.mxu3 %v2023_v40  ;;  %v2296_v40 = vld [vmem:[%s1797_s25 + $0xd8] sm:$0xff] }
  0xb8   : > { %v625_v23 = vpop.permute.xlu0 %624  ;;  %v685_v26 = vpop.permute.xlu1 %684  ;;  %v1026_v29 = vld [vmem:[#allocation2 + $0x10] sm:$0xff]  ;;  %317 = vst.msk [vmem:[#allocation2 + $0x90] sm:$0xff] %vm298_vm1, %v2296_v40 }
  0xb9   : > { %781 = vst.msk [vmem:[#allocation2 + $0x2e] sm:$0x3] %vm774_vm7, %v625_v23  ;;  %1091 = vmatmul.f32.vlgmr.msra.gmra.mxu1 %v1026_v29  ;;  %v629_v58 = vpop.permute.xlu2 %628  ;;  %1628 = vmatpush.msra.mxu3 %v2036_v43  ;;  %v2306_v43 = vld [vmem:[%s1797_s25 + $0xe0] sm:$0xff] }
  0xba   : > { %811 = vst.msk [vmem:[#allocation2 + $0xce] sm:$0x3] %vm774_vm7, %v685_v26  ;;  %v296_v23 = vld [vmem:[%s1797_s25 + $0x1a0] sm:$0xff] }
  0xbb   : > { %1629 = vmatpush.msra.mxu3 %v2045_v45  ;;  %318 = vst.msk [vmem:[#allocation2 + $0x98] sm:$0xff] %vm298_vm1, %v2306_v43 }
  0xbc   : > { %334 = vst.msk [vmem:[#allocation2 + $0x118] sm:$0xff] %vm298_vm1, %v296_v23 }
  0xbd   : > { %1630 = vmatpush.msra.mxu3 %v2057_v48 }
  0xbe   : > { %646 = vrot.lane.b32.xlu0 %v2199_v27, %s1721_s27  ;;  %429 = vrot.lane.b32.xlu1 %v264_v59, %s1720_s26 }
  0xbf   : > { %648 = vrot.lane.b32.xlu2 %v264_v59, %s1721_s27  ;;  %1631 = vmatpush.msra.mxu3 %v2078_v51 }
  0xc0   : > { %v613_v31 = vpop.permute.xlu0 %612  ;;  %v400_v60 = vpop.permute.xlu1 %399  ;;  %v2286_v33 = vld [vmem:[#allocation2 + $0x28] sm:$0xff] }
  0xc1   : > { %775 = vst.msk [vmem:[#allocation2 + $0xe] sm:$0x3] %vm774_vm7, %v613_v31  ;;  %v857_v36 = vld [vmem:[#allocation2 + $0xc8] sm:$0xff]  ;;  %1289 = vmatmul.f32.gmra.mxu2 %v2286_v33  ;;  %v412_v38 = vpop.permute.xlu2 %411  ;;  %1632 = vmatpush.msra.mxu3 %v2089_v54  ;;  %v279_v31 = vld [vmem:[%s1797_s25 + $0x118] sm:$0x3] }
  0xc2   : > { %559 = vst.msk [vmem:[#allocation2 + $0x1f] sm:$0x1] %vm555_vm6, %v400_v60  ;;  %971 = vmatmul.f32.gmra.mxu3 %v857_v36 }
  0xc3   : > { %778 = vst.msk [vmem:[#allocation2 + $0x1e] sm:$0x3] %vm774_vm7, %v619_v52 }
  0xc4   : > { %565 = vst.msk [vmem:[#allocation2 + $0x3f] sm:$0x1] %vm555_vm6, %v412_v38 }
  0xc6   : > { %431 = vrot.lane.b32.xlu0 %v2226_v44, %s1720_s26  ;;  %433 = vrot.lane.b32.xlu1 %v2236_v47, %s1720_s26 }
  0xc7   : > { %650 = vrot.lane.b32.xlu2 %v2226_v44, %s1721_s27 }
  0xc8   : > { %v408_v45 = vpop.permute.xlu0 %407  ;;  %v410_v48 = vpop.permute.xlu1 %409  ;;  %v833_v61 = vld [vmem:[#allocation2 + $0x8] sm:$0xff] }
  0xc9   : > { %563 = vst.msk [vmem:[#allocation2 + $0x2f] sm:$0xfe] %vm551_vm2, %v408_v45  ;;  %899 = vmatmul.f32.gmra.mxu0 %v833_v61  ;;  %v691_v62 = vpop.permute.xlu2 %690 }
  0xca   : > { %564 = vst.msk [vmem:[#allocation2 + $0x37] sm:$0xff] %vm553_vm4, %v410_v48  ;;  %v1027_v63 = vld [vmem:[#allocation2 + $0x18] sm:$0xff] }
  0xcb   : > { %1094 = vmatmul.f32.gmra.mxu1 %v1027_v63  ;;  %783 = vst.msk [vmem:[#allocation2 + $0x36] sm:$0xff] %vm772_vm5, %v629_v58 }
  0xce   : > { %652 = vrot.lane.b32.xlu0 %v2236_v47, %s1721_s27  ;;  %435 = vrot.lane.b32.xlu1 %v267_v0, %s1720_s26 }
  0xcf   : > { %654 = vrot.lane.b32.xlu2 %v267_v0, %s1721_s27 }
  0xd0   : > { %v470_v51 = vpop.permute.xlu0 %469  ;;  %v627_v54 = vpop.permute.xlu1 %626 }
  0xd1   : > { %594 = vst.msk [vmem:[#allocation2 + $0xd7] sm:$0xff] %vm553_vm4, %v470_v51  ;;  %902 = vmatmul.f32.gmra.mxu0 %v1026_v29  ;;  %v474_v2 = vpop.permute.xlu2 %473 }
  0xd2   : > { %782 = vst.msk [vmem:[#allocation2 + $0x2e] sm:$0xfc] %vm770_vm3, %v627_v54  ;;  %v2466_v54 = vld [vmem:[%s2665_s2] ss:$0 sm:$0xff] }
  0xd3   : > { %1097 = vmatmul.f32.gmra.mxu1 %v2210_v35  ;;  %596 = vst.msk [vmem:[#allocation2 + $0xdf] sm:$0xfe] %vm551_vm2, %v474_v2 }
  0xd6   : > { %437 = vrot.lane.b32.xlu0 %v2257_v20, %s1720_s26  ;;  %439 = vrot.lane.b32.xlu1 %v2268_v22, %s1720_s26 }
  0xd7   : > { %656 = vrot.lane.b32.xlu2 %v2257_v20, %s1721_s27 }
  0xd8   : > { %v687_v4 = vpop.permute.xlu0 %686  ;;  %v689_v5 = vpop.permute.xlu1 %688 }
  0xd9   : > { %812 = vst.msk [vmem:[#allocation2 + $0xce] sm:$0xfc] %vm770_vm3, %v687_v4  ;;  %905 = vmatmul.f32.gmra.mxu0 %v1027_v63  ;;  %v1223_v6 = vld [vmem:[#allocation2 + $0x30] sm:$0xff]  ;;  %v635_v7 = vpop.permute.xlu2 %634 }
  0xda   : > { %813 = vst.msk [vmem:[#allocation2 + $0xd6] sm:$0xff] %vm772_vm5, %v689_v5  ;;  %1292 = vmatmul.f32.gmra.mxu2 %v1223_v6 }
  0xdb   : > { %1100 = vmatmul.f32.gmra.mxu1 %v2286_v33 }
  0xde   : > { %658 = vrot.lane.b32.xlu0 %v2268_v22, %s1721_s27  ;;  %441 = vrot.lane.b32.xlu1 %v270_v8, %s1720_s26 }
  0xdf   : > { %660 = vrot.lane.b32.xlu2 %v270_v8, %s1721_s27 }
  0xe0   : > { %v472_v9 = vpop.permute.xlu0 %471  ;;  %v631_v10 = vpop.permute.xlu1 %630 }
  0xe1   : > { %595 = vst.msk [vmem:[#allocation2 + $0xdf] sm:$0x1] %vm555_vm6, %v472_v9  ;;  %908 = vmatmul.f32.gmra.mxu0 %v2210_v35  ;;  %v2349_v11 = vld [vmem:[#allocation2 + $0xd0] sm:$0xff]  ;;  %v418_v12 = vpop.permute.xlu2 %417 }
  0xe2   : > { %784 = vst.msk [vmem:[#allocation2 + $0x3e] sm:$0x3] %vm774_vm7, %v631_v10  ;;  %974 = vmatmul.f32.gmra.mxu3 %v2349_v11 }
  0xe3   : > { %814 = vst.msk [vmem:[#allocation2 + $0xde] sm:$0x3] %vm774_vm7, %v691_v62  ;;  %1103 = vmatmul.f32.gmra.mxu1 %v1223_v6  ;;  %v297_v62 = vld [vmem:[%s1797_s25 + $0x1a8] sm:$0x3] }
  0xe4   : > { %568 = vst.msk [vmem:[#allocation2 + $0x4f] sm:$0x1] %vm555_vm6, %v418_v12 }
  0xe6   : > { %443 = vrot.lane.b32.xlu0 %v2296_v40, %s1720_s26  ;;  %445 = vrot.lane.b32.xlu1 %v2306_v43, %s1720_s26 }
  0xe7   : > { %485 = vrot.lane.b32.xlu2 %v292_v3, %s1720_s26 }
  0xe8   : > { %v414_v15 = vpop.permute.xlu0 %413  ;;  %v416_v16 = vpop.permute.xlu1 %415 }
  0xe9   : > { %566 = vst.msk [vmem:[#allocation2 + $0x3f] sm:$0xfe] %vm551_vm2, %v414_v15  ;;  %911 = vmatmul.f32.gmra.mxu0 %v2286_v33  ;;  %v1224_v17 = vld [vmem:[#allocation2 + $0x38] sm:$0xff]  ;;  %v697_v18 = vpop.permute.xlu2 %696 }
  0xea   : > { %567 = vst.msk [vmem:[#allocation2 + $0x47] sm:$0xff] %vm553_vm4, %v416_v16  ;;  %1295 = vmatmul.f32.gmra.mxu2 %v1224_v17  ;;  %v2370_v21 = vld [vmem:[#allocation2 + $0xd8] sm:$0xff] }
  0xeb   : > { %977 = vmatmul.f32.gmra.mxu3 %v2370_v21  ;;  %1106 = vmatmul.f32.gmra.mxu1 %v1224_v17  ;;  %786 = vst.msk [vmem:[#allocation2 + $0x46] sm:$0xff] %vm772_vm5, %v635_v7 }
  0xee   : > { %487 = vrot.lane.b32.xlu0 %v2319_v1, %s1720_s26  ;;  %662 = vrot.lane.b32.xlu1 %v2296_v40, %s1721_s27 }
  0xef   : > { %664 = vrot.lane.b32.xlu2 %v2306_v43, %s1721_s27 }
  0xf0   : > { %v476_v24 = vpop.permute.xlu0 %475  ;;  %v633_v25 = vpop.permute.xlu1 %632 }
  0xf1   : > { %597 = vst.msk [vmem:[#allocation2 + $0xe7] sm:$0xff] %vm553_vm4, %v476_v24  ;;  %914 = vmatmul.f32.gmra.mxu0 %v1223_v6  ;;  %v480_v27 = vpop.permute.xlu2 %479 }
  0xf2   : > { %785 = vst.msk [vmem:[#allocation2 + $0x3e] sm:$0xfc] %vm770_vm3, %v633_v25 }
  0xf3   : > { %599 = vst.msk [vmem:[#allocation2 + $0xef] sm:$0xfe] %vm551_vm2, %v480_v27 }
  0xf6   : > { %704 = vrot.lane.b32.xlu0 %v292_v3, %s1721_s27  ;;  %706 = vrot.lane.b32.xlu1 %v2319_v1, %s1721_s27 }
  0xf7   : > { %447 = vrot.lane.b32.xlu2 %v273_v30, %s1720_s26 }
  0xf8   : > { %v693_v34 = vpop.permute.xlu0 %692  ;;  %v695_v35 = vpop.permute.xlu1 %694 }
  0xf9   : > { %815 = vst.msk [vmem:[#allocation2 + $0xde] sm:$0xfc] %vm770_vm3, %v693_v34  ;;  %917 = vmatmul.f32.gmra.mxu0 %v1224_v17  ;;  %v1032_v37 = vld [vmem:[#allocation2 + $0x40] sm:$0xff]  ;;  %v641_v39 = vpop.permute.xlu2 %640 }
  0xfa   : > { %816 = vst.msk [vmem:[#allocation2 + $0xe6] sm:$0xff] %vm772_vm5, %v695_v35  ;;  %1109 = vmatmul.f32.gmra.mxu1 %v1032_v37  ;;  %1298 = vmatmul.f32.gmra.mxu2 %v1032_v37 }
  0xfe   : > { %489 = vrot.lane.b32.xlu0 %v294_v41, %s1720_s26  ;;  %666 = vrot.lane.b32.xlu1 %v273_v30, %s1721_s27 }
  0xff   : > { %708 = vrot.lane.b32.xlu2 %v294_v41, %s1721_s27 }
 0x100   : > { %v478_v42 = vpop.permute.xlu0 %477  ;;  %v637_v44 = vpop.permute.xlu1 %636 }
 0x101   : > { %598 = vst.msk [vmem:[#allocation2 + $0xef] sm:$0x1] %vm555_vm6, %v478_v42  ;;  %920 = vmatmul.f32.gmra.mxu0 %v1032_v37  ;;  %v2402_v46 = vld [vmem:[#allocation2 + $0xe0] sm:$0xff]  ;;  %v424_v47 = vpop.permute.xlu2 %423 }
 0x102   : > { %787 = vst.msk [vmem:[#allocation2 + $0x4e] sm:$0x3] %vm774_vm7, %v637_v44  ;;  %980 = vmatmul.f32.gmra.mxu3 %v2402_v46 }
 0x103   : > { %817 = vst.msk [vmem:[#allocation2 + $0xee] sm:$0x3] %vm774_vm7, %v697_v18 }
 0x104   : > { %571 = vst.msk [vmem:[#allocation2 + $0x5f] sm:$0x1] %vm555_vm6, %v424_v47 }
 0x106   : > { %449 = vrot.lane.b32.xlu0 %v274_v13, %s1720_s26  ;;  %451 = vrot.lane.b32.xlu1 %v2362_v14, %s1720_s26 }
 0x107   : > { %668 = vrot.lane.b32.xlu2 %v274_v13, %s1721_s27 }
 0x108   : > { %v420_v49 = vpop.permute.xlu0 %419  ;;  %v422_v50 = vpop.permute.xlu1 %421 }
 0x109   : > { %569 = vst.msk [vmem:[#allocation2 + $0x4f] sm:$0xfe] %vm551_vm2, %v420_v49  ;;  %v841_v52 = vld [vmem:[#allocation2 + $0x48] sm:$0xff]  ;;  %v703_v53 = vpop.permute.xlu2 %702 }
 0x10a   : > { %570 = vst.msk [vmem:[#allocation2 + $0x57] sm:$0xff] %vm553_vm4, %v422_v50  ;;  %923 = vmatmul.f32.gmra.mxu0 %v841_v52  ;;  %1112 = vmatmul.f32.gmra.mxu1 %v841_v52  ;;  %v2414_v55 = vld [vmem:[#allocation2 + $0xe8] sm:$0xff] }
 0x10b   : > { %1301 = vmatmul.f32.gmra.mxu2 %v841_v52  ;;  %983 = vmatmul.f32.gmra.mxu3 %v2414_v55  ;;  %789 = vst.msk [vmem:[#allocation2 + $0x56] sm:$0xff] %vm772_vm5, %v641_v39 }
 0x10e   : > { %670 = vrot.lane.b32.xlu0 %v2362_v14, %s1721_s27  ;;  %453 = vrot.lane.b32.xlu1 %v276_v56, %s1720_s26 }
 0x10f   : > { %672 = vrot.lane.b32.xlu2 %v276_v56, %s1721_s27 }
 0x110   : > { %v482_v19 = vpop.permute.xlu0 %481  ;;  %v639_v20 = vpop.permute.xlu1 %638 }
 0x111   : > { %600 = vst.msk [vmem:[#allocation2 + $0xf7] sm:$0xff] %vm553_vm4, %v482_v19  ;;  %v645_v22 = vpop.permute.xlu2 %644 }
 0x112   : > { %788 = vst.msk [vmem:[#allocation2 + $0x4e] sm:$0xfc] %vm770_vm3, %v639_v20 }
 0x116   : > { %455 = vrot.lane.b32.xlu0 %v277_v28, %s1720_s26  ;;  %457 = vrot.lane.b32.xlu1 %v2390_v32, %s1720_s26 }
 0x117   : > { %674 = vrot.lane.b32.xlu2 %v277_v28, %s1721_s27 }
 0x118   : > { %v699_v26 = vpop.permute.xlu0 %698  ;;  %v701_v29 = vpop.permute.xlu1 %700 }
 0x119   : > { %818 = vst.msk [vmem:[#allocation2 + $0xee] sm:$0xfc] %vm770_vm3, %v699_v26  ;;  %v1034_v58 = vld [vmem:[#allocation2 + $0x50] sm:$0xff]  ;;  %v649_v59 = vpop.permute.xlu2 %648 }
 0x11a   : > { %819 = vst.msk [vmem:[#allocation2 + $0xf6] sm:$0xff] %vm772_vm5, %v701_v29  ;;  %1115 = vmatmul.f32.gmra.mxu1 %v1034_v58  ;;  %1304 = vmatmul.f32.gmra.mxu2 %v1034_v58 }
 0x11b   : > { %926 = vmatmul.f32.gmra.mxu0 %v1034_v58 }
 0x11e   : > { %676 = vrot.lane.b32.xlu0 %v2390_v32, %s1721_s27  ;;  %459 = vrot.lane.b32.xlu1 %v279_v31, %s1720_s26  ;;  %v1287_v4 = vpop.f32.mrf.mxu2 }
 0x11f   : > { %678 = vrot.lane.b32.xlu2 %v279_v31, %s1721_s27 }
 0x120   : > { %v484_v60 = vpop.permute.xlu0 %483  ;;  %v643_v33 = vpop.permute.xlu1 %642 }
 0x121   : > { %601 = vst.msk [vmem:[#allocation2 + $0xff] sm:$0x1] %vm555_vm6, %v484_v60  ;;  %v2441_v36 = vld [vmem:[#allocation2 + $0xf0] sm:$0xff]  ;;  %v651_v38 = vpop.permute.xlu2 %650 }
 0x122   : > { %790 = vst.msk [vmem:[#allocation2 + $0x5e] sm:$0x3] %vm774_vm7, %v643_v33  ;;  %986 = vmatmul.f32.gmra.mxu3 %v2441_v36 }
 0x123   : > { %820 = vst.msk [vmem:[#allocation2 + $0xfe] sm:$0x3] %vm774_vm7, %v703_v53 }
 0x126   : > { %491 = vrot.lane.b32.xlu0 %v295_v57, %s1720_s26  ;;  %493 = vrot.lane.b32.xlu1 %v296_v23, %s1720_s26 }
 0x127   : > { %710 = vrot.lane.b32.xlu2 %v295_v57, %s1721_s27 }
 0x128   : > { %v426_v40 = vpop.permute.xlu0 %425  ;;  %v428_v43 = vpop.permute.xlu1 %427 }
 0x129   : > { %572 = vst.msk [vmem:[#allocation2 + $0x5f] sm:$0xfe] %vm551_vm2, %v426_v40  ;;  %v843_v45 = vld [vmem:[#allocation2 + $0x58] sm:$0xff]  ;;  %v655_v48 = vpop.permute.xlu2 %654  ;;  %v897_v51 = vpop.f32.mrf.mxu0 }
 0x12a   : > { %573 = vst.msk [vmem:[#allocation2 + $0x67] sm:$0xff] %vm553_vm4, %v428_v43  ;;  %929 = vmatmul.f32.gmra.mxu0 %v843_v45  ;;  %1118 = vmatmul.f32.gmra.mxu1 %v843_v45  ;;  %v2451_v61 = vld [vmem:[#allocation2 + $0xf8] sm:$0xff]  ;;  %v993_v2 = vadd.f32 %v2466_v54, %v897_v51 }
 0x12b   : > { %791 = vst.msk [vmem:[#allocation2 + $0x5e] sm:$0xfc] %vm770_vm3, %v645_v22  ;;  %1307 = vmatmul.f32.gmra.mxu2 %v843_v45  ;;  %989 = vmatmul.f32.gmra.mxu3 %v2451_v61 }
 0x12e   : > { %712 = vrot.lane.b32.xlu0 %v296_v23, %s1721_s27  ;;  %495 = vrot.lane.b32.xlu1 %v297_v62, %s1720_s26  ;;  %s2474_s26 = scalar_lea.vmem %s2666_s3, %s1550_s12 }
 0x12f   : > { %714 = vrot.lane.b32.xlu2 %v297_v62, %s1721_s27 }
 0x130   : > { %v647_v63 = vpop.permute.xlu0 %646  ;;  %v430_v0 = vpop.permute.xlu1 %429 }
 0x131   : > { %792 = vst.msk [vmem:[#allocation2 + $0x66] sm:$0xff] %vm772_vm5, %v647_v63  ;;  %v657_v1 = vpop.permute.xlu2 %656  ;;  %v2514_v63 = vpop.f32.mrf.mxu3 }
 0x132   : > { %574 = vst.msk [vmem:[#allocation2 + $0x6f] sm:$0x1] %vm555_vm6, %v430_v0 }
 0x133   : > { %793 = vst.msk [vmem:[#allocation2 + $0x6e] sm:$0x3] %vm774_vm7, %v649_v59  ;;  %1163 = vmatmul.f32.vlgmr.msrb.gmra.mxu3 %v2349_v11 }
 0x136   : > { %v1092_v3 = vpop.f32.mrf.mxu1 }
 0x137   : > { %v1188_v5 = vadd.f32 %v1092_v3, %v993_v2 }
 0x138   : > { %v432_v6 = vpop.permute.xlu0 %431  ;;  %v434_v7 = vpop.permute.xlu1 %433  ;;  %v844_v8 = vld [vmem:[#allocation2 + $0x60] sm:$0xff] }
 0x139   : > { %v1383_v9 = vadd.f32 %v1287_v4, %v1188_v5  ;;  %575 = vst.msk [vmem:[#allocation2 + $0x6f] sm:$0xfe] %vm551_vm2, %v432_v6  ;;  %932 = vmatmul.f32.gmra.mxu0 %v844_v8  ;;  %1121 = vmatmul.f32.gmra.mxu1 %v844_v8  ;;  %v661_v10 = vpop.permute.xlu2 %660 }
 0x13a   : > { %576 = vst.msk [vmem:[#allocation2 + $0x77] sm:$0xff] %vm553_vm4, %v434_v7  ;;  %1310 = vmatmul.f32.gmra.mxu2 %v844_v8  ;;  %v845_v14 = vld [vmem:[#allocation2 + $0x68] sm:$0xff] }
 0x13b   : > { %1415 = vst [vmem:[%s2474_s26] sm:$0xff] %v1383_v9  ;;  %1166 = vmatmul.f32.gmra.mxu3 %v2370_v21 }
 0x13c   : > { %794 = vst.msk [vmem:[#allocation2 + $0x6e] sm:$0xfc] %vm770_vm3, %v651_v38 }
 0x140   : > { %v653_v12 = vpop.permute.xlu0 %652  ;;  %v436_v13 = vpop.permute.xlu1 %435 }
 0x141   : > { %795 = vst.msk [vmem:[#allocation2 + $0x76] sm:$0xff] %vm772_vm5, %v653_v12  ;;  %935 = vmatmul.f32.gmra.mxu0 %v845_v14  ;;  %1124 = vmatmul.f32.gmra.mxu1 %v845_v14  ;;  %v486_v15 = vpop.permute.xlu2 %485 }
 0x142   : > { %577 = vst.msk [vmem:[#allocation2 + $0x7f] sm:$0x1] %vm555_vm6, %v436_v13  ;;  %1313 = vmatmul.f32.gmra.mxu2 %v845_v14 }
 0x143   : > { %796 = vst.msk [vmem:[#allocation2 + $0x7e] sm:$0x3] %vm774_vm7, %v655_v48  ;;  %1169 = vmatmul.f32.gmra.mxu3 %v2402_v46 }
 0x144   : > { %602 = vst.msk [vmem:[#allocation2 + $0xff] sm:$0xfe] %vm551_vm2, %v486_v15  ;;  %v1290_v32 = vpop.f32.mrf.mxu2 }
 0x145   : > { %v2522_v7 = vpop.f32.mrf.mxu3 }
 0x146   : > { %v900_v16 = vpop.f32.mrf.mxu0 }
 0x147   : > { %v994_v17 = vadd.f32 %v2466_v54, %v900_v16 }
 0x148   : > { %v1095_v18 = vpop.f32.mrf.mxu1  ;;  %v438_v24 = vpop.permute.xlu0 %437  ;;  %v846_v25 = vld [vmem:[#allocation2 + $0x70] sm:$0xff] }
 0x149   : > { %v1189_v27 = vadd.f32 %v1095_v18, %v994_v17  ;;  %578 = vst.msk [vmem:[#allocation2 + $0x7f] sm:$0xfe] %vm551_vm2, %v438_v24  ;;  %v440_v28 = vpop.permute.xlu1 %439  ;;  %938 = vmatmul.f32.gmra.mxu0 %v846_v25  ;;  %1127 = vmatmul.f32.gmra.mxu1 %v846_v25  ;;  %v665_v30 = vpop.permute.xlu2 %664 }
 0x14a   : > { %579 = vst.msk [vmem:[#allocation2 + $0x87] sm:$0xff] %vm553_vm4, %v440_v28  ;;  %1316 = vmatmul.f32.gmra.mxu2 %v846_v25  ;;  %v847_v37 = vld [vmem:[#allocation2 + $0x78] sm:$0xff] }
 0x14b   : > { %v1384_v34 = vadd.f32 %v1290_v32, %v1189_v27  ;;  %797 = vst.msk [vmem:[#allocation2 + $0x7e] sm:$0xfc] %vm770_vm3, %v657_v1  ;;  %1172 = vmatmul.f32.gmra.mxu3 %v2414_v55 }
 0x14d   : > { %1416 = vst [vmem:[%s2474_s26 + $0x8] sm:$0xff] %v1384_v34 }
 0x14e   : > { %v903_v42 = vpop.f32.mrf.mxu0 }
 0x14f   : > { %v995_v44 = vadd.f32 %v2466_v54, %v903_v42 }
 0x150   : > { %v659_v35 = vpop.permute.xlu0 %658  ;;  %v1098_v50 = vpop.f32.mrf.mxu1 }
 0x151   : > { %798 = vst.msk [vmem:[#allocation2 + $0x86] sm:$0xff] %vm772_vm5, %v659_v35  ;;  %v442_v39 = vpop.permute.xlu1 %441  ;;  %941 = vmatmul.f32.gmra.mxu0 %v847_v37  ;;  %1130 = vmatmul.f32.gmra.mxu1 %v847_v37  ;;  %v448_v41 = vpop.permute.xlu2 %447  ;;  %v1190_v53 = vadd.f32 %v1098_v50, %v995_v44 }
 0x152   : > { %580 = vst.msk [vmem:[#allocation2 + $0x8f] sm:$0x1] %vm555_vm6, %v442_v39  ;;  %1319 = vmatmul.f32.gmra.mxu2 %v847_v37 }
 0x153   : > { %799 = vst.msk [vmem:[#allocation2 + $0x8e] sm:$0x3] %vm774_vm7, %v661_v10  ;;  %1175 = vmatmul.f32.gmra.mxu3 %v2441_v36 }
 0x154   : > { %583 = vst.msk [vmem:[#allocation2 + $0x9f] sm:$0x1] %vm555_vm6, %v448_v41 }
 0x156   : > { %v906_v23 = vpop.f32.mrf.mxu0 }
 0x157   : > { %v996_v29 = vadd.f32 %v2466_v54, %v906_v23 }
 0x158   : > { %v444_v47 = vpop.permute.xlu0 %443  ;;  %v848_v49 = vld [vmem:[#allocation2 + $0x80] sm:$0xff]  ;;  %v1101_v59 = vpop.f32.mrf.mxu1 }
 0x159   : > { %581 = vst.msk [vmem:[#allocation2 + $0x8f] sm:$0xfe] %vm551_vm2, %v444_v47  ;;  %v446_v52 = vpop.permute.xlu1 %445  ;;  %944 = vmatmul.f32.gmra.mxu0 %v848_v49  ;;  %1133 = vmatmul.f32.gmra.mxu1 %v848_v49  ;;  %v709_v26 = vpop.permute.xlu2 %708  ;;  %v1191_v33 = vadd.f32 %v1101_v59, %v996_v29 }
 0x15a   : > { %582 = vst.msk [vmem:[#allocation2 + $0x97] sm:$0xff] %vm553_vm4, %v446_v52  ;;  %1322 = vmatmul.f32.gmra.mxu2 %v848_v49  ;;  %v849_v20 = vld [vmem:[#allocation2 + $0x88] sm:$0xff] }
 0x15b   : > { %1178 = vmatmul.f32.gmra.mxu3 %v2451_v61  ;;  %801 = vst.msk [vmem:[#allocation2 + $0x96] sm:$0xff] %vm772_vm5, %v665_v30 }
 0x15d   : > { %v1293_v56 = vpop.f32.mrf.mxu2 }
 0x15e   : > { %v1385_v57 = vadd.f32 %v1293_v56, %v1190_v53  ;;  %v909_v0 = vpop.f32.mrf.mxu0 }
 0x15f   : > { %v997_v1 = vadd.f32 %v2466_v54, %v909_v0 }
 0x160   : > { %1417 = vst [vmem:[%s2474_s26 + $0x10] sm:$0xff] %v1385_v57  ;;  %v488_v19 = vpop.permute.xlu0 %487  ;;  %v1104_v2 = vpop.f32.mrf.mxu1 }
 0x161   : > { %603 = vst.msk [vmem:[#allocation2 + $0x107] sm:$0xff] %vm553_vm4, %v488_v19  ;;  %v663_v22 = vpop.permute.xlu1 %662  ;;  %947 = vmatmul.f32.gmra.mxu0 %v849_v20  ;;  %1136 = vmatmul.f32.gmra.mxu1 %v849_v20  ;;  %v669_v45 = vpop.permute.xlu2 %668  ;;  %v1192_v8 = vadd.f32 %v1104_v2, %v997_v1 }
 0x162   : > { %800 = vst.msk [vmem:[#allocation2 + $0x8e] sm:$0xfc] %vm770_vm3, %v663_v22  ;;  %1325 = vmatmul.f32.gmra.mxu2 %v849_v20 }
 0x165   : > { %v2529_v14 = vpop.f32.mrf.mxu3 }
 0x166   : > { %v912_v16 = vpop.f32.mrf.mxu0 }
 0x167   : > { %v998_v24 = vadd.f32 %v2466_v54, %v912_v16 }
 0x168   : > { %v705_v58 = vpop.permute.xlu0 %704  ;;  %v1107_v27 = vpop.f32.mrf.mxu1 }
 0x169   : > { %821 = vst.msk [vmem:[#allocation2 + $0xfe] sm:$0xfc] %vm770_vm3, %v705_v58  ;;  %v707_v31 = vpop.permute.xlu1 %706  ;;  %v1042_v60 = vld [vmem:[#allocation2 + $0x90] sm:$0xff]  ;;  %v673_v6 = vpop.permute.xlu2 %672  ;;  %v1048_v58 = vld [vmem:[#allocation2 + $0xc0] sm:$0xff] }
 0x16a   : > { %822 = vst.msk [vmem:[#allocation2 + $0x106] sm:$0xff] %vm772_vm5, %v707_v31  ;;  %1139 = vmatmul.f32.gmra.mxu1 %v1042_v60  ;;  %1328 = vmatmul.f32.gmra.mxu2 %v1042_v60 }
 0x16b   : > { %950 = vmatmul.f32.gmra.mxu0 %v1042_v60 }
 0x16d   : > { %v1296_v38 = vpop.f32.mrf.mxu2 }
 0x16e   : > { %v1386_v40 = vadd.f32 %v1296_v38, %v1191_v33  ;;  %v2538_v28 = vpop.f32.mrf.mxu3  ;;  %v915_v42 = vpop.f32.mrf.mxu0 }
 0x16f   : > { %v999_v52 = vadd.f32 %v2466_v54, %v915_v42 }
 0x170   : > { %1418 = vst [vmem:[%s2474_s26 + $0x18] sm:$0xff] %v1386_v40  ;;  %v490_v43 = vpop.permute.xlu0 %489 }
 0x171   : > { %604 = vst.msk [vmem:[#allocation2 + $0x10f] sm:$0x1] %vm555_vm6, %v490_v43  ;;  %v667_v48 = vpop.permute.xlu1 %666  ;;  %v2510_v62 = vld [vmem:[#allocation2 + $0x100] sm:$0xff]  ;;  %v675_v15 = vpop.permute.xlu2 %674 }
 0x172   : > { %802 = vst.msk [vmem:[#allocation2 + $0x9e] sm:$0x3] %vm774_vm7, %v667_v48  ;;  %1181 = vmatmul.f32.gmra.mxu3 %v2510_v62  ;;  %v1049_v48 = vld [vmem:[#allocation2 + $0xc8] sm:$0xff] }
 0x173   : > { %823 = vst.msk [vmem:[#allocation2 + $0x10e] sm:$0x3] %vm774_vm7, %v709_v26 }
 0x177   : > { %v1110_v47 = vpop.f32.mrf.mxu1 }
 0x178   : > { %v450_v51 = vpop.permute.xlu0 %449 }
 0x179   : > { %584 = vst.msk [vmem:[#allocation2 + $0x9f] sm:$0xfe] %vm551_vm2, %v450_v51  ;;  %v452_v3 = vpop.permute.xlu1 %451  ;;  %v1043_v4 = vld [vmem:[#allocation2 + $0x98] sm:$0xff]  ;;  %v679_v32 = vpop.permute.xlu2 %678 }
 0x17a   : > { %585 = vst.msk [vmem:[#allocation2 + $0xa7] sm:$0xff] %vm553_vm4, %v452_v3  ;;  %1142 = vmatmul.f32.gmra.mxu1 %v1043_v4  ;;  %1331 = vmatmul.f32.gmra.mxu2 %v1043_v4  ;;  %v2520_v5 = vld [vmem:[#allocation2 + $0x108] sm:$0xff] }
 0x17b   : > { %803 = vst.msk [vmem:[#allocation2 + $0x9e] sm:$0xfc] %vm770_vm3, %v669_v45  ;;  %953 = vmatmul.f32.gmra.mxu0 %v1043_v4  ;;  %1184 = vmatmul.f32.gmra.mxu3 %v2520_v5 }
 0x17d   : > { %v1299_v9 = vpop.f32.mrf.mxu2 }
 0x17e   : > { %v1387_v10 = vadd.f32 %v1299_v9, %v1192_v8 }
 0x180   : > { %1419 = vst [vmem:[%s2474_s26 + $0x20] sm:$0xff] %v1387_v10  ;;  %v671_v12 = vpop.permute.xlu0 %670 }
 0x181   : > { %804 = vst.msk [vmem:[#allocation2 + $0xa6] sm:$0xff] %vm772_vm5, %v671_v12  ;;  %v454_v13 = vpop.permute.xlu1 %453  ;;  %v711_v41 = vpop.permute.xlu2 %710 }
 0x182   : > { %586 = vst.msk [vmem:[#allocation2 + $0xaf] sm:$0x1] %vm555_vm6, %v454_v13 }
 0x183   : > { %805 = vst.msk [vmem:[#allocation2 + $0xae] sm:$0x3] %vm774_vm7, %v673_v6  ;;  %1358 = vmatmul.f32.vlgmr.msra.gmra.mxu3 %v2402_v46  ;;  %v1193_v46 = vadd.f32 %v1107_v27, %v998_v24 }
 0x187   : > { %v1113_v29 = vpop.f32.mrf.mxu1 }
 0x188   : > { %v456_v17 = vpop.permute.xlu0 %455  ;;  %v1044_v18 = vld [vmem:[#allocation2 + $0xa0] sm:$0xff] }
 0x189   : > { %587 = vst.msk [vmem:[#allocation2 + $0xaf] sm:$0xfe] %vm551_vm2, %v456_v17  ;;  %v458_v25 = vpop.permute.xlu1 %457  ;;  %1145 = vmatmul.f32.gmra.mxu1 %v1044_v18  ;;  %1334 = vmatmul.f32.gmra.mxu2 %v1044_v18  ;;  %v715_v20 = vpop.permute.xlu2 %714 }
 0x18a   : > { %588 = vst.msk [vmem:[#allocation2 + $0xb7] sm:$0xff] %vm553_vm4, %v458_v25  ;;  %956 = vmatmul.f32.gmra.mxu0 %v1044_v18  ;;  %v1045_v37 = vld [vmem:[#allocation2 + $0xa8] sm:$0xff] }
 0x18b   : > { %806 = vst.msk [vmem:[#allocation2 + $0xae] sm:$0xfc] %vm770_vm3, %v675_v15  ;;  %1361 = vmatmul.f32.gmra.mxu3 %v2414_v55  ;;  %v2545_v55 = vpop.f32.mrf.mxu3 }
 0x18e   : > { %v1302_v30 = vpop.f32.mrf.mxu2 }
 0x18f   : > { %v1388_v34 = vadd.f32 %v1302_v30, %v1193_v46 }
 0x190   : > { %v677_v35 = vpop.permute.xlu0 %676 }
 0x191   : > { %1420 = vst [vmem:[%s2474_s26 + $0x28] sm:$0xff] %v1388_v34  ;;  %v460_v39 = vpop.permute.xlu1 %459  ;;  %1148 = vmatmul.f32.gmra.mxu1 %v1045_v37  ;;  %1337 = vmatmul.f32.gmra.mxu2 %v1045_v37 }
 0x192   : > { %807 = vst.msk [vmem:[#allocation2 + $0xb6] sm:$0xff] %vm772_vm5, %v677_v35  ;;  %959 = vmatmul.f32.gmra.mxu0 %v1045_v37 }
 0x193   : > { %589 = vst.msk [vmem:[#allocation2 + $0xbf] sm:$0x1] %vm555_vm6, %v460_v39  ;;  %1364 = vmatmul.f32.gmra.mxu3 %v2441_v36  ;;  %v1194_v36 = vadd.f32 %v1110_v47, %v999_v52  ;;  %v2552_v57 = vpop.f32.mrf.mxu3 }
 0x194   : > { %808 = vst.msk [vmem:[#allocation2 + $0xbe] sm:$0x3] %vm774_vm7, %v679_v32 }
 0x197   : > { %v1116_v43 = vpop.f32.mrf.mxu1 }
 0x198   : > { %v492_v44 = vpop.permute.xlu0 %491 }
 0x199   : > { %v854_v49 = vld [vmem:[#allocation2 + $0xb0] sm:$0xff]  ;;  %605 = vst.msk [vmem:[#allocation2 + $0x10f] sm:$0xfe] %vm551_vm2, %v492_v44  ;;  %v494_v50 = vpop.permute.xlu1 %493 }
 0x19a   : > { %962 = vmatmul.f32.gmra.mxu0 %v854_v49  ;;  %1151 = vmatmul.f32.gmra.mxu1 %v854_v49  ;;  %606 = vst.msk [vmem:[#allocation2 + $0x117] sm:$0xff] %vm553_vm4, %v494_v50 }
 0x19b   : > { %1340 = vmatmul.f32.gmra.mxu2 %v854_v49  ;;  %1367 = vmatmul.f32.gmra.mxu3 %v2451_v61  ;;  %824 = vst.msk [vmem:[#allocation2 + $0x10e] sm:$0xfc] %vm770_vm3, %v711_v41  ;;  %v855_v22 = vld [vmem:[#allocation2 + $0xb8] sm:$0xff]  ;;  %v918_v61 = vpop.f32.mrf.mxu0 }
 0x19c   : > { %v1000_v59 = vadd.f32 %v2466_v54, %v918_v61 }
 0x19d   : > { %v1305_v53 = vpop.f32.mrf.mxu2 }
 0x19e   : > { %v1389_v56 = vadd.f32 %v1305_v53, %v1194_v36  ;;  %v1195_v31 = vadd.f32 %v1113_v29, %v1000_v59 }
 0x1a0   : > { %1421 = vst [vmem:[%s2474_s26 + $0x30] sm:$0xff] %v1389_v56  ;;  %v713_v19 = vpop.permute.xlu0 %712 }
 0x1a1   : > { %825 = vst.msk [vmem:[#allocation2 + $0x116] sm:$0xff] %vm772_vm5, %v713_v19  ;;  %v496_v23 = vpop.permute.xlu1 %495 }
 0x1a2   : > { %965 = vmatmul.f32.gmra.mxu0 %v855_v22  ;;  %1154 = vmatmul.f32.gmra.mxu1 %v855_v22  ;;  %607 = vst.msk [vmem:[#allocation2 + $0x11f] sm:$0x1] %vm555_vm6, %v496_v23 }
 0x1a3   : > { %1343 = vmatmul.f32.gmra.mxu2 %v855_v22  ;;  %1370 = vmatmul.f32.gmra.mxu3 %v2510_v62  ;;  %826 = vst.msk [vmem:[#allocation2 + $0x11e] sm:$0x3] %vm774_vm7, %v715_v20  ;;  %v921_v33 = vpop.f32.mrf.mxu0 }
 0x1a4   : > { %v1001_v51 = vadd.f32 %v2466_v54, %v921_v33 }
 0x1a5   : > { %v2559_v26 = vpop.f32.mrf.mxu3 }
 0x1a6   : > { %v1196_v3 = vadd.f32 %v1116_v43, %v1001_v51 }
 0x1a7   : > { %v1119_v1 = vpop.f32.mrf.mxu1 }
 0x1a8   : > { %v1251_v40 = vld [vmem:[#allocation2 + $0x110] sm:$0xff] }
 0x1aa   : > { %1157 = vmatmul.f32.gmra.mxu1 %v1048_v58  ;;  %v1252_v62 = vld [vmem:[#allocation2 + $0x118] sm:$0xff] }
 0x1ab   : > { %1346 = vmatmul.f32.gmra.mxu2 %v1048_v58  ;;  %1373 = vmatmul.f32.gmra.mxu3 %v2520_v5  ;;  %v924_v0 = vpop.f32.mrf.mxu0 }
 0x1ac   : > { %v1002_v9 = vadd.f32 %v2466_v54, %v924_v0 }
 0x1ae   : > { %v1308_v60 = vpop.f32.mrf.mxu2  ;;  %v2564_v45 = vpop.f32.mrf.mxu3  ;;  %v1197_v10 = vadd.f32 %v1119_v1, %v1002_v9  ;;  %v1017_v1 = vadd.f32 %v2466_v54, %v2514_v63  ;;  %v1018_v9 = vadd.f32 %v2466_v54, %v2522_v7 }
 0x1af   : > { %v1390_v38 = vadd.f32 %v1308_v60, %v1195_v31 }
 0x1b1   : > { %1422 = vst [vmem:[%s2474_s26 + $0x38] sm:$0xff] %v1390_v38 }
 0x1b2   : > { %1160 = vmatmul.f32.gmra.mxu1 %v1049_v48 }
 0x1b3   : > { %1349 = vmatmul.f32.gmra.mxu2 %v1049_v48  ;;  %1376 = vmatmul.f32.gmra.mxu3 %v1251_v40  ;;  %v927_v6 = vpop.f32.mrf.mxu0 }
 0x1b6   : > { %v2567_v2 = vpop.f32.mrf.mxu3  ;;  %v1122_v8 = vpop.f32.mrf.mxu1 }
 0x1b7   : > { %v1212_v51 = vadd.f32 %v2567_v2, %v1017_v1 }
 0x1bb   : > { %1352 = vmatmul.f32.gmra.mxu2 %v2349_v11  ;;  %1379 = vmatmul.f32.gmra.mxu3 %v1252_v62  ;;  %v1003_v11 = vadd.f32 %v2466_v54, %v927_v6  ;;  %v930_v16 = vpop.f32.mrf.mxu0 }
 0x1bd   : > { %v1311_v4 = vpop.f32.mrf.mxu2  ;;  %v1198_v18 = vadd.f32 %v1122_v8, %v1003_v11 }
 0x1be   : > { %v1391_v5 = vadd.f32 %v1311_v4, %v1196_v3  ;;  %v2573_v12 = vpop.f32.mrf.mxu3  ;;  %v1125_v17 = vpop.f32.mrf.mxu1 }
 0x1c0   : > { %1423 = vst [vmem:[%s2474_s26 + $0x40] sm:$0xff] %v1391_v5 }
 0x1c3   : > { %1355 = vmatmul.f32.gmra.mxu2 %v2370_v21  ;;  %v1004_v21 = vadd.f32 %v2466_v54, %v930_v16  ;;  %v933_v46 = vpop.f32.mrf.mxu0 }
 0x1c4   : > { %v1005_v39 = vadd.f32 %v2466_v54, %v933_v46 }
 0x1c5   : > { %v1314_v13 = vpop.f32.mrf.mxu2  ;;  %v1199_v30 = vadd.f32 %v1125_v17, %v1004_v21 }
 0x1c6   : > { %v1392_v15 = vadd.f32 %v1314_v13, %v1197_v10  ;;  %v2577_v27 = vpop.f32.mrf.mxu3  ;;  %v1128_v32 = vpop.f32.mrf.mxu1 }
 0x1c7   : > { %v1200_v41 = vadd.f32 %v1128_v32, %v1005_v39 }
 0x1c8   : > { %1424 = vst [vmem:[%s2474_s26 + $0x48] sm:$0xff] %v1392_v15  ;;  %v1213_v15 = vadd.f32 %v2573_v12, %v1018_v9 }
 0x1cb   : > { %v936_v42 = vpop.f32.mrf.mxu0 }
 0x1cc   : > { %v1006_v50 = vadd.f32 %v2466_v54, %v936_v42 }
 0x1cd   : > { %v1317_v24 = vpop.f32.mrf.mxu2 }
 0x1ce   : > { %v1393_v25 = vadd.f32 %v1317_v24, %v1198_v18  ;;  %v2582_v37 = vpop.f32.mrf.mxu3  ;;  %v1131_v49 = vpop.f32.mrf.mxu1  ;;  %v1019_v24 = vadd.f32 %v2466_v54, %v2529_v14 }
 0x1cf   : > { %v1201_v36 = vadd.f32 %v1131_v49, %v1006_v50  ;;  %v1021_v50 = vadd.f32 %v2466_v54, %v2545_v55 }
 0x1d0   : > { %1425 = vst [vmem:[%s2474_s26 + $0x50] sm:$0xff] %v1393_v25  ;;  %v1214_v21 = vadd.f32 %v2577_v27, %v1019_v24 }
 0x1d3   : > { %v939_v19 = vpop.f32.mrf.mxu0 }
 0x1d4   : > { %v1007_v22 = vadd.f32 %v2466_v54, %v939_v19 }
 0x1d5   : > { %v1320_v34 = vpop.f32.mrf.mxu2 }
 0x1d6   : > { %v1394_v35 = vadd.f32 %v1320_v34, %v1199_v30  ;;  %v2587_v52 = vpop.f32.mrf.mxu3  ;;  %v1134_v20 = vpop.f32.mrf.mxu1 }
 0x1d7   : > { %v1202_v23 = vadd.f32 %v1134_v20, %v1007_v22 }
 0x1d8   : > { %1426 = vst [vmem:[%s2474_s26 + $0x58] sm:$0xff] %v1394_v35  ;;  %v1020_v35 = vadd.f32 %v2466_v54, %v2538_v28 }
 0x1da   : > { %v1215_v14 = vadd.f32 %v2582_v37, %v1020_v35 }
 0x1db   : > { %v942_v59 = vpop.f32.mrf.mxu0 }
 0x1dc   : > { %v1008_v33 = vadd.f32 %v2466_v54, %v942_v59 }
 0x1dd   : > { %v1323_v44 = vpop.f32.mrf.mxu2 }
 0x1de   : > { %v1395_v47 = vadd.f32 %v1323_v44, %v1200_v41  ;;  %v2591_v61 = vpop.f32.mrf.mxu3  ;;  %v1137_v31 = vpop.f32.mrf.mxu1 }
 0x1df   : > { %v1203_v38 = vadd.f32 %v1137_v31, %v1008_v33 }
 0x1e0   : > { %1427 = vst [vmem:[%s2474_s26 + $0x60] sm:$0xff] %v1395_v47 }
 0x1e3   : > { %v945_v40 = vpop.f32.mrf.mxu0 }
 0x1e4   : > { %v1009_v8 = vadd.f32 %v2466_v54, %v945_v40 }
 0x1e5   : > { %v1326_v53 = vpop.f32.mrf.mxu2 }
 0x1e6   : > { %v1396_v56 = vadd.f32 %v1326_v53, %v1201_v36  ;;  %v1216_v53 = vadd.f32 %v2587_v52, %v1021_v50 }
 0x1e7   : > { %v1140_v0 = vpop.f32.mrf.mxu1 }
 0x1e8   : > { %1428 = vst [vmem:[%s2474_s26 + $0x68] sm:$0xff] %v1396_v56  ;;  %v1204_v10 = vadd.f32 %v1140_v0, %v1009_v8 }
 0x1eb   : > { %v948_v4 = vpop.f32.mrf.mxu0 }
 0x1ec   : > { %v1010_v18 = vadd.f32 %v2466_v54, %v948_v4 }
 0x1ed   : > { %v1329_v29 = vpop.f32.mrf.mxu2 }
 0x1ee   : > { %v1397_v58 = vadd.f32 %v1329_v29, %v1202_v23  ;;  %v1022_v23 = vadd.f32 %v2466_v54, %v2552_v57 }
 0x1f0   : > { %1429 = vst [vmem:[%s2474_s26 + $0x70] sm:$0xff] %v1397_v58  ;;  %v1217_v58 = vadd.f32 %v2591_v61, %v1022_v23 }
 0x1f3   : > { %v951_v16 = vpop.f32.mrf.mxu0 }
 0x1f4   : > { %v1011_v39 = vadd.f32 %v2466_v54, %v951_v16 }
 0x1f5   : > { %v2594_v60 = vpop.f32.mrf.mxu3 }
 0x1f7   : > { %v1143_v5 = vpop.f32.mrf.mxu1 }
 0x1f8   : > { %v1205_v25 = vadd.f32 %v1143_v5, %v1010_v18 }
 0x1fb   : > { %v954_v32 = vpop.f32.mrf.mxu0 }
 0x1fc   : > { %v1012_v36 = vadd.f32 %v2466_v54, %v954_v32 }
 0x1fd   : > { %v1332_v43 = vpop.f32.mrf.mxu2 }
 0x1fe   : > { %v1398_v48 = vadd.f32 %v1332_v43, %v1203_v38  ;;  %v2597_v62 = vpop.f32.mrf.mxu3  ;;  %v1023_v43 = vadd.f32 %v2466_v54, %v2559_v26 }
 0x200   : > { %1430 = vst [vmem:[%s2474_s26 + $0x78] sm:$0xff] %v1398_v48  ;;  %v1218_v48 = vadd.f32 %v2594_v60, %v1023_v43 }
 0x206   : > { %v1359_v3 = vpop.f32.mrf.mxu3  ;;  %v1146_v2 = vpop.f32.mrf.mxu1 }
 0x207   : > { %v1407_v6 = vadd.f32 %v1359_v3, %v1212_v51  ;;  %v1206_v41 = vadd.f32 %v1146_v2, %v1011_v39  ;;  %v957_v49 = vpop.f32.mrf.mxu0 }
 0x208   : > { %v1013_v29 = vadd.f32 %v2466_v54, %v957_v49 }
 0x209   : > { %1439 = vst [vmem:[%s2474_s26 + $0xc0] sm:$0xff] %v1407_v6  ;;  %v1024_v6 = vadd.f32 %v2466_v54, %v2564_v45 }
 0x20b   : > { %v1219_v8 = vadd.f32 %v2597_v62, %v1024_v6 }
 0x20c   : > { %v1335_v13 = vpop.f32.mrf.mxu2 }
 0x20d   : > { %v1399_v63 = vadd.f32 %v1335_v13, %v1204_v10 }
 0x20e   : > { %v1362_v11 = vpop.f32.mrf.mxu3  ;;  %v1149_v34 = vpop.f32.mrf.mxu1 }
 0x20f   : > { %1431 = vst [vmem:[%s2474_s26 + $0x80] sm:$0xff] %v1399_v63  ;;  %v1408_v17 = vadd.f32 %v1362_v11, %v1213_v15  ;;  %v1207_v56 = vadd.f32 %v1149_v34, %v1012_v36  ;;  %v960_v55 = vpop.f32.mrf.mxu0 }
 0x210   : > { %v1014_v57 = vadd.f32 %v2466_v54, %v960_v55 }
 0x211   : > { %1440 = vst [vmem:[%s2474_s26 + $0xc8] sm:$0xff] %v1408_v17 }
 0x214   : > { %v1338_v7 = vpop.f32.mrf.mxu2 }
 0x215   : > { %v1400_v46 = vadd.f32 %v1338_v7, %v1205_v25 }
 0x216   : > { %v1365_v12 = vpop.f32.mrf.mxu3 }
 0x217   : > { %1432 = vst [vmem:[%s2474_s26 + $0x88] sm:$0xff] %v1400_v46  ;;  %v1409_v30 = vadd.f32 %v1365_v12, %v1214_v21  ;;  %v1152_v28 = vpop.f32.mrf.mxu1  ;;  %v963_v0 = vpop.f32.mrf.mxu0 }
 0x218   : > { %v1208_v59 = vadd.f32 %v1152_v28, %v1013_v29  ;;  %v1015_v26 = vadd.f32 %v2466_v54, %v963_v0 }
 0x219   : > { %1441 = vst [vmem:[%s2474_s26 + $0xd0] sm:$0xff] %v1409_v30 }
 0x21e   : > { %v1341_v42 = vpop.f32.mrf.mxu2  ;;  %v1368_v27 = vpop.f32.mrf.mxu3 }
 0x21f   : > { %v1401_v44 = vadd.f32 %v1341_v42, %v1206_v41  ;;  %v1410_v47 = vadd.f32 %v1368_v27, %v1215_v14  ;;  %v1155_v31 = vpop.f32.mrf.mxu1  ;;  %v966_v63 = vpop.f32.mrf.mxu0 }
 0x220   : > { %v1209_v1 = vadd.f32 %v1155_v31, %v1014_v57  ;;  %v1016_v16 = vadd.f32 %v2466_v54, %v966_v63 }
 0x221   : > { %1433 = vst [vmem:[%s2474_s26 + $0x90] sm:$0xff] %v1401_v44 }
 0x222   : > { %1442 = vst [vmem:[%s2474_s26 + $0xd8] sm:$0xff] %v1410_v47 }
 0x226   : > { %v1344_v37 = vpop.f32.mrf.mxu2  ;;  %v1371_v19 = vpop.f32.mrf.mxu3 }
 0x227   : > { %v1402_v20 = vadd.f32 %v1344_v37, %v1207_v56  ;;  %v1411_v22 = vadd.f32 %v1371_v19, %v1216_v53  ;;  %v1158_v5 = vpop.f32.mrf.mxu1 }
 0x228   : > { %v1210_v60 = vadd.f32 %v1158_v5, %v1015_v26 }
 0x229   : > { %1434 = vst [vmem:[%s2474_s26 + $0x98] sm:$0xff] %v1402_v20 }
 0x22a   : > { %1443 = vst [vmem:[%s2474_s26 + $0xe0] sm:$0xff] %v1411_v22 }
 0x22e   : > { %v1347_v52 = vpop.f32.mrf.mxu2  ;;  %v1374_v33 = vpop.f32.mrf.mxu3 }
 0x22f   : > { %v1403_v38 = vadd.f32 %v1347_v52, %v1208_v59  ;;  %v1412_v40 = vadd.f32 %v1374_v33, %v1217_v58  ;;  %v1161_v11 = vpop.f32.mrf.mxu1 }
 0x230   : > { %v1211_v2 = vadd.f32 %v1161_v11, %v1016_v16 }
 0x231   : > { %1435 = vst [vmem:[%s2474_s26 + $0xa0] sm:$0xff] %v1403_v38 }
 0x232   : > { %1444 = vst [vmem:[%s2474_s26 + $0xe8] sm:$0xff] %v1412_v40 }
 0x236   : > { %v1350_v61 = vpop.f32.mrf.mxu2  ;;  %v1377_v51 = vpop.f32.mrf.mxu3 }
 0x237   : > { %v1404_v3 = vadd.f32 %v1350_v61, %v1209_v1  ;;  %v1413_v4 = vadd.f32 %v1377_v51, %v1218_v48 }
 0x239   : > { %1436 = vst [vmem:[%s2474_s26 + $0xa8] sm:$0xff] %v1404_v3 }
 0x23a   : > { %1445 = vst [vmem:[%s2474_s26 + $0xf0] sm:$0xff] %v1413_v4 }
 0x23e   : > { %v1353_v9 = vpop.f32.mrf.mxu2  ;;  %v1380_v10 = vpop.f32.mrf.mxu3 }
 0x23f   : > { %v1405_v13 = vadd.f32 %v1353_v9, %v1210_v60  ;;  %v1414_v15 = vadd.f32 %v1380_v10, %v1219_v8 }
 0x241   : > { %1437 = vst [vmem:[%s2474_s26 + $0xb0] sm:$0xff] %v1405_v13 }
 0x242   : > { %1446 = vst [vmem:[%s2474_s26 + $0xf8] sm:$0xff] %v1414_v15 }
 0x246   : > { %v1356_v17 = vpop.f32.mrf.mxu2 }
 0x247   : > { %v1406_v18 = vadd.f32 %v1356_v17, %v1211_v2 }
 0x249   : > { %1438 = vst [vmem:[%s2474_s26 + $0xb8] sm:$0xff] %v1406_v18 }
 0x24a PF: > { %s13_s16 = sadd.s32 1, %s1717_s16   ;;  %s2667_s12 = smov %s1709_s14 }
 0x24b   : > { %p10_p7 = scmp.ge.s32.totalorder %s13_s16, 18   ;;  %s2668_s13 = smov %s1713_s15 }
 0x24c   : > { %s2669_s14 = smov %s2672_s17  ;;  %s2670_s15 = smov %s2676_s18 }
 0x24d   :  { %12 = sbr.rel (!%p10_p7) target bundleno = 3 (0x3), region = 66 }

</bundles_post_ra>
